<compile_context>
chip_gen: v6e
topology: v6e:2x2x1
jax: 0.10.0
libtpu: 0.0.40
codegen_flags: <defaults>
</compile_context>

<pallas_src>
import functools

import numpy as np
import jax
import jax.numpy as jnp
from jax import lax
from jax.experimental import pallas as pl
from jax.experimental.pallas import tpu as pltpu


# ------------------------------ Pallas kernels -------------------------------
def _pool_conv0_kernel(x_ref, pt_ref, w0_ref, s0_ref, b0_ref, o_ref):
    """Per image: avg_pool(5,3) as a matmul, then 1x1 conv + folded BN + ReLU.

    x_ref : (1, H*W, C)   NHWC-flattened image (channels on lanes)
    pt_ref: (P, H*W)      transposed pooling matrix, P = Hp*Wp
    w0_ref: (C, 128)      1x1 conv weight
    s0/b0 : (1, 128)      folded BN scale / bias
    o_ref : (1, P, 128)
    """
    xb = x_ref[0]                                                          # (H*W, C)
    pooled = jnp.dot(pt_ref[...], xb, preferred_element_type=jnp.float32)  # (P, C)
    y0 = jnp.dot(pooled, w0_ref[...], preferred_element_type=jnp.float32)  # (P, 128)
    o_ref[0] = jnp.maximum(y0 * s0_ref[...] + b0_ref[...], 0.0)


def _conv1_fc_kernel(x_ref, w1_ref, s1_ref, b1_ref, wf_ref, bf_ref, o_ref):
    """5x5 VALID conv on the 5x5 map (full contraction) + BN + ReLU, then fc.

    x_ref : (N, P*128)    conv0 output, rows flattened in (i, j, c) order
    w1_ref: (P*128, 768)  conv1 weight, rows permuted to (i, j, c) order
    s1/b1 : (1, 768)      folded BN scale / bias
    wf_ref: (768, Cpad)   fc weight padded to a multiple of 128 lanes
    bf_ref: (1, Cpad)
    o_ref : (N, Cpad)
    """
    h = jnp.dot(x_ref[...], w1_ref[...], preferred_element_type=jnp.float32)
    h = jnp.maximum(h * s1_ref[...] + b1_ref[...], 0.0)                    # (N, 768)
    o_ref[...] = (
        jnp.dot(h, wf_ref[...], preferred_element_type=jnp.float32) + bf_ref[...]
    )


def pool_conv0(x_hwc, pt, w0, s0, b0):
    N, HW, C = x_hwc.shape
    P = pt.shape[0]
    return pl.pallas_call(
        _pool_conv0_kernel,
        out_shape=jax.ShapeDtypeStruct((N, P, 128), jnp.float32),
        grid=(N,),
        in_specs=[
            pl.BlockSpec((1, HW, C), lambda n: (n, 0, 0)),
            pl.BlockSpec((P, HW), lambda n: (0, 0)),
            pl.BlockSpec((C, 128), lambda n: (0, 0)),
            pl.BlockSpec((1, 128), lambda n: (0, 0)),
            pl.BlockSpec((1, 128), lambda n: (0, 0)),
        ],
        out_specs=pl.BlockSpec((1, P, 128), lambda n: (n, 0, 0)),
        compiler_params=pltpu.CompilerParams(dimension_semantics=("parallel",)),
    )(x_hwc, pt, w0, s0, b0)


def conv1_fc(y0f, w1p, s1, b1, wf, bf):
    N, K = y0f.shape
    K2, M1 = w1p.shape
    assert K == K2
    Cpad = wf.shape[1]
    return pl.pallas_call(
        _conv1_fc_kernel,
        out_shape=jax.ShapeDtypeStruct((N, Cpad), jnp.float32),
        grid=(1,),
        in_specs=[
            pl.BlockSpec((N, K), lambda i: (0, 0)),
            pl.BlockSpec((K, M1), lambda i: (0, 0)),
            pl.BlockSpec((1, M1), lambda i: (0, 0)),
            pl.BlockSpec((1, M1), lambda i: (0, 0)),
            pl.BlockSpec((M1, Cpad), lambda i: (0, 0)),
            pl.BlockSpec((1, Cpad), lambda i: (0, 0)),
        ],
        out_specs=pl.BlockSpec((N, Cpad), lambda i: (0, 0)),
        compiler_params=pltpu.CompilerParams(
            dimension_semantics=("arbitrary",),
            # 9.4 MiB f32 conv1 weight (double-buffered) exceeds v5e's 16 MiB
            # default scoped VMEM; raise the budget (still < v7x 64 MiB physical).
            vmem_limit_bytes=40 * 1024 * 1024,
        ),
    )(y0f, w1p, s1, b1, wf, bf)


# ------------------------- one-time parameter setup ---------------------------
def build_pool_matrix_t(H, W, k=5, s=3):
    """(Hp*Wp, H*W) matrix PT so that PT @ x(H*W, C) == avg_pool2d(x, k, s)."""
    Hp = (H - k) // s + 1
    Wp = (W - k) // s + 1
    PT = np.zeros((Hp * Wp, H * W), np.float32)
    for i in range(Hp):
        for j in range(Wp):
            for di in range(k):
                for dj in range(k):
                    PT[i * Wp + j, (s * i + di) * W + (s * j + dj)] = 1.0 / (k * k)
    return jnp.asarray(PT), Hp, Wp


def fold_bn(gamma, beta, mean, var, eps=1e-3):
    scale = gamma / jnp.sqrt(var + eps)
    bias = beta - mean * scale
    return scale, bias


def prepare_params(params, H, W):
    """Hoisted setup: pool matrix, BN folding, weight permutation, fc padding."""
    pt, Hp, Wp = build_pool_matrix_t(H, W, 5, 3)
    # TODO(synk): the conv1-as-full-contraction trick assumes the pooled map is
    # exactly 5x5 (true for Inception-v3's 17x17 aux input); generalize otherwise.
    assert Hp == 5 and Wp == 5, "InceptionAux expects a 5x5 map after pooling"
    P = Hp * Wp
    C = params["w0"].shape[1]
    num_classes = params["wf"].shape[0]

    s0, b0 = fold_bn(params["g0"], params["b0"], params["m0"], params["v0"])
    s1, b1 = fold_bn(params["g1"], params["b1"], params["m1"], params["v1"])

    w0m = params["w0"].reshape(128, C).T                    # (C, 128)
    # (768, 128, 5, 5) (o, c, ki, kj) -> rows in (ki, kj, c) order -> (3200, 768)
    w1p = params["w1"].transpose(2, 3, 1, 0).reshape(P * 128, 768)

    cpad = ((num_classes + 127) // 128) * 128
    wf = jnp.zeros((768, cpad), jnp.float32).at[:, :num_classes].set(params["wf"].T)
    bf = jnp.zeros((1, cpad), jnp.float32).at[0, :num_classes].set(params["bf"])

    prep = dict(
        pt=pt, w0=w0m, s0=s0.reshape(1, 128), b0=b0.reshape(1, 128),
        w1=w1p, s1=s1.reshape(1, 768), b1=b1.reshape(1, 768), wf=wf, bf=bf,
    )
    return prep, num_classes


# --------------------------------- forward ------------------------------------
@functools.partial(jax.jit, static_argnames=("num_classes",))
def inception_aux_forward(x, prep, *, num_classes):
    """x: (N, C, H, W) float32 NCHW (like PyTorch). Returns (N, num_classes)."""
    N, C, H, W = x.shape
    P = prep["pt"].shape[0]
    # Single input relayout so channels sit on the lane axis from the start.
    x_hwc = jnp.transpose(x, (0, 2, 3, 1)).reshape(N, H * W, C)
    y0 = pool_conv0(x_hwc, prep["pt"], prep["w0"], prep["s0"], prep["b0"])  # (N,P,128)
    y0f = y0.reshape(N, P * 128)                     # contiguous -> free reshape
    out = conv1_fc(y0f, prep["w1"], prep["s1"], prep["b1"], prep["wf"], prep["bf"])
    return out[:, :num_classes]


# ------------------------------ init / reference -------------------------------
def init_params(key, in_channels, num_classes):
    ks = jax.random.split(key, 13)
    p = {}
    # conv0: 1x1, in_channels -> 128 (no bias) + BN(128)
    p["w0"] = 0.1 * jax.random.normal(ks[0], (128, in_channels, 1, 1), jnp.float32)
    p["g0"] = 1.0 + 0.1 * jax.random.normal(ks[1], (128,), jnp.float32)
    p["b0"] = 0.1 * jax.random.normal(ks[2], (128,), jnp.float32)
    p["m0"] = 0.1 * jax.random.normal(ks[3], (128,), jnp.float32)
    p["v0"] = jax.random.uniform(ks[4], (128,), jnp.float32, 0.5, 1.5)
    # conv1: 5x5, 128 -> 768 (no bias, stddev=0.01) + BN(768)
    p["w1"] = 0.01 * jax.random.normal(ks[5], (768, 128, 5, 5), jnp.float32)
    p["g1"] = 1.0 + 0.1 * jax.random.normal(ks[6], (768,), jnp.float32)
    p["b1"] = 0.1 * jax.random.normal(ks[7], (768,), jnp.float32)
    p["m1"] = 0.1 * jax.random.normal(ks[8], (768,), jnp.float32)
    p["v1"] = jax.random.uniform(ks[9], (768,), jnp.float32, 0.5, 1.5)
    # fc: 768 -> num_classes (stddev=0.001)
    p["wf"] = 0.001 * jax.random.normal(ks[10], (num_classes, 768), jnp.float32)
    p["bf"] = 0.001 * jax.random.normal(ks[11], (num_classes,), jnp.float32)
    return p


def reference_forward(x, params):
    N = x.shape[0]
    p = lax.reduce_window(x, 0.0, lax.add, (1, 1, 5, 5), (1, 1, 3, 3), "VALID") / 25.0
    dn = ("NCHW", "OIHW", "NCHW")
    s0, bb0 = fold_bn(params["g0"], params["b0"], params["m0"], params["v0"])
    y = lax.conv_general_dilated(p, params["w0"], (1, 1), "VALID", dimension_numbers=dn)
    y = jnp.maximum(y * s0[None, :, None, None] + bb0[None, :, None, None], 0.0)
    s1, bb1 = fold_bn(params["g1"], params["b1"], params["m1"], params["v1"])
    y = lax.conv_general_dilated(y, params["w1"], (1, 1), "VALID", dimension_numbers=dn)
    y = jnp.maximum(y * s1[None, :, None, None] + bb1[None, :, None, None], 0.0)
    y = y.reshape(N, -1)
    return y @ params["wf"].T + params["bf"]


# ----------------------------------- main --------------------------------------
if __name__ == "__main__":
    N, C_in, H, W = 2, 8, 17, 17      # 17x17 -> avg_pool(5,3) -> 5x5, as in Inception-v3
    num_classes = 10

    key = jax.random.PRNGKey(0)
    k_x, k_p = jax.random.split(key)
    x = jax.random.normal(k_x, (N, C_in, H, W), jnp.float32)
    params = init_params(k_p, C_in, num_classes)

    prep, nc = prepare_params(params, H, W)          # one-time setup

    out = inception_aux_forward(x, prep, num_classes=nc)
    out = jax.block_until_ready(out)
    assert out.shape == (N, num_classes)

    ref = jax.block_until_ready(reference_forward(x, params))
    np.testing.assert_allclose(np.asarray(out), np.asarray(ref), rtol=1e-3, atol=1e-4)

    print("KERNEL_OK")
</pallas_src>

<mosaic_0001>
module attributes {stable_mosaic.version = 11 : i64} {
  func.func @_pool_conv0_kernel(%arg0: i32, %arg1: memref<1x289x8xf32, #tpu.memory_space<vmem>>, %arg2: memref<25x289xf32, #tpu.memory_space<vmem>>, %arg3: memref<8x128xf32, #tpu.memory_space<vmem>>, %arg4: memref<1x128xf32, #tpu.memory_space<vmem>>, %arg5: memref<1x128xf32, #tpu.memory_space<vmem>>, %arg6: memref<1x25x128xf32, #tpu.memory_space<vmem>>) attributes {dimension_semantics = [#tpu.dimension_semantics<parallel>], iteration_bounds = array<i64: 2>, scalar_prefetch = 0 : i64, scratch_operands = 0 : i64, tpu.core_type = #tpu.core_type<tc>, window_params = [{transform_indices = @transform_0, window_bounds = array<i64: 1, 289, 8>}, {pipeline_mode = #tpu.pipeline_mode<synchronous>, transform_indices = @transform_1, window_bounds = array<i64: 25, 289>}, {pipeline_mode = #tpu.pipeline_mode<synchronous>, transform_indices = @transform_2, window_bounds = array<i64: 8, 128>}, {pipeline_mode = #tpu.pipeline_mode<synchronous>, transform_indices = @transform_3, window_bounds = array<i64: 1, 128>}, {pipeline_mode = #tpu.pipeline_mode<synchronous>, transform_indices = @transform_4, window_bounds = array<i64: 1, 128>}, {transform_indices = @transform_5, window_bounds = array<i64: 1, 25, 128>}]} {
    %c0 = arith.constant 0 : index
    %c0_0 = arith.constant 0 : index
    %c0_1 = arith.constant 0 : index
    %0 = vector.load %arg1[%c0, %c0_0, %c0_1] : memref<1x289x8xf32, #tpu.memory_space<vmem>>, vector<1x289x8xf32>
    %1 = vector.shape_cast %0 : vector<1x289x8xf32> to vector<289x8xf32>
    %c0_2 = arith.constant 0 : index
    %c0_3 = arith.constant 0 : index
    %2 = vector.load %arg2[%c0_2, %c0_3] : memref<25x289xf32, #tpu.memory_space<vmem>>, vector<25x289xf32>
    %cst = arith.constant dense<0.000000e+00> : vector<25x8xf32>
    %3 = tpu.matmul %2, %1, %cst {dimension_numbers = #tpu.dot_dimension_numbers<[1], [0], [0], [1], [0, 0, 1, 1], [], []>} : vector<25x289xf32>, vector<289x8xf32>, vector<25x8xf32> -> vector<25x8xf32>
    %c0_4 = arith.constant 0 : index
    %c0_5 = arith.constant 0 : index
    %4 = vector.load %arg3[%c0_4, %c0_5] : memref<8x128xf32, #tpu.memory_space<vmem>>, vector<8x128xf32>
    %cst_6 = arith.constant dense<0.000000e+00> : vector<25x128xf32>
    %5 = tpu.matmul %3, %4, %cst_6 {dimension_numbers = #tpu.dot_dimension_numbers<[1], [0], [0], [1], [0, 0, 1, 1], [], []>} : vector<25x8xf32>, vector<8x128xf32>, vector<25x128xf32> -> vector<25x128xf32>
    %c0_7 = arith.constant 0 : index
    %c0_8 = arith.constant 0 : index
    %6 = vector.load %arg4[%c0_7, %c0_8] : memref<1x128xf32, #tpu.memory_space<vmem>>, vector<1x128xf32>
    %7 = vector.broadcast %6 : vector<1x128xf32> to vector<25x128xf32>
    %8 = arith.mulf %5, %7 : vector<25x128xf32>
    %c0_9 = arith.constant 0 : index
    %c0_10 = arith.constant 0 : index
    %9 = vector.load %arg5[%c0_9, %c0_10] : memref<1x128xf32, #tpu.memory_space<vmem>>, vector<1x128xf32>
    %10 = vector.broadcast %9 : vector<1x128xf32> to vector<25x128xf32>
    %11 = arith.addf %8, %10 : vector<25x128xf32>
    %cst_11 = arith.constant 0.000000e+00 : f32
    %12 = vector.broadcast %cst_11 : f32 to vector<25x128xf32>
    %13 = arith.maximumf %11, %12 : vector<25x128xf32>
    %c0_12 = arith.constant 0 : index
    %c0_13 = arith.constant 0 : index
    %c0_14 = arith.constant 0 : index
    %14 = vector.load %arg6[%c0_12, %c0_13, %c0_14] : memref<1x25x128xf32, #tpu.memory_space<vmem>>, vector<1x25x128xf32>
    %15 = vector.shape_cast %14 : vector<1x25x128xf32> to vector<25x128xf32>
    %16 = vector.shape_cast %13 : vector<25x128xf32> to vector<1x25x128xf32>
    tpu.vector_store %arg6[%c0_12, %c0_13, %c0_14], %16 {strides = array<i32>} : memref<1x25x128xf32, #tpu.memory_space<vmem>>, vector<1x25x128xf32>,
    return
  }
  func.func @transform_0(%arg0: i32) -> (i32, i32, i32) {
    %c0_i32 = arith.constant 0 : i32
    %c0_i32_0 = arith.constant 0 : i32
    %c0_i32_1 = arith.constant 0 : i32
    return %arg0, %c0_i32, %c0_i32_0 : i32, i32, i32
  }
  func.func @transform_1(%arg0: i32) -> (i32, i32) {
    %c0_i32 = arith.constant 0 : i32
    %c0_i32_0 = arith.constant 0 : i32
    %c0_i32_1 = arith.constant 0 : i32
    return %c0_i32, %c0_i32_0 : i32, i32
  }
  func.func @transform_2(%arg0: i32) -> (i32, i32) {
    %c0_i32 = arith.constant 0 : i32
    %c0_i32_0 = arith.constant 0 : i32
    %c0_i32_1 = arith.constant 0 : i32
    return %c0_i32, %c0_i32_0 : i32, i32
  }
  func.func @transform_3(%arg0: i32) -> (i32, i32) {
    %c0_i32 = arith.constant 0 : i32
    %c0_i32_0 = arith.constant 0 : i32
    %c0_i32_1 = arith.constant 0 : i32
    return %c0_i32, %c0_i32_0 : i32, i32
  }
  func.func @transform_4(%arg0: i32) -> (i32, i32) {
    %c0_i32 = arith.constant 0 : i32
    %c0_i32_0 = arith.constant 0 : i32
    %c0_i32_1 = arith.constant 0 : i32
    return %c0_i32, %c0_i32_0 : i32, i32
  }
  func.func @transform_5(%arg0: i32) -> (i32, i32, i32) {
    %c0_i32 = arith.constant 0 : i32
    %c0_i32_0 = arith.constant 0 : i32
    %c0_i32_1 = arith.constant 0 : i32
    return %arg0, %c0_i32, %c0_i32_0 : i32, i32, i32
  }
}

module attributes {stable_mosaic.version = 11 : i64} {
  func.func @_conv1_fc_kernel(%arg0: i32, %arg1: memref<2x3200xf32, #tpu.memory_space<vmem>>, %arg2: memref<3200x768xf32, #tpu.memory_space<vmem>>, %arg3: memref<1x768xf32, #tpu.memory_space<vmem>>, %arg4: memref<1x768xf32, #tpu.memory_space<vmem>>, %arg5: memref<768x128xf32, #tpu.memory_space<vmem>>, %arg6: memref<1x128xf32, #tpu.memory_space<vmem>>, %arg7: memref<2x128xf32, #tpu.memory_space<vmem>>) attributes {dimension_semantics = [#tpu.dimension_semantics<arbitrary>], iteration_bounds = array<i64: 1>, scalar_prefetch = 0 : i64, scratch_operands = 0 : i64, tpu.core_type = #tpu.core_type<tc>, window_params = [{pipeline_mode = #tpu.pipeline_mode<synchronous>, transform_indices = @transform_0, window_bounds = array<i64: 2, 3200>}, {pipeline_mode = #tpu.pipeline_mode<synchronous>, transform_indices = @transform_1, window_bounds = array<i64: 3200, 768>}, {pipeline_mode = #tpu.pipeline_mode<synchronous>, transform_indices = @transform_2, window_bounds = array<i64: 1, 768>}, {pipeline_mode = #tpu.pipeline_mode<synchronous>, transform_indices = @transform_3, window_bounds = array<i64: 1, 768>}, {pipeline_mode = #tpu.pipeline_mode<synchronous>, transform_indices = @transform_4, window_bounds = array<i64: 768, 128>}, {pipeline_mode = #tpu.pipeline_mode<synchronous>, transform_indices = @transform_5, window_bounds = array<i64: 1, 128>}, {pipeline_mode = #tpu.pipeline_mode<synchronous>, transform_indices = @transform_6, window_bounds = array<i64: 2, 128>}]} {
    %c0 = arith.constant 0 : index
    %c0_0 = arith.constant 0 : index
    %0 = vector.load %arg1[%c0, %c0_0] : memref<2x3200xf32, #tpu.memory_space<vmem>>, vector<2x3200xf32>
    %c0_1 = arith.constant 0 : index
    %c0_2 = arith.constant 0 : index
    %1 = vector.load %arg2[%c0_1, %c0_2] : memref<3200x768xf32, #tpu.memory_space<vmem>>, vector<3200x768xf32>
    %cst = arith.constant dense<0.000000e+00> : vector<2x768xf32>
    %2 = tpu.matmul %0, %1, %cst {dimension_numbers = #tpu.dot_dimension_numbers<[1], [0], [0], [1], [0, 0, 1, 1], [], []>} : vector<2x3200xf32>, vector<3200x768xf32>, vector<2x768xf32> -> vector<2x768xf32>
    %c0_3 = arith.constant 0 : index
    %c0_4 = arith.constant 0 : index
    %3 = vector.load %arg3[%c0_3, %c0_4] : memref<1x768xf32, #tpu.memory_space<vmem>>, vector<1x768xf32>
    %4 = vector.broadcast %3 : vector<1x768xf32> to vector<2x768xf32>
    %5 = arith.mulf %2, %4 : vector<2x768xf32>
    %c0_5 = arith.constant 0 : index
    %c0_6 = arith.constant 0 : index
    %6 = vector.load %arg4[%c0_5, %c0_6] : memref<1x768xf32, #tpu.memory_space<vmem>>, vector<1x768xf32>
    %7 = vector.broadcast %6 : vector<1x768xf32> to vector<2x768xf32>
    %8 = arith.addf %5, %7 : vector<2x768xf32>
    %cst_7 = arith.constant 0.000000e+00 : f32
    %9 = vector.broadcast %cst_7 : f32 to vector<2x768xf32>
    %10 = arith.maximumf %8, %9 : vector<2x768xf32>
    %c0_8 = arith.constant 0 : index
    %c0_9 = arith.constant 0 : index
    %11 = vector.load %arg5[%c0_8, %c0_9] : memref<768x128xf32, #tpu.memory_space<vmem>>, vector<768x128xf32>
    %cst_10 = arith.constant dense<0.000000e+00> : vector<2x128xf32>
    %12 = tpu.matmul %10, %11, %cst_10 {dimension_numbers = #tpu.dot_dimension_numbers<[1], [0], [0], [1], [0, 0, 1, 1], [], []>} : vector<2x768xf32>, vector<768x128xf32>, vector<2x128xf32> -> vector<2x128xf32>
    %c0_11 = arith.constant 0 : index
    %c0_12 = arith.constant 0 : index
    %13 = vector.load %arg6[%c0_11, %c0_12] : memref<1x128xf32, #tpu.memory_space<vmem>>, vector<1x128xf32>
    %14 = vector.broadcast %13 : vector<1x128xf32> to vector<2x128xf32>
    %15 = arith.addf %12, %14 : vector<2x128xf32>
    %c0_13 = arith.constant 0 : index
    %c0_14 = arith.constant 0 : index
    %16 = vector.load %arg7[%c0_13, %c0_14] : memref<2x128xf32, #tpu.memory_space<vmem>>, vector<2x128xf32>
    tpu.vector_store %arg7[%c0_13, %c0_14], %15 {strides = array<i32>} : memref<2x128xf32, #tpu.memory_space<vmem>>, vector<2x128xf32>,
    return
  }
  func.func @transform_0(%arg0: i32) -> (i32, i32) {
    %c0_i32 = arith.constant 0 : i32
    %c0_i32_0 = arith.constant 0 : i32
    %c0_i32_1 = arith.constant 0 : i32
    return %c0_i32, %c0_i32_0 : i32, i32
  }
  func.func @transform_1(%arg0: i32) -> (i32, i32) {
    %c0_i32 = arith.constant 0 : i32
    %c0_i32_0 = arith.constant 0 : i32
    %c0_i32_1 = arith.constant 0 : i32
    return %c0_i32, %c0_i32_0 : i32, i32
  }
  func.func @transform_2(%arg0: i32) -> (i32, i32) {
    %c0_i32 = arith.constant 0 : i32
    %c0_i32_0 = arith.constant 0 : i32
    %c0_i32_1 = arith.constant 0 : i32
    return %c0_i32, %c0_i32_0 : i32, i32
  }
  func.func @transform_3(%arg0: i32) -> (i32, i32) {
    %c0_i32 = arith.constant 0 : i32
    %c0_i32_0 = arith.constant 0 : i32
    %c0_i32_1 = arith.constant 0 : i32
    return %c0_i32, %c0_i32_0 : i32, i32
  }
  func.func @transform_4(%arg0: i32) -> (i32, i32) {
    %c0_i32 = arith.constant 0 : i32
    %c0_i32_0 = arith.constant 0 : i32
    %c0_i32_1 = arith.constant 0 : i32
    return %c0_i32, %c0_i32_0 : i32, i32
  }
  func.func @transform_5(%arg0: i32) -> (i32, i32) {
    %c0_i32 = arith.constant 0 : i32
    %c0_i32_0 = arith.constant 0 : i32
    %c0_i32_1 = arith.constant 0 : i32
    return %c0_i32, %c0_i32_0 : i32, i32
  }
  func.func @transform_6(%arg0: i32) -> (i32, i32) {
    %c0_i32 = arith.constant 0 : i32
    %c0_i32_0 = arith.constant 0 : i32
    %c0_i32_1 = arith.constant 0 : i32
    return %c0_i32, %c0_i32_0 : i32, i32
  }
}

</mosaic_0001>

<bundles_post_ra>
// kernel: inception_aux_forward.2
= control target key start
LH: loop header
LB: loop body
LE: loop exit
PB: predicated region body
PF: predicated region fallthrough
CT: control target
= control target key end

     0   :  { %10 = vsyncpa [#allocation3], 0  ;;  %s1214_s0 = inlined_call_operand.vmem [shape: f32[2,289,8], index: 0, kind: input, shape index: {}]   ;;  %s1215_s1 = inlined_call_operand.hbm [shape: f32[25,289], index: 1, kind: input, shape index: {}]   ;;  %s1216_s2 = inlined_call_operand.hbm [shape: f32[8,128], index: 2, kind: input, shape index: {}]   ;;  %s1217_s3 = inlined_call_operand.hbm [shape: f32[1,128], index: 3, kind: input, shape index: {}]   ;;  %s1218_s4 = inlined_call_operand.hbm [shape: f32[1,128], index: 4, kind: input, shape index: {}]   ;;  %s1219_s5 = inlined_call_operand.vmem [shape: f32[2,25,128], index: 5, kind: output, shape index: {}]  }
   0x1   :  { %11 = vsyncpa [#allocation5], 0 }
   0x2   :  { %12 = vsyncpa [#allocation8], 0  ;;  %s1063_s18 = smov 0  }
   0x3 LB: > { %s1027_s19 = smov [#allocation4]   ;;  %s1069_s21 = sadd.s32 4294967295, %s1025_s18   ;;  %s1025_s18 = sphi %s1063_s18, %s18_s18  }
   0x4   : > { %s185_s20 = sshll.u32 %s1027_s19, 4  ;;  %p741_p0 = scmp.ge.s32.totalorder %s1025_s18, 1  ;;  %s186_s20 = int_to_ptr.vmem [resolvable:$true] %s185_s20 }
   0x5   : > { %p159_p1 = scmp.lt.s32.totalorder %s1025_s18, 3  ;;  %p881_p2 = scmp.eq.s32.totalorder %s1069_s21, 0 }
   0x6   : > { %s1028_s23 = smov [#allocation2]   ;;  %s1029_s26 = smov [#allocation6]  }
   0x7   : > { %p1074_p3 = pnand %p741_p0, %p159_p1  ;;  %s171_s24 = sshll.u32 %s1028_s23, 4  ;;  %s1080_s24 = int_to_ptr.vmem [resolvable:$true] %s171_s24 }
   0x8   : > { %s196_s27 = sshll.u32 %s1029_s26, 4  ;;  %s1030_s28 = smov [#allocation7]   ;;  %s1088_s27 = int_to_ptr.vmem [resolvable:$true] %s196_s27 }
   0x9   : > { %p868_p4 = pneg %p1074_p3  ;;  %s1090_s29 = sshll.u32 %s1030_s28, 4  ;;  %s208_s29 = int_to_ptr.vmem [resolvable:$true] %s1090_s29 }
   0xa   : > { %s914_s30 = scalar_lea.vmem %s186_s20, 128  ;;  %p922_p10 = scmp.lt.s32.totalorder %s186_s20, %s186_s20 }
   0xb   : > { %p1084_p5 = pnand %p881_p2, %p868_p4  ;;  %p915_p7 = scmp.ne.s32.totalorder %s186_s20, %s914_s30 }
   0xc   : > { %p923_p11 = scmp.lt.s32.totalorder %s914_s30, %s914_s30 }
   0xd   : > { %p905_p6 = pneg %p1084_p5 }
   0xe   : > { %p924_p12 = por %p923_p11, %p922_p10 }
   0xf   : > { %p917_p8 = pnand %p915_p7, %p905_p6 }
  0x11   : > { %p918_p9 = pneg %p917_p8 }
  0x13   : > { %p925_p13 = pnand %p924_p12, %p918_p9 }
  0x15   : > { %928 = shalt.err (!%p925_p13)
}
  0x16   : > { %874 = dma.hbm_to_vmem [thread:$0]  (!%p1084_p5), %s1216_s2, 128, %s186_s20, [#allocation5]  }
  0x17   : > { %s940_s8 = scalar_lea.vmem %s1080_s24, 1536  ;;  %p948_p7 = scmp.lt.s32.totalorder %s1080_s24, %s1080_s24 }
  0x18   : > { %p941_p0 = scmp.ne.s32.totalorder %s1080_s24, %s940_s8  ;;  %p949_p8 = scmp.lt.s32.totalorder %s940_s8, %s940_s8 }
  0x1a   : > { %p943_p1 = pnand %p941_p0, %p905_p6  ;;  %p950_p9 = por %p949_p8, %p948_p7 }
  0x1c   : > { %p944_p4 = pneg %p943_p1 }
  0x1e   : > { %p951_p10 = pnand %p950_p9, %p944_p4 }
  0x20   : > { %954 = shalt.err (!%p951_p10)
}
  0x21   : > { %s1031_s9 = smov 384   ;;  %s1032_s10 = smov 24  }
  0x22   : > { %871 = dma.hbm_to_vmem [thread:$0]  (!%p1084_p5), %s1215_s1, 1536, %s1080_s24, [#allocation3], %s1031_s9, %s1031_s9, %s1032_s10  }
  0x23   : > { %s966_s13 = scalar_lea.vmem %s1088_s27, 16  ;;  %s973_s14 = scalar_lea.vmem %s1088_s27, 32 }
  0x24   : > { %p967_p11 = scmp.ne.s32.totalorder %s1088_s27, %s966_s13  ;;  %p974_p0 = scmp.lt.s32.totalorder %s1088_s27, %s1088_s27 }
  0x25   : > { %p975_p1 = scmp.lt.s32.totalorder %s973_s14, %s966_s13 }
  0x26   : > { %p969_p12 = pnand %p967_p11, %p905_p6 }
  0x27   : > { %p976_p4 = por %p975_p1, %p974_p0 }
  0x28   : > { %p970_p13 = pneg %p969_p12 }
  0x2a   : > { %p977_p7 = pnand %p976_p4, %p970_p13 }
  0x2c   : > { %980 = shalt.err (!%p977_p7)
}
  0x2d   : > { %877 = dma.hbm_to_vmem [thread:$0]  (!%p1084_p5), %s1217_s3, 16, %s1088_s27, [#allocation5]  }
  0x2e   : > { %s992_s17 = scalar_lea.vmem %s208_s29, 16  ;;  %s999_s19 = scalar_lea.vmem %s208_s29, 32 }
  0x2f   : > { %p993_p8 = scmp.ne.s32.totalorder %s208_s29, %s992_s17  ;;  %p1000_p11 = scmp.lt.s32.totalorder %s208_s29, %s208_s29 }
  0x30   : > { %p1001_p12 = scmp.lt.s32.totalorder %s999_s19, %s992_s17 }
  0x31   : > { %p995_p9 = pnand %p993_p8, %p905_p6 }
  0x32   : > { %p1002_p13 = por %p1001_p12, %p1000_p11 }
  0x33   : > { %p996_p10 = pneg %p995_p9 }
  0x35   : > { %p1003_p0 = pnand %p1002_p13, %p996_p10 }
  0x37   : > { %1006 = shalt.err (!%p1003_p0)
}
  0x38   : > { %880 = dma.hbm_to_vmem [thread:$0]  (!%p1084_p5), %s1218_s4, 16, %s208_s29, [#allocation8]  }
  0x39   : > { %228 = sbr.rel (%p1074_p3) target bundleno = 519 (0x207), region = 40 }
  0x3e   : > { %1012 = dma.done.wait (%p881_p2), [#allocation3], 1536  }
  0x3f   : > { %1014 = vsyncadd (%p881_p2), [#allocation3], 4294965760 }
  0x40   : > { %1016 = dma.done.wait (%p881_p2), [#allocation5], 144  }
  0x41   : > { %1018 = vsyncadd (%p881_p2), [#allocation5], 4294967152 }
  0x42   : > { %1020 = dma.done.wait (%p881_p2), [#allocation8], 16  }
  0x43   : > { %1022 = vsyncadd (%p881_p2), [#allocation8], 4294967280  ;;  %p268_p3 = scmp.lt.s32.totalorder %s1069_s21, 1  ;;  %vm340_vm0 = vcmask 1040384   ;;  %v316_v20 = vld [vmem:[#allocation2 + $0x8] sm:$0xff]  ;;  %v317_v26 = vld [vmem:[#allocation2 + $0x10] sm:$0xff] }
  0x44   : > { %408 = vmatprep.mubr.f32.mxu0 %v316_v20  ;;  %vm327_vm1 = vcmask 269312   ;;  %v320_v28 = vld [vmem:[#allocation2 + $0x28] sm:$0xff]  ;;  %v323_v30 = vld [vmem:[#allocation2 + $0x40] sm:$0xff]  ;;  %v326_v34 = vld [vmem:[#allocation2 + $0x58] sm:$0x1]  ;;  %vm515_vm2 = vcmask 64512  }
  0x45   : > { %s1223_s21 = smov (!%p268_p3, %s1069_s21), 1  ;;  %837 = vmatprep.mubr.msk.f32.mxu1 %vm327_vm1, %v317_v26  ;;  %v315_v42 = vld [vmem:[#allocation2] sm:$0xff]  ;;  %v318_v44 = vld [vmem:[#allocation2 + $0x18] sm:$0xff]  ;;  %v321_v46 = vld [vmem:[#allocation2 + $0x30] sm:$0xff] }
  0x46   : > { %s851_s22 = smul.u32 296, %s1223_s21  ;;  %v319_v43 = vld [vmem:[#allocation2 + $0x20] sm:$0xff]  ;;  %v322_v45 = vld [vmem:[#allocation2 + $0x38] sm:$0xff]  ;;  %v325_v47 = vld [vmem:[#allocation2 + $0x50] sm:$0x1]  ;;  %s768_s27 = sshll.u32 %s1223_s21, 5 }
  0x47   : > { %v324_v48 = vld [vmem:[#allocation2 + $0x48] sm:$0x1]  ;;  %v514_v49 = vld [vmem:[#allocation4] sm:$0xff]  ;;  %s277_s30 = scalar_lea.vmem %s1219_s5, %s768_s27 }
  0x48   : > { %s1160_s26 = scalar_lea.vmem %s1214_s0, %s851_s22 }
  0x49   : > { %v309_v0 = vld [vmem:[%s1160_s26 + $0xf8] sm:$0xff]  ;;  %v308_v2 = vld [vmem:[%s1160_s26 + $0xf0] sm:$0xff]  ;;  %v307_v4 = vld [vmem:[%s1160_s26 + $0xe8] sm:$0xff] }
  0x4a   : > { %v293_v1 = vld [vmem:[%s1160_s26 + $0x78] sm:$0xff]  ;;  %769 = vmatprep.subr.mxu0 %v309_v0  ;;  %v292_v3 = vld [vmem:[%s1160_s26 + $0x70] sm:$0xff]  ;;  %v291_v5 = vld [vmem:[%s1160_s26 + $0x68] sm:$0xff] }
  0x4b   : > { %770 = vmatpush3.msra.mxu0 %v293_v1  ;;  %v306_v6 = vld [vmem:[%s1160_s26 + $0xe0] sm:$0xff]  ;;  %v305_v8 = vld [vmem:[%s1160_s26 + $0xd8] sm:$0xff]  ;;  %v304_v10 = vld [vmem:[%s1160_s26 + $0xd0] sm:$0xff] }
  0x4c   : > { %771 = vmatprep.subr.mxu0 %v308_v2  ;;  %v290_v7 = vld [vmem:[%s1160_s26 + $0x60] sm:$0xff]  ;;  %v289_v9 = vld [vmem:[%s1160_s26 + $0x58] sm:$0xff]  ;;  %v288_v12 = vld [vmem:[%s1160_s26 + $0x50] sm:$0xff] }
  0x4d   : > { %772 = vmatpush3.msra.mxu0 %v292_v3  ;;  %v314_v11 = vld [vmem:[%s1160_s26 + $0x120] sm:$0x1]  ;;  %v313_v13 = vld [vmem:[%s1160_s26 + $0x118] sm:$0xff]  ;;  %v303_v14 = vld [vmem:[%s1160_s26 + $0xc8] sm:$0xff] }
  0x4e   : > { %773 = vmatprep.subr.mxu0 %v307_v4  ;;  %827 = vmatprep.subr.msk.mxu1 %vm340_vm0, %v314_v11  ;;  %v312_v15 = vld [vmem:[%s1160_s26 + $0x110] sm:$0xff]  ;;  %v287_v16 = vld [vmem:[%s1160_s26 + $0x48] sm:$0xff]  ;;  %v302_v17 = vld [vmem:[%s1160_s26 + $0xc0] sm:$0xff] }
  0x4f   : > { %774 = vmatpush3.msra.mxu0 %v291_v5  ;;  %828 = vmatpush3.msk.msra.mxu1 %vm340_vm0, %v314_v11  ;;  %v311_v18 = vld [vmem:[%s1160_s26 + $0x108] sm:$0xff]  ;;  %v286_v19 = vld [vmem:[%s1160_s26 + $0x40] sm:$0xff]  ;;  %v301_v21 = vld [vmem:[%s1160_s26 + $0xb8] sm:$0xff] }
  0x50   : > { %775 = vmatprep.subr.mxu0 %v306_v6  ;;  %829 = vmatprep.subr.mxu1 %v313_v13  ;;  %v285_v22 = vld [vmem:[%s1160_s26 + $0x38] sm:$0xff]  ;;  %v310_v23 = vld [vmem:[%s1160_s26 + $0x100] sm:$0xff]  ;;  %v300_v24 = vld [vmem:[%s1160_s26 + $0xb0] sm:$0xff] }
  0x51   : > { %776 = vmatpush3.msra.mxu0 %v290_v7  ;;  %830 = vmatpush3.msra.mxu1 %v313_v13  ;;  %v284_v25 = vld [vmem:[%s1160_s26 + $0x30] sm:$0xff]  ;;  %v299_v27 = vld [vmem:[%s1160_s26 + $0xa8] sm:$0xff]  ;;  %v298_v31 = vld [vmem:[%s1160_s26 + $0xa0] sm:$0xff] }
  0x52   : > { %777 = vmatprep.subr.mxu0 %v305_v8  ;;  %831 = vmatprep.subr.mxu1 %v312_v15  ;;  %v283_v29 = vld [vmem:[%s1160_s26 + $0x28] sm:$0xff]  ;;  %v282_v32 = vld [vmem:[%s1160_s26 + $0x20] sm:$0xff]  ;;  %v297_v33 = vld [vmem:[%s1160_s26 + $0x98] sm:$0xff] }
  0x53   : > { %778 = vmatpush3.msra.mxu0 %v289_v9  ;;  %832 = vmatpush3.msra.mxu1 %v312_v15  ;;  %v281_v35 = vld [vmem:[%s1160_s26 + $0x18] sm:$0xff]  ;;  %v296_v36 = vld [vmem:[%s1160_s26 + $0x90] sm:$0xff]  ;;  %v295_v38 = vld [vmem:[%s1160_s26 + $0x88] sm:$0xff] }
  0x54   : > { %779 = vmatprep.subr.mxu0 %v304_v10  ;;  %833 = vmatprep.subr.mxu1 %v311_v18  ;;  %v280_v37 = vld [vmem:[%s1160_s26 + $0x10] sm:$0xff]  ;;  %v279_v39 = vld [vmem:[%s1160_s26 + $0x8] sm:$0xff]  ;;  %v294_v40 = vld [vmem:[%s1160_s26 + $0x80] sm:$0xff] }
  0x55   : > { %780 = vmatpush3.msra.mxu0 %v288_v12  ;;  %834 = vmatpush3.msra.mxu1 %v311_v18  ;;  %v278_v41 = vld [vmem:[%s1160_s26] sm:$0xff]  ;;  %v764_v6 = vld [vmem:[#allocation6] ss:$0 sm:$0xff]  ;;  %v765_v8 = vld [vmem:[#allocation7] ss:$0 sm:$0xff] }
  0x56   : > { %781 = vmatprep.subr.mxu0 %v303_v14  ;;  %835 = vmatprep.subr.mxu1 %v310_v23 }
  0x57   : > { %782 = vmatpush3.msra.mxu0 %v287_v16  ;;  %836 = vmatpush3.msra.mxu1 %v310_v23 }
  0x58   : > { %783 = vmatprep.subr.mxu0 %v302_v17  ;;  %838 = vmatmul.mubr.msk.f32.vlgmr.msra.gmra.mxu1 %vm327_vm1, %v320_v28 }
  0x59   : > { %784 = vmatpush3.msra.mxu0 %v286_v19  ;;  %840 = vmatprep.mubr.msk.f32.mxu1 %vm327_vm1, %v323_v30 }
  0x5a   : > { %785 = vmatprep.subr.mxu0 %v301_v21  ;;  %843 = vmatprep.subr.mxu1 %v514_v49 }
  0x5b   : > { %786 = vmatpush3.msra.mxu0 %v285_v22  ;;  %844 = vmatpush3.msra.mxu1 %v514_v49 }
  0x5c   : > { %787 = vmatprep.subr.mxu0 %v300_v24  ;;  %841 = vmatmul.mubr.msk.f32.gmra.mxu1 %vm327_vm1, %v326_v34 }
  0x5d   : > { %788 = vmatpush3.msra.mxu0 %v284_v25 }
  0x5e   : > { %789 = vmatprep.subr.mxu0 %v299_v27 }
  0x5f   : > { %790 = vmatpush3.msra.mxu0 %v283_v29 }
  0x60   : > { %791 = vmatprep.subr.mxu0 %v298_v31 }
  0x61   : > { %792 = vmatpush3.msra.mxu0 %v282_v32 }
  0x62   : > { %793 = vmatprep.subr.mxu0 %v297_v33 }
  0x63   : > { %794 = vmatpush3.msra.mxu0 %v281_v35 }
  0x64   : > { %795 = vmatprep.subr.mxu0 %v296_v36 }
  0x65   : > { %796 = vmatpush3.msra.mxu0 %v280_v37 }
  0x66   : > { %797 = vmatprep.subr.mxu0 %v295_v38 }
  0x67   : > { %798 = vmatpush3.msra.mxu0 %v279_v39 }
  0x68   : > { %799 = vmatprep.subr.mxu0 %v294_v40 }
  0x69   : > { %800 = vmatpush3.msra.mxu0 %v278_v41 }
  0x6a   : > { %409 = vmatmul.mubr.f32.vlgmr.msra.gmra.mxu0 %v315_v42 }
  0x6b   : > { %413 = vmatprep.mubr.f32.mxu0 %v319_v43 }
  0x6e   : > { %414 = vmatmul.mubr.f32.gmra.mxu0 %v318_v44 }
  0x6f   : > { %418 = vmatprep.mubr.f32.mxu0 %v322_v45 }
  0x72   : > { %419 = vmatmul.mubr.f32.gmra.mxu0 %v321_v46 }
  0x73   : > { %423 = vmatprep.mubr.f32.mxu0 %v325_v47 }
  0x76   : > { %424 = vmatmul.mubr.f32.gmra.mxu0 %v324_v48 }
 0x118   : > { %v839_v50 = vpop.f32.mrf.mxu1 }
 0x11a   : > { %v495_v53 = vpop.f32.mrf.mxu1 }
 0x11c   : > { %v842_v58 = vpop.f32.mrf.mxu1 }
 0x11e   : > { %v505_v63 = vpop.f32.mrf.mxu1 }
 0x12a   : > { %v801_v51 = vpop.f32.mrf.mxu0 }
 0x12c   : > { %v802_v52 = vpop.f32.mrf.mxu0 }
 0x12d   : > { %v803_v54 = vadd.f32 %v802_v52, %v801_v51 }
 0x12e   : > { %v804_v55 = vpop.f32.mrf.mxu0 }
 0x12f   : > { %v496_v56 = vadd.f32 %v803_v54, %v495_v53 }
 0x130   : > { %v805_v57 = vpop.f32.mrf.mxu0 }
 0x131   : > { %v806_v59 = vadd.f32 %v805_v57, %v804_v55  ;;  %845 = vmatprep.mubr.msk.f32.mxu1 %vm515_vm2, %v496_v56 }
 0x132   : > { %v807_v60 = vpop.f32.mrf.mxu0 }
 0x133   : > { %v501_v61 = vadd.f32 %v839_v50, %v806_v59 }
 0x134   : > { %v808_v62 = vpop.f32.mrf.mxu0 }
 0x135   : > { %v809_v0 = vadd.f32 %v808_v62, %v807_v60  ;;  %846 = vmatmul.mubr.msk.f32.vlgmr.msra.gmra.mxu1 %vm515_vm2, %v501_v61 }
 0x136   : > { %v810_v1 = vpop.f32.mrf.mxu0 }
 0x137   : > { %v506_v2 = vadd.f32 %v809_v0, %v505_v63 }
 0x138   : > { %v811_v3 = vpop.f32.mrf.mxu0 }
 0x139   : > { %v812_v4 = vadd.f32 %v811_v3, %v810_v1  ;;  %848 = vmatprep.mubr.msk.f32.mxu1 %vm515_vm2, %v506_v2 }
 0x13b   : > { %v511_v5 = vadd.f32 %v842_v58, %v812_v4 }
 0x13d   : > { %849 = vmatmul.mubr.msk.f32.gmra.mxu1 %vm515_vm2, %v511_v5 }
 0x1f5   : > { %v847_v7 = vpop.f32.mrf.mxu1 }
 0x1f6   : > { %v621_v9 = vmul.f32 %v847_v7, %v764_v6 }
 0x1f7   : > { %v594_v10 = vpop.f32.mrf.mxu1 }
 0x1f8   : > { %v632_v11 = vadd.f32 %v765_v8, %v621_v9  ;;  %v620_v12 = vmul.f32 %v764_v6, %v594_v10 }
 0x1fa   : > { %v636_v13 = vmax.f32 %v632_v11, 0.0  ;;  %v631_v14 = vadd.f32 %v765_v8, %v620_v12 }
 0x1fc   : > { %640 = vst [vmem:[%s277_s30 + $0x8] sm:$0xff] %v636_v13  ;;  %v635_v15 = vmax.f32 %v631_v14, 0.0 }
 0x1fd   : > { %v850_v16 = vpop.f32.mrf.mxu1 }
 0x1fe   : > { %639 = vst [vmem:[%s277_s30] sm:$0xff] %v635_v15  ;;  %v623_v17 = vmul.f32 %v850_v16, %v764_v6 }
 0x1ff   : > { %v604_v18 = vpop.f32.mrf.mxu1 }
 0x200   : > { %v634_v19 = vadd.f32 %v765_v8, %v623_v17  ;;  %v622_v20 = vmul.f32 %v764_v6, %v604_v18 }
 0x202   : > { %v638_v21 = vmax.f32 %v634_v19, 0.0  ;;  %v633_v22 = vadd.f32 %v765_v8, %v622_v20 }
 0x204   : > { %642 = vst [vmem:[%s277_s30 + $0x18] sm:$0x1] %v638_v21  ;;  %v637_v23 = vmax.f32 %v633_v22, 0.0 }
 0x206   : > { %641 = vst [vmem:[%s277_s30 + $0x10] sm:$0xff] %v637_v23 }
 0x207 PF: > { %s18_s18 = sadd.s32 1, %s1025_s18  }
 0x208   : > { %p15_p2 = scmp.ge.s32.totalorder %s18_s18, 4  }
 0x20a   :  { %17 = sbr.rel (!%p15_p2) target bundleno = 3 (0x3), region = 87 }
 0x20f   :  { %664 = vsyncpa [#allocation3], 1 }
 0x210   :  { %666 = vsyncpa [#allocation3 + $0x1], 1 }
 0x211   :  { %667 = vsyncpa [#allocation5], 1 }
 0x212   :  { %668 = vsyncpa [#allocation8], 1 }

// kernel: inception_aux_forward.3
= control target key start
LH: loop header
LB: loop body
LE: loop exit
PB: predicated region body
PF: predicated region fallthrough
CT: control target
= control target key end

     0   :  { %11 = vsyncpa [#allocation3], 0  ;;  %s6436_s0 = inlined_call_operand.vmem [shape: f32[2,3200], index: 0, kind: input, shape index: {}]   ;;  %s6437_s1 = inlined_call_operand.hbm [shape: f32[3200,768], index: 1, kind: input, shape index: {}]   ;;  %s6438_s2 = inlined_call_operand.hbm [shape: f32[1,768], index: 2, kind: input, shape index: {}]   ;;  %s6439_s3 = inlined_call_operand.hbm [shape: f32[1,768], index: 3, kind: input, shape index: {}]   ;;  %s6440_s4 = inlined_call_operand.hbm [shape: f32[768,128], index: 4, kind: input, shape index: {}]   ;;  %s6441_s5 = inlined_call_operand.hbm [shape: f32[1,128], index: 5, kind: input, shape index: {}]   ;;  %s6442_s6 = inlined_call_operand.hbm [shape: f32[2,128], index: 6, kind: output, shape index: {}]  }
   0x1   :  { %12 = vsyncpa [#allocation6], 0 }
   0x2   :  { %13 = vsyncpa [#allocation9], 0 }
   0x3   :  { %14 = vsyncpa [#allocation4], 0  ;;  %s6071_s21 = smov [#allocation5]   ;;  %s6072_s23 = smov [#allocation8]  }
   0x4   :  { %s35_s22 = sshll.u32 %s6071_s21, 4  ;;  %s54_s24 = sshll.u32 %s6072_s23, 4  ;;  %s36_s22 = int_to_ptr.vmem [resolvable:$true] %s35_s22  ;;  %s55_s24 = int_to_ptr.vmem [resolvable:$true] %s54_s24 }
   0x5   :  { %s5951_s25 = scalar_lea.vmem %s36_s22, 96  ;;  %p5956_p1 = scmp.lt.s32.totalorder %s36_s22, %s36_s22 }
   0x6   :  { %p5952_p0 = scmp.ne.s32.totalorder %s36_s22, %s5951_s25  ;;  %p5957_p2 = scmp.lt.s32.totalorder %s5951_s25, %s5951_s25 }
   0x8   :  { %p5958_p3 = por %p5957_p2, %p5956_p1 }
   0xa   :  { %p5959_p4 = pnand %p5958_p3, %p5952_p0 }
   0xc   :  { %5962 = shalt.err (!%p5959_p4)
}
   0xd   :  { %38 = dma.hbm_to_vmem [thread:$0]  %s6438_s2, 96, %s36_s22, [#allocation6]  }
   0xe   :  { %s5971_s28 = scalar_lea.vmem %s55_s24, 12288  ;;  %p5976_p6 = scmp.lt.s32.totalorder %s55_s24, %s55_s24 }
   0xf   :  { %p5972_p5 = scmp.ne.s32.totalorder %s55_s24, %s5971_s28  ;;  %p5977_p7 = scmp.lt.s32.totalorder %s5971_s28, %s5971_s28 }
  0x11   :  { %p5978_p8 = por %p5977_p7, %p5976_p6 }
  0x13   :  { %p5979_p9 = pnand %p5978_p8, %p5972_p5 }
  0x15   :  { %5982 = shalt.err (!%p5979_p9)
}
  0x16   :  { %s6073_s29 = smov 128   ;;  %s6074_s30 = smov 8  }
  0x17   :  { %60 = dma.hbm_to_vmem [thread:$0]  %s6440_s4, 12288, %s55_s24, [#allocation9], %s6073_s29, %s6073_s29, %s6074_s30  }
  0x18   :  { %s6075_s9 = smov [#allocation2]  }
  0x19   :  { %s22_s10 = sshll.u32 %s6075_s9, 4  ;;  %s23_s10 = int_to_ptr.vmem [resolvable:$true] %s22_s10 }
  0x1a   :  { %s5991_s11 = scalar_lea.vmem %s23_s10, 307200  ;;  %p5996_p11 = scmp.lt.s32.totalorder %s23_s10, %s23_s10 }
  0x1b   :  { %p5992_p10 = scmp.ne.s32.totalorder %s23_s10, %s5991_s11  ;;  %p5997_p12 = scmp.lt.s32.totalorder %s5991_s11, %s5991_s11 }
  0x1d   :  { %p5998_p13 = por %p5997_p12, %p5996_p11 }
  0x1f   :  { %p5999_p0 = pnand %p5998_p13, %p5992_p10 }
  0x21   :  { %6002 = shalt.err (!%p5999_p0)
}
  0x22   :  { %s6076_s2 = smov 768   ;;  %s6077_s12 = smov 48  }
  0x23   :  { %28 = dma.hbm_to_vmem [thread:$0]  %s6437_s1, 307200, %s23_s10, [#allocation3], %s6076_s2, %s6076_s2, %s6077_s12  }
  0x24   :  { %s6078_s15 = smov [#allocation7]   ;;  %s6079_s4 = smov [#allocation10]  }
  0x25   :  { %s45_s16 = sshll.u32 %s6078_s15, 4  ;;  %s67_s17 = sshll.u32 %s6079_s4, 4  ;;  %s46_s16 = int_to_ptr.vmem [resolvable:$true] %s45_s16  ;;  %s68_s17 = int_to_ptr.vmem [resolvable:$true] %s67_s17 }
  0x26   :  { %s6011_s18 = scalar_lea.vmem %s46_s16, 96  ;;  %p6016_p2 = scmp.lt.s32.totalorder %s46_s16, %s46_s16 }
  0x27   :  { %p6012_p1 = scmp.ne.s32.totalorder %s46_s16, %s6011_s18  ;;  %p6017_p3 = scmp.lt.s32.totalorder %s6011_s18, %s6011_s18 }
  0x29   :  { %p6018_p4 = por %p6017_p3, %p6016_p2 }
  0x2b   :  { %p6019_p5 = pnand %p6018_p4, %p6012_p1 }
  0x2d   :  { %6022 = shalt.err (!%p6019_p5)
}
  0x2e   :  { %48 = dma.hbm_to_vmem [thread:$0]  %s6439_s3, 96, %s46_s16, [#allocation6]  }
  0x2f   :  { %s6031_s21 = scalar_lea.vmem %s68_s17, 16  ;;  %s6035_s1 = scalar_lea.vmem %s68_s17, 32 }
  0x30   :  { %p6032_p6 = scmp.ne.s32.totalorder %s68_s17, %s6031_s21  ;;  %p6036_p7 = scmp.lt.s32.totalorder %s68_s17, %s68_s17 }
  0x31   :  { %p6037_p8 = scmp.lt.s32.totalorder %s6035_s1, %s6031_s21 }
  0x33   :  { %p6038_p9 = por %p6037_p8, %p6036_p7 }
  0x35   :  { %p6039_p10 = pnand %p6038_p9, %p6032_p6 }
  0x37   :  { %6042 = shalt.err (!%p6039_p10)
}
  0x38   :  { %70 = dma.hbm_to_vmem [thread:$0]  %s6441_s5, 16, %s68_s17, [#allocation9]  }
  0x39   :  { %6063 = dma.done.wait [#allocation3], 307200  }
  0x3a   :  { %6064 = vsyncadd [#allocation3], 4294660096 }
  0x3b   :  { %6065 = dma.done.wait [#allocation6], 192  }
  0x3c   :  { %6066 = vsyncadd [#allocation6], 4294967104 }
  0x3d   :  { %6067 = dma.done.wait [#allocation9], 12304  }
  0x3e   :  { %6068 = vsyncadd [#allocation9], 4294954992  ;;  %v184_v0 = vld [vmem:[#allocation2 + $0x2d8] sm:$0xff]  ;;  %v183_v2 = vld [vmem:[#allocation2 + $0x2d0] sm:$0xff] }
  0x3f   :  { %v376_v1 = vld [vmem:[#allocation2 + $0x8d8] sm:$0xff]  ;;  %2634 = vmatprep.subr.mxu0 %v184_v0  ;;  %v375_v3 = vld [vmem:[#allocation2 + $0x8d0] sm:$0xff]  ;;  %v178_v4 = vld [vmem:[#allocation2 + $0x2a8] sm:$0xff] }
  0x40   :  { %2705 = vmatprep.subr.mxu1 %v376_v1  ;;  %v370_v5 = vld [vmem:[#allocation2 + $0x8a8] sm:$0xff]  ;;  %2635 = vmatpush1.msra.mxu0 %v183_v2  ;;  %v177_v6 = vld [vmem:[#allocation2 + $0x2a0] sm:$0xff]  ;;  %v172_v8 = vld [vmem:[#allocation2 + $0x278] sm:$0xff] }
  0x41   :  { %2706 = vmatpush1.msra.mxu1 %v375_v3  ;;  %v369_v7 = vld [vmem:[#allocation2 + $0x8a0] sm:$0xff]  ;;  %2636 = vmatprep.subr.mxu0 %v178_v4  ;;  %v364_v9 = vld [vmem:[#allocation2 + $0x878] sm:$0xff]  ;;  %v171_v10 = vld [vmem:[#allocation2 + $0x270] sm:$0xff] }
  0x42   :  { %2707 = vmatprep.subr.mxu1 %v370_v5  ;;  %v363_v11 = vld [vmem:[#allocation2 + $0x870] sm:$0xff]  ;;  %2637 = vmatpush1.msra.mxu0 %v177_v6  ;;  %v166_v12 = vld [vmem:[#allocation2 + $0x248] sm:$0xff]  ;;  %v165_v14 = vld [vmem:[#allocation2 + $0x240] sm:$0xff] }
  0x43   :  { %2708 = vmatpush1.msra.mxu1 %v369_v7  ;;  %v358_v13 = vld [vmem:[#allocation2 + $0x848] sm:$0xff]  ;;  %2638 = vmatprep.subr.mxu0 %v172_v8  ;;  %v357_v15 = vld [vmem:[#allocation2 + $0x840] sm:$0xff]  ;;  %v160_v16 = vld [vmem:[#allocation2 + $0x218] sm:$0xff] }
  0x44   :  { %2709 = vmatprep.subr.mxu1 %v364_v9  ;;  %2639 = vmatpush1.msra.mxu0 %v171_v10  ;;  %v352_v17 = vld [vmem:[#allocation2 + $0x818] sm:$0xff]  ;;  %v159_v18 = vld [vmem:[#allocation2 + $0x210] sm:$0xff]  ;;  %v154_v20 = vld [vmem:[#allocation2 + $0x1e8] sm:$0xff] }
  0x45   :  { %2710 = vmatpush1.msra.mxu1 %v363_v11  ;;  %2640 = vmatprep.subr.mxu0 %v166_v12  ;;  %v351_v19 = vld [vmem:[#allocation2 + $0x810] sm:$0xff]  ;;  %v346_v21 = vld [vmem:[#allocation2 + $0x7e8] sm:$0xff]  ;;  %v153_v22 = vld [vmem:[#allocation2 + $0x1e0] sm:$0xff] }
  0x46   :  { %2711 = vmatprep.subr.mxu1 %v358_v13  ;;  %2641 = vmatpush1.msra.mxu0 %v165_v14  ;;  %v345_v23 = vld [vmem:[#allocation2 + $0x7e0] sm:$0xff]  ;;  %v148_v24 = vld [vmem:[#allocation2 + $0x1b8] sm:$0xff]  ;;  %v147_v26 = vld [vmem:[#allocation2 + $0x1b0] sm:$0xff] }
  0x47   :  { %2712 = vmatpush1.msra.mxu1 %v357_v15  ;;  %2642 = vmatprep.subr.mxu0 %v160_v16  ;;  %v340_v25 = vld [vmem:[#allocation2 + $0x7b8] sm:$0xff]  ;;  %v339_v27 = vld [vmem:[#allocation2 + $0x7b0] sm:$0xff]  ;;  %v142_v28 = vld [vmem:[#allocation2 + $0x188] sm:$0xff] }
  0x48   :  { %2713 = vmatprep.subr.mxu1 %v352_v17  ;;  %2643 = vmatpush1.msra.mxu0 %v159_v18  ;;  %v334_v29 = vld [vmem:[#allocation2 + $0x788] sm:$0xff]  ;;  %v141_v30 = vld [vmem:[#allocation2 + $0x180] sm:$0xff]  ;;  %v136_v32 = vld [vmem:[#allocation2 + $0x158] sm:$0xff] }
  0x49   :  { %2714 = vmatpush1.msra.mxu1 %v351_v19  ;;  %2644 = vmatprep.subr.mxu0 %v154_v20  ;;  %v333_v31 = vld [vmem:[#allocation2 + $0x780] sm:$0xff]  ;;  %v328_v33 = vld [vmem:[#allocation2 + $0x758] sm:$0xff]  ;;  %v135_v34 = vld [vmem:[#allocation2 + $0x150] sm:$0xff] }
  0x4a   :  { %2715 = vmatprep.subr.mxu1 %v346_v21  ;;  %2645 = vmatpush1.msra.mxu0 %v153_v22  ;;  %v327_v35 = vld [vmem:[#allocation2 + $0x750] sm:$0xff]  ;;  %v130_v36 = vld [vmem:[#allocation2 + $0x128] sm:$0xff]  ;;  %v129_v38 = vld [vmem:[#allocation2 + $0x120] sm:$0xff] }
  0x4b   :  { %2716 = vmatpush1.msra.mxu1 %v345_v23  ;;  %2646 = vmatprep.subr.mxu0 %v148_v24  ;;  %v322_v37 = vld [vmem:[#allocation2 + $0x728] sm:$0xff]  ;;  %v321_v39 = vld [vmem:[#allocation2 + $0x720] sm:$0xff]  ;;  %v124_v40 = vld [vmem:[#allocation2 + $0xf8] sm:$0xff] }
  0x4c   :  { %2717 = vmatprep.subr.mxu1 %v340_v25  ;;  %2647 = vmatpush1.msra.mxu0 %v147_v26  ;;  %v316_v41 = vld [vmem:[#allocation2 + $0x6f8] sm:$0xff]  ;;  %v123_v42 = vld [vmem:[#allocation2 + $0xf0] sm:$0xff]  ;;  %v118_v44 = vld [vmem:[#allocation2 + $0xc8] sm:$0xff] }
  0x4d   :  { %2718 = vmatpush1.msra.mxu1 %v339_v27  ;;  %2648 = vmatprep.subr.mxu0 %v142_v28  ;;  %v315_v43 = vld [vmem:[#allocation2 + $0x6f0] sm:$0xff]  ;;  %v310_v45 = vld [vmem:[#allocation2 + $0x6c8] sm:$0xff]  ;;  %v117_v46 = vld [vmem:[#allocation2 + $0xc0] sm:$0xff] }
  0x4e   :  { %2719 = vmatprep.subr.mxu1 %v334_v29  ;;  %2649 = vmatpush1.msra.mxu0 %v141_v30  ;;  %v309_v47 = vld [vmem:[#allocation2 + $0x6c0] sm:$0xff]  ;;  %v112_v48 = vld [vmem:[#allocation2 + $0x98] sm:$0xff]  ;;  %v111_v50 = vld [vmem:[#allocation2 + $0x90] sm:$0xff]  ;;  %v6080_v30 = vmov 1983009808  }
  0x4f   :  { %2720 = vmatpush1.msra.mxu1 %v333_v31  ;;  %2650 = vmatprep.subr.mxu0 %v136_v32  ;;  %v304_v49 = vld [vmem:[#allocation2 + $0x698] sm:$0xff]  ;;  %v303_v51 = vld [vmem:[#allocation2 + $0x690] sm:$0xff]  ;;  %v106_v52 = vld [vmem:[#allocation2 + $0x68] sm:$0xff]  ;;  %v2502_v31 = vunpack.c.l.s4 %v6080_v30  ;;  %v2504_v32 = vlaneseq }
  0x50   :  { %2721 = vmatprep.subr.mxu1 %v328_v33  ;;  %2651 = vmatpush1.msra.mxu0 %v135_v34  ;;  %v298_v53 = vld [vmem:[#allocation2 + $0x668] sm:$0xff]  ;;  %v105_v54 = vld [vmem:[#allocation2 + $0x60] sm:$0xff]  ;;  %v100_v56 = vld [vmem:[#allocation2 + $0x38] sm:$0xff] }
  0x51   :  { %2722 = vmatpush1.msra.mxu1 %v327_v35  ;;  %2652 = vmatprep.subr.mxu0 %v130_v36  ;;  %v297_v55 = vld [vmem:[#allocation2 + $0x660] sm:$0xff]  ;;  %v292_v57 = vld [vmem:[#allocation2 + $0x638] sm:$0xff]  ;;  %v99_v58 = vld [vmem:[#allocation2 + $0x30] sm:$0xff] }
  0x52   :  { %2723 = vmatprep.subr.mxu1 %v322_v37  ;;  %2653 = vmatpush1.msra.mxu0 %v129_v38  ;;  %v291_v59 = vld [vmem:[#allocation2 + $0x630] sm:$0xff]  ;;  %v94_v60 = vld [vmem:[#allocation2 + $0x8] sm:$0xff]  ;;  %v93_v62 = vld [vmem:[#allocation2] sm:$0xff] }
  0x53   :  { %2724 = vmatpush1.msra.mxu1 %v321_v39  ;;  %2654 = vmatprep.subr.mxu0 %v124_v40  ;;  %v286_v61 = vld [vmem:[#allocation2 + $0x608] sm:$0xff]  ;;  %v285_v63 = vld [vmem:[#allocation2 + $0x600] sm:$0xff]  ;;  %v280_v0 = vld [vmem:[#allocation2 + $0x5d8] sm:$0xff] }
  0x54   :  { %2725 = vmatprep.subr.mxu1 %v316_v41  ;;  %2655 = vmatpush1.msra.mxu0 %v123_v42  ;;  %v472_v1 = vld [vmem:[#allocation2 + $0xbd8] sm:$0xff]  ;;  %v279_v2 = vld [vmem:[#allocation2 + $0x5d0] sm:$0xff]  ;;  %v274_v4 = vld [vmem:[#allocation2 + $0x5a8] sm:$0xff]  ;;  %v2503_v41 = vunpack.c.0.s8 %v2502_v31  ;;  %v6133_v42 = vshrl.u32 %v2504_v32, 7 }
  0x55   :  { %2726 = vmatpush1.msra.mxu1 %v315_v43  ;;  %2656 = vmatprep.subr.mxu0 %v118_v44  ;;  %v471_v3 = vld [vmem:[#allocation2 + $0xbd0] sm:$0xff]  ;;  %v466_v5 = vld [vmem:[#allocation2 + $0xba8] sm:$0xff]  ;;  %v273_v6 = vld [vmem:[#allocation2 + $0x5a0] sm:$0xff] }
  0x56   :  { %2727 = vmatprep.subr.mxu1 %v310_v45  ;;  %2657 = vmatpush1.msra.mxu0 %v117_v46  ;;  %v465_v7 = vld [vmem:[#allocation2 + $0xba0] sm:$0xff]  ;;  %v268_v8 = vld [vmem:[#allocation2 + $0x578] sm:$0xff]  ;;  %v267_v10 = vld [vmem:[#allocation2 + $0x570] sm:$0xff] }
  0x57   :  { %2728 = vmatpush1.msra.mxu1 %v309_v47  ;;  %2658 = vmatprep.subr.mxu0 %v112_v48  ;;  %v460_v9 = vld [vmem:[#allocation2 + $0xb78] sm:$0xff]  ;;  %v459_v11 = vld [vmem:[#allocation2 + $0xb70] sm:$0xff]  ;;  %v262_v12 = vld [vmem:[#allocation2 + $0x548] sm:$0xff] }
  0x58   :  { %2729 = vmatprep.subr.mxu1 %v304_v49  ;;  %2659 = vmatpush1.msra.mxu0 %v111_v50  ;;  %v454_v13 = vld [vmem:[#allocation2 + $0xb48] sm:$0xff]  ;;  %v261_v14 = vld [vmem:[#allocation2 + $0x540] sm:$0xff]  ;;  %v256_v16 = vld [vmem:[#allocation2 + $0x518] sm:$0xff] }
  0x59   :  { %2730 = vmatpush1.msra.mxu1 %v303_v51  ;;  %2660 = vmatprep.subr.mxu0 %v106_v52  ;;  %v453_v15 = vld [vmem:[#allocation2 + $0xb40] sm:$0xff]  ;;  %v448_v17 = vld [vmem:[#allocation2 + $0xb18] sm:$0xff]  ;;  %v255_v18 = vld [vmem:[#allocation2 + $0x510] sm:$0xff]  ;;  %v6139_v52 = vsub.s32 %v2503_v41, %v6133_v42 }
  0x5a   :  { %2731 = vmatprep.subr.mxu1 %v298_v53  ;;  %2661 = vmatpush1.msra.mxu0 %v105_v54  ;;  %v447_v19 = vld [vmem:[#allocation2 + $0xb10] sm:$0xff]  ;;  %v250_v20 = vld [vmem:[#allocation2 + $0x4e8] sm:$0xff]  ;;  %v249_v22 = vld [vmem:[#allocation2 + $0x4e0] sm:$0xff] }
  0x5b   :  { %2732 = vmatpush1.msra.mxu1 %v297_v55  ;;  %2662 = vmatprep.subr.mxu0 %v100_v56  ;;  %v442_v21 = vld [vmem:[#allocation2 + $0xae8] sm:$0xff]  ;;  %v441_v23 = vld [vmem:[#allocation2 + $0xae0] sm:$0xff]  ;;  %v244_v24 = vld [vmem:[#allocation2 + $0x4b8] sm:$0xff] }
  0x5c   :  { %2733 = vmatprep.subr.mxu1 %v292_v57  ;;  %2663 = vmatpush1.msra.mxu0 %v99_v58  ;;  %v436_v25 = vld [vmem:[#allocation2 + $0xab8] sm:$0xff]  ;;  %v243_v26 = vld [vmem:[#allocation2 + $0x4b0] sm:$0xff]  ;;  %v238_v28 = vld [vmem:[#allocation2 + $0x488] sm:$0xff] }
  0x5d   :  { %2734 = vmatpush1.msra.mxu1 %v291_v59  ;;  %2664 = vmatprep.subr.mxu0 %v94_v60  ;;  %v435_v27 = vld [vmem:[#allocation2 + $0xab0] sm:$0xff]  ;;  %v430_v29 = vld [vmem:[#allocation2 + $0xa88] sm:$0xff]  ;;  %v237_v33 = vld [vmem:[#allocation2 + $0x480] sm:$0xff] }
  0x5e   :  { %2735 = vmatprep.subr.mxu1 %v286_v61  ;;  %2665 = vmatpush1.msra.mxu0 %v93_v62  ;;  %v429_v34 = vld [vmem:[#allocation2 + $0xa80] sm:$0xff]  ;;  %v232_v35 = vld [vmem:[#allocation2 + $0x458] sm:$0xff]  ;;  %v231_v37 = vld [vmem:[#allocation2 + $0x450] sm:$0xff] }
  0x5f   :  { %2736 = vmatpush1.msra.mxu1 %v285_v63  ;;  %2666 = vmatprep.subr.mxu0 %v280_v0  ;;  %v424_v36 = vld [vmem:[#allocation2 + $0xa58] sm:$0xff]  ;;  %v423_v38 = vld [vmem:[#allocation2 + $0xa50] sm:$0xff]  ;;  %v226_v39 = vld [vmem:[#allocation2 + $0x428] sm:$0xff] }
  0x60   :  { %2737 = vmatprep.subr.mxu1 %v472_v1  ;;  %2667 = vmatpush2.msra.mxu0 %v279_v2  ;;  %v418_v40 = vld [vmem:[#allocation2 + $0xa28] sm:$0xff]  ;;  %v225_v43 = vld [vmem:[#allocation2 + $0x420] sm:$0xff]  ;;  %v220_v45 = vld [vmem:[#allocation2 + $0x3f8] sm:$0xff] }
  0x61   :  { %2738 = vmatpush2.msra.mxu1 %v471_v3  ;;  %2668 = vmatprep.subr.mxu0 %v274_v4  ;;  %v417_v44 = vld [vmem:[#allocation2 + $0xa20] sm:$0xff]  ;;  %v412_v46 = vld [vmem:[#allocation2 + $0x9f8] sm:$0xff]  ;;  %v219_v48 = vld [vmem:[#allocation2 + $0x3f0] sm:$0xff] }
  0x62   :  { %2739 = vmatprep.subr.mxu1 %v466_v5  ;;  %2669 = vmatpush2.msra.mxu0 %v273_v6  ;;  %v86_v47 = vld [vmem:[%s6436_s0] sm:$0xff]  ;;  %v411_v49 = vld [vmem:[#allocation2 + $0x9f0] sm:$0xff]  ;;  %v214_v50 = vld [vmem:[#allocation2 + $0x3c8] sm:$0xff] }
  0x63   :  { %2740 = vmatpush2.msra.mxu1 %v465_v7  ;;  %2670 = vmatprep.subr.mxu0 %v268_v8  ;;  %v406_v51 = vld [vmem:[#allocation2 + $0x9c8] sm:$0xff]  ;;  %v213_v53 = vld [vmem:[#allocation2 + $0x3c0] sm:$0xff]  ;;  %v2500_v55 = vcombine.high %v86_v47, %v86_v47  ;;  %v208_v56 = vld [vmem:[#allocation2 + $0x398] sm:$0xff]  ;;  %v6142_v62 = vrot.slane %v86_v47, %v6139_v52 }
  0x64   :  { %2741 = vmatprep.subr.mxu1 %v460_v9  ;;  %2671 = vmatpush2.msra.mxu0 %v267_v10  ;;  %v405_v54 = vld [vmem:[#allocation2 + $0x9c0] sm:$0xff]  ;;  %v400_v57 = vld [vmem:[#allocation2 + $0x998] sm:$0xff]  ;;  %v207_v58 = vld [vmem:[#allocation2 + $0x390] sm:$0xff] }
  0x65   :  { %2742 = vmatpush2.msra.mxu1 %v459_v11  ;;  %2672 = vmatprep.subr.mxu0 %v262_v12  ;;  %v399_v59 = vld [vmem:[#allocation2 + $0x990] sm:$0xff]  ;;  %v202_v60 = vld [vmem:[#allocation2 + $0x368] sm:$0xff]  ;;  %v201_v63 = vld [vmem:[#allocation2 + $0x360] sm:$0xff]  ;;  %v6145_v1 = vrot.slane %v2500_v55, %v6139_v52  ;;  %v6149_v8 = vcombine.high %v6142_v62, %v6142_v62 }
  0x66   :  { %2743 = vmatprep.subr.mxu1 %v454_v13  ;;  %2673 = vmatpush2.msra.mxu0 %v261_v14  ;;  %v394_v61 = vld [vmem:[#allocation2 + $0x968] sm:$0xff]  ;;  %v393_v0 = vld [vmem:[#allocation2 + $0x960] sm:$0xff]  ;;  %v196_v2 = vld [vmem:[#allocation2 + $0x338] sm:$0xff] }
  0x67   :  { %2744 = vmatpush2.msra.mxu1 %v453_v15  ;;  %2674 = vmatprep.subr.mxu0 %v256_v16  ;;  %v388_v3 = vld [vmem:[#allocation2 + $0x938] sm:$0xff]  ;;  %v195_v4 = vld [vmem:[#allocation2 + $0x330] sm:$0xff]  ;;  %v190_v6 = vld [vmem:[#allocation2 + $0x308] sm:$0xff]  ;;  %v6153_v10 = vcombine.high %v6145_v1, %v6145_v1 }
  0x68   :  { %2745 = vmatprep.subr.mxu1 %v448_v17  ;;  %2675 = vmatpush2.msra.mxu0 %v255_v18  ;;  %v387_v5 = vld [vmem:[#allocation2 + $0x930] sm:$0xff]  ;;  %v382_v7 = vld [vmem:[#allocation2 + $0x908] sm:$0xff]  ;;  %v189_v9 = vld [vmem:[#allocation2 + $0x300] sm:$0xff] }
  0x69   :  { %2746 = vmatpush2.msra.mxu1 %v447_v19  ;;  %2676 = vmatprep.subr.mxu0 %v250_v20  ;;  %v381_v11 = vld [vmem:[#allocation2 + $0x900] sm:$0xff]  ;;  %v568_v12 = vld [vmem:[#allocation2 + $0xed8] sm:$0xff]  ;;  %v567_v14 = vld [vmem:[#allocation2 + $0xed0] sm:$0xff] }
  0x6a   :  { %2747 = vmatprep.subr.mxu1 %v442_v21  ;;  %2677 = vmatpush2.msra.mxu0 %v249_v22  ;;  %v760_v13 = vld [vmem:[#allocation2 + $0x14d8] sm:$0xff]  ;;  %v759_v15 = vld [vmem:[#allocation2 + $0x14d0] sm:$0xff]  ;;  %v562_v16 = vld [vmem:[#allocation2 + $0xea8] sm:$0xff] }
  0x6b   :  { %2748 = vmatpush2.msra.mxu1 %v441_v23  ;;  %2678 = vmatprep.subr.mxu0 %v244_v24  ;;  %v754_v17 = vld [vmem:[#allocation2 + $0x14a8] sm:$0xff]  ;;  %v561_v18 = vld [vmem:[#allocation2 + $0xea0] sm:$0xff]  ;;  %v556_v20 = vld [vmem:[#allocation2 + $0xe78] sm:$0xff] }
  0x6c   :  { %2749 = vmatprep.subr.mxu1 %v436_v25  ;;  %2679 = vmatpush2.msra.mxu0 %v243_v26  ;;  %v753_v19 = vld [vmem:[#allocation2 + $0x14a0] sm:$0xff]  ;;  %v748_v21 = vld [vmem:[#allocation2 + $0x1478] sm:$0xff]  ;;  %v555_v22 = vld [vmem:[#allocation2 + $0xe70] sm:$0xff] }
  0x6d   :  { %2750 = vmatpush2.msra.mxu1 %v435_v27  ;;  %2680 = vmatprep.subr.mxu0 %v238_v28  ;;  %v747_v23 = vld [vmem:[#allocation2 + $0x1470] sm:$0xff]  ;;  %v550_v24 = vld [vmem:[#allocation2 + $0xe48] sm:$0xff]  ;;  %v549_v26 = vld [vmem:[#allocation2 + $0xe40] sm:$0xff] }
  0x6e   :  { %2751 = vmatprep.subr.mxu1 %v430_v29  ;;  %2681 = vmatpush2.msra.mxu0 %v237_v33  ;;  %v742_v25 = vld [vmem:[#allocation2 + $0x1448] sm:$0xff]  ;;  %v741_v27 = vld [vmem:[#allocation2 + $0x1440] sm:$0xff]  ;;  %v544_v28 = vld [vmem:[#allocation2 + $0xe18] sm:$0xff] }
  0x6f   :  { %2752 = vmatpush2.msra.mxu1 %v429_v34  ;;  %2682 = vmatprep.subr.mxu0 %v232_v35  ;;  %v736_v29 = vld [vmem:[#allocation2 + $0x1418] sm:$0xff]  ;;  %v543_v30 = vld [vmem:[#allocation2 + $0xe10] sm:$0xff]  ;;  %v538_v32 = vld [vmem:[#allocation2 + $0xde8] sm:$0xff] }
  0x70   :  { %2753 = vmatprep.subr.mxu1 %v424_v36  ;;  %2683 = vmatpush2.msra.mxu0 %v231_v37  ;;  %v735_v31 = vld [vmem:[#allocation2 + $0x1410] sm:$0xff]  ;;  %v730_v33 = vld [vmem:[#allocation2 + $0x13e8] sm:$0xff]  ;;  %v537_v34 = vld [vmem:[#allocation2 + $0xde0] sm:$0xff] }
  0x71   :  { %2754 = vmatpush2.msra.mxu1 %v423_v38  ;;  %2684 = vmatprep.subr.mxu0 %v226_v39  ;;  %v729_v35 = vld [vmem:[#allocation2 + $0x13e0] sm:$0xff]  ;;  %v532_v36 = vld [vmem:[#allocation2 + $0xdb8] sm:$0xff]  ;;  %v531_v38 = vld [vmem:[#allocation2 + $0xdb0] sm:$0xff] }
  0x72   :  { %2755 = vmatprep.subr.mxu1 %v418_v40  ;;  %2685 = vmatpush2.msra.mxu0 %v225_v43  ;;  %v724_v37 = vld [vmem:[#allocation2 + $0x13b8] sm:$0xff]  ;;  %v723_v39 = vld [vmem:[#allocation2 + $0x13b0] sm:$0xff]  ;;  %v526_v40 = vld [vmem:[#allocation2 + $0xd88] sm:$0xff] }
  0x73   :  { %2756 = vmatpush2.msra.mxu1 %v417_v44  ;;  %2686 = vmatprep.subr.mxu0 %v220_v45  ;;  %v718_v41 = vld [vmem:[#allocation2 + $0x1388] sm:$0xff]  ;;  %v525_v43 = vld [vmem:[#allocation2 + $0xd80] sm:$0xff]  ;;  %v520_v45 = vld [vmem:[#allocation2 + $0xd58] sm:$0xff] }
  0x74   :  { %2757 = vmatprep.subr.mxu1 %v412_v46  ;;  %2687 = vmatpush2.msra.mxu0 %v219_v48  ;;  %v717_v44 = vld [vmem:[#allocation2 + $0x1380] sm:$0xff]  ;;  %v712_v46 = vld [vmem:[#allocation2 + $0x1358] sm:$0xff]  ;;  %v519_v47 = vld [vmem:[#allocation2 + $0xd50] sm:$0xff] }
  0x75   :  { %2758 = vmatpush2.msra.mxu1 %v411_v49  ;;  %2688 = vmatprep.subr.mxu0 %v214_v50  ;;  %v711_v48 = vld [vmem:[#allocation2 + $0x1350] sm:$0xff]  ;;  %v514_v49 = vld [vmem:[#allocation2 + $0xd28] sm:$0xff]  ;;  %v700_v55 = vld [vmem:[#allocation2 + $0x12f8] sm:$0xff] }
  0x76   :  { %2759 = vmatprep.subr.mxu1 %v406_v51  ;;  %2689 = vmatpush2.msra.mxu0 %v213_v53  ;;  %v706_v50 = vld [vmem:[#allocation2 + $0x1328] sm:$0xff]  ;;  %v513_v51 = vld [vmem:[#allocation2 + $0xd20] sm:$0xff] }
  0x77   :  { %2760 = vmatpush2.msra.mxu1 %v405_v54  ;;  %2690 = vmatprep.subr.mxu0 %v208_v56  ;;  %v705_v53 = vld [vmem:[#allocation2 + $0x1320] sm:$0xff]  ;;  %v508_v54 = vld [vmem:[#allocation2 + $0xcf8] sm:$0xff]  ;;  %v507_v56 = vld [vmem:[#allocation2 + $0xcf0] sm:$0xff] }
  0x78   :  { %2761 = vmatprep.subr.mxu1 %v400_v57  ;;  %2691 = vmatpush2.msra.mxu0 %v207_v58  ;;  %v699_v57 = vld [vmem:[#allocation2 + $0x12f0] sm:$0xff]  ;;  %v502_v58 = vld [vmem:[#allocation2 + $0xcc8] sm:$0xff] }
  0x79   :  { %2762 = vmatpush2.msra.mxu1 %v399_v59  ;;  %2692 = vmatprep.subr.mxu0 %v202_v60  ;;  %v694_v59 = vld [vmem:[#allocation2 + $0x12c8] sm:$0xff]  ;;  %v501_v60 = vld [vmem:[#allocation2 + $0xcc0] sm:$0xff] }
  0x7a   :  { %2763 = vmatprep.subr.mxu1 %v394_v61  ;;  %2693 = vmatpush2.msra.mxu0 %v201_v63  ;;  %v693_v61 = vld [vmem:[#allocation2 + $0x12c0] sm:$0xff]  ;;  %v496_v63 = vld [vmem:[#allocation2 + $0xc98] sm:$0xff] }
  0x7b   :  { %2764 = vmatpush2.msra.mxu1 %v393_v0  ;;  %2694 = vmatprep.subr.mxu0 %v196_v2  ;;  %v688_v0 = vld [vmem:[#allocation2 + $0x1298] sm:$0xff]  ;;  %v495_v2 = vld [vmem:[#allocation2 + $0xc90] sm:$0xff] }
  0x7c   :  { %2765 = vmatprep.subr.mxu1 %v388_v3  ;;  %2695 = vmatpush2.msra.mxu0 %v195_v4  ;;  %v687_v3 = vld [vmem:[#allocation2 + $0x1290] sm:$0xff]  ;;  %v490_v4 = vld [vmem:[#allocation2 + $0xc68] sm:$0xff] }
  0x7d   :  { %2766 = vmatpush2.msra.mxu1 %v387_v5  ;;  %2696 = vmatprep.subr.mxu0 %v190_v6  ;;  %v682_v5 = vld [vmem:[#allocation2 + $0x1268] sm:$0xff]  ;;  %v489_v6 = vld [vmem:[#allocation2 + $0xc60] sm:$0xff] }
  0x7e   :  { %2767 = vmatprep.subr.mxu1 %v382_v7  ;;  %2697 = vmatpush2.msra.mxu0 %v189_v9  ;;  %v681_v7 = vld [vmem:[#allocation2 + $0x1260] sm:$0xff]  ;;  %v484_v9 = vld [vmem:[#allocation2 + $0xc38] sm:$0xff] }
  0x7f   :  { %2698 = vmatprep.mubr.f32.mxu0 %v6149_v8  ;;  %2768 = vmatpush2.msra.mxu1 %v381_v11  ;;  %v676_v11 = vld [vmem:[#allocation2 + $0x1238] sm:$0xff] }
  0x80   :  { %2769 = vmatprep.mubr.f32.mxu1 %v6153_v10  ;;  %2699 = vmatmul.mubr.f32.vlgmr.msra.gmra.mxu0 %v6142_v62 }
  0x81   :  { %2770 = vmatmul.mubr.f32.vlgmr.msra.gmra.mxu1 %v6145_v1  ;;  %2776 = vmatprep.subr.mxu0 %v568_v12  ;;  %v483_v12 = vld [vmem:[#allocation2 + $0xc30] sm:$0xff] }
  0x82   :  { %2847 = vmatprep.subr.mxu1 %v760_v13  ;;  %2777 = vmatpush1.msra.mxu0 %v567_v14  ;;  %v675_v13 = vld [vmem:[#allocation2 + $0x1230] sm:$0xff]  ;;  %v478_v14 = vld [vmem:[#allocation2 + $0xc08] sm:$0xff] }
  0x83   :  { %2848 = vmatpush1.msra.mxu1 %v759_v15  ;;  %2778 = vmatprep.subr.mxu0 %v562_v16  ;;  %v670_v15 = vld [vmem:[#allocation2 + $0x1208] sm:$0xff]  ;;  %v477_v16 = vld [vmem:[#allocation2 + $0xc00] sm:$0xff] }
  0x84   :  { %2849 = vmatprep.subr.mxu1 %v754_v17  ;;  %2779 = vmatpush1.msra.mxu0 %v561_v18  ;;  %v669_v17 = vld [vmem:[#allocation2 + $0x1200] sm:$0xff]  ;;  %v664_v18 = vld [vmem:[#allocation2 + $0x11d8] sm:$0xff] }
  0x85   :  { %2850 = vmatpush1.msra.mxu1 %v753_v19  ;;  %2780 = vmatprep.subr.mxu0 %v556_v20  ;;  %v856_v19 = vld [vmem:[#allocation2 + $0x17d8] sm:$0xff]  ;;  %v663_v20 = vld [vmem:[#allocation2 + $0x11d0] sm:$0xff] }
  0x86   :  { %2851 = vmatprep.subr.mxu1 %v748_v21  ;;  %2781 = vmatpush1.msra.mxu0 %v555_v22  ;;  %v855_v21 = vld [vmem:[#allocation2 + $0x17d0] sm:$0xff]  ;;  %v658_v22 = vld [vmem:[#allocation2 + $0x11a8] sm:$0xff] }
  0x87   :  { %2852 = vmatpush1.msra.mxu1 %v747_v23  ;;  %2782 = vmatprep.subr.mxu0 %v550_v24  ;;  %v850_v23 = vld [vmem:[#allocation2 + $0x17a8] sm:$0xff]  ;;  %v657_v24 = vld [vmem:[#allocation2 + $0x11a0] sm:$0xff] }
  0x88   :  { %2853 = vmatprep.subr.mxu1 %v742_v25  ;;  %2783 = vmatpush1.msra.mxu0 %v549_v26  ;;  %v849_v25 = vld [vmem:[#allocation2 + $0x17a0] sm:$0xff]  ;;  %v652_v26 = vld [vmem:[#allocation2 + $0x1178] sm:$0xff] }
  0x89   :  { %2854 = vmatpush1.msra.mxu1 %v741_v27  ;;  %2784 = vmatprep.subr.mxu0 %v544_v28  ;;  %v844_v27 = vld [vmem:[#allocation2 + $0x1778] sm:$0xff]  ;;  %v651_v28 = vld [vmem:[#allocation2 + $0x1170] sm:$0xff] }
  0x8a   :  { %2855 = vmatprep.subr.mxu1 %v736_v29  ;;  %2785 = vmatpush1.msra.mxu0 %v543_v30  ;;  %v843_v29 = vld [vmem:[#allocation2 + $0x1770] sm:$0xff]  ;;  %v646_v30 = vld [vmem:[#allocation2 + $0x1148] sm:$0xff] }
  0x8b   :  { %2856 = vmatpush1.msra.mxu1 %v735_v31  ;;  %2786 = vmatprep.subr.mxu0 %v538_v32  ;;  %v838_v31 = vld [vmem:[#allocation2 + $0x1748] sm:$0xff]  ;;  %v645_v32 = vld [vmem:[#allocation2 + $0x1140] sm:$0xff] }
  0x8c   :  { %2857 = vmatprep.subr.mxu1 %v730_v33  ;;  %2787 = vmatpush1.msra.mxu0 %v537_v34  ;;  %v837_v33 = vld [vmem:[#allocation2 + $0x1740] sm:$0xff]  ;;  %v640_v34 = vld [vmem:[#allocation2 + $0x1118] sm:$0xff] }
  0x8d   :  { %2858 = vmatpush1.msra.mxu1 %v729_v35  ;;  %2788 = vmatprep.subr.mxu0 %v532_v36  ;;  %v832_v35 = vld [vmem:[#allocation2 + $0x1718] sm:$0xff]  ;;  %v639_v36 = vld [vmem:[#allocation2 + $0x1110] sm:$0xff] }
  0x8e   :  { %2859 = vmatprep.subr.mxu1 %v724_v37  ;;  %2789 = vmatpush1.msra.mxu0 %v531_v38  ;;  %v831_v37 = vld [vmem:[#allocation2 + $0x1710] sm:$0xff]  ;;  %v634_v38 = vld [vmem:[#allocation2 + $0x10e8] sm:$0xff] }
  0x8f   :  { %2860 = vmatpush1.msra.mxu1 %v723_v39  ;;  %2790 = vmatprep.subr.mxu0 %v526_v40  ;;  %v826_v39 = vld [vmem:[#allocation2 + $0x16e8] sm:$0xff]  ;;  %v633_v40 = vld [vmem:[#allocation2 + $0x10e0] sm:$0xff] }
  0x90   :  { %2861 = vmatprep.subr.mxu1 %v718_v41  ;;  %2791 = vmatpush1.msra.mxu0 %v525_v43  ;;  %v825_v41 = vld [vmem:[#allocation2 + $0x16e0] sm:$0xff]  ;;  %v628_v43 = vld [vmem:[#allocation2 + $0x10b8] sm:$0xff] }
  0x91   :  { %2862 = vmatpush1.msra.mxu1 %v717_v44  ;;  %2792 = vmatprep.subr.mxu0 %v520_v45  ;;  %v820_v44 = vld [vmem:[#allocation2 + $0x16b8] sm:$0xff]  ;;  %v627_v45 = vld [vmem:[#allocation2 + $0x10b0] sm:$0xff] }
  0x92   :  { %2863 = vmatprep.subr.mxu1 %v712_v46  ;;  %2793 = vmatpush1.msra.mxu0 %v519_v47  ;;  %v819_v46 = vld [vmem:[#allocation2 + $0x16b0] sm:$0xff]  ;;  %v622_v47 = vld [vmem:[#allocation2 + $0x1088] sm:$0xff] }
  0x93   :  { %2864 = vmatpush1.msra.mxu1 %v711_v48  ;;  %2794 = vmatprep.subr.mxu0 %v514_v49  ;;  %v814_v48 = vld [vmem:[#allocation2 + $0x1688] sm:$0xff]  ;;  %v621_v49 = vld [vmem:[#allocation2 + $0x1080] sm:$0xff] }
  0x94   :  { %2865 = vmatprep.subr.mxu1 %v706_v50  ;;  %2795 = vmatpush1.msra.mxu0 %v513_v51  ;;  %v813_v50 = vld [vmem:[#allocation2 + $0x1680] sm:$0xff]  ;;  %v616_v51 = vld [vmem:[#allocation2 + $0x1058] sm:$0xff] }
  0x95   :  { %2866 = vmatpush1.msra.mxu1 %v705_v53  ;;  %2796 = vmatprep.subr.mxu0 %v508_v54  ;;  %v808_v53 = vld [vmem:[#allocation2 + $0x1658] sm:$0xff]  ;;  %v615_v54 = vld [vmem:[#allocation2 + $0x1050] sm:$0xff] }
  0x96   :  { %2867 = vmatprep.subr.mxu1 %v700_v55  ;;  %2797 = vmatpush1.msra.mxu0 %v507_v56  ;;  %v807_v55 = vld [vmem:[#allocation2 + $0x1650] sm:$0xff]  ;;  %v610_v56 = vld [vmem:[#allocation2 + $0x1028] sm:$0xff] }
  0x97   :  { %2868 = vmatpush1.msra.mxu1 %v699_v57  ;;  %2798 = vmatprep.subr.mxu0 %v502_v58  ;;  %v802_v57 = vld [vmem:[#allocation2 + $0x1628] sm:$0xff]  ;;  %v609_v58 = vld [vmem:[#allocation2 + $0x1020] sm:$0xff] }
  0x98   :  { %2869 = vmatprep.subr.mxu1 %v694_v59  ;;  %2799 = vmatpush1.msra.mxu0 %v501_v60  ;;  %v801_v59 = vld [vmem:[#allocation2 + $0x1620] sm:$0xff]  ;;  %v604_v60 = vld [vmem:[#allocation2 + $0xff8] sm:$0xff] }
  0x99   :  { %2870 = vmatpush1.msra.mxu1 %v693_v61  ;;  %2800 = vmatprep.subr.mxu0 %v496_v63  ;;  %v796_v61 = vld [vmem:[#allocation2 + $0x15f8] sm:$0xff]  ;;  %v603_v63 = vld [vmem:[#allocation2 + $0xff0] sm:$0xff] }
  0x9a   :  { %2871 = vmatprep.subr.mxu1 %v688_v0  ;;  %2801 = vmatpush1.msra.mxu0 %v495_v2  ;;  %v795_v0 = vld [vmem:[#allocation2 + $0x15f0] sm:$0xff]  ;;  %v87_v2 = vld [vmem:[%s6436_s0 + $0x8] sm:$0xff] }
  0x9b   :  { %2872 = vmatpush1.msra.mxu1 %v687_v3  ;;  %2802 = vmatprep.subr.mxu0 %v490_v4  ;;  %v598_v3 = vld [vmem:[#allocation2 + $0xfc8] sm:$0xff] }
  0x9c   :  { %2873 = vmatprep.subr.mxu1 %v682_v5  ;;  %2803 = vmatpush1.msra.mxu0 %v489_v6  ;;  %v790_v4 = vld [vmem:[#allocation2 + $0x15c8] sm:$0xff]  ;;  %v597_v5 = vld [vmem:[#allocation2 + $0xfc0] sm:$0xff] }
  0x9d   :  { %2874 = vmatpush1.msra.mxu1 %v681_v7  ;;  %2804 = vmatprep.subr.mxu0 %v484_v9  ;;  %v789_v6 = vld [vmem:[#allocation2 + $0x15c0] sm:$0xff]  ;;  %v592_v7 = vld [vmem:[#allocation2 + $0xf98] sm:$0xff] }
  0x9e   :  { %2875 = vmatprep.subr.mxu1 %v676_v11  ;;  %2805 = vmatpush1.msra.mxu0 %v483_v12  ;;  %v784_v9 = vld [vmem:[#allocation2 + $0x1598] sm:$0xff]  ;;  %v2517_v11 = vcombine.high %v87_v2, %v87_v2  ;;  %v591_v12 = vld [vmem:[#allocation2 + $0xf90] sm:$0xff] }
  0x9f   :  { %2876 = vmatpush1.msra.mxu1 %v675_v13  ;;  %2806 = vmatprep.subr.mxu0 %v478_v14  ;;  %v783_v13 = vld [vmem:[#allocation2 + $0x1590] sm:$0xff]  ;;  %v586_v14 = vld [vmem:[#allocation2 + $0xf68] sm:$0xff] }
  0xa0   :  { %2877 = vmatprep.subr.mxu1 %v670_v15  ;;  %2807 = vmatpush1.msra.mxu0 %v477_v16  ;;  %v778_v15 = vld [vmem:[#allocation2 + $0x1568] sm:$0xff]  ;;  %v6163_v16 = vrot.slane %v87_v2, %v6139_v52  ;;  %v904_v2 = vld [vmem:[#allocation2 + $0x1958] sm:$0xff] }
  0xa1   :  { %2878 = vmatpush1.msra.mxu1 %v669_v17  ;;  %2808 = vmatprep.subr.mxu0 %v664_v18  ;;  %v585_v17 = vld [vmem:[#allocation2 + $0xf60] sm:$0xff] }
  0xa2   :  { %2879 = vmatprep.subr.mxu1 %v856_v19  ;;  %2809 = vmatpush2.msra.mxu0 %v663_v20  ;;  %v777_v18 = vld [vmem:[#allocation2 + $0x1560] sm:$0xff]  ;;  %v580_v19 = vld [vmem:[#allocation2 + $0xf38] sm:$0xff] }
  0xa3   :  { %2880 = vmatpush2.msra.mxu1 %v855_v21  ;;  %2810 = vmatprep.subr.mxu0 %v658_v22  ;;  %v772_v20 = vld [vmem:[#allocation2 + $0x1538] sm:$0xff]  ;;  %v6166_v21 = vrot.slane %v2517_v11, %v6139_v52  ;;  %v579_v22 = vld [vmem:[#allocation2 + $0xf30] sm:$0xff]  ;;  %v1089_v11 = vld [vmem:[#allocation2 + $0x1f20] sm:$0xff] }
  0xa4   :  { %2881 = vmatprep.subr.mxu1 %v850_v23  ;;  %2811 = vmatpush2.msra.mxu0 %v657_v24  ;;  %v771_v23 = vld [vmem:[#allocation2 + $0x1530] sm:$0xff]  ;;  %v574_v24 = vld [vmem:[#allocation2 + $0xf08] sm:$0xff] }
  0xa5   :  { %2882 = vmatpush2.msra.mxu1 %v849_v25  ;;  %2812 = vmatprep.subr.mxu0 %v652_v26  ;;  %v766_v25 = vld [vmem:[#allocation2 + $0x1508] sm:$0xff]  ;;  %v6170_v26 = vcombine.high %v6163_v16, %v6163_v16 }
  0xa6   :  { %2883 = vmatprep.subr.mxu1 %v844_v27  ;;  %2813 = vmatpush2.msra.mxu0 %v651_v28  ;;  %v573_v27 = vld [vmem:[#allocation2 + $0xf00] sm:$0xff] }
  0xa7   :  { %2884 = vmatpush2.msra.mxu1 %v843_v29  ;;  %2814 = vmatprep.subr.mxu0 %v646_v30  ;;  %v765_v28 = vld [vmem:[#allocation2 + $0x1500] sm:$0xff]  ;;  %v6174_v29 = vcombine.high %v6166_v21, %v6166_v21  ;;  %v952_v30 = vld [vmem:[#allocation2 + $0x1ad8] sm:$0xff] }
  0xa8   :  { %2885 = vmatprep.subr.mxu1 %v838_v31  ;;  %2815 = vmatpush2.msra.mxu0 %v645_v32  ;;  %v1144_v31 = vld [vmem:[#allocation2 + $0x20d8] sm:$0xff]  ;;  %v951_v32 = vld [vmem:[#allocation2 + $0x1ad0] sm:$0xff] }
  0xa9   :  { %2886 = vmatpush2.msra.mxu1 %v837_v33  ;;  %2816 = vmatprep.subr.mxu0 %v640_v34  ;;  %v1143_v33 = vld [vmem:[#allocation2 + $0x20d0] sm:$0xff]  ;;  %v946_v34 = vld [vmem:[#allocation2 + $0x1aa8] sm:$0xff] }
  0xaa   :  { %2887 = vmatprep.subr.mxu1 %v832_v35  ;;  %2817 = vmatpush2.msra.mxu0 %v639_v36  ;;  %v1138_v35 = vld [vmem:[#allocation2 + $0x20a8] sm:$0xff]  ;;  %v945_v36 = vld [vmem:[#allocation2 + $0x1aa0] sm:$0xff] }
  0xab   :  { %2888 = vmatpush2.msra.mxu1 %v831_v37  ;;  %2818 = vmatprep.subr.mxu0 %v634_v38  ;;  %v1137_v37 = vld [vmem:[#allocation2 + $0x20a0] sm:$0xff]  ;;  %v940_v38 = vld [vmem:[#allocation2 + $0x1a78] sm:$0xff] }
  0xac   :  { %2889 = vmatprep.subr.mxu1 %v826_v39  ;;  %2819 = vmatpush2.msra.mxu0 %v633_v40  ;;  %v1132_v39 = vld [vmem:[#allocation2 + $0x2078] sm:$0xff]  ;;  %v939_v40 = vld [vmem:[#allocation2 + $0x1a70] sm:$0xff] }
  0xad   :  { %2890 = vmatpush2.msra.mxu1 %v825_v41  ;;  %2820 = vmatprep.subr.mxu0 %v628_v43  ;;  %v1131_v41 = vld [vmem:[#allocation2 + $0x2070] sm:$0xff]  ;;  %v934_v43 = vld [vmem:[#allocation2 + $0x1a48] sm:$0xff] }
  0xae   :  { %2891 = vmatprep.subr.mxu1 %v820_v44  ;;  %2821 = vmatpush2.msra.mxu0 %v627_v45  ;;  %v1126_v44 = vld [vmem:[#allocation2 + $0x2048] sm:$0xff]  ;;  %v933_v45 = vld [vmem:[#allocation2 + $0x1a40] sm:$0xff] }
  0xaf   :  { %2892 = vmatpush2.msra.mxu1 %v819_v46  ;;  %2822 = vmatprep.subr.mxu0 %v622_v47  ;;  %v1125_v46 = vld [vmem:[#allocation2 + $0x2040] sm:$0xff]  ;;  %v928_v47 = vld [vmem:[#allocation2 + $0x1a18] sm:$0xff] }
  0xb0   :  { %2893 = vmatprep.subr.mxu1 %v814_v48  ;;  %2823 = vmatpush2.msra.mxu0 %v621_v49  ;;  %v1120_v48 = vld [vmem:[#allocation2 + $0x2018] sm:$0xff]  ;;  %v927_v49 = vld [vmem:[#allocation2 + $0x1a10] sm:$0xff] }
  0xb1   :  { %2894 = vmatpush2.msra.mxu1 %v813_v50  ;;  %2824 = vmatprep.subr.mxu0 %v616_v51  ;;  %v1119_v50 = vld [vmem:[#allocation2 + $0x2010] sm:$0xff]  ;;  %v922_v51 = vld [vmem:[#allocation2 + $0x19e8] sm:$0xff] }
  0xb2   :  { %2895 = vmatprep.subr.mxu1 %v808_v53  ;;  %2825 = vmatpush2.msra.mxu0 %v615_v54  ;;  %v1114_v53 = vld [vmem:[#allocation2 + $0x1fe8] sm:$0xff]  ;;  %v921_v54 = vld [vmem:[#allocation2 + $0x19e0] sm:$0xff] }
  0xb3   :  { %2896 = vmatpush2.msra.mxu1 %v807_v55  ;;  %2826 = vmatprep.subr.mxu0 %v610_v56  ;;  %v1113_v55 = vld [vmem:[#allocation2 + $0x1fe0] sm:$0xff]  ;;  %v916_v56 = vld [vmem:[#allocation2 + $0x19b8] sm:$0xff] }
  0xb4   :  { %2897 = vmatprep.subr.mxu1 %v802_v57  ;;  %2827 = vmatpush2.msra.mxu0 %v609_v58  ;;  %v1108_v57 = vld [vmem:[#allocation2 + $0x1fb8] sm:$0xff]  ;;  %v915_v58 = vld [vmem:[#allocation2 + $0x19b0] sm:$0xff] }
  0xb5   :  { %2898 = vmatpush2.msra.mxu1 %v801_v59  ;;  %2828 = vmatprep.subr.mxu0 %v604_v60  ;;  %v1107_v59 = vld [vmem:[#allocation2 + $0x1fb0] sm:$0xff]  ;;  %v910_v60 = vld [vmem:[#allocation2 + $0x1988] sm:$0xff] }
  0xb6   :  { %2899 = vmatprep.subr.mxu1 %v796_v61  ;;  %2829 = vmatpush2.msra.mxu0 %v603_v63  ;;  %v1102_v61 = vld [vmem:[#allocation2 + $0x1f88] sm:$0xff]  ;;  %v909_v63 = vld [vmem:[#allocation2 + $0x1980] sm:$0xff] }
  0xb7   :  { %2900 = vmatpush2.msra.mxu1 %v795_v0  ;;  %2830 = vmatprep.subr.mxu0 %v598_v3  ;;  %v1101_v0 = vld [vmem:[#allocation2 + $0x1f80] sm:$0xff]  ;;  %v1096_v3 = vld [vmem:[#allocation2 + $0x1f58] sm:$0xff] }
  0xb8   :  { %2901 = vmatprep.subr.mxu1 %v790_v4  ;;  %2831 = vmatpush2.msra.mxu0 %v597_v5  ;;  %v903_v4 = vld [vmem:[#allocation2 + $0x1950] sm:$0xff] }
  0xb9   :  { %2902 = vmatpush2.msra.mxu1 %v789_v6  ;;  %2832 = vmatprep.subr.mxu0 %v592_v7  ;;  %v1095_v5 = vld [vmem:[#allocation2 + $0x1f50] sm:$0xff]  ;;  %v898_v6 = vld [vmem:[#allocation2 + $0x1928] sm:$0xff] }
  0xba   :  { %2903 = vmatprep.subr.mxu1 %v784_v9  ;;  %2833 = vmatpush2.msra.mxu0 %v591_v12  ;;  %v1090_v7 = vld [vmem:[#allocation2 + $0x1f28] sm:$0xff]  ;;  %v897_v9 = vld [vmem:[#allocation2 + $0x1920] sm:$0xff]  ;;  %v892_v12 = vld [vmem:[#allocation2 + $0x18f8] sm:$0xff] }
  0xbb   :  { %2904 = vmatpush2.msra.mxu1 %v783_v13  ;;  %2834 = vmatprep.subr.mxu0 %v586_v14  ;;  %v1084_v13 = vld [vmem:[#allocation2 + $0x1ef8] sm:$0xff]  ;;  %v891_v14 = vld [vmem:[#allocation2 + $0x18f0] sm:$0xff] }
  0xbc   :  { %2905 = vmatprep.subr.mxu1 %v778_v15  ;;  %2835 = vmatpush2.msra.mxu0 %v585_v17  ;;  %v1083_v15 = vld [vmem:[#allocation2 + $0x1ef0] sm:$0xff]  ;;  %v886_v17 = vld [vmem:[#allocation2 + $0x18c8] sm:$0xff] }
  0xbd   :  { %2906 = vmatpush2.msra.mxu1 %v777_v18  ;;  %2836 = vmatprep.subr.mxu0 %v580_v19  ;;  %v1078_v18 = vld [vmem:[#allocation2 + $0x1ec8] sm:$0xff]  ;;  %v885_v19 = vld [vmem:[#allocation2 + $0x18c0] sm:$0xff] }
  0xbe   :  { %2907 = vmatprep.subr.mxu1 %v772_v20  ;;  %2837 = vmatpush2.msra.mxu0 %v579_v22  ;;  %v1077_v20 = vld [vmem:[#allocation2 + $0x1ec0] sm:$0xff]  ;;  %v880_v22 = vld [vmem:[#allocation2 + $0x1898] sm:$0xff] }
  0xbf   :  { %2908 = vmatpush2.msra.mxu1 %v771_v23  ;;  %2838 = vmatprep.subr.mxu0 %v574_v24  ;;  %v1072_v23 = vld [vmem:[#allocation2 + $0x1e98] sm:$0xff]  ;;  %v879_v24 = vld [vmem:[#allocation2 + $0x1890] sm:$0xff] }
  0xc0   :  { %2909 = vmatprep.subr.mxu1 %v766_v25  ;;  %2839 = vmatpush2.msra.mxu0 %v573_v27  ;;  %v1071_v25 = vld [vmem:[#allocation2 + $0x1e90] sm:$0xff]  ;;  %v874_v27 = vld [vmem:[#allocation2 + $0x1868] sm:$0xff] }
  0xc1   :  { %2840 = vmatprep.mubr.f32.mxu0 %v6170_v26  ;;  %2910 = vmatpush2.msra.mxu1 %v765_v28  ;;  %v1066_v28 = vld [vmem:[#allocation2 + $0x1e68] sm:$0xff] }
  0xc2   :  { %2841 = vmatmul.mubr.f32.vlgmr.msra.gmra.mxu0 %v6163_v16  ;;  %2911 = vmatprep.mubr.f32.mxu1 %v6174_v29 }
  0xc3   :  { %2918 = vmatprep.subr.mxu0 %v952_v30  ;;  %2989 = vmatprep.subr.mxu1 %v1144_v31  ;;  %v873_v30 = vld [vmem:[#allocation2 + $0x1860] sm:$0xff] }
  0xc4   :  { %2912 = vmatmul.mubr.f32.vlgmr.msra.gmra.mxu1 %v6166_v21  ;;  %2919 = vmatpush1.msra.mxu0 %v951_v32  ;;  %v1065_v31 = vld [vmem:[#allocation2 + $0x1e60] sm:$0xff]  ;;  %v868_v32 = vld [vmem:[#allocation2 + $0x1838] sm:$0xff] }
  0xc5   :  { %2990 = vmatpush1.msra.mxu1 %v1143_v33  ;;  %2920 = vmatprep.subr.mxu0 %v946_v34  ;;  %v1060_v33 = vld [vmem:[#allocation2 + $0x1e38] sm:$0xff]  ;;  %v867_v34 = vld [vmem:[#allocation2 + $0x1830] sm:$0xff] }
  0xc6   :  { %2991 = vmatprep.subr.mxu1 %v1138_v35  ;;  %2921 = vmatpush1.msra.mxu0 %v945_v36  ;;  %v1059_v35 = vld [vmem:[#allocation2 + $0x1e30] sm:$0xff]  ;;  %v862_v36 = vld [vmem:[#allocation2 + $0x1808] sm:$0xff] }
  0xc7   :  { %2992 = vmatpush1.msra.mxu1 %v1137_v37  ;;  %2922 = vmatprep.subr.mxu0 %v940_v38  ;;  %v1054_v37 = vld [vmem:[#allocation2 + $0x1e08] sm:$0xff]  ;;  %v861_v38 = vld [vmem:[#allocation2 + $0x1800] sm:$0xff] }
  0xc8   :  { %2993 = vmatprep.subr.mxu1 %v1132_v39  ;;  %2923 = vmatpush1.msra.mxu0 %v939_v40  ;;  %v1053_v39 = vld [vmem:[#allocation2 + $0x1e00] sm:$0xff]  ;;  %v1048_v40 = vld [vmem:[#allocation2 + $0x1dd8] sm:$0xff] }
  0xc9   :  { %2994 = vmatpush1.msra.mxu1 %v1131_v41  ;;  %2924 = vmatprep.subr.mxu0 %v934_v43  ;;  %v1240_v41 = vld [vmem:[#allocation2 + $0x23d8] sm:$0xff]  ;;  %v1047_v43 = vld [vmem:[#allocation2 + $0x1dd0] sm:$0xff] }
  0xca   :  { %2995 = vmatprep.subr.mxu1 %v1126_v44  ;;  %2925 = vmatpush1.msra.mxu0 %v933_v45  ;;  %v1239_v44 = vld [vmem:[#allocation2 + $0x23d0] sm:$0xff]  ;;  %v1042_v45 = vld [vmem:[#allocation2 + $0x1da8] sm:$0xff] }
  0xcb   :  { %2996 = vmatpush1.msra.mxu1 %v1125_v46  ;;  %2926 = vmatprep.subr.mxu0 %v928_v47  ;;  %v1234_v46 = vld [vmem:[#allocation2 + $0x23a8] sm:$0xff]  ;;  %v1041_v47 = vld [vmem:[#allocation2 + $0x1da0] sm:$0xff] }
  0xcc   :  { %2997 = vmatprep.subr.mxu1 %v1120_v48  ;;  %2927 = vmatpush1.msra.mxu0 %v927_v49  ;;  %v1233_v48 = vld [vmem:[#allocation2 + $0x23a0] sm:$0xff]  ;;  %v1036_v49 = vld [vmem:[#allocation2 + $0x1d78] sm:$0xff] }
  0xcd   :  { %2998 = vmatpush1.msra.mxu1 %v1119_v50  ;;  %2928 = vmatprep.subr.mxu0 %v922_v51  ;;  %v1228_v50 = vld [vmem:[#allocation2 + $0x2378] sm:$0xff]  ;;  %v1035_v51 = vld [vmem:[#allocation2 + $0x1d70] sm:$0xff] }
  0xce   :  { %2999 = vmatprep.subr.mxu1 %v1114_v53  ;;  %2929 = vmatpush1.msra.mxu0 %v921_v54  ;;  %v1227_v53 = vld [vmem:[#allocation2 + $0x2370] sm:$0xff]  ;;  %v1030_v54 = vld [vmem:[#allocation2 + $0x1d48] sm:$0xff] }
  0xcf   :  { %3000 = vmatpush1.msra.mxu1 %v1113_v55  ;;  %2930 = vmatprep.subr.mxu0 %v916_v56  ;;  %v1222_v55 = vld [vmem:[#allocation2 + $0x2348] sm:$0xff]  ;;  %v1029_v56 = vld [vmem:[#allocation2 + $0x1d40] sm:$0xff] }
  0xd0   :  { %3001 = vmatprep.subr.mxu1 %v1108_v57  ;;  %2931 = vmatpush1.msra.mxu0 %v915_v58  ;;  %v1221_v57 = vld [vmem:[#allocation2 + $0x2340] sm:$0xff]  ;;  %v1024_v58 = vld [vmem:[#allocation2 + $0x1d18] sm:$0xff] }
  0xd1   :  { %3002 = vmatpush1.msra.mxu1 %v1107_v59  ;;  %2932 = vmatprep.subr.mxu0 %v910_v60  ;;  %v1216_v59 = vld [vmem:[#allocation2 + $0x2318] sm:$0xff]  ;;  %v1023_v60 = vld [vmem:[#allocation2 + $0x1d10] sm:$0xff] }
  0xd2   :  { %3003 = vmatprep.subr.mxu1 %v1102_v61  ;;  %2933 = vmatpush1.msra.mxu0 %v909_v63  ;;  %v1215_v61 = vld [vmem:[#allocation2 + $0x2310] sm:$0xff]  ;;  %v1018_v63 = vld [vmem:[#allocation2 + $0x1ce8] sm:$0xff] }
  0xd3   :  { %3004 = vmatpush1.msra.mxu1 %v1101_v0  ;;  %2934 = vmatprep.subr.mxu0 %v904_v2  ;;  %v1210_v0 = vld [vmem:[#allocation2 + $0x22e8] sm:$0xff]  ;;  %v1017_v2 = vld [vmem:[#allocation2 + $0x1ce0] sm:$0xff] }
  0xd4   :  { %3005 = vmatprep.subr.mxu1 %v1096_v3  ;;  %2935 = vmatpush1.msra.mxu0 %v903_v4  ;;  %v1209_v3 = vld [vmem:[#allocation2 + $0x22e0] sm:$0xff]  ;;  %v1012_v4 = vld [vmem:[#allocation2 + $0x1cb8] sm:$0xff] }
  0xd5   :  { %3006 = vmatpush1.msra.mxu1 %v1095_v5  ;;  %2936 = vmatprep.subr.mxu0 %v898_v6  ;;  %v1204_v5 = vld [vmem:[#allocation2 + $0x22b8] sm:$0xff]  ;;  %v1011_v6 = vld [vmem:[#allocation2 + $0x1cb0] sm:$0xff] }
  0xd6   :  { %3007 = vmatprep.subr.mxu1 %v1090_v7  ;;  %2937 = vmatpush1.msra.mxu0 %v897_v9  ;;  %v1203_v7 = vld [vmem:[#allocation2 + $0x22b0] sm:$0xff]  ;;  %v1006_v9 = vld [vmem:[#allocation2 + $0x1c88] sm:$0xff] }
  0xd7   :  { %3008 = vmatpush1.msra.mxu1 %v1089_v11  ;;  %2938 = vmatprep.subr.mxu0 %v892_v12  ;;  %v1198_v11 = vld [vmem:[#allocation2 + $0x2288] sm:$0xff]  ;;  %v1005_v12 = vld [vmem:[#allocation2 + $0x1c80] sm:$0xff] }
  0xd8   :  { %3009 = vmatprep.subr.mxu1 %v1084_v13  ;;  %2939 = vmatpush1.msra.mxu0 %v891_v14  ;;  %v1197_v13 = vld [vmem:[#allocation2 + $0x2280] sm:$0xff]  ;;  %v1000_v14 = vld [vmem:[#allocation2 + $0x1c58] sm:$0xff] }
  0xd9   :  { %3010 = vmatpush1.msra.mxu1 %v1083_v15  ;;  %2940 = vmatprep.subr.mxu0 %v886_v17  ;;  %v1192_v15 = vld [vmem:[#allocation2 + $0x2258] sm:$0xff]  ;;  %v999_v17 = vld [vmem:[#allocation2 + $0x1c50] sm:$0xff] }
  0xda   :  { %3011 = vmatprep.subr.mxu1 %v1078_v18  ;;  %2941 = vmatpush1.msra.mxu0 %v885_v19  ;;  %v1191_v18 = vld [vmem:[#allocation2 + $0x2250] sm:$0xff]  ;;  %v994_v19 = vld [vmem:[#allocation2 + $0x1c28] sm:$0xff] }
  0xdb   :  { %3012 = vmatpush1.msra.mxu1 %v1077_v20  ;;  %2942 = vmatprep.subr.mxu0 %v880_v22  ;;  %v1186_v20 = vld [vmem:[#allocation2 + $0x2228] sm:$0xff]  ;;  %v993_v22 = vld [vmem:[#allocation2 + $0x1c20] sm:$0xff] }
  0xdc   :  { %3013 = vmatprep.subr.mxu1 %v1072_v23  ;;  %2943 = vmatpush1.msra.mxu0 %v879_v24  ;;  %v1185_v23 = vld [vmem:[#allocation2 + $0x2220] sm:$0xff]  ;;  %v988_v24 = vld [vmem:[#allocation2 + $0x1bf8] sm:$0xff] }
  0xdd   :  { %3014 = vmatpush1.msra.mxu1 %v1071_v25  ;;  %2944 = vmatprep.subr.mxu0 %v874_v27  ;;  %v1180_v25 = vld [vmem:[#allocation2 + $0x21f8] sm:$0xff]  ;;  %v987_v27 = vld [vmem:[#allocation2 + $0x1bf0] sm:$0xff] }
  0xde   :  { %3015 = vmatprep.subr.mxu1 %v1066_v28  ;;  %2945 = vmatpush1.msra.mxu0 %v873_v30  ;;  %v1179_v28 = vld [vmem:[#allocation2 + $0x21f0] sm:$0xff] }
  0xdf   :  { %3016 = vmatpush1.msra.mxu1 %v1065_v31  ;;  %2946 = vmatprep.subr.mxu0 %v868_v32  ;;  %v88_v30 = vld [vmem:[%s6436_s0 + $0x10] sm:$0xff]  ;;  %v982_v31 = vld [vmem:[#allocation2 + $0x1bc8] sm:$0xff] }
  0xe0   :  { %3017 = vmatprep.subr.mxu1 %v1060_v33  ;;  %2947 = vmatpush1.msra.mxu0 %v867_v34  ;;  %v1174_v32 = vld [vmem:[#allocation2 + $0x21c8] sm:$0xff]  ;;  %v981_v33 = vld [vmem:[#allocation2 + $0x1bc0] sm:$0xff] }
  0xe1   :  { %3018 = vmatpush1.msra.mxu1 %v1059_v35  ;;  %2948 = vmatprep.subr.mxu0 %v862_v36  ;;  %v1173_v34 = vld [vmem:[#allocation2 + $0x21c0] sm:$0xff]  ;;  %v976_v35 = vld [vmem:[#allocation2 + $0x1b98] sm:$0xff] }
  0xe2   :  { %3019 = vmatprep.subr.mxu1 %v1054_v37  ;;  %2949 = vmatpush1.msra.mxu0 %v861_v38  ;;  %v1168_v36 = vld [vmem:[#allocation2 + $0x2198] sm:$0xff]  ;;  %v2534_v37 = vcombine.high %v88_v30, %v88_v30  ;;  %v975_v38 = vld [vmem:[#allocation2 + $0x1b90] sm:$0xff] }
  0xe3   :  { %3020 = vmatpush1.msra.mxu1 %v1053_v39  ;;  %2950 = vmatprep.subr.mxu0 %v1048_v40  ;;  %v1167_v39 = vld [vmem:[#allocation2 + $0x2190] sm:$0xff]  ;;  %v970_v40 = vld [vmem:[#allocation2 + $0x1b68] sm:$0xff] }
  0xe4   :  { %3021 = vmatprep.subr.mxu1 %v1240_v41  ;;  %2951 = vmatpush2.msra.mxu0 %v1047_v43  ;;  %v1162_v41 = vld [vmem:[#allocation2 + $0x2168] sm:$0xff]  ;;  %v6184_v43 = vrot.slane %v88_v30, %v6139_v52 }
  0xe5   :  { %3022 = vmatpush2.msra.mxu1 %v1239_v44  ;;  %2952 = vmatprep.subr.mxu0 %v1042_v45  ;;  %v969_v44 = vld [vmem:[#allocation2 + $0x1b60] sm:$0xff]  ;;  %v1294_v30 = vld [vmem:[#allocation2 + $0x2588] sm:$0xff] }
  0xe6   :  { %3023 = vmatprep.subr.mxu1 %v1234_v46  ;;  %2953 = vmatpush2.msra.mxu0 %v1041_v47  ;;  %v1161_v45 = vld [vmem:[#allocation2 + $0x2160] sm:$0xff]  ;;  %v964_v46 = vld [vmem:[#allocation2 + $0x1b38] sm:$0xff] }
  0xe7   :  { %3024 = vmatpush2.msra.mxu1 %v1233_v48  ;;  %2954 = vmatprep.subr.mxu0 %v1036_v49  ;;  %v1156_v47 = vld [vmem:[#allocation2 + $0x2138] sm:$0xff]  ;;  %v6187_v48 = vrot.slane %v2534_v37, %v6139_v52  ;;  %v963_v49 = vld [vmem:[#allocation2 + $0x1b30] sm:$0xff] }
  0xe8   :  { %3025 = vmatprep.subr.mxu1 %v1228_v50  ;;  %2955 = vmatpush2.msra.mxu0 %v1035_v51  ;;  %v1155_v50 = vld [vmem:[#allocation2 + $0x2130] sm:$0xff]  ;;  %v958_v51 = vld [vmem:[#allocation2 + $0x1b08] sm:$0xff] }
  0xe9   :  { %3026 = vmatpush2.msra.mxu1 %v1227_v53  ;;  %2956 = vmatprep.subr.mxu0 %v1030_v54  ;;  %v1150_v53 = vld [vmem:[#allocation2 + $0x2108] sm:$0xff]  ;;  %v6191_v54 = vcombine.high %v6184_v43, %v6184_v43  ;;  %v1479_v37 = vld [vmem:[#allocation2 + $0x2b50] sm:$0xff] }
  0xea   :  { %3027 = vmatprep.subr.mxu1 %v1222_v55  ;;  %2957 = vmatpush2.msra.mxu0 %v1029_v56  ;;  %v957_v55 = vld [vmem:[#allocation2 + $0x1b00] sm:$0xff] }
  0xeb   :  { %3028 = vmatpush2.msra.mxu1 %v1221_v57  ;;  %2958 = vmatprep.subr.mxu0 %v1024_v58  ;;  %v1149_v56 = vld [vmem:[#allocation2 + $0x2100] sm:$0xff]  ;;  %v6195_v57 = vcombine.high %v6187_v48, %v6187_v48  ;;  %v1336_v58 = vld [vmem:[#allocation2 + $0x26d8] sm:$0xff] }
  0xec   :  { %3029 = vmatprep.subr.mxu1 %v1216_v59  ;;  %2959 = vmatpush2.msra.mxu0 %v1023_v60  ;;  %v1528_v59 = vld [vmem:[#allocation2 + $0x2cd8] sm:$0xff]  ;;  %v1335_v60 = vld [vmem:[#allocation2 + $0x26d0] sm:$0xff] }
  0xed   :  { %3030 = vmatpush2.msra.mxu1 %v1215_v61  ;;  %2960 = vmatprep.subr.mxu0 %v1018_v63  ;;  %v1527_v61 = vld [vmem:[#allocation2 + $0x2cd0] sm:$0xff]  ;;  %v1330_v63 = vld [vmem:[#allocation2 + $0x26a8] sm:$0xff] }
  0xee   :  { %3031 = vmatprep.subr.mxu1 %v1210_v0  ;;  %2961 = vmatpush2.msra.mxu0 %v1017_v2  ;;  %v1522_v0 = vld [vmem:[#allocation2 + $0x2ca8] sm:$0xff]  ;;  %v1329_v2 = vld [vmem:[#allocation2 + $0x26a0] sm:$0xff] }
  0xef   :  { %3032 = vmatpush2.msra.mxu1 %v1209_v3  ;;  %2962 = vmatprep.subr.mxu0 %v1012_v4  ;;  %v1521_v3 = vld [vmem:[#allocation2 + $0x2ca0] sm:$0xff]  ;;  %v1324_v4 = vld [vmem:[#allocation2 + $0x2678] sm:$0xff] }
  0xf0   :  { %3033 = vmatprep.subr.mxu1 %v1204_v5  ;;  %2963 = vmatpush2.msra.mxu0 %v1011_v6  ;;  %v1516_v5 = vld [vmem:[#allocation2 + $0x2c78] sm:$0xff]  ;;  %v1323_v6 = vld [vmem:[#allocation2 + $0x2670] sm:$0xff] }
  0xf1   :  { %3034 = vmatpush2.msra.mxu1 %v1203_v7  ;;  %2964 = vmatprep.subr.mxu0 %v1006_v9  ;;  %v1515_v7 = vld [vmem:[#allocation2 + $0x2c70] sm:$0xff]  ;;  %v1318_v9 = vld [vmem:[#allocation2 + $0x2648] sm:$0xff] }
  0xf2   :  { %3035 = vmatprep.subr.mxu1 %v1198_v11  ;;  %2965 = vmatpush2.msra.mxu0 %v1005_v12  ;;  %v1510_v11 = vld [vmem:[#allocation2 + $0x2c48] sm:$0xff]  ;;  %v1317_v12 = vld [vmem:[#allocation2 + $0x2640] sm:$0xff] }
  0xf3   :  { %3036 = vmatpush2.msra.mxu1 %v1197_v13  ;;  %2966 = vmatprep.subr.mxu0 %v1000_v14  ;;  %v1509_v13 = vld [vmem:[#allocation2 + $0x2c40] sm:$0xff]  ;;  %v1312_v14 = vld [vmem:[#allocation2 + $0x2618] sm:$0xff] }
  0xf4   :  { %3037 = vmatprep.subr.mxu1 %v1192_v15  ;;  %2967 = vmatpush2.msra.mxu0 %v999_v17  ;;  %v1504_v15 = vld [vmem:[#allocation2 + $0x2c18] sm:$0xff]  ;;  %v1311_v17 = vld [vmem:[#allocation2 + $0x2610] sm:$0xff] }
  0xf5   :  { %3038 = vmatpush2.msra.mxu1 %v1191_v18  ;;  %2968 = vmatprep.subr.mxu0 %v994_v19  ;;  %v1503_v18 = vld [vmem:[#allocation2 + $0x2c10] sm:$0xff]  ;;  %v1306_v19 = vld [vmem:[#allocation2 + $0x25e8] sm:$0xff] }
  0xf6   :  { %3039 = vmatprep.subr.mxu1 %v1186_v20  ;;  %2969 = vmatpush2.msra.mxu0 %v993_v22  ;;  %v1498_v20 = vld [vmem:[#allocation2 + $0x2be8] sm:$0xff]  ;;  %v1305_v22 = vld [vmem:[#allocation2 + $0x25e0] sm:$0xff] }
  0xf7   :  { %3040 = vmatpush2.msra.mxu1 %v1185_v23  ;;  %2970 = vmatprep.subr.mxu0 %v988_v24  ;;  %v1497_v23 = vld [vmem:[#allocation2 + $0x2be0] sm:$0xff]  ;;  %v1300_v24 = vld [vmem:[#allocation2 + $0x25b8] sm:$0xff] }
  0xf8   :  { %3041 = vmatprep.subr.mxu1 %v1180_v25  ;;  %2971 = vmatpush2.msra.mxu0 %v987_v27  ;;  %v1492_v25 = vld [vmem:[#allocation2 + $0x2bb8] sm:$0xff]  ;;  %v1299_v27 = vld [vmem:[#allocation2 + $0x25b0] sm:$0xff] }
  0xf9   :  { %3042 = vmatpush2.msra.mxu1 %v1179_v28  ;;  %2972 = vmatprep.subr.mxu0 %v982_v31  ;;  %v1491_v28 = vld [vmem:[#allocation2 + $0x2bb0] sm:$0xff]  ;;  %v1486_v31 = vld [vmem:[#allocation2 + $0x2b88] sm:$0xff] }
  0xfa   :  { %3043 = vmatprep.subr.mxu1 %v1174_v32  ;;  %2973 = vmatpush2.msra.mxu0 %v981_v33  ;;  %v1293_v32 = vld [vmem:[#allocation2 + $0x2580] sm:$0xff] }
  0xfb   :  { %3044 = vmatpush2.msra.mxu1 %v1173_v34  ;;  %2974 = vmatprep.subr.mxu0 %v976_v35  ;;  %v1485_v33 = vld [vmem:[#allocation2 + $0x2b80] sm:$0xff]  ;;  %v1288_v34 = vld [vmem:[#allocation2 + $0x2558] sm:$0xff] }
  0xfc   :  { %3045 = vmatprep.subr.mxu1 %v1168_v36  ;;  %2975 = vmatpush2.msra.mxu0 %v975_v38  ;;  %v1480_v35 = vld [vmem:[#allocation2 + $0x2b58] sm:$0xff]  ;;  %v1287_v36 = vld [vmem:[#allocation2 + $0x2550] sm:$0xff]  ;;  %v1282_v38 = vld [vmem:[#allocation2 + $0x2528] sm:$0xff] }
  0xfd   :  { %3046 = vmatpush2.msra.mxu1 %v1167_v39  ;;  %2976 = vmatprep.subr.mxu0 %v970_v40  ;;  %v1474_v39 = vld [vmem:[#allocation2 + $0x2b28] sm:$0xff]  ;;  %v1281_v40 = vld [vmem:[#allocation2 + $0x2520] sm:$0xff] }
  0xfe   :  { %3047 = vmatprep.subr.mxu1 %v1162_v41  ;;  %2977 = vmatpush2.msra.mxu0 %v969_v44  ;;  %v1473_v41 = vld [vmem:[#allocation2 + $0x2b20] sm:$0xff]  ;;  %v1276_v44 = vld [vmem:[#allocation2 + $0x24f8] sm:$0xff] }
  0xff   :  { %3048 = vmatpush2.msra.mxu1 %v1161_v45  ;;  %2978 = vmatprep.subr.mxu0 %v964_v46  ;;  %v1468_v45 = vld [vmem:[#allocation2 + $0x2af8] sm:$0xff]  ;;  %v1275_v46 = vld [vmem:[#allocation2 + $0x24f0] sm:$0xff] }
 0x100   :  { %3049 = vmatprep.subr.mxu1 %v1156_v47  ;;  %2979 = vmatpush2.msra.mxu0 %v963_v49  ;;  %v1467_v47 = vld [vmem:[#allocation2 + $0x2af0] sm:$0xff]  ;;  %v1270_v49 = vld [vmem:[#allocation2 + $0x24c8] sm:$0xff] }
 0x101   :  { %3050 = vmatpush2.msra.mxu1 %v1155_v50  ;;  %2980 = vmatprep.subr.mxu0 %v958_v51  ;;  %v1462_v50 = vld [vmem:[#allocation2 + $0x2ac8] sm:$0xff]  ;;  %v1269_v51 = vld [vmem:[#allocation2 + $0x24c0] sm:$0xff] }
 0x102   :  { %3051 = vmatprep.subr.mxu1 %v1150_v53  ;;  %2981 = vmatpush2.msra.mxu0 %v957_v55  ;;  %v1461_v53 = vld [vmem:[#allocation2 + $0x2ac0] sm:$0xff]  ;;  %v1264_v55 = vld [vmem:[#allocation2 + $0x2498] sm:$0xff] }
 0x103   :  { %2982 = vmatprep.mubr.f32.mxu0 %v6191_v54  ;;  %3052 = vmatpush2.msra.mxu1 %v1149_v56  ;;  %v1456_v56 = vld [vmem:[#allocation2 + $0x2a98] sm:$0xff] }
 0x104   :  { %2983 = vmatmul.mubr.f32.vlgmr.msra.gmra.mxu0 %v6184_v43  ;;  %3053 = vmatprep.mubr.f32.mxu1 %v6195_v57 }
 0x105   :  { %3060 = vmatprep.subr.mxu0 %v1336_v58  ;;  %3131 = vmatprep.subr.mxu1 %v1528_v59  ;;  %v1263_v58 = vld [vmem:[#allocation2 + $0x2490] sm:$0xff] }
 0x106   :  { %3054 = vmatmul.mubr.f32.vlgmr.msra.gmra.mxu1 %v6187_v48  ;;  %3061 = vmatpush1.msra.mxu0 %v1335_v60  ;;  %v1455_v59 = vld [vmem:[#allocation2 + $0x2a90] sm:$0xff]  ;;  %v1258_v60 = vld [vmem:[#allocation2 + $0x2468] sm:$0xff] }
 0x107   :  { %3132 = vmatpush1.msra.mxu1 %v1527_v61  ;;  %3062 = vmatprep.subr.mxu0 %v1330_v63  ;;  %v1450_v61 = vld [vmem:[#allocation2 + $0x2a68] sm:$0xff]  ;;  %v1257_v63 = vld [vmem:[#allocation2 + $0x2460] sm:$0xff] }
 0x108   :  { %3133 = vmatprep.subr.mxu1 %v1522_v0  ;;  %3063 = vmatpush1.msra.mxu0 %v1329_v2  ;;  %v1449_v0 = vld [vmem:[#allocation2 + $0x2a60] sm:$0xff]  ;;  %v1252_v2 = vld [vmem:[#allocation2 + $0x2438] sm:$0xff] }
 0x109   :  { %3134 = vmatpush1.msra.mxu1 %v1521_v3  ;;  %3064 = vmatprep.subr.mxu0 %v1324_v4  ;;  %v1444_v3 = vld [vmem:[#allocation2 + $0x2a38] sm:$0xff]  ;;  %v1251_v4 = vld [vmem:[#allocation2 + $0x2430] sm:$0xff] }
 0x10a   :  { %3135 = vmatprep.subr.mxu1 %v1516_v5  ;;  %3065 = vmatpush1.msra.mxu0 %v1323_v6  ;;  %v1443_v5 = vld [vmem:[#allocation2 + $0x2a30] sm:$0xff]  ;;  %v1246_v6 = vld [vmem:[#allocation2 + $0x2408] sm:$0xff] }
 0x10b   :  { %3136 = vmatpush1.msra.mxu1 %v1515_v7  ;;  %3066 = vmatprep.subr.mxu0 %v1318_v9  ;;  %v1438_v7 = vld [vmem:[#allocation2 + $0x2a08] sm:$0xff]  ;;  %v1245_v9 = vld [vmem:[#allocation2 + $0x2400] sm:$0xff] }
 0x10c   :  { %3137 = vmatprep.subr.mxu1 %v1510_v11  ;;  %3067 = vmatpush1.msra.mxu0 %v1317_v12  ;;  %v1437_v11 = vld [vmem:[#allocation2 + $0x2a00] sm:$0xff]  ;;  %v1432_v12 = vld [vmem:[#allocation2 + $0x29d8] sm:$0xff] }
 0x10d   :  { %3138 = vmatpush1.msra.mxu1 %v1509_v13  ;;  %3068 = vmatprep.subr.mxu0 %v1312_v14  ;;  %v1624_v13 = vld [vmem:[#allocation2 + $0x2fd8] sm:$0xff]  ;;  %v1431_v14 = vld [vmem:[#allocation2 + $0x29d0] sm:$0xff] }
 0x10e   :  { %3139 = vmatprep.subr.mxu1 %v1504_v15  ;;  %3069 = vmatpush1.msra.mxu0 %v1311_v17  ;;  %v1623_v15 = vld [vmem:[#allocation2 + $0x2fd0] sm:$0xff]  ;;  %v1426_v17 = vld [vmem:[#allocation2 + $0x29a8] sm:$0xff] }
 0x10f   :  { %3140 = vmatpush1.msra.mxu1 %v1503_v18  ;;  %3070 = vmatprep.subr.mxu0 %v1306_v19  ;;  %v1618_v18 = vld [vmem:[#allocation2 + $0x2fa8] sm:$0xff]  ;;  %v1425_v19 = vld [vmem:[#allocation2 + $0x29a0] sm:$0xff] }
 0x110   :  { %3141 = vmatprep.subr.mxu1 %v1498_v20  ;;  %3071 = vmatpush1.msra.mxu0 %v1305_v22  ;;  %v1617_v20 = vld [vmem:[#allocation2 + $0x2fa0] sm:$0xff]  ;;  %v1420_v22 = vld [vmem:[#allocation2 + $0x2978] sm:$0xff] }
 0x111   :  { %3142 = vmatpush1.msra.mxu1 %v1497_v23  ;;  %3072 = vmatprep.subr.mxu0 %v1300_v24  ;;  %v1612_v23 = vld [vmem:[#allocation2 + $0x2f78] sm:$0xff]  ;;  %v1419_v24 = vld [vmem:[#allocation2 + $0x2970] sm:$0xff] }
 0x112   :  { %3143 = vmatprep.subr.mxu1 %v1492_v25  ;;  %3073 = vmatpush1.msra.mxu0 %v1299_v27  ;;  %v1611_v25 = vld [vmem:[#allocation2 + $0x2f70] sm:$0xff]  ;;  %v1414_v27 = vld [vmem:[#allocation2 + $0x2948] sm:$0xff] }
 0x113   :  { %3144 = vmatpush1.msra.mxu1 %v1491_v28  ;;  %3074 = vmatprep.subr.mxu0 %v1294_v30  ;;  %v1606_v28 = vld [vmem:[#allocation2 + $0x2f48] sm:$0xff]  ;;  %v1413_v30 = vld [vmem:[#allocation2 + $0x2940] sm:$0xff] }
 0x114   :  { %3145 = vmatprep.subr.mxu1 %v1486_v31  ;;  %3075 = vmatpush1.msra.mxu0 %v1293_v32  ;;  %v1605_v31 = vld [vmem:[#allocation2 + $0x2f40] sm:$0xff]  ;;  %v1408_v32 = vld [vmem:[#allocation2 + $0x2918] sm:$0xff] }
 0x115   :  { %3146 = vmatpush1.msra.mxu1 %v1485_v33  ;;  %3076 = vmatprep.subr.mxu0 %v1288_v34  ;;  %v1600_v33 = vld [vmem:[#allocation2 + $0x2f18] sm:$0xff]  ;;  %v1407_v34 = vld [vmem:[#allocation2 + $0x2910] sm:$0xff] }
 0x116   :  { %3147 = vmatprep.subr.mxu1 %v1480_v35  ;;  %3077 = vmatpush1.msra.mxu0 %v1287_v36  ;;  %v1599_v35 = vld [vmem:[#allocation2 + $0x2f10] sm:$0xff]  ;;  %v1402_v36 = vld [vmem:[#allocation2 + $0x28e8] sm:$0xff] }
 0x117   :  { %3148 = vmatpush1.msra.mxu1 %v1479_v37  ;;  %3078 = vmatprep.subr.mxu0 %v1282_v38  ;;  %v1594_v37 = vld [vmem:[#allocation2 + $0x2ee8] sm:$0xff]  ;;  %v1401_v38 = vld [vmem:[#allocation2 + $0x28e0] sm:$0xff] }
 0x118   :  { %3149 = vmatprep.subr.mxu1 %v1474_v39  ;;  %3079 = vmatpush1.msra.mxu0 %v1281_v40  ;;  %v1593_v39 = vld [vmem:[#allocation2 + $0x2ee0] sm:$0xff]  ;;  %v1396_v40 = vld [vmem:[#allocation2 + $0x28b8] sm:$0xff] }
 0x119   :  { %3150 = vmatpush1.msra.mxu1 %v1473_v41  ;;  %3080 = vmatprep.subr.mxu0 %v1276_v44  ;;  %v1588_v41 = vld [vmem:[#allocation2 + $0x2eb8] sm:$0xff]  ;;  %v1395_v44 = vld [vmem:[#allocation2 + $0x28b0] sm:$0xff] }
 0x11a   :  { %3151 = vmatprep.subr.mxu1 %v1468_v45  ;;  %3081 = vmatpush1.msra.mxu0 %v1275_v46  ;;  %v1587_v45 = vld [vmem:[#allocation2 + $0x2eb0] sm:$0xff]  ;;  %v1390_v46 = vld [vmem:[#allocation2 + $0x2888] sm:$0xff] }
 0x11b   :  { %3152 = vmatpush1.msra.mxu1 %v1467_v47  ;;  %3082 = vmatprep.subr.mxu0 %v1270_v49  ;;  %v1582_v47 = vld [vmem:[#allocation2 + $0x2e88] sm:$0xff]  ;;  %v1389_v49 = vld [vmem:[#allocation2 + $0x2880] sm:$0xff] }
 0x11c   :  { %3153 = vmatprep.subr.mxu1 %v1462_v50  ;;  %3083 = vmatpush1.msra.mxu0 %v1269_v51  ;;  %v1581_v50 = vld [vmem:[#allocation2 + $0x2e80] sm:$0xff]  ;;  %v1384_v51 = vld [vmem:[#allocation2 + $0x2858] sm:$0xff] }
 0x11d   :  { %3154 = vmatpush1.msra.mxu1 %v1461_v53  ;;  %3084 = vmatprep.subr.mxu0 %v1264_v55  ;;  %v1576_v53 = vld [vmem:[#allocation2 + $0x2e58] sm:$0xff]  ;;  %v1383_v55 = vld [vmem:[#allocation2 + $0x2850] sm:$0xff] }
 0x11e   :  { %3155 = vmatprep.subr.mxu1 %v1456_v56  ;;  %3085 = vmatpush1.msra.mxu0 %v1263_v58  ;;  %v1575_v56 = vld [vmem:[#allocation2 + $0x2e50] sm:$0xff]  ;;  %v1378_v58 = vld [vmem:[#allocation2 + $0x2828] sm:$0xff] }
 0x11f   :  { %3156 = vmatpush1.msra.mxu1 %v1455_v59  ;;  %3086 = vmatprep.subr.mxu0 %v1258_v60  ;;  %v1570_v59 = vld [vmem:[#allocation2 + $0x2e28] sm:$0xff]  ;;  %v1377_v60 = vld [vmem:[#allocation2 + $0x2820] sm:$0xff] }
 0x120   :  { %3157 = vmatprep.subr.mxu1 %v1450_v61  ;;  %3087 = vmatpush1.msra.mxu0 %v1257_v63  ;;  %v1569_v61 = vld [vmem:[#allocation2 + $0x2e20] sm:$0xff]  ;;  %v1372_v63 = vld [vmem:[#allocation2 + $0x27f8] sm:$0xff] }
 0x121   :  { %3158 = vmatpush1.msra.mxu1 %v1449_v0  ;;  %3088 = vmatprep.subr.mxu0 %v1252_v2  ;;  %v1564_v0 = vld [vmem:[#allocation2 + $0x2df8] sm:$0xff]  ;;  %v1371_v2 = vld [vmem:[#allocation2 + $0x27f0] sm:$0xff] }
 0x122   :  { %3159 = vmatprep.subr.mxu1 %v1444_v3  ;;  %3089 = vmatpush1.msra.mxu0 %v1251_v4  ;;  %v1563_v3 = vld [vmem:[#allocation2 + $0x2df0] sm:$0xff]  ;;  %v89_v4 = vld [vmem:[%s6436_s0 + $0x18] sm:$0xff] }
 0x123   :  { %3160 = vmatpush1.msra.mxu1 %v1443_v5  ;;  %3090 = vmatprep.subr.mxu0 %v1246_v6  ;;  %v1366_v5 = vld [vmem:[#allocation2 + $0x27c8] sm:$0xff] }
 0x124   :  { %3161 = vmatprep.subr.mxu1 %v1438_v7  ;;  %3091 = vmatpush1.msra.mxu0 %v1245_v9  ;;  %v1558_v6 = vld [vmem:[#allocation2 + $0x2dc8] sm:$0xff]  ;;  %v1365_v7 = vld [vmem:[#allocation2 + $0x27c0] sm:$0xff] }
 0x125   :  { %3162 = vmatpush1.msra.mxu1 %v1437_v11  ;;  %3092 = vmatprep.subr.mxu0 %v1432_v12  ;;  %v1557_v9 = vld [vmem:[#allocation2 + $0x2dc0] sm:$0xff]  ;;  %v1360_v11 = vld [vmem:[#allocation2 + $0x2798] sm:$0xff] }
 0x126   :  { %3163 = vmatprep.subr.mxu1 %v1624_v13  ;;  %3093 = vmatpush2.msra.mxu0 %v1431_v14  ;;  %v1552_v12 = vld [vmem:[#allocation2 + $0x2d98] sm:$0xff]  ;;  %v2551_v13 = vcombine.high %v89_v4, %v89_v4  ;;  %v1359_v14 = vld [vmem:[#allocation2 + $0x2790] sm:$0xff] }
 0x127   :  { %3164 = vmatpush2.msra.mxu1 %v1623_v15  ;;  %3094 = vmatprep.subr.mxu0 %v1426_v17  ;;  %v1551_v15 = vld [vmem:[#allocation2 + $0x2d90] sm:$0xff]  ;;  %v1354_v17 = vld [vmem:[#allocation2 + $0x2768] sm:$0xff] }
 0x128   :  { %3165 = vmatprep.subr.mxu1 %v1618_v18  ;;  %3095 = vmatpush2.msra.mxu0 %v1425_v19  ;;  %v1546_v18 = vld [vmem:[#allocation2 + $0x2d68] sm:$0xff]  ;;  %v6205_v19 = vrot.slane %v89_v4, %v6139_v52  ;;  %v1684_v4 = vld [vmem:[#allocation2 + $0x31b8] sm:$0xff] }
 0x129   :  { %3166 = vmatpush2.msra.mxu1 %v1617_v20  ;;  %3096 = vmatprep.subr.mxu0 %v1420_v22  ;;  %v1353_v20 = vld [vmem:[#allocation2 + $0x2760] sm:$0xff] }
 0x12a   :  { %3167 = vmatprep.subr.mxu1 %v1612_v23  ;;  %3097 = vmatpush2.msra.mxu0 %v1419_v24  ;;  %v1545_v22 = vld [vmem:[#allocation2 + $0x2d60] sm:$0xff]  ;;  %v1348_v23 = vld [vmem:[#allocation2 + $0x2738] sm:$0xff] }
 0x12b   :  { %3168 = vmatpush2.msra.mxu1 %v1611_v25  ;;  %3098 = vmatprep.subr.mxu0 %v1414_v27  ;;  %v1540_v24 = vld [vmem:[#allocation2 + $0x2d38] sm:$0xff]  ;;  %v6208_v25 = vrot.slane %v2551_v13, %v6139_v52  ;;  %v1347_v27 = vld [vmem:[#allocation2 + $0x2730] sm:$0xff]  ;;  %v1869_v13 = vld [vmem:[#allocation2 + $0x3780] sm:$0xff] }
 0x12c   :  { %3169 = vmatprep.subr.mxu1 %v1606_v28  ;;  %3099 = vmatpush2.msra.mxu0 %v1413_v30  ;;  %v1539_v28 = vld [vmem:[#allocation2 + $0x2d30] sm:$0xff]  ;;  %v1342_v30 = vld [vmem:[#allocation2 + $0x2708] sm:$0xff] }
 0x12d   :  { %3170 = vmatpush2.msra.mxu1 %v1605_v31  ;;  %3100 = vmatprep.subr.mxu0 %v1408_v32  ;;  %v1534_v31 = vld [vmem:[#allocation2 + $0x2d08] sm:$0xff]  ;;  %v6212_v32 = vcombine.high %v6205_v19, %v6205_v19 }
 0x12e   :  { %3171 = vmatprep.subr.mxu1 %v1600_v33  ;;  %3101 = vmatpush2.msra.mxu0 %v1407_v34  ;;  %v1341_v33 = vld [vmem:[#allocation2 + $0x2700] sm:$0xff] }
 0x12f   :  { %3172 = vmatpush2.msra.mxu1 %v1599_v35  ;;  %3102 = vmatprep.subr.mxu0 %v1402_v36  ;;  %v1533_v34 = vld [vmem:[#allocation2 + $0x2d00] sm:$0xff]  ;;  %v6216_v35 = vcombine.high %v6208_v25, %v6208_v25  ;;  %v1720_v36 = vld [vmem:[#allocation2 + $0x32d8] sm:$0xff] }
 0x130   :  { %3173 = vmatprep.subr.mxu1 %v1594_v37  ;;  %3103 = vmatpush2.msra.mxu0 %v1401_v38  ;;  %v1912_v37 = vld [vmem:[#allocation2 + $0x38d8] sm:$0xff]  ;;  %v1719_v38 = vld [vmem:[#allocation2 + $0x32d0] sm:$0xff] }
 0x131   :  { %3174 = vmatpush2.msra.mxu1 %v1593_v39  ;;  %3104 = vmatprep.subr.mxu0 %v1396_v40  ;;  %v1911_v39 = vld [vmem:[#allocation2 + $0x38d0] sm:$0xff]  ;;  %v1714_v40 = vld [vmem:[#allocation2 + $0x32a8] sm:$0xff] }
 0x132   :  { %3175 = vmatprep.subr.mxu1 %v1588_v41  ;;  %3105 = vmatpush2.msra.mxu0 %v1395_v44  ;;  %v1906_v41 = vld [vmem:[#allocation2 + $0x38a8] sm:$0xff]  ;;  %v1713_v44 = vld [vmem:[#allocation2 + $0x32a0] sm:$0xff] }
 0x133   :  { %3176 = vmatpush2.msra.mxu1 %v1587_v45  ;;  %3106 = vmatprep.subr.mxu0 %v1390_v46  ;;  %v1905_v45 = vld [vmem:[#allocation2 + $0x38a0] sm:$0xff]  ;;  %v1708_v46 = vld [vmem:[#allocation2 + $0x3278] sm:$0xff] }
 0x134   :  { %3177 = vmatprep.subr.mxu1 %v1582_v47  ;;  %3107 = vmatpush2.msra.mxu0 %v1389_v49  ;;  %v1900_v47 = vld [vmem:[#allocation2 + $0x3878] sm:$0xff]  ;;  %v1707_v49 = vld [vmem:[#allocation2 + $0x3270] sm:$0xff] }
 0x135   :  { %3178 = vmatpush2.msra.mxu1 %v1581_v50  ;;  %3108 = vmatprep.subr.mxu0 %v1384_v51  ;;  %v1899_v50 = vld [vmem:[#allocation2 + $0x3870] sm:$0xff]  ;;  %v1702_v51 = vld [vmem:[#allocation2 + $0x3248] sm:$0xff] }
 0x136   :  { %3179 = vmatprep.subr.mxu1 %v1576_v53  ;;  %3109 = vmatpush2.msra.mxu0 %v1383_v55  ;;  %v1894_v53 = vld [vmem:[#allocation2 + $0x3848] sm:$0xff]  ;;  %v1701_v55 = vld [vmem:[#allocation2 + $0x3240] sm:$0xff] }
 0x137   :  { %3180 = vmatpush2.msra.mxu1 %v1575_v56  ;;  %3110 = vmatprep.subr.mxu0 %v1378_v58  ;;  %v1893_v56 = vld [vmem:[#allocation2 + $0x3840] sm:$0xff]  ;;  %v1696_v58 = vld [vmem:[#allocation2 + $0x3218] sm:$0xff] }
 0x138   :  { %3181 = vmatprep.subr.mxu1 %v1570_v59  ;;  %3111 = vmatpush2.msra.mxu0 %v1377_v60  ;;  %v1888_v59 = vld [vmem:[#allocation2 + $0x3818] sm:$0xff]  ;;  %v1695_v60 = vld [vmem:[#allocation2 + $0x3210] sm:$0xff] }
 0x139   :  { %3182 = vmatpush2.msra.mxu1 %v1569_v61  ;;  %3112 = vmatprep.subr.mxu0 %v1372_v63  ;;  %v1887_v61 = vld [vmem:[#allocation2 + $0x3810] sm:$0xff]  ;;  %v1690_v63 = vld [vmem:[#allocation2 + $0x31e8] sm:$0xff] }
 0x13a   :  { %3183 = vmatprep.subr.mxu1 %v1564_v0  ;;  %3113 = vmatpush2.msra.mxu0 %v1371_v2  ;;  %v1882_v0 = vld [vmem:[#allocation2 + $0x37e8] sm:$0xff]  ;;  %v1689_v2 = vld [vmem:[#allocation2 + $0x31e0] sm:$0xff] }
 0x13b   :  { %3184 = vmatpush2.msra.mxu1 %v1563_v3  ;;  %3114 = vmatprep.subr.mxu0 %v1366_v5  ;;  %v1881_v3 = vld [vmem:[#allocation2 + $0x37e0] sm:$0xff]  ;;  %v1876_v5 = vld [vmem:[#allocation2 + $0x37b8] sm:$0xff] }
 0x13c   :  { %3185 = vmatprep.subr.mxu1 %v1558_v6  ;;  %3115 = vmatpush2.msra.mxu0 %v1365_v7  ;;  %v1683_v6 = vld [vmem:[#allocation2 + $0x31b0] sm:$0xff] }
 0x13d   :  { %3186 = vmatpush2.msra.mxu1 %v1557_v9  ;;  %3116 = vmatprep.subr.mxu0 %v1360_v11  ;;  %v1875_v7 = vld [vmem:[#allocation2 + $0x37b0] sm:$0xff]  ;;  %v1678_v9 = vld [vmem:[#allocation2 + $0x3188] sm:$0xff] }
 0x13e   :  { %3187 = vmatprep.subr.mxu1 %v1552_v12  ;;  %3117 = vmatpush2.msra.mxu0 %v1359_v14  ;;  %v1870_v11 = vld [vmem:[#allocation2 + $0x3788] sm:$0xff]  ;;  %v1677_v12 = vld [vmem:[#allocation2 + $0x3180] sm:$0xff]  ;;  %v1672_v14 = vld [vmem:[#allocation2 + $0x3158] sm:$0xff] }
 0x13f   :  { %3188 = vmatpush2.msra.mxu1 %v1551_v15  ;;  %3118 = vmatprep.subr.mxu0 %v1354_v17  ;;  %v1864_v15 = vld [vmem:[#allocation2 + $0x3758] sm:$0xff]  ;;  %v1671_v17 = vld [vmem:[#allocation2 + $0x3150] sm:$0xff] }
 0x140   :  { %3189 = vmatprep.subr.mxu1 %v1546_v18  ;;  %3119 = vmatpush2.msra.mxu0 %v1353_v20  ;;  %v1863_v18 = vld [vmem:[#allocation2 + $0x3750] sm:$0xff]  ;;  %v1666_v20 = vld [vmem:[#allocation2 + $0x3128] sm:$0xff] }
 0x141   :  { %3190 = vmatpush2.msra.mxu1 %v1545_v22  ;;  %3120 = vmatprep.subr.mxu0 %v1348_v23  ;;  %v1858_v22 = vld [vmem:[#allocation2 + $0x3728] sm:$0xff]  ;;  %v1665_v23 = vld [vmem:[#allocation2 + $0x3120] sm:$0xff] }
 0x142   :  { %3191 = vmatprep.subr.mxu1 %v1540_v24  ;;  %3121 = vmatpush2.msra.mxu0 %v1347_v27  ;;  %v1857_v24 = vld [vmem:[#allocation2 + $0x3720] sm:$0xff]  ;;  %v1660_v27 = vld [vmem:[#allocation2 + $0x30f8] sm:$0xff] }
 0x143   :  { %3192 = vmatpush2.msra.mxu1 %v1539_v28  ;;  %3122 = vmatprep.subr.mxu0 %v1342_v30  ;;  %v1852_v28 = vld [vmem:[#allocation2 + $0x36f8] sm:$0xff]  ;;  %v1659_v30 = vld [vmem:[#allocation2 + $0x30f0] sm:$0xff] }
 0x144   :  { %3193 = vmatprep.subr.mxu1 %v1534_v31  ;;  %3123 = vmatpush2.msra.mxu0 %v1341_v33  ;;  %v1851_v31 = vld [vmem:[#allocation2 + $0x36f0] sm:$0xff]  ;;  %v1654_v33 = vld [vmem:[#allocation2 + $0x30c8] sm:$0xff] }
 0x145   :  { %3124 = vmatprep.mubr.f32.mxu0 %v6212_v32  ;;  %3194 = vmatpush2.msra.mxu1 %v1533_v34  ;;  %v1846_v34 = vld [vmem:[#allocation2 + $0x36c8] sm:$0xff] }
 0x146   :  { %3125 = vmatmul.mubr.f32.vlgmr.msra.gmra.mxu0 %v6205_v19  ;;  %3195 = vmatprep.mubr.f32.mxu1 %v6216_v35 }
 0x147   :  { %3202 = vmatprep.subr.mxu0 %v1720_v36  ;;  %3273 = vmatprep.subr.mxu1 %v1912_v37  ;;  %v1653_v36 = vld [vmem:[#allocation2 + $0x30c0] sm:$0xff] }
 0x148   :  { %3196 = vmatmul.mubr.f32.vlgmr.msra.gmra.mxu1 %v6208_v25  ;;  %3203 = vmatpush1.msra.mxu0 %v1719_v38  ;;  %v1845_v37 = vld [vmem:[#allocation2 + $0x36c0] sm:$0xff]  ;;  %v1648_v38 = vld [vmem:[#allocation2 + $0x3098] sm:$0xff] }
 0x149   :  { %3274 = vmatpush1.msra.mxu1 %v1911_v39  ;;  %3204 = vmatprep.subr.mxu0 %v1714_v40  ;;  %v1840_v39 = vld [vmem:[#allocation2 + $0x3698] sm:$0xff]  ;;  %v1647_v40 = vld [vmem:[#allocation2 + $0x3090] sm:$0xff] }
 0x14a   :  { %3275 = vmatprep.subr.mxu1 %v1906_v41  ;;  %3205 = vmatpush1.msra.mxu0 %v1713_v44  ;;  %v1839_v41 = vld [vmem:[#allocation2 + $0x3690] sm:$0xff]  ;;  %v1642_v44 = vld [vmem:[#allocation2 + $0x3068] sm:$0xff] }
 0x14b   :  { %3276 = vmatpush1.msra.mxu1 %v1905_v45  ;;  %3206 = vmatprep.subr.mxu0 %v1708_v46  ;;  %v1834_v45 = vld [vmem:[#allocation2 + $0x3668] sm:$0xff]  ;;  %v1641_v46 = vld [vmem:[#allocation2 + $0x3060] sm:$0xff] }
 0x14c   :  { %3277 = vmatprep.subr.mxu1 %v1900_v47  ;;  %3207 = vmatpush1.msra.mxu0 %v1707_v49  ;;  %v1833_v47 = vld [vmem:[#allocation2 + $0x3660] sm:$0xff]  ;;  %v1636_v49 = vld [vmem:[#allocation2 + $0x3038] sm:$0xff] }
 0x14d   :  { %3278 = vmatpush1.msra.mxu1 %v1899_v50  ;;  %3208 = vmatprep.subr.mxu0 %v1702_v51  ;;  %v1828_v50 = vld [vmem:[#allocation2 + $0x3638] sm:$0xff]  ;;  %v1635_v51 = vld [vmem:[#allocation2 + $0x3030] sm:$0xff] }
 0x14e   :  { %3279 = vmatprep.subr.mxu1 %v1894_v53  ;;  %3209 = vmatpush1.msra.mxu0 %v1701_v55  ;;  %v1827_v53 = vld [vmem:[#allocation2 + $0x3630] sm:$0xff]  ;;  %v1630_v55 = vld [vmem:[#allocation2 + $0x3008] sm:$0xff] }
 0x14f   :  { %3280 = vmatpush1.msra.mxu1 %v1893_v56  ;;  %3210 = vmatprep.subr.mxu0 %v1696_v58  ;;  %v1822_v56 = vld [vmem:[#allocation2 + $0x3608] sm:$0xff]  ;;  %v1629_v58 = vld [vmem:[#allocation2 + $0x3000] sm:$0xff] }
 0x150   :  { %3281 = vmatprep.subr.mxu1 %v1888_v59  ;;  %3211 = vmatpush1.msra.mxu0 %v1695_v60  ;;  %v1821_v59 = vld [vmem:[#allocation2 + $0x3600] sm:$0xff]  ;;  %v1816_v60 = vld [vmem:[#allocation2 + $0x35d8] sm:$0xff] }
 0x151   :  { %3282 = vmatpush1.msra.mxu1 %v1887_v61  ;;  %3212 = vmatprep.subr.mxu0 %v1690_v63  ;;  %v2008_v61 = vld [vmem:[#allocation2 + $0x3bd8] sm:$0xff]  ;;  %v1815_v63 = vld [vmem:[#allocation2 + $0x35d0] sm:$0xff] }
 0x152   :  { %3283 = vmatprep.subr.mxu1 %v1882_v0  ;;  %3213 = vmatpush1.msra.mxu0 %v1689_v2  ;;  %v2007_v0 = vld [vmem:[#allocation2 + $0x3bd0] sm:$0xff]  ;;  %v1810_v2 = vld [vmem:[#allocation2 + $0x35a8] sm:$0xff] }
 0x153   :  { %3284 = vmatpush1.msra.mxu1 %v1881_v3  ;;  %3214 = vmatprep.subr.mxu0 %v1684_v4  ;;  %v2002_v3 = vld [vmem:[#allocation2 + $0x3ba8] sm:$0xff]  ;;  %v1809_v4 = vld [vmem:[#allocation2 + $0x35a0] sm:$0xff] }
 0x154   :  { %3285 = vmatprep.subr.mxu1 %v1876_v5  ;;  %3215 = vmatpush1.msra.mxu0 %v1683_v6  ;;  %v2001_v5 = vld [vmem:[#allocation2 + $0x3ba0] sm:$0xff]  ;;  %v1804_v6 = vld [vmem:[#allocation2 + $0x3578] sm:$0xff] }
 0x155   :  { %3286 = vmatpush1.msra.mxu1 %v1875_v7  ;;  %3216 = vmatprep.subr.mxu0 %v1678_v9  ;;  %v1996_v7 = vld [vmem:[#allocation2 + $0x3b78] sm:$0xff]  ;;  %v1803_v9 = vld [vmem:[#allocation2 + $0x3570] sm:$0xff] }
 0x156   :  { %3287 = vmatprep.subr.mxu1 %v1870_v11  ;;  %3217 = vmatpush1.msra.mxu0 %v1677_v12  ;;  %v1995_v11 = vld [vmem:[#allocation2 + $0x3b70] sm:$0xff]  ;;  %v1798_v12 = vld [vmem:[#allocation2 + $0x3548] sm:$0xff] }
 0x157   :  { %3288 = vmatpush1.msra.mxu1 %v1869_v13  ;;  %3218 = vmatprep.subr.mxu0 %v1672_v14  ;;  %v1990_v13 = vld [vmem:[#allocation2 + $0x3b48] sm:$0xff]  ;;  %v1797_v14 = vld [vmem:[#allocation2 + $0x3540] sm:$0xff] }
 0x158   :  { %3289 = vmatprep.subr.mxu1 %v1864_v15  ;;  %3219 = vmatpush1.msra.mxu0 %v1671_v17  ;;  %v1989_v15 = vld [vmem:[#allocation2 + $0x3b40] sm:$0xff]  ;;  %v1792_v17 = vld [vmem:[#allocation2 + $0x3518] sm:$0xff] }
 0x159   :  { %3290 = vmatpush1.msra.mxu1 %v1863_v18  ;;  %3220 = vmatprep.subr.mxu0 %v1666_v20  ;;  %v1984_v18 = vld [vmem:[#allocation2 + $0x3b18] sm:$0xff]  ;;  %v1791_v20 = vld [vmem:[#allocation2 + $0x3510] sm:$0xff] }
 0x15a   :  { %3291 = vmatprep.subr.mxu1 %v1858_v22  ;;  %3221 = vmatpush1.msra.mxu0 %v1665_v23  ;;  %v1983_v22 = vld [vmem:[#allocation2 + $0x3b10] sm:$0xff]  ;;  %v1786_v23 = vld [vmem:[#allocation2 + $0x34e8] sm:$0xff] }
 0x15b   :  { %3292 = vmatpush1.msra.mxu1 %v1857_v24  ;;  %3222 = vmatprep.subr.mxu0 %v1660_v27  ;;  %v1978_v24 = vld [vmem:[#allocation2 + $0x3ae8] sm:$0xff]  ;;  %v1785_v27 = vld [vmem:[#allocation2 + $0x34e0] sm:$0xff] }
 0x15c   :  { %3293 = vmatprep.subr.mxu1 %v1852_v28  ;;  %3223 = vmatpush1.msra.mxu0 %v1659_v30  ;;  %v1977_v28 = vld [vmem:[#allocation2 + $0x3ae0] sm:$0xff]  ;;  %v1780_v30 = vld [vmem:[#allocation2 + $0x34b8] sm:$0xff] }
 0x15d   :  { %3294 = vmatpush1.msra.mxu1 %v1851_v31  ;;  %3224 = vmatprep.subr.mxu0 %v1654_v33  ;;  %v1972_v31 = vld [vmem:[#allocation2 + $0x3ab8] sm:$0xff]  ;;  %v1779_v33 = vld [vmem:[#allocation2 + $0x34b0] sm:$0xff] }
 0x15e   :  { %3295 = vmatprep.subr.mxu1 %v1846_v34  ;;  %3225 = vmatpush1.msra.mxu0 %v1653_v36  ;;  %v1971_v34 = vld [vmem:[#allocation2 + $0x3ab0] sm:$0xff]  ;;  %v1774_v36 = vld [vmem:[#allocation2 + $0x3488] sm:$0xff] }
 0x15f   :  { %3296 = vmatpush1.msra.mxu1 %v1845_v37  ;;  %3226 = vmatprep.subr.mxu0 %v1648_v38  ;;  %v1966_v37 = vld [vmem:[#allocation2 + $0x3a88] sm:$0xff]  ;;  %v1773_v38 = vld [vmem:[#allocation2 + $0x3480] sm:$0xff] }
 0x160   :  { %3297 = vmatprep.subr.mxu1 %v1840_v39  ;;  %3227 = vmatpush1.msra.mxu0 %v1647_v40  ;;  %v1965_v39 = vld [vmem:[#allocation2 + $0x3a80] sm:$0xff]  ;;  %v1768_v40 = vld [vmem:[#allocation2 + $0x3458] sm:$0xff] }
 0x161   :  { %3298 = vmatpush1.msra.mxu1 %v1839_v41  ;;  %3228 = vmatprep.subr.mxu0 %v1642_v44  ;;  %v1960_v41 = vld [vmem:[#allocation2 + $0x3a58] sm:$0xff]  ;;  %v1767_v44 = vld [vmem:[#allocation2 + $0x3450] sm:$0xff] }
 0x162   :  { %3299 = vmatprep.subr.mxu1 %v1834_v45  ;;  %3229 = vmatpush1.msra.mxu0 %v1641_v46  ;;  %v1959_v45 = vld [vmem:[#allocation2 + $0x3a50] sm:$0xff]  ;;  %v1762_v46 = vld [vmem:[#allocation2 + $0x3428] sm:$0xff] }
 0x163   :  { %3300 = vmatpush1.msra.mxu1 %v1833_v47  ;;  %3230 = vmatprep.subr.mxu0 %v1636_v49  ;;  %v1954_v47 = vld [vmem:[#allocation2 + $0x3a28] sm:$0xff]  ;;  %v1761_v49 = vld [vmem:[#allocation2 + $0x3420] sm:$0xff] }
 0x164   :  { %3301 = vmatprep.subr.mxu1 %v1828_v50  ;;  %3231 = vmatpush1.msra.mxu0 %v1635_v51  ;;  %v1953_v50 = vld [vmem:[#allocation2 + $0x3a20] sm:$0xff]  ;;  %v1756_v51 = vld [vmem:[#allocation2 + $0x33f8] sm:$0xff] }
 0x165   :  { %3302 = vmatpush1.msra.mxu1 %v1827_v53  ;;  %3232 = vmatprep.subr.mxu0 %v1630_v55  ;;  %v1948_v53 = vld [vmem:[#allocation2 + $0x39f8] sm:$0xff]  ;;  %v1755_v55 = vld [vmem:[#allocation2 + $0x33f0] sm:$0xff] }
 0x166   :  { %3303 = vmatprep.subr.mxu1 %v1822_v56  ;;  %3233 = vmatpush1.msra.mxu0 %v1629_v58  ;;  %v1947_v56 = vld [vmem:[#allocation2 + $0x39f0] sm:$0xff]  ;;  %v90_v58 = vld [vmem:[%s6436_s0 + $0x20] sm:$0xff] }
 0x167   :  { %3304 = vmatpush1.msra.mxu1 %v1821_v59  ;;  %3234 = vmatprep.subr.mxu0 %v1816_v60  ;;  %v1750_v59 = vld [vmem:[#allocation2 + $0x33c8] sm:$0xff] }
 0x168   :  { %3305 = vmatprep.subr.mxu1 %v2008_v61  ;;  %3235 = vmatpush2.msra.mxu0 %v1815_v63  ;;  %v1942_v60 = vld [vmem:[#allocation2 + $0x39c8] sm:$0xff]  ;;  %v1749_v61 = vld [vmem:[#allocation2 + $0x33c0] sm:$0xff] }
 0x169   :  { %3306 = vmatpush2.msra.mxu1 %v2007_v0  ;;  %3236 = vmatprep.subr.mxu0 %v1810_v2  ;;  %v1941_v63 = vld [vmem:[#allocation2 + $0x39c0] sm:$0xff]  ;;  %v1744_v0 = vld [vmem:[#allocation2 + $0x3398] sm:$0xff] }
 0x16a   :  { %3307 = vmatprep.subr.mxu1 %v2002_v3  ;;  %3237 = vmatpush2.msra.mxu0 %v1809_v4  ;;  %v1936_v2 = vld [vmem:[#allocation2 + $0x3998] sm:$0xff]  ;;  %v2568_v3 = vcombine.high %v90_v58, %v90_v58  ;;  %v1743_v4 = vld [vmem:[#allocation2 + $0x3390] sm:$0xff] }
 0x16b   :  { %3308 = vmatpush2.msra.mxu1 %v2001_v5  ;;  %3238 = vmatprep.subr.mxu0 %v1804_v6  ;;  %v1935_v5 = vld [vmem:[#allocation2 + $0x3990] sm:$0xff]  ;;  %v1738_v6 = vld [vmem:[#allocation2 + $0x3368] sm:$0xff] }
 0x16c   :  { %3309 = vmatprep.subr.mxu1 %v1996_v7  ;;  %3239 = vmatpush2.msra.mxu0 %v1803_v9  ;;  %v1930_v7 = vld [vmem:[#allocation2 + $0x3968] sm:$0xff]  ;;  %v6226_v9 = vrot.slane %v90_v58, %v6139_v52 }
 0x16d   :  { %3310 = vmatpush2.msra.mxu1 %v1995_v11  ;;  %3240 = vmatprep.subr.mxu0 %v1798_v12  ;;  %v1737_v11 = vld [vmem:[#allocation2 + $0x3360] sm:$0xff]  ;;  %v2074_v58 = vld [vmem:[#allocation2 + $0x3de8] sm:$0xff] }
 0x16e   :  { %3311 = vmatprep.subr.mxu1 %v1990_v13  ;;  %3241 = vmatpush2.msra.mxu0 %v1797_v14  ;;  %v1929_v12 = vld [vmem:[#allocation2 + $0x3960] sm:$0xff]  ;;  %v1732_v13 = vld [vmem:[#allocation2 + $0x3338] sm:$0xff] }
 0x16f   :  { %3312 = vmatpush2.msra.mxu1 %v1989_v15  ;;  %3242 = vmatprep.subr.mxu0 %v1792_v17  ;;  %v1924_v14 = vld [vmem:[#allocation2 + $0x3938] sm:$0xff]  ;;  %v6229_v15 = vrot.slane %v2568_v3, %v6139_v52  ;;  %v1731_v17 = vld [vmem:[#allocation2 + $0x3330] sm:$0xff] }
 0x170   :  { %3313 = vmatprep.subr.mxu1 %v1984_v18  ;;  %3243 = vmatpush2.msra.mxu0 %v1791_v20  ;;  %v1923_v18 = vld [vmem:[#allocation2 + $0x3930] sm:$0xff]  ;;  %v1726_v20 = vld [vmem:[#allocation2 + $0x3308] sm:$0xff] }
 0x171   :  { %3314 = vmatpush2.msra.mxu1 %v1983_v22  ;;  %3244 = vmatprep.subr.mxu0 %v1786_v23  ;;  %v1918_v22 = vld [vmem:[#allocation2 + $0x3908] sm:$0xff]  ;;  %v6233_v23 = vcombine.high %v6226_v9, %v6226_v9  ;;  %v2259_v3 = vld [vmem:[#allocation2 + $0x43b0] sm:$0xff] }
 0x172   :  { %3315 = vmatprep.subr.mxu1 %v1978_v24  ;;  %3245 = vmatpush2.msra.mxu0 %v1785_v27  ;;  %v1725_v24 = vld [vmem:[#allocation2 + $0x3300] sm:$0xff] }
 0x173   :  { %3316 = vmatpush2.msra.mxu1 %v1977_v28  ;;  %3246 = vmatprep.subr.mxu0 %v1780_v30  ;;  %v1917_v27 = vld [vmem:[#allocation2 + $0x3900] sm:$0xff]  ;;  %v6237_v28 = vcombine.high %v6229_v15, %v6229_v15  ;;  %v2104_v30 = vld [vmem:[#allocation2 + $0x3ed8] sm:$0xff] }
 0x174   :  { %3317 = vmatprep.subr.mxu1 %v1972_v31  ;;  %3247 = vmatpush2.msra.mxu0 %v1779_v33  ;;  %v2296_v31 = vld [vmem:[#allocation2 + $0x44d8] sm:$0xff]  ;;  %v2103_v33 = vld [vmem:[#allocation2 + $0x3ed0] sm:$0xff] }
 0x175   :  { %3318 = vmatpush2.msra.mxu1 %v1971_v34  ;;  %3248 = vmatprep.subr.mxu0 %v1774_v36  ;;  %v2295_v34 = vld [vmem:[#allocation2 + $0x44d0] sm:$0xff]  ;;  %v2098_v36 = vld [vmem:[#allocation2 + $0x3ea8] sm:$0xff] }
 0x176   :  { %3319 = vmatprep.subr.mxu1 %v1966_v37  ;;  %3249 = vmatpush2.msra.mxu0 %v1773_v38  ;;  %v2290_v37 = vld [vmem:[#allocation2 + $0x44a8] sm:$0xff]  ;;  %v2097_v38 = vld [vmem:[#allocation2 + $0x3ea0] sm:$0xff] }
 0x177   :  { %3320 = vmatpush2.msra.mxu1 %v1965_v39  ;;  %3250 = vmatprep.subr.mxu0 %v1768_v40  ;;  %v2289_v39 = vld [vmem:[#allocation2 + $0x44a0] sm:$0xff]  ;;  %v2092_v40 = vld [vmem:[#allocation2 + $0x3e78] sm:$0xff] }
 0x178   :  { %3321 = vmatprep.subr.mxu1 %v1960_v41  ;;  %3251 = vmatpush2.msra.mxu0 %v1767_v44  ;;  %v2284_v41 = vld [vmem:[#allocation2 + $0x4478] sm:$0xff]  ;;  %v2091_v44 = vld [vmem:[#allocation2 + $0x3e70] sm:$0xff] }
 0x179   :  { %3322 = vmatpush2.msra.mxu1 %v1959_v45  ;;  %3252 = vmatprep.subr.mxu0 %v1762_v46  ;;  %v2283_v45 = vld [vmem:[#allocation2 + $0x4470] sm:$0xff]  ;;  %v2086_v46 = vld [vmem:[#allocation2 + $0x3e48] sm:$0xff] }
 0x17a   :  { %3323 = vmatprep.subr.mxu1 %v1954_v47  ;;  %3253 = vmatpush2.msra.mxu0 %v1761_v49  ;;  %v2278_v47 = vld [vmem:[#allocation2 + $0x4448] sm:$0xff]  ;;  %v2085_v49 = vld [vmem:[#allocation2 + $0x3e40] sm:$0xff] }
 0x17b   :  { %3324 = vmatpush2.msra.mxu1 %v1953_v50  ;;  %3254 = vmatprep.subr.mxu0 %v1756_v51  ;;  %v2277_v50 = vld [vmem:[#allocation2 + $0x4440] sm:$0xff]  ;;  %v2080_v51 = vld [vmem:[#allocation2 + $0x3e18] sm:$0xff] }
 0x17c   :  { %3325 = vmatprep.subr.mxu1 %v1948_v53  ;;  %3255 = vmatpush2.msra.mxu0 %v1755_v55  ;;  %v2272_v53 = vld [vmem:[#allocation2 + $0x4418] sm:$0xff]  ;;  %v2079_v55 = vld [vmem:[#allocation2 + $0x3e10] sm:$0xff] }
 0x17d   :  { %3326 = vmatpush2.msra.mxu1 %v1947_v56  ;;  %3256 = vmatprep.subr.mxu0 %v1750_v59  ;;  %v2271_v56 = vld [vmem:[#allocation2 + $0x4410] sm:$0xff]  ;;  %v2266_v59 = vld [vmem:[#allocation2 + $0x43e8] sm:$0xff] }
 0x17e   :  { %3327 = vmatprep.subr.mxu1 %v1942_v60  ;;  %3257 = vmatpush2.msra.mxu0 %v1749_v61  ;;  %v2073_v60 = vld [vmem:[#allocation2 + $0x3de0] sm:$0xff] }
 0x17f   :  { %3328 = vmatpush2.msra.mxu1 %v1941_v63  ;;  %3258 = vmatprep.subr.mxu0 %v1744_v0  ;;  %v2265_v61 = vld [vmem:[#allocation2 + $0x43e0] sm:$0xff]  ;;  %v2068_v63 = vld [vmem:[#allocation2 + $0x3db8] sm:$0xff] }
 0x180   :  { %3329 = vmatprep.subr.mxu1 %v1936_v2  ;;  %3259 = vmatpush2.msra.mxu0 %v1743_v4  ;;  %v2260_v0 = vld [vmem:[#allocation2 + $0x43b8] sm:$0xff]  ;;  %v2067_v2 = vld [vmem:[#allocation2 + $0x3db0] sm:$0xff]  ;;  %v2062_v4 = vld [vmem:[#allocation2 + $0x3d88] sm:$0xff] }
 0x181   :  { %3330 = vmatpush2.msra.mxu1 %v1935_v5  ;;  %3260 = vmatprep.subr.mxu0 %v1738_v6  ;;  %v2254_v5 = vld [vmem:[#allocation2 + $0x4388] sm:$0xff]  ;;  %v2061_v6 = vld [vmem:[#allocation2 + $0x3d80] sm:$0xff] }
 0x182   :  { %3331 = vmatprep.subr.mxu1 %v1930_v7  ;;  %3261 = vmatpush2.msra.mxu0 %v1737_v11  ;;  %v2253_v7 = vld [vmem:[#allocation2 + $0x4380] sm:$0xff]  ;;  %v2056_v11 = vld [vmem:[#allocation2 + $0x3d58] sm:$0xff] }
 0x183   :  { %3332 = vmatpush2.msra.mxu1 %v1929_v12  ;;  %3262 = vmatprep.subr.mxu0 %v1732_v13  ;;  %v2248_v12 = vld [vmem:[#allocation2 + $0x4358] sm:$0xff]  ;;  %v2055_v13 = vld [vmem:[#allocation2 + $0x3d50] sm:$0xff] }
 0x184   :  { %3333 = vmatprep.subr.mxu1 %v1924_v14  ;;  %3263 = vmatpush2.msra.mxu0 %v1731_v17  ;;  %v2247_v14 = vld [vmem:[#allocation2 + $0x4350] sm:$0xff]  ;;  %v2050_v17 = vld [vmem:[#allocation2 + $0x3d28] sm:$0xff] }
 0x185   :  { %3334 = vmatpush2.msra.mxu1 %v1923_v18  ;;  %3264 = vmatprep.subr.mxu0 %v1726_v20  ;;  %v2242_v18 = vld [vmem:[#allocation2 + $0x4328] sm:$0xff]  ;;  %v2049_v20 = vld [vmem:[#allocation2 + $0x3d20] sm:$0xff] }
 0x186   :  { %3335 = vmatprep.subr.mxu1 %v1918_v22  ;;  %3265 = vmatpush2.msra.mxu0 %v1725_v24  ;;  %v2241_v22 = vld [vmem:[#allocation2 + $0x4320] sm:$0xff]  ;;  %v2044_v24 = vld [vmem:[#allocation2 + $0x3cf8] sm:$0xff] }
 0x187   :  { %3266 = vmatprep.mubr.f32.mxu0 %v6233_v23  ;;  %3336 = vmatpush2.msra.mxu1 %v1917_v27  ;;  %v2236_v27 = vld [vmem:[#allocation2 + $0x42f8] sm:$0xff] }
 0x188   :  { %3267 = vmatmul.mubr.f32.vlgmr.msra.gmra.mxu0 %v6226_v9  ;;  %3337 = vmatprep.mubr.f32.mxu1 %v6237_v28 }
 0x189   :  { %3344 = vmatprep.subr.mxu0 %v2104_v30  ;;  %3415 = vmatprep.subr.mxu1 %v2296_v31  ;;  %v2043_v30 = vld [vmem:[#allocation2 + $0x3cf0] sm:$0xff] }
 0x18a   :  { %3338 = vmatmul.mubr.f32.vlgmr.msra.gmra.mxu1 %v6229_v15  ;;  %3345 = vmatpush1.msra.mxu0 %v2103_v33  ;;  %v2235_v31 = vld [vmem:[#allocation2 + $0x42f0] sm:$0xff]  ;;  %v2038_v33 = vld [vmem:[#allocation2 + $0x3cc8] sm:$0xff] }
 0x18b   :  { %3416 = vmatpush1.msra.mxu1 %v2295_v34  ;;  %3346 = vmatprep.subr.mxu0 %v2098_v36  ;;  %v2230_v34 = vld [vmem:[#allocation2 + $0x42c8] sm:$0xff]  ;;  %v2037_v36 = vld [vmem:[#allocation2 + $0x3cc0] sm:$0xff] }
 0x18c   :  { %3417 = vmatprep.subr.mxu1 %v2290_v37  ;;  %3347 = vmatpush1.msra.mxu0 %v2097_v38  ;;  %v2229_v37 = vld [vmem:[#allocation2 + $0x42c0] sm:$0xff]  ;;  %v2032_v38 = vld [vmem:[#allocation2 + $0x3c98] sm:$0xff] }
 0x18d   :  { %3418 = vmatpush1.msra.mxu1 %v2289_v39  ;;  %3348 = vmatprep.subr.mxu0 %v2092_v40  ;;  %v2224_v39 = vld [vmem:[#allocation2 + $0x4298] sm:$0xff]  ;;  %v2031_v40 = vld [vmem:[#allocation2 + $0x3c90] sm:$0xff] }
 0x18e   :  { %3419 = vmatprep.subr.mxu1 %v2284_v41  ;;  %3349 = vmatpush1.msra.mxu0 %v2091_v44  ;;  %v2223_v41 = vld [vmem:[#allocation2 + $0x4290] sm:$0xff]  ;;  %v2026_v44 = vld [vmem:[#allocation2 + $0x3c68] sm:$0xff] }
 0x18f   :  { %3420 = vmatpush1.msra.mxu1 %v2283_v45  ;;  %3350 = vmatprep.subr.mxu0 %v2086_v46  ;;  %v2218_v45 = vld [vmem:[#allocation2 + $0x4268] sm:$0xff]  ;;  %v2025_v46 = vld [vmem:[#allocation2 + $0x3c60] sm:$0xff] }
 0x190   :  { %3421 = vmatprep.subr.mxu1 %v2278_v47  ;;  %3351 = vmatpush1.msra.mxu0 %v2085_v49  ;;  %v2217_v47 = vld [vmem:[#allocation2 + $0x4260] sm:$0xff]  ;;  %v2020_v49 = vld [vmem:[#allocation2 + $0x3c38] sm:$0xff] }
 0x191   :  { %3422 = vmatpush1.msra.mxu1 %v2277_v50  ;;  %3352 = vmatprep.subr.mxu0 %v2080_v51  ;;  %v2212_v50 = vld [vmem:[#allocation2 + $0x4238] sm:$0xff]  ;;  %v2019_v51 = vld [vmem:[#allocation2 + $0x3c30] sm:$0xff] }
 0x192   :  { %3423 = vmatprep.subr.mxu1 %v2272_v53  ;;  %3353 = vmatpush1.msra.mxu0 %v2079_v55  ;;  %v2211_v53 = vld [vmem:[#allocation2 + $0x4230] sm:$0xff]  ;;  %v2014_v55 = vld [vmem:[#allocation2 + $0x3c08] sm:$0xff] }
 0x193   :  { %3424 = vmatpush1.msra.mxu1 %v2271_v56  ;;  %3354 = vmatprep.subr.mxu0 %v2074_v58  ;;  %v2206_v56 = vld [vmem:[#allocation2 + $0x4208] sm:$0xff]  ;;  %v2013_v58 = vld [vmem:[#allocation2 + $0x3c00] sm:$0xff] }
 0x194   :  { %3425 = vmatprep.subr.mxu1 %v2266_v59  ;;  %3355 = vmatpush1.msra.mxu0 %v2073_v60  ;;  %v2205_v59 = vld [vmem:[#allocation2 + $0x4200] sm:$0xff]  ;;  %v2200_v60 = vld [vmem:[#allocation2 + $0x41d8] sm:$0xff] }
 0x195   :  { %3426 = vmatpush1.msra.mxu1 %v2265_v61  ;;  %3356 = vmatprep.subr.mxu0 %v2068_v63  ;;  %v2392_v61 = vld [vmem:[#allocation2 + $0x47d8] sm:$0xff]  ;;  %v2199_v63 = vld [vmem:[#allocation2 + $0x41d0] sm:$0xff] }
 0x196   :  { %3427 = vmatprep.subr.mxu1 %v2260_v0  ;;  %3357 = vmatpush1.msra.mxu0 %v2067_v2  ;;  %v2391_v0 = vld [vmem:[#allocation2 + $0x47d0] sm:$0xff]  ;;  %v2194_v2 = vld [vmem:[#allocation2 + $0x41a8] sm:$0xff] }
 0x197   :  { %3428 = vmatpush1.msra.mxu1 %v2259_v3  ;;  %3358 = vmatprep.subr.mxu0 %v2062_v4  ;;  %v2386_v3 = vld [vmem:[#allocation2 + $0x47a8] sm:$0xff]  ;;  %v2193_v4 = vld [vmem:[#allocation2 + $0x41a0] sm:$0xff] }
 0x198   :  { %3429 = vmatprep.subr.mxu1 %v2254_v5  ;;  %3359 = vmatpush1.msra.mxu0 %v2061_v6  ;;  %v2385_v5 = vld [vmem:[#allocation2 + $0x47a0] sm:$0xff]  ;;  %v2188_v6 = vld [vmem:[#allocation2 + $0x4178] sm:$0xff] }
 0x199   :  { %3430 = vmatpush1.msra.mxu1 %v2253_v7  ;;  %3360 = vmatprep.subr.mxu0 %v2056_v11  ;;  %v2380_v7 = vld [vmem:[#allocation2 + $0x4778] sm:$0xff]  ;;  %v2187_v11 = vld [vmem:[#allocation2 + $0x4170] sm:$0xff] }
 0x19a   :  { %3431 = vmatprep.subr.mxu1 %v2248_v12  ;;  %3361 = vmatpush1.msra.mxu0 %v2055_v13  ;;  %v2379_v12 = vld [vmem:[#allocation2 + $0x4770] sm:$0xff]  ;;  %v2182_v13 = vld [vmem:[#allocation2 + $0x4148] sm:$0xff] }
 0x19b   :  { %3432 = vmatpush1.msra.mxu1 %v2247_v14  ;;  %3362 = vmatprep.subr.mxu0 %v2050_v17  ;;  %v2374_v14 = vld [vmem:[#allocation2 + $0x4748] sm:$0xff]  ;;  %v2181_v17 = vld [vmem:[#allocation2 + $0x4140] sm:$0xff] }
 0x19c   :  { %3433 = vmatprep.subr.mxu1 %v2242_v18  ;;  %3363 = vmatpush1.msra.mxu0 %v2049_v20  ;;  %v2373_v18 = vld [vmem:[#allocation2 + $0x4740] sm:$0xff]  ;;  %v2176_v20 = vld [vmem:[#allocation2 + $0x4118] sm:$0xff] }
 0x19d   :  { %3434 = vmatpush1.msra.mxu1 %v2241_v22  ;;  %3364 = vmatprep.subr.mxu0 %v2044_v24  ;;  %v2368_v22 = vld [vmem:[#allocation2 + $0x4718] sm:$0xff]  ;;  %v2175_v24 = vld [vmem:[#allocation2 + $0x4110] sm:$0xff] }
 0x19e   :  { %3435 = vmatprep.subr.mxu1 %v2236_v27  ;;  %3365 = vmatpush1.msra.mxu0 %v2043_v30  ;;  %v2367_v27 = vld [vmem:[#allocation2 + $0x4710] sm:$0xff]  ;;  %v2170_v30 = vld [vmem:[#allocation2 + $0x40e8] sm:$0xff] }
 0x19f   :  { %3436 = vmatpush1.msra.mxu1 %v2235_v31  ;;  %3366 = vmatprep.subr.mxu0 %v2038_v33  ;;  %v2362_v31 = vld [vmem:[#allocation2 + $0x46e8] sm:$0xff]  ;;  %v2169_v33 = vld [vmem:[#allocation2 + $0x40e0] sm:$0xff] }
 0x1a0   :  { %3437 = vmatprep.subr.mxu1 %v2230_v34  ;;  %3367 = vmatpush1.msra.mxu0 %v2037_v36  ;;  %v2361_v34 = vld [vmem:[#allocation2 + $0x46e0] sm:$0xff]  ;;  %v2164_v36 = vld [vmem:[#allocation2 + $0x40b8] sm:$0xff] }
 0x1a1   :  { %3438 = vmatpush1.msra.mxu1 %v2229_v37  ;;  %3368 = vmatprep.subr.mxu0 %v2032_v38  ;;  %v2356_v37 = vld [vmem:[#allocation2 + $0x46b8] sm:$0xff]  ;;  %v2163_v38 = vld [vmem:[#allocation2 + $0x40b0] sm:$0xff] }
 0x1a2   :  { %3439 = vmatprep.subr.mxu1 %v2224_v39  ;;  %3369 = vmatpush1.msra.mxu0 %v2031_v40  ;;  %v2355_v39 = vld [vmem:[#allocation2 + $0x46b0] sm:$0xff]  ;;  %v2158_v40 = vld [vmem:[#allocation2 + $0x4088] sm:$0xff] }
 0x1a3   :  { %3440 = vmatpush1.msra.mxu1 %v2223_v41  ;;  %3370 = vmatprep.subr.mxu0 %v2026_v44  ;;  %v2350_v41 = vld [vmem:[#allocation2 + $0x4688] sm:$0xff]  ;;  %v2157_v44 = vld [vmem:[#allocation2 + $0x4080] sm:$0xff] }
 0x1a4   :  { %3441 = vmatprep.subr.mxu1 %v2218_v45  ;;  %3371 = vmatpush1.msra.mxu0 %v2025_v46  ;;  %v2349_v45 = vld [vmem:[#allocation2 + $0x4680] sm:$0xff]  ;;  %v2152_v46 = vld [vmem:[#allocation2 + $0x4058] sm:$0xff] }
 0x1a5   :  { %3442 = vmatpush1.msra.mxu1 %v2217_v47  ;;  %3372 = vmatprep.subr.mxu0 %v2020_v49  ;;  %v2344_v47 = vld [vmem:[#allocation2 + $0x4658] sm:$0xff]  ;;  %v2151_v49 = vld [vmem:[#allocation2 + $0x4050] sm:$0xff] }
 0x1a6   :  { %3443 = vmatprep.subr.mxu1 %v2212_v50  ;;  %3373 = vmatpush1.msra.mxu0 %v2019_v51  ;;  %v2343_v50 = vld [vmem:[#allocation2 + $0x4650] sm:$0xff]  ;;  %v2146_v51 = vld [vmem:[#allocation2 + $0x4028] sm:$0xff] }
 0x1a7   :  { %3444 = vmatpush1.msra.mxu1 %v2211_v53  ;;  %3374 = vmatprep.subr.mxu0 %v2014_v55  ;;  %v2338_v53 = vld [vmem:[#allocation2 + $0x4628] sm:$0xff]  ;;  %v2145_v55 = vld [vmem:[#allocation2 + $0x4020] sm:$0xff] }
 0x1a8   :  { %3445 = vmatprep.subr.mxu1 %v2206_v56  ;;  %3375 = vmatpush1.msra.mxu0 %v2013_v58  ;;  %v2337_v56 = vld [vmem:[#allocation2 + $0x4620] sm:$0xff]  ;;  %v2140_v58 = vld [vmem:[#allocation2 + $0x3ff8] sm:$0xff] }
 0x1a9   :  { %3446 = vmatpush1.msra.mxu1 %v2205_v59  ;;  %3376 = vmatprep.subr.mxu0 %v2200_v60  ;;  %v2332_v59 = vld [vmem:[#allocation2 + $0x45f8] sm:$0xff]  ;;  %v2139_v60 = vld [vmem:[#allocation2 + $0x3ff0] sm:$0xff] }
 0x1aa   :  { %3447 = vmatprep.subr.mxu1 %v2392_v61  ;;  %3377 = vmatpush2.msra.mxu0 %v2199_v63  ;;  %v2331_v61 = vld [vmem:[#allocation2 + $0x45f0] sm:$0xff]  ;;  %v91_v63 = vld [vmem:[%s6436_s0 + $0x28] sm:$0xff] }
 0x1ab   :  { %3448 = vmatpush2.msra.mxu1 %v2391_v0  ;;  %3378 = vmatprep.subr.mxu0 %v2194_v2  ;;  %v2134_v0 = vld [vmem:[#allocation2 + $0x3fc8] sm:$0xff] }
 0x1ac   :  { %3449 = vmatprep.subr.mxu1 %v2386_v3  ;;  %3379 = vmatpush2.msra.mxu0 %v2193_v4  ;;  %v2326_v2 = vld [vmem:[#allocation2 + $0x45c8] sm:$0xff]  ;;  %v2133_v3 = vld [vmem:[#allocation2 + $0x3fc0] sm:$0xff] }
 0x1ad   :  { %3450 = vmatpush2.msra.mxu1 %v2385_v5  ;;  %3380 = vmatprep.subr.mxu0 %v2188_v6  ;;  %v2325_v4 = vld [vmem:[#allocation2 + $0x45c0] sm:$0xff]  ;;  %v2128_v5 = vld [vmem:[#allocation2 + $0x3f98] sm:$0xff] }
 0x1ae   :  { %3451 = vmatprep.subr.mxu1 %v2380_v7  ;;  %3381 = vmatpush2.msra.mxu0 %v2187_v11  ;;  %v2320_v6 = vld [vmem:[#allocation2 + $0x4598] sm:$0xff]  ;;  %v2585_v7 = vcombine.high %v91_v63, %v91_v63  ;;  %v2127_v11 = vld [vmem:[#allocation2 + $0x3f90] sm:$0xff] }
 0x1af   :  { %3452 = vmatpush2.msra.mxu1 %v2379_v12  ;;  %3382 = vmatprep.subr.mxu0 %v2182_v13  ;;  %v2319_v12 = vld [vmem:[#allocation2 + $0x4590] sm:$0xff]  ;;  %v2122_v13 = vld [vmem:[#allocation2 + $0x3f68] sm:$0xff] }
 0x1b0   :  { %3453 = vmatprep.subr.mxu1 %v2374_v14  ;;  %3383 = vmatpush2.msra.mxu0 %v2181_v17  ;;  %v2314_v14 = vld [vmem:[#allocation2 + $0x4568] sm:$0xff]  ;;  %v6247_v17 = vrot.slane %v91_v63, %v6139_v52 }
 0x1b1   :  { %3454 = vmatpush2.msra.mxu1 %v2373_v18  ;;  %3384 = vmatprep.subr.mxu0 %v2176_v20  ;;  %v2121_v18 = vld [vmem:[#allocation2 + $0x3f60] sm:$0xff]  ;;  %v162_v63 = vld [vmem:[#allocation2 + $0x228] sm:$0xff] }
 0x1b2   :  { %3455 = vmatprep.subr.mxu1 %v2368_v22  ;;  %3385 = vmatpush2.msra.mxu0 %v2175_v24  ;;  %v2313_v20 = vld [vmem:[#allocation2 + $0x4560] sm:$0xff]  ;;  %v2116_v22 = vld [vmem:[#allocation2 + $0x3f38] sm:$0xff] }
 0x1b3   :  { %3456 = vmatpush2.msra.mxu1 %v2367_v27  ;;  %3386 = vmatprep.subr.mxu0 %v2170_v30  ;;  %v2308_v24 = vld [vmem:[#allocation2 + $0x4538] sm:$0xff]  ;;  %v6250_v27 = vrot.slane %v2585_v7, %v6139_v52  ;;  %v2115_v30 = vld [vmem:[#allocation2 + $0x3f30] sm:$0xff] }
 0x1b4   :  { %3457 = vmatprep.subr.mxu1 %v2362_v31  ;;  %3387 = vmatpush2.msra.mxu0 %v2169_v33  ;;  %v2307_v31 = vld [vmem:[#allocation2 + $0x4530] sm:$0xff]  ;;  %v2110_v33 = vld [vmem:[#allocation2 + $0x3f08] sm:$0xff]  ;;  %v2452_v7 = vld [vmem:[#allocation2 + $0x49b8] sm:$0xff] }
 0x1b5   :  { %3458 = vmatpush2.msra.mxu1 %v2361_v34  ;;  %3388 = vmatprep.subr.mxu0 %v2164_v36  ;;  %v2302_v34 = vld [vmem:[#allocation2 + $0x4508] sm:$0xff]  ;;  %v6254_v36 = vcombine.high %v6247_v17, %v6247_v17  ;;  %v6258_v52 = vcombine.high %v6250_v27, %v6250_v27 }
 0x1b6   :  { %3459 = vmatprep.subr.mxu1 %v2356_v37  ;;  %3389 = vmatpush2.msra.mxu0 %v2163_v38  ;;  %v2109_v37 = vld [vmem:[#allocation2 + $0x3f00] sm:$0xff] }
 0x1b7   :  { %3460 = vmatpush2.msra.mxu1 %v2355_v39  ;;  %3390 = vmatprep.subr.mxu0 %v2158_v40  ;;  %v2301_v38 = vld [vmem:[#allocation2 + $0x4500] sm:$0xff]  ;;  %v2488_v39 = vld [vmem:[#allocation2 + $0x4ad8] sm:$0xff]  ;;  %v186_v40 = vld [vmem:[#allocation2 + $0x2e8] sm:$0xff] }
 0x1b8   :  { %3461 = vmatprep.subr.mxu1 %v2350_v41  ;;  %3391 = vmatpush2.msra.mxu0 %v2157_v44  ;;  %v2487_v41 = vld [vmem:[#allocation2 + $0x4ad0] sm:$0xff]  ;;  %v185_v44 = vld [vmem:[#allocation2 + $0x2e0] sm:$0xff] }
 0x1b9   :  { %3462 = vmatpush2.msra.mxu1 %v2349_v45  ;;  %3392 = vmatprep.subr.mxu0 %v2152_v46  ;;  %v2482_v45 = vld [vmem:[#allocation2 + $0x4aa8] sm:$0xff]  ;;  %v180_v46 = vld [vmem:[#allocation2 + $0x2b8] sm:$0xff] }
 0x1ba   :  { %3463 = vmatprep.subr.mxu1 %v2344_v47  ;;  %3393 = vmatpush2.msra.mxu0 %v2151_v49  ;;  %v2481_v47 = vld [vmem:[#allocation2 + $0x4aa0] sm:$0xff]  ;;  %v179_v49 = vld [vmem:[#allocation2 + $0x2b0] sm:$0xff] }
 0x1bb   :  { %3464 = vmatpush2.msra.mxu1 %v2343_v50  ;;  %3394 = vmatprep.subr.mxu0 %v2146_v51  ;;  %v2476_v50 = vld [vmem:[#allocation2 + $0x4a78] sm:$0xff]  ;;  %v174_v51 = vld [vmem:[#allocation2 + $0x288] sm:$0xff] }
 0x1bc   :  { %3465 = vmatprep.subr.mxu1 %v2338_v53  ;;  %3395 = vmatpush2.msra.mxu0 %v2145_v55  ;;  %v2475_v53 = vld [vmem:[#allocation2 + $0x4a70] sm:$0xff]  ;;  %v173_v55 = vld [vmem:[#allocation2 + $0x280] sm:$0xff] }
 0x1bd   :  { %3466 = vmatpush2.msra.mxu1 %v2337_v56  ;;  %3396 = vmatprep.subr.mxu0 %v2140_v58  ;;  %v2470_v56 = vld [vmem:[#allocation2 + $0x4a48] sm:$0xff]  ;;  %v168_v58 = vld [vmem:[#allocation2 + $0x258] sm:$0xff] }
 0x1be   :  { %3467 = vmatprep.subr.mxu1 %v2332_v59  ;;  %3397 = vmatpush2.msra.mxu0 %v2139_v60  ;;  %v2469_v59 = vld [vmem:[#allocation2 + $0x4a40] sm:$0xff]  ;;  %v167_v60 = vld [vmem:[#allocation2 + $0x250] sm:$0xff] }
 0x1bf   :  { %3468 = vmatpush2.msra.mxu1 %v2331_v61  ;;  %3398 = vmatprep.subr.mxu0 %v2134_v0  ;;  %v2464_v61 = vld [vmem:[#allocation2 + $0x4a18] sm:$0xff]  ;;  %v2463_v0 = vld [vmem:[#allocation2 + $0x4a10] sm:$0xff] }
 0x1c0   :  { %3469 = vmatprep.subr.mxu1 %v2326_v2  ;;  %3399 = vmatpush2.msra.mxu0 %v2133_v3  ;;  %v161_v2 = vld [vmem:[#allocation2 + $0x220] sm:$0xff]  ;;  %v2458_v3 = vld [vmem:[#allocation2 + $0x49e8] sm:$0xff] }
 0x1c1   :  { %3470 = vmatpush2.msra.mxu1 %v2325_v4  ;;  %3400 = vmatprep.subr.mxu0 %v2128_v5  ;;  %v156_v4 = vld [vmem:[#allocation2 + $0x1f8] sm:$0xff]  ;;  %v2457_v5 = vld [vmem:[#allocation2 + $0x49e0] sm:$0xff] }
 0x1c2   :  { %3471 = vmatprep.subr.mxu1 %v2320_v6  ;;  %3401 = vmatpush2.msra.mxu0 %v2127_v11  ;;  %v155_v6 = vld [vmem:[#allocation2 + $0x1f0] sm:$0xff]  ;;  %v150_v11 = vld [vmem:[#allocation2 + $0x1c8] sm:$0xff] }
 0x1c3   :  { %3472 = vmatpush2.msra.mxu1 %v2319_v12  ;;  %3402 = vmatprep.subr.mxu0 %v2122_v13  ;;  %v2451_v12 = vld [vmem:[#allocation2 + $0x49b0] sm:$0xff]  ;;  %v149_v13 = vld [vmem:[#allocation2 + $0x1c0] sm:$0xff] }
 0x1c4   :  { %3473 = vmatprep.subr.mxu1 %v2314_v14  ;;  %3403 = vmatpush2.msra.mxu0 %v2121_v18  ;;  %v2446_v14 = vld [vmem:[#allocation2 + $0x4988] sm:$0xff]  ;;  %v144_v18 = vld [vmem:[#allocation2 + $0x198] sm:$0xff] }
 0x1c5   :  { %3474 = vmatpush2.msra.mxu1 %v2313_v20  ;;  %3404 = vmatprep.subr.mxu0 %v2116_v22  ;;  %v2445_v20 = vld [vmem:[#allocation2 + $0x4980] sm:$0xff]  ;;  %v143_v22 = vld [vmem:[#allocation2 + $0x190] sm:$0xff] }
 0x1c6   :  { %3475 = vmatprep.subr.mxu1 %v2308_v24  ;;  %3405 = vmatpush2.msra.mxu0 %v2115_v30  ;;  %v2440_v24 = vld [vmem:[#allocation2 + $0x4958] sm:$0xff]  ;;  %v138_v30 = vld [vmem:[#allocation2 + $0x168] sm:$0xff] }
 0x1c7   :  { %3476 = vmatpush2.msra.mxu1 %v2307_v31  ;;  %3406 = vmatprep.subr.mxu0 %v2110_v33  ;;  %v2439_v31 = vld [vmem:[#allocation2 + $0x4950] sm:$0xff]  ;;  %v137_v33 = vld [vmem:[#allocation2 + $0x160] sm:$0xff] }
 0x1c8   :  { %3477 = vmatprep.subr.mxu1 %v2302_v34  ;;  %3407 = vmatpush2.msra.mxu0 %v2109_v37  ;;  %v2434_v34 = vld [vmem:[#allocation2 + $0x4928] sm:$0xff]  ;;  %v132_v37 = vld [vmem:[#allocation2 + $0x138] sm:$0xff] }
 0x1c9   :  { %3408 = vmatprep.mubr.f32.mxu0 %v6254_v36  ;;  %3478 = vmatpush2.msra.mxu1 %v2301_v38  ;;  %v2433_v38 = vld [vmem:[#allocation2 + $0x4920] sm:$0xff] }
 0x1ca   :  { %3409 = vmatmul.mubr.f32.vlgmr.msra.gmra.mxu0 %v6247_v17  ;;  %3479 = vmatprep.mubr.f32.mxu1 %v6258_v52 }
 0x1cb   :  { %3486 = vmatprep.subr.mxu0 %v2488_v39  ;;  %3557 = vmatprep.subr.mxu1 %v186_v40  ;;  %v131_v39 = vld [vmem:[#allocation2 + $0x130] sm:$0xff]  ;;  %v2428_v40 = vld [vmem:[#allocation2 + $0x48f8] sm:$0xff] }
 0x1cc   :  { %3480 = vmatmul.mubr.f32.vlgmr.msra.gmra.mxu1 %v6250_v27  ;;  %3487 = vmatpush1.msra.mxu0 %v2487_v41  ;;  %v126_v41 = vld [vmem:[#allocation2 + $0x108] sm:$0xff] }
 0x1cd   :  { %3558 = vmatpush1.msra.mxu1 %v185_v44  ;;  %3488 = vmatprep.subr.mxu0 %v2482_v45  ;;  %v2427_v44 = vld [vmem:[#allocation2 + $0x48f0] sm:$0xff]  ;;  %v125_v45 = vld [vmem:[#allocation2 + $0x100] sm:$0xff] }
 0x1ce   :  { %3559 = vmatprep.subr.mxu1 %v180_v46  ;;  %3489 = vmatpush1.msra.mxu0 %v2481_v47  ;;  %v2422_v46 = vld [vmem:[#allocation2 + $0x48c8] sm:$0xff]  ;;  %v120_v47 = vld [vmem:[#allocation2 + $0xd8] sm:$0xff] }
 0x1cf   :  { %3560 = vmatpush1.msra.mxu1 %v179_v49  ;;  %3490 = vmatprep.subr.mxu0 %v2476_v50  ;;  %v2421_v49 = vld [vmem:[#allocation2 + $0x48c0] sm:$0xff]  ;;  %v119_v50 = vld [vmem:[#allocation2 + $0xd0] sm:$0xff] }
 0x1d0   :  { %3561 = vmatprep.subr.mxu1 %v174_v51  ;;  %3491 = vmatpush1.msra.mxu0 %v2475_v53  ;;  %v2416_v51 = vld [vmem:[#allocation2 + $0x4898] sm:$0xff]  ;;  %v114_v53 = vld [vmem:[#allocation2 + $0xa8] sm:$0xff] }
 0x1d1   :  { %3562 = vmatpush1.msra.mxu1 %v173_v55  ;;  %3492 = vmatprep.subr.mxu0 %v2470_v56  ;;  %v2415_v55 = vld [vmem:[#allocation2 + $0x4890] sm:$0xff]  ;;  %v113_v56 = vld [vmem:[#allocation2 + $0xa0] sm:$0xff] }
 0x1d2   :  { %3563 = vmatprep.subr.mxu1 %v168_v58  ;;  %3493 = vmatpush1.msra.mxu0 %v2469_v59  ;;  %v2410_v58 = vld [vmem:[#allocation2 + $0x4868] sm:$0xff]  ;;  %v108_v59 = vld [vmem:[#allocation2 + $0x78] sm:$0xff] }
 0x1d3   :  { %3564 = vmatpush1.msra.mxu1 %v167_v60  ;;  %3494 = vmatprep.subr.mxu0 %v2464_v61  ;;  %v2409_v60 = vld [vmem:[#allocation2 + $0x4860] sm:$0xff]  ;;  %v107_v61 = vld [vmem:[#allocation2 + $0x70] sm:$0xff] }
 0x1d4   :  { %3565 = vmatprep.subr.mxu1 %v162_v63  ;;  %3495 = vmatpush1.msra.mxu0 %v2463_v0  ;;  %v2404_v63 = vld [vmem:[#allocation2 + $0x4838] sm:$0xff]  ;;  %v102_v0 = vld [vmem:[#allocation2 + $0x48] sm:$0xff] }
 0x1d5   :  { %3566 = vmatpush1.msra.mxu1 %v161_v2  ;;  %3496 = vmatprep.subr.mxu0 %v2458_v3  ;;  %v2403_v2 = vld [vmem:[#allocation2 + $0x4830] sm:$0xff]  ;;  %v101_v3 = vld [vmem:[#allocation2 + $0x40] sm:$0xff] }
 0x1d6   :  { %3567 = vmatprep.subr.mxu1 %v156_v4  ;;  %3497 = vmatpush1.msra.mxu0 %v2457_v5  ;;  %v2398_v4 = vld [vmem:[#allocation2 + $0x4808] sm:$0xff]  ;;  %v96_v5 = vld [vmem:[#allocation2 + $0x18] sm:$0xff] }
 0x1d7   :  { %3568 = vmatpush1.msra.mxu1 %v155_v6  ;;  %3498 = vmatprep.subr.mxu0 %v2452_v7  ;;  %v2397_v6 = vld [vmem:[#allocation2 + $0x4800] sm:$0xff]  ;;  %v95_v7 = vld [vmem:[#allocation2 + $0x10] sm:$0xff] }
 0x1d8   :  { %3569 = vmatprep.subr.mxu1 %v150_v11  ;;  %3499 = vmatpush1.msra.mxu0 %v2451_v12  ;;  %v5816_v11 = vld.sshfl [vmem:[%s6436_s0 + $0x30] sm:$0x3 pattern:$0x76325410]  ;;  %v282_v12 = vld [vmem:[#allocation2 + $0x5e8] sm:$0xff] }
 0x1d9   :  { %3570 = vmatpush1.msra.mxu1 %v149_v13  ;;  %3500 = vmatprep.subr.mxu0 %v2446_v14  ;;  %v378_v13 = vld [vmem:[#allocation2 + $0x8e8] sm:$0xff]  ;;  %v6081_v14 = vmov 0.0  }
 0x1da   :  { %3571 = vmatprep.subr.mxu1 %v144_v18  ;;  %3501 = vmatpush1.msra.mxu0 %v2445_v20  ;;  %v281_v18 = vld [vmem:[#allocation2 + $0x5e0] sm:$0xff] }
 0x1db   :  { %3572 = vmatpush1.msra.mxu1 %v143_v22  ;;  %3502 = vmatprep.subr.mxu0 %v2440_v24  ;;  %v377_v20 = vld [vmem:[#allocation2 + $0x8e0] sm:$0xff]  ;;  %v276_v22 = vld [vmem:[#allocation2 + $0x5b8] sm:$0xff] }
 0x1dc   :  { %3573 = vmatprep.subr.mxu1 %v138_v30  ;;  %3503 = vmatpush1.msra.mxu0 %v2439_v31  ;;  %v372_v24 = vld [vmem:[#allocation2 + $0x8b8] sm:$0xff]  ;;  %v275_v30 = vld [vmem:[#allocation2 + $0x5b0] sm:$0xff] }
 0x1dd   :  { %3574 = vmatpush1.msra.mxu1 %v137_v33  ;;  %3504 = vmatprep.subr.mxu0 %v2434_v34  ;;  %v371_v31 = vld [vmem:[#allocation2 + $0x8b0] sm:$0xff]  ;;  %v270_v33 = vld [vmem:[#allocation2 + $0x588] sm:$0xff] }
 0x1de   :  { %3575 = vmatprep.subr.mxu1 %v132_v37  ;;  %3505 = vmatpush1.msra.mxu0 %v2433_v38  ;;  %v366_v34 = vld [vmem:[#allocation2 + $0x888] sm:$0xff]  ;;  %v269_v37 = vld [vmem:[#allocation2 + $0x580] sm:$0xff] }
 0x1df   :  { %3576 = vmatpush1.msra.mxu1 %v131_v39  ;;  %3506 = vmatprep.subr.mxu0 %v2428_v40  ;;  %v365_v38 = vld [vmem:[#allocation2 + $0x880] sm:$0xff]  ;;  %v264_v39 = vld [vmem:[#allocation2 + $0x558] sm:$0xff] }
 0x1e0   :  { %3577 = vmatprep.subr.mxu1 %v126_v41  ;;  %3507 = vmatpush1.msra.mxu0 %v2427_v44  ;;  %v360_v40 = vld [vmem:[#allocation2 + $0x858] sm:$0xff]  ;;  %v263_v41 = vld [vmem:[#allocation2 + $0x550] sm:$0xff] }
 0x1e1   :  { %3578 = vmatpush1.msra.mxu1 %v125_v45  ;;  %3508 = vmatprep.subr.mxu0 %v2422_v46  ;;  %v359_v44 = vld [vmem:[#allocation2 + $0x850] sm:$0xff]  ;;  %v258_v45 = vld [vmem:[#allocation2 + $0x528] sm:$0xff] }
 0x1e2   :  { %3579 = vmatprep.subr.mxu1 %v120_v47  ;;  %3509 = vmatpush1.msra.mxu0 %v2421_v49  ;;  %v354_v46 = vld [vmem:[#allocation2 + $0x828] sm:$0xff]  ;;  %v257_v47 = vld [vmem:[#allocation2 + $0x520] sm:$0xff] }
 0x1e3   :  { %3580 = vmatpush1.msra.mxu1 %v119_v50  ;;  %3510 = vmatprep.subr.mxu0 %v2416_v51  ;;  %v353_v49 = vld [vmem:[#allocation2 + $0x820] sm:$0xff]  ;;  %v252_v50 = vld [vmem:[#allocation2 + $0x4f8] sm:$0xff] }
 0x1e4   :  { %3581 = vmatprep.subr.mxu1 %v114_v53  ;;  %3511 = vmatpush1.msra.mxu0 %v2415_v55  ;;  %v348_v51 = vld [vmem:[#allocation2 + $0x7f8] sm:$0xff]  ;;  %v251_v53 = vld [vmem:[#allocation2 + $0x4f0] sm:$0xff] }
 0x1e5   :  { %3582 = vmatpush1.msra.mxu1 %v113_v56  ;;  %3512 = vmatprep.subr.mxu0 %v2410_v58  ;;  %v347_v55 = vld [vmem:[#allocation2 + $0x7f0] sm:$0xff]  ;;  %v246_v56 = vld [vmem:[#allocation2 + $0x4c8] sm:$0xff] }
 0x1e6   :  { %3583 = vmatprep.subr.mxu1 %v108_v59  ;;  %3513 = vmatpush1.msra.mxu0 %v2409_v60  ;;  %v342_v58 = vld [vmem:[#allocation2 + $0x7c8] sm:$0xff]  ;;  %v245_v59 = vld [vmem:[#allocation2 + $0x4c0] sm:$0xff] }
 0x1e7   :  { %3584 = vmatpush1.msra.mxu1 %v107_v61  ;;  %3514 = vmatprep.subr.mxu0 %v2404_v63  ;;  %v341_v60 = vld [vmem:[#allocation2 + $0x7c0] sm:$0xff]  ;;  %v240_v61 = vld [vmem:[#allocation2 + $0x498] sm:$0xff] }
 0x1e8   :  { %3585 = vmatprep.subr.mxu1 %v102_v0  ;;  %3515 = vmatpush1.msra.mxu0 %v2403_v2  ;;  %v336_v63 = vld [vmem:[#allocation2 + $0x798] sm:$0xff]  ;;  %v239_v0 = vld [vmem:[#allocation2 + $0x490] sm:$0xff] }
 0x1e9   :  { %3586 = vmatpush1.msra.mxu1 %v101_v3  ;;  %3516 = vmatprep.subr.mxu0 %v2398_v4  ;;  %v335_v2 = vld [vmem:[#allocation2 + $0x790] sm:$0xff]  ;;  %v234_v3 = vld [vmem:[#allocation2 + $0x468] sm:$0xff] }
 0x1ea   :  { %3587 = vmatprep.subr.mxu1 %v96_v5  ;;  %3517 = vmatpush1.msra.mxu0 %v2397_v6  ;;  %v330_v4 = vld [vmem:[#allocation2 + $0x768] sm:$0xff]  ;;  %v233_v5 = vld [vmem:[#allocation2 + $0x460] sm:$0xff] }
 0x1eb   :  { %3550 = vmatprep.mubr.f32.mxu0 %v6081_v14  ;;  %3588 = vmatpush1.msra.mxu1 %v95_v7  ;;  %v329_v6 = vld [vmem:[#allocation2 + $0x760] sm:$0xff]  ;;  %v228_v7 = vld [vmem:[#allocation2 + $0x438] sm:$0xff] }
 0x1ec   :  { %3551 = vmatmul.mubr.f32.vlgmr.msra.gmra.mxu0 %v5816_v11  ;;  %3589 = vmatprep.subr.mxu1 %v282_v12  ;;  %v324_v11 = vld [vmem:[#allocation2 + $0x738] sm:$0xff]  ;;  %v227_v12 = vld [vmem:[#allocation2 + $0x430] sm:$0xff] }
 0x1ed   :  { %3628 = vmatprep.subr.mxu0 %v378_v13  ;;  %3590 = vmatpush2.msra.mxu1 %v281_v18  ;;  %v323_v13 = vld [vmem:[#allocation2 + $0x730] sm:$0xff]  ;;  %v222_v18 = vld [vmem:[#allocation2 + $0x408] sm:$0xff] }
 0x1ee   :  { %3629 = vmatpush1.msra.mxu0 %v377_v20  ;;  %3591 = vmatprep.subr.mxu1 %v276_v22  ;;  %v318_v20 = vld [vmem:[#allocation2 + $0x708] sm:$0xff]  ;;  %v221_v22 = vld [vmem:[#allocation2 + $0x400] sm:$0xff] }
 0x1ef   :  { %3630 = vmatprep.subr.mxu0 %v372_v24  ;;  %3592 = vmatpush2.msra.mxu1 %v275_v30  ;;  %v317_v24 = vld [vmem:[#allocation2 + $0x700] sm:$0xff]  ;;  %v216_v30 = vld [vmem:[#allocation2 + $0x3d8] sm:$0xff] }
 0x1f0   :  { %3631 = vmatpush1.msra.mxu0 %v371_v31  ;;  %3593 = vmatprep.subr.mxu1 %v270_v33  ;;  %v312_v31 = vld [vmem:[#allocation2 + $0x6d8] sm:$0xff]  ;;  %v215_v33 = vld [vmem:[#allocation2 + $0x3d0] sm:$0xff] }
 0x1f1   :  { %3632 = vmatprep.subr.mxu0 %v366_v34  ;;  %3594 = vmatpush2.msra.mxu1 %v269_v37  ;;  %v311_v34 = vld [vmem:[#allocation2 + $0x6d0] sm:$0xff]  ;;  %v210_v37 = vld [vmem:[#allocation2 + $0x3a8] sm:$0xff] }
 0x1f2   :  { %3633 = vmatpush1.msra.mxu0 %v365_v38  ;;  %3595 = vmatprep.subr.mxu1 %v264_v39  ;;  %v306_v38 = vld [vmem:[#allocation2 + $0x6a8] sm:$0xff]  ;;  %v209_v39 = vld [vmem:[#allocation2 + $0x3a0] sm:$0xff] }
 0x1f3   :  { %3634 = vmatprep.subr.mxu0 %v360_v40  ;;  %3596 = vmatpush2.msra.mxu1 %v263_v41  ;;  %v305_v40 = vld [vmem:[#allocation2 + $0x6a0] sm:$0xff]  ;;  %v204_v41 = vld [vmem:[#allocation2 + $0x378] sm:$0xff] }
 0x1f4   :  { %3635 = vmatpush1.msra.mxu0 %v359_v44  ;;  %3597 = vmatprep.subr.mxu1 %v258_v45  ;;  %v300_v44 = vld [vmem:[#allocation2 + $0x678] sm:$0xff]  ;;  %v203_v45 = vld [vmem:[#allocation2 + $0x370] sm:$0xff] }
 0x1f5   :  { %3636 = vmatprep.subr.mxu0 %v354_v46  ;;  %3598 = vmatpush2.msra.mxu1 %v257_v47  ;;  %v299_v46 = vld [vmem:[#allocation2 + $0x670] sm:$0xff]  ;;  %v198_v47 = vld [vmem:[#allocation2 + $0x348] sm:$0xff] }
 0x1f6   :  { %3637 = vmatpush1.msra.mxu0 %v353_v49  ;;  %3599 = vmatprep.subr.mxu1 %v252_v50  ;;  %v294_v49 = vld [vmem:[#allocation2 + $0x648] sm:$0xff]  ;;  %v197_v50 = vld [vmem:[#allocation2 + $0x340] sm:$0xff] }
 0x1f7   :  { %3638 = vmatprep.subr.mxu0 %v348_v51  ;;  %3600 = vmatpush2.msra.mxu1 %v251_v53  ;;  %v293_v51 = vld [vmem:[#allocation2 + $0x640] sm:$0xff]  ;;  %v192_v53 = vld [vmem:[#allocation2 + $0x318] sm:$0xff] }
 0x1f8   :  { %3639 = vmatpush1.msra.mxu0 %v347_v55  ;;  %3601 = vmatprep.subr.mxu1 %v246_v56  ;;  %v288_v55 = vld [vmem:[#allocation2 + $0x618] sm:$0xff]  ;;  %v191_v56 = vld [vmem:[#allocation2 + $0x310] sm:$0xff] }
 0x1f9   :  { %3640 = vmatprep.subr.mxu0 %v342_v58  ;;  %3602 = vmatpush2.msra.mxu1 %v245_v59  ;;  %v287_v58 = vld [vmem:[#allocation2 + $0x610] sm:$0xff]  ;;  %v474_v59 = vld [vmem:[#allocation2 + $0xbe8] sm:$0xff] }
 0x1fa   :  { %3641 = vmatpush1.msra.mxu0 %v341_v60  ;;  %3603 = vmatprep.subr.mxu1 %v240_v61  ;;  %v570_v60 = vld [vmem:[#allocation2 + $0xee8] sm:$0xff]  ;;  %v473_v61 = vld [vmem:[#allocation2 + $0xbe0] sm:$0xff] }
 0x1fb   :  { %3642 = vmatprep.subr.mxu0 %v336_v63  ;;  %3604 = vmatpush2.msra.mxu1 %v239_v0  ;;  %v569_v63 = vld [vmem:[#allocation2 + $0xee0] sm:$0xff]  ;;  %v468_v0 = vld [vmem:[#allocation2 + $0xbb8] sm:$0xff] }
 0x1fc   :  { %3643 = vmatpush1.msra.mxu0 %v335_v2  ;;  %3605 = vmatprep.subr.mxu1 %v234_v3  ;;  %v564_v2 = vld [vmem:[#allocation2 + $0xeb8] sm:$0xff]  ;;  %v467_v3 = vld [vmem:[#allocation2 + $0xbb0] sm:$0xff] }
 0x1fd   :  { %3644 = vmatprep.subr.mxu0 %v330_v4  ;;  %3606 = vmatpush2.msra.mxu1 %v233_v5  ;;  %v563_v4 = vld [vmem:[#allocation2 + $0xeb0] sm:$0xff]  ;;  %v462_v5 = vld [vmem:[#allocation2 + $0xb88] sm:$0xff] }
 0x1fe   :  { %3645 = vmatpush1.msra.mxu0 %v329_v6  ;;  %3607 = vmatprep.subr.mxu1 %v228_v7  ;;  %v558_v6 = vld [vmem:[#allocation2 + $0xe88] sm:$0xff]  ;;  %v461_v7 = vld [vmem:[#allocation2 + $0xb80] sm:$0xff] }
 0x1ff   :  { %3646 = vmatprep.subr.mxu0 %v324_v11  ;;  %3608 = vmatpush2.msra.mxu1 %v227_v12  ;;  %v557_v11 = vld [vmem:[#allocation2 + $0xe80] sm:$0xff]  ;;  %v456_v12 = vld [vmem:[#allocation2 + $0xb58] sm:$0xff] }
 0x200   :  { %3647 = vmatpush1.msra.mxu0 %v323_v13  ;;  %3609 = vmatprep.subr.mxu1 %v222_v18  ;;  %v552_v13 = vld [vmem:[#allocation2 + $0xe58] sm:$0xff]  ;;  %v455_v18 = vld [vmem:[#allocation2 + $0xb50] sm:$0xff] }
 0x201   :  { %3648 = vmatprep.subr.mxu0 %v318_v20  ;;  %3610 = vmatpush2.msra.mxu1 %v221_v22  ;;  %v551_v20 = vld [vmem:[#allocation2 + $0xe50] sm:$0xff]  ;;  %v450_v22 = vld [vmem:[#allocation2 + $0xb28] sm:$0xff] }
 0x202   :  { %3649 = vmatpush1.msra.mxu0 %v317_v24  ;;  %3611 = vmatprep.subr.mxu1 %v216_v30  ;;  %v546_v24 = vld [vmem:[#allocation2 + $0xe28] sm:$0xff]  ;;  %v449_v30 = vld [vmem:[#allocation2 + $0xb20] sm:$0xff] }
 0x203   :  { %3650 = vmatprep.subr.mxu0 %v312_v31  ;;  %3612 = vmatpush2.msra.mxu1 %v215_v33  ;;  %v545_v31 = vld [vmem:[#allocation2 + $0xe20] sm:$0xff]  ;;  %v444_v33 = vld [vmem:[#allocation2 + $0xaf8] sm:$0xff] }
 0x204   :  { %3651 = vmatpush1.msra.mxu0 %v311_v34  ;;  %3613 = vmatprep.subr.mxu1 %v210_v37  ;;  %v540_v34 = vld [vmem:[#allocation2 + $0xdf8] sm:$0xff]  ;;  %v443_v37 = vld [vmem:[#allocation2 + $0xaf0] sm:$0xff] }
 0x205   :  { %3652 = vmatprep.subr.mxu0 %v306_v38  ;;  %3614 = vmatpush2.msra.mxu1 %v209_v39  ;;  %v539_v38 = vld [vmem:[#allocation2 + $0xdf0] sm:$0xff]  ;;  %v438_v39 = vld [vmem:[#allocation2 + $0xac8] sm:$0xff] }
 0x206   :  { %3653 = vmatpush1.msra.mxu0 %v305_v40  ;;  %3615 = vmatprep.subr.mxu1 %v204_v41  ;;  %v534_v40 = vld [vmem:[#allocation2 + $0xdc8] sm:$0xff]  ;;  %v437_v41 = vld [vmem:[#allocation2 + $0xac0] sm:$0xff] }
 0x207   :  { %3654 = vmatprep.subr.mxu0 %v300_v44  ;;  %3616 = vmatpush2.msra.mxu1 %v203_v45  ;;  %v533_v44 = vld [vmem:[#allocation2 + $0xdc0] sm:$0xff]  ;;  %v432_v45 = vld [vmem:[#allocation2 + $0xa98] sm:$0xff] }
 0x208   :  { %3655 = vmatpush1.msra.mxu0 %v299_v46  ;;  %3617 = vmatprep.subr.mxu1 %v198_v47  ;;  %v528_v46 = vld [vmem:[#allocation2 + $0xd98] sm:$0xff]  ;;  %v431_v47 = vld [vmem:[#allocation2 + $0xa90] sm:$0xff] }
 0x209   :  { %3656 = vmatprep.subr.mxu0 %v294_v49  ;;  %3618 = vmatpush2.msra.mxu1 %v197_v50  ;;  %v527_v49 = vld [vmem:[#allocation2 + $0xd90] sm:$0xff]  ;;  %v426_v50 = vld [vmem:[#allocation2 + $0xa68] sm:$0xff] }
 0x20a   :  { %3657 = vmatpush1.msra.mxu0 %v293_v51  ;;  %3619 = vmatprep.subr.mxu1 %v192_v53  ;;  %v522_v51 = vld [vmem:[#allocation2 + $0xd68] sm:$0xff]  ;;  %v425_v53 = vld [vmem:[#allocation2 + $0xa60] sm:$0xff] }
 0x20b   :  { %3658 = vmatprep.subr.mxu0 %v288_v55  ;;  %3620 = vmatpush2.msra.mxu1 %v191_v56  ;;  %v521_v55 = vld [vmem:[#allocation2 + $0xd60] sm:$0xff]  ;;  %v420_v56 = vld [vmem:[#allocation2 + $0xa38] sm:$0xff] }
 0x20c   :  { %3659 = vmatpush1.msra.mxu0 %v287_v58  ;;  %3621 = vmatprep.mubr.f32.mxu1 %v6149_v8  ;;  %v516_v58 = vld [vmem:[#allocation2 + $0xd38] sm:$0xff] }
 0x20d   :  { %3660 = vmatprep.subr.mxu0 %v474_v59  ;;  %3699 = vmatprep.subr.mxu1 %v570_v60  ;;  %v419_v59 = vld [vmem:[#allocation2 + $0xa30] sm:$0xff] }
 0x20e   :  { %3622 = vmatmul.mubr.f32.vlgmr.msra.gmra.mxu1 %v6142_v62  ;;  %3661 = vmatpush2.msra.mxu0 %v473_v61  ;;  %v515_v60 = vld [vmem:[#allocation2 + $0xd30] sm:$0xff]  ;;  %v414_v61 = vld [vmem:[#allocation2 + $0xa08] sm:$0xff] }
 0x20f   :  { %3700 = vmatpush1.msra.mxu1 %v569_v63  ;;  %3662 = vmatprep.subr.mxu0 %v468_v0  ;;  %v510_v63 = vld [vmem:[#allocation2 + $0xd08] sm:$0xff]  ;;  %v413_v0 = vld [vmem:[#allocation2 + $0xa00] sm:$0xff] }
 0x210   :  { %3701 = vmatprep.subr.mxu1 %v564_v2  ;;  %3663 = vmatpush2.msra.mxu0 %v467_v3  ;;  %v509_v2 = vld [vmem:[#allocation2 + $0xd00] sm:$0xff]  ;;  %v408_v3 = vld [vmem:[#allocation2 + $0x9d8] sm:$0xff] }
 0x211   :  { %3702 = vmatpush1.msra.mxu1 %v563_v4  ;;  %3664 = vmatprep.subr.mxu0 %v462_v5  ;;  %v504_v4 = vld [vmem:[#allocation2 + $0xcd8] sm:$0xff]  ;;  %v407_v5 = vld [vmem:[#allocation2 + $0x9d0] sm:$0xff] }
 0x212   :  { %3703 = vmatprep.subr.mxu1 %v558_v6  ;;  %3665 = vmatpush2.msra.mxu0 %v461_v7  ;;  %v503_v6 = vld [vmem:[#allocation2 + $0xcd0] sm:$0xff]  ;;  %v402_v7 = vld [vmem:[#allocation2 + $0x9a8] sm:$0xff] }
 0x213   :  { %3704 = vmatpush1.msra.mxu1 %v557_v11  ;;  %3666 = vmatprep.subr.mxu0 %v456_v12  ;;  %v498_v11 = vld [vmem:[#allocation2 + $0xca8] sm:$0xff]  ;;  %v401_v12 = vld [vmem:[#allocation2 + $0x9a0] sm:$0xff] }
 0x214   :  { %3705 = vmatprep.subr.mxu1 %v552_v13  ;;  %3667 = vmatpush2.msra.mxu0 %v455_v18  ;;  %v497_v13 = vld [vmem:[#allocation2 + $0xca0] sm:$0xff]  ;;  %v396_v18 = vld [vmem:[#allocation2 + $0x978] sm:$0xff] }
 0x215   :  { %3706 = vmatpush1.msra.mxu1 %v551_v20  ;;  %3668 = vmatprep.subr.mxu0 %v450_v22  ;;  %v492_v20 = vld [vmem:[#allocation2 + $0xc78] sm:$0xff]  ;;  %v395_v22 = vld [vmem:[#allocation2 + $0x970] sm:$0xff] }
 0x216   :  { %3707 = vmatprep.subr.mxu1 %v546_v24  ;;  %3669 = vmatpush2.msra.mxu0 %v449_v30  ;;  %v491_v24 = vld [vmem:[#allocation2 + $0xc70] sm:$0xff]  ;;  %v390_v30 = vld [vmem:[#allocation2 + $0x948] sm:$0xff] }
 0x217   :  { %3708 = vmatpush1.msra.mxu1 %v545_v31  ;;  %3670 = vmatprep.subr.mxu0 %v444_v33  ;;  %v486_v31 = vld [vmem:[#allocation2 + $0xc48] sm:$0xff]  ;;  %v389_v33 = vld [vmem:[#allocation2 + $0x940] sm:$0xff] }
 0x218   :  { %3709 = vmatprep.subr.mxu1 %v540_v34  ;;  %3671 = vmatpush2.msra.mxu0 %v443_v37  ;;  %v485_v34 = vld [vmem:[#allocation2 + $0xc40] sm:$0xff]  ;;  %v384_v37 = vld [vmem:[#allocation2 + $0x918] sm:$0xff] }
 0x219   :  { %3710 = vmatpush1.msra.mxu1 %v539_v38  ;;  %3672 = vmatprep.subr.mxu0 %v438_v39  ;;  %v480_v38 = vld [vmem:[#allocation2 + $0xc18] sm:$0xff]  ;;  %v383_v39 = vld [vmem:[#allocation2 + $0x910] sm:$0xff] }
 0x21a   :  { %3711 = vmatprep.subr.mxu1 %v534_v40  ;;  %3673 = vmatpush2.msra.mxu0 %v437_v41  ;;  %v479_v40 = vld [vmem:[#allocation2 + $0xc10] sm:$0xff]  ;;  %v666_v41 = vld [vmem:[#allocation2 + $0x11e8] sm:$0xff] }
 0x21b   :  { %3712 = vmatpush1.msra.mxu1 %v533_v44  ;;  %3674 = vmatprep.subr.mxu0 %v432_v45  ;;  %v762_v44 = vld [vmem:[#allocation2 + $0x14e8] sm:$0xff]  ;;  %v665_v45 = vld [vmem:[#allocation2 + $0x11e0] sm:$0xff] }
 0x21c   :  { %3713 = vmatprep.subr.mxu1 %v528_v46  ;;  %3675 = vmatpush2.msra.mxu0 %v431_v47  ;;  %v761_v46 = vld [vmem:[#allocation2 + $0x14e0] sm:$0xff]  ;;  %v660_v47 = vld [vmem:[#allocation2 + $0x11b8] sm:$0xff] }
 0x21d   :  { %3714 = vmatpush1.msra.mxu1 %v527_v49  ;;  %3676 = vmatprep.subr.mxu0 %v426_v50  ;;  %v756_v49 = vld [vmem:[#allocation2 + $0x14b8] sm:$0xff]  ;;  %v659_v50 = vld [vmem:[#allocation2 + $0x11b0] sm:$0xff] }
 0x21e   :  { %3715 = vmatprep.subr.mxu1 %v522_v51  ;;  %3677 = vmatpush2.msra.mxu0 %v425_v53  ;;  %v755_v51 = vld [vmem:[#allocation2 + $0x14b0] sm:$0xff]  ;;  %v654_v53 = vld [vmem:[#allocation2 + $0x1188] sm:$0xff] }
 0x21f   :  { %3716 = vmatpush1.msra.mxu1 %v521_v55  ;;  %3678 = vmatprep.subr.mxu0 %v420_v56  ;;  %v750_v55 = vld [vmem:[#allocation2 + $0x1488] sm:$0xff]  ;;  %v653_v56 = vld [vmem:[#allocation2 + $0x1180] sm:$0xff] }
 0x220   :  { %3717 = vmatprep.subr.mxu1 %v516_v58  ;;  %3679 = vmatpush2.msra.mxu0 %v419_v59  ;;  %v749_v58 = vld [vmem:[#allocation2 + $0x1480] sm:$0xff]  ;;  %v648_v59 = vld [vmem:[#allocation2 + $0x1158] sm:$0xff] }
 0x221   :  { %3718 = vmatpush1.msra.mxu1 %v515_v60  ;;  %3680 = vmatprep.subr.mxu0 %v414_v61  ;;  %v744_v60 = vld [vmem:[#allocation2 + $0x1458] sm:$0xff]  ;;  %v647_v61 = vld [vmem:[#allocation2 + $0x1150] sm:$0xff] }
 0x222   :  { %3719 = vmatprep.subr.mxu1 %v510_v63  ;;  %3681 = vmatpush2.msra.mxu0 %v413_v0  ;;  %v743_v63 = vld [vmem:[#allocation2 + $0x1450] sm:$0xff]  ;;  %v642_v0 = vld [vmem:[#allocation2 + $0x1128] sm:$0xff] }
 0x223   :  { %3720 = vmatpush1.msra.mxu1 %v509_v2  ;;  %3682 = vmatprep.subr.mxu0 %v408_v3  ;;  %v738_v2 = vld [vmem:[#allocation2 + $0x1428] sm:$0xff]  ;;  %v641_v3 = vld [vmem:[#allocation2 + $0x1120] sm:$0xff] }
 0x224   :  { %3721 = vmatprep.subr.mxu1 %v504_v4  ;;  %3683 = vmatpush2.msra.mxu0 %v407_v5  ;;  %v737_v4 = vld [vmem:[#allocation2 + $0x1420] sm:$0xff]  ;;  %v636_v5 = vld [vmem:[#allocation2 + $0x10f8] sm:$0xff] }
 0x225   :  { %3722 = vmatpush1.msra.mxu1 %v503_v6  ;;  %3684 = vmatprep.subr.mxu0 %v402_v7  ;;  %v732_v6 = vld [vmem:[#allocation2 + $0x13f8] sm:$0xff]  ;;  %v635_v7 = vld [vmem:[#allocation2 + $0x10f0] sm:$0xff] }
 0x226   :  { %3723 = vmatprep.subr.mxu1 %v498_v11  ;;  %3685 = vmatpush2.msra.mxu0 %v401_v12  ;;  %v731_v11 = vld [vmem:[#allocation2 + $0x13f0] sm:$0xff]  ;;  %v630_v12 = vld [vmem:[#allocation2 + $0x10c8] sm:$0xff] }
 0x227   :  { %3724 = vmatpush1.msra.mxu1 %v497_v13  ;;  %3686 = vmatprep.subr.mxu0 %v396_v18  ;;  %v726_v13 = vld [vmem:[#allocation2 + $0x13c8] sm:$0xff]  ;;  %v629_v18 = vld [vmem:[#allocation2 + $0x10c0] sm:$0xff] }
 0x228   :  { %3725 = vmatprep.subr.mxu1 %v492_v20  ;;  %3687 = vmatpush2.msra.mxu0 %v395_v22  ;;  %v725_v20 = vld [vmem:[#allocation2 + $0x13c0] sm:$0xff]  ;;  %v624_v22 = vld [vmem:[#allocation2 + $0x1098] sm:$0xff] }
 0x229   :  { %3726 = vmatpush1.msra.mxu1 %v491_v24  ;;  %3688 = vmatprep.subr.mxu0 %v390_v30  ;;  %v720_v24 = vld [vmem:[#allocation2 + $0x1398] sm:$0xff]  ;;  %v623_v30 = vld [vmem:[#allocation2 + $0x1090] sm:$0xff] }
 0x22a   :  { %3727 = vmatprep.subr.mxu1 %v486_v31  ;;  %3689 = vmatpush2.msra.mxu0 %v389_v33  ;;  %v719_v31 = vld [vmem:[#allocation2 + $0x1390] sm:$0xff]  ;;  %v618_v33 = vld [vmem:[#allocation2 + $0x1068] sm:$0xff] }
 0x22b   :  { %3728 = vmatpush1.msra.mxu1 %v485_v34  ;;  %3690 = vmatprep.subr.mxu0 %v384_v37  ;;  %v714_v34 = vld [vmem:[#allocation2 + $0x1368] sm:$0xff]  ;;  %v617_v37 = vld [vmem:[#allocation2 + $0x1060] sm:$0xff] }
 0x22c   :  { %3729 = vmatprep.subr.mxu1 %v480_v38  ;;  %3691 = vmatpush2.msra.mxu0 %v383_v39  ;;  %v713_v38 = vld [vmem:[#allocation2 + $0x1360] sm:$0xff]  ;;  %v612_v39 = vld [vmem:[#allocation2 + $0x1038] sm:$0xff] }
 0x22d   :  { %3692 = vmatprep.mubr.f32.mxu0 %v6153_v10  ;;  %3730 = vmatpush1.msra.mxu1 %v479_v40  ;;  %v708_v40 = vld [vmem:[#allocation2 + $0x1338] sm:$0xff] }
 0x22e   :  { %3693 = vmatmul.mubr.f32.vlgmr.msra.gmra.mxu0 %v6145_v1  ;;  %3731 = vmatprep.subr.mxu1 %v666_v41  ;;  %v611_v41 = vld [vmem:[#allocation2 + $0x1030] sm:$0xff] }
 0x22f   :  { %3770 = vmatprep.subr.mxu0 %v762_v44  ;;  %3732 = vmatpush2.msra.mxu1 %v665_v45  ;;  %v707_v44 = vld [vmem:[#allocation2 + $0x1330] sm:$0xff]  ;;  %v606_v45 = vld [vmem:[#allocation2 + $0x1008] sm:$0xff] }
 0x230   :  { %3771 = vmatpush1.msra.mxu0 %v761_v46  ;;  %3733 = vmatprep.subr.mxu1 %v660_v47  ;;  %v702_v46 = vld [vmem:[#allocation2 + $0x1308] sm:$0xff]  ;;  %v605_v47 = vld [vmem:[#allocation2 + $0x1000] sm:$0xff] }
 0x231   :  { %3772 = vmatprep.subr.mxu0 %v756_v49  ;;  %3734 = vmatpush2.msra.mxu1 %v659_v50  ;;  %v701_v49 = vld [vmem:[#allocation2 + $0x1300] sm:$0xff]  ;;  %v600_v50 = vld [vmem:[#allocation2 + $0xfd8] sm:$0xff] }
 0x232   :  { %3773 = vmatpush1.msra.mxu0 %v755_v51  ;;  %3735 = vmatprep.subr.mxu1 %v654_v53  ;;  %v696_v51 = vld [vmem:[#allocation2 + $0x12d8] sm:$0xff]  ;;  %v599_v53 = vld [vmem:[#allocation2 + $0xfd0] sm:$0xff] }
 0x233   :  { %3774 = vmatprep.subr.mxu0 %v750_v55  ;;  %3736 = vmatpush2.msra.mxu1 %v653_v56  ;;  %v695_v55 = vld [vmem:[#allocation2 + $0x12d0] sm:$0xff]  ;;  %v594_v56 = vld [vmem:[#allocation2 + $0xfa8] sm:$0xff] }
 0x234   :  { %3775 = vmatpush1.msra.mxu0 %v749_v58  ;;  %3737 = vmatprep.subr.mxu1 %v648_v59  ;;  %v690_v58 = vld [vmem:[#allocation2 + $0x12a8] sm:$0xff]  ;;  %v593_v59 = vld [vmem:[#allocation2 + $0xfa0] sm:$0xff] }
 0x235   :  { %3776 = vmatprep.subr.mxu0 %v744_v60  ;;  %3738 = vmatpush2.msra.mxu1 %v647_v61  ;;  %v689_v60 = vld [vmem:[#allocation2 + $0x12a0] sm:$0xff]  ;;  %v588_v61 = vld [vmem:[#allocation2 + $0xf78] sm:$0xff] }
 0x236   :  { %3777 = vmatpush1.msra.mxu0 %v743_v63  ;;  %3739 = vmatprep.subr.mxu1 %v642_v0  ;;  %v684_v63 = vld [vmem:[#allocation2 + $0x1278] sm:$0xff]  ;;  %v587_v0 = vld [vmem:[#allocation2 + $0xf70] sm:$0xff] }
 0x237   :  { %3778 = vmatprep.subr.mxu0 %v738_v2  ;;  %3740 = vmatpush2.msra.mxu1 %v641_v3  ;;  %v683_v2 = vld [vmem:[#allocation2 + $0x1270] sm:$0xff]  ;;  %v582_v3 = vld [vmem:[#allocation2 + $0xf48] sm:$0xff] }
 0x238   :  { %3779 = vmatpush1.msra.mxu0 %v737_v4  ;;  %3741 = vmatprep.subr.mxu1 %v636_v5  ;;  %v678_v4 = vld [vmem:[#allocation2 + $0x1248] sm:$0xff]  ;;  %v581_v5 = vld [vmem:[#allocation2 + $0xf40] sm:$0xff] }
 0x239   :  { %3780 = vmatprep.subr.mxu0 %v732_v6  ;;  %3742 = vmatpush2.msra.mxu1 %v635_v7  ;;  %v677_v6 = vld [vmem:[#allocation2 + $0x1240] sm:$0xff]  ;;  %v576_v7 = vld [vmem:[#allocation2 + $0xf18] sm:$0xff] }
 0x23a   :  { %3781 = vmatpush1.msra.mxu0 %v731_v11  ;;  %3743 = vmatprep.subr.mxu1 %v630_v12  ;;  %v672_v11 = vld [vmem:[#allocation2 + $0x1218] sm:$0xff]  ;;  %v575_v12 = vld [vmem:[#allocation2 + $0xf10] sm:$0xff] }
 0x23b   :  { %3782 = vmatprep.subr.mxu0 %v726_v13  ;;  %3744 = vmatpush2.msra.mxu1 %v629_v18  ;;  %v671_v13 = vld [vmem:[#allocation2 + $0x1210] sm:$0xff]  ;;  %v858_v18 = vld [vmem:[#allocation2 + $0x17e8] sm:$0xff] }
 0x23c   :  { %3783 = vmatpush1.msra.mxu0 %v725_v20  ;;  %3745 = vmatprep.subr.mxu1 %v624_v22  ;;  %v954_v20 = vld [vmem:[#allocation2 + $0x1ae8] sm:$0xff]  ;;  %v857_v22 = vld [vmem:[#allocation2 + $0x17e0] sm:$0xff] }
 0x23d   :  { %3784 = vmatprep.subr.mxu0 %v720_v24  ;;  %3746 = vmatpush2.msra.mxu1 %v623_v30  ;;  %v953_v24 = vld [vmem:[#allocation2 + $0x1ae0] sm:$0xff]  ;;  %v852_v30 = vld [vmem:[#allocation2 + $0x17b8] sm:$0xff] }
 0x23e   :  { %3785 = vmatpush1.msra.mxu0 %v719_v31  ;;  %3747 = vmatprep.subr.mxu1 %v618_v33  ;;  %v948_v31 = vld [vmem:[#allocation2 + $0x1ab8] sm:$0xff]  ;;  %v851_v33 = vld [vmem:[#allocation2 + $0x17b0] sm:$0xff] }
 0x23f   :  { %3786 = vmatprep.subr.mxu0 %v714_v34  ;;  %3748 = vmatpush2.msra.mxu1 %v617_v37  ;;  %v947_v34 = vld [vmem:[#allocation2 + $0x1ab0] sm:$0xff]  ;;  %v846_v37 = vld [vmem:[#allocation2 + $0x1788] sm:$0xff] }
 0x240   :  { %3787 = vmatpush1.msra.mxu0 %v713_v38  ;;  %3749 = vmatprep.subr.mxu1 %v612_v39  ;;  %v942_v38 = vld [vmem:[#allocation2 + $0x1a88] sm:$0xff]  ;;  %v845_v39 = vld [vmem:[#allocation2 + $0x1780] sm:$0xff] }
 0x241   :  { %3788 = vmatprep.subr.mxu0 %v708_v40  ;;  %3750 = vmatpush2.msra.mxu1 %v611_v41  ;;  %v941_v40 = vld [vmem:[#allocation2 + $0x1a80] sm:$0xff]  ;;  %v840_v41 = vld [vmem:[#allocation2 + $0x1758] sm:$0xff] }
 0x242   :  { %3789 = vmatpush1.msra.mxu0 %v707_v44  ;;  %3751 = vmatprep.subr.mxu1 %v606_v45  ;;  %v936_v44 = vld [vmem:[#allocation2 + $0x1a58] sm:$0xff]  ;;  %v839_v45 = vld [vmem:[#allocation2 + $0x1750] sm:$0xff] }
 0x243   :  { %3790 = vmatprep.subr.mxu0 %v702_v46  ;;  %3752 = vmatpush2.msra.mxu1 %v605_v47  ;;  %v935_v46 = vld [vmem:[#allocation2 + $0x1a50] sm:$0xff]  ;;  %v834_v47 = vld [vmem:[#allocation2 + $0x1728] sm:$0xff] }
 0x244   :  { %3791 = vmatpush1.msra.mxu0 %v701_v49  ;;  %3753 = vmatprep.subr.mxu1 %v600_v50  ;;  %v930_v49 = vld [vmem:[#allocation2 + $0x1a28] sm:$0xff]  ;;  %v833_v50 = vld [vmem:[#allocation2 + $0x1720] sm:$0xff] }
 0x245   :  { %3792 = vmatprep.subr.mxu0 %v696_v51  ;;  %3754 = vmatpush2.msra.mxu1 %v599_v53  ;;  %v929_v51 = vld [vmem:[#allocation2 + $0x1a20] sm:$0xff]  ;;  %v828_v53 = vld [vmem:[#allocation2 + $0x16f8] sm:$0xff] }
 0x246   :  { %3793 = vmatpush1.msra.mxu0 %v695_v55  ;;  %3755 = vmatprep.subr.mxu1 %v594_v56  ;;  %v924_v55 = vld [vmem:[#allocation2 + $0x19f8] sm:$0xff]  ;;  %v827_v56 = vld [vmem:[#allocation2 + $0x16f0] sm:$0xff] }
 0x247   :  { %3794 = vmatprep.subr.mxu0 %v690_v58  ;;  %3756 = vmatpush2.msra.mxu1 %v593_v59  ;;  %v923_v58 = vld [vmem:[#allocation2 + $0x19f0] sm:$0xff]  ;;  %v822_v59 = vld [vmem:[#allocation2 + $0x16c8] sm:$0xff] }
 0x248   :  { %3795 = vmatpush1.msra.mxu0 %v689_v60  ;;  %3757 = vmatprep.subr.mxu1 %v588_v61  ;;  %v918_v60 = vld [vmem:[#allocation2 + $0x19c8] sm:$0xff]  ;;  %v821_v61 = vld [vmem:[#allocation2 + $0x16c0] sm:$0xff] }
 0x249   :  { %3796 = vmatprep.subr.mxu0 %v684_v63  ;;  %3758 = vmatpush2.msra.mxu1 %v587_v0  ;;  %v917_v63 = vld [vmem:[#allocation2 + $0x19c0] sm:$0xff]  ;;  %v816_v0 = vld [vmem:[#allocation2 + $0x1698] sm:$0xff] }
 0x24a   :  { %3797 = vmatpush1.msra.mxu0 %v683_v2  ;;  %3759 = vmatprep.subr.mxu1 %v582_v3  ;;  %v912_v2 = vld [vmem:[#allocation2 + $0x1998] sm:$0xff]  ;;  %v815_v3 = vld [vmem:[#allocation2 + $0x1690] sm:$0xff] }
 0x24b   :  { %3798 = vmatprep.subr.mxu0 %v678_v4  ;;  %3760 = vmatpush2.msra.mxu1 %v581_v5  ;;  %v911_v4 = vld [vmem:[#allocation2 + $0x1990] sm:$0xff]  ;;  %v810_v5 = vld [vmem:[#allocation2 + $0x1668] sm:$0xff] }
 0x24c   :  { %3799 = vmatpush1.msra.mxu0 %v677_v6  ;;  %3761 = vmatprep.subr.mxu1 %v576_v7  ;;  %v906_v6 = vld [vmem:[#allocation2 + $0x1968] sm:$0xff]  ;;  %v809_v7 = vld [vmem:[#allocation2 + $0x1660] sm:$0xff] }
 0x24d   :  { %3800 = vmatprep.subr.mxu0 %v672_v11  ;;  %3762 = vmatpush2.msra.mxu1 %v575_v12  ;;  %v905_v11 = vld [vmem:[#allocation2 + $0x1960] sm:$0xff]  ;;  %v804_v12 = vld [vmem:[#allocation2 + $0x1638] sm:$0xff] }
 0x24e   :  { %3763 = vmatprep.mubr.f32.mxu1 %v6170_v26  ;;  %3801 = vmatpush1.msra.mxu0 %v671_v13  ;;  %v900_v13 = vld [vmem:[#allocation2 + $0x1938] sm:$0xff] }
 0x24f   :  { %3764 = vmatmul.mubr.f32.vlgmr.msra.gmra.mxu1 %v6163_v16  ;;  %3802 = vmatprep.subr.mxu0 %v858_v18  ;;  %v803_v18 = vld [vmem:[#allocation2 + $0x1630] sm:$0xff] }
 0x250   :  { %3841 = vmatprep.subr.mxu1 %v954_v20  ;;  %3803 = vmatpush2.msra.mxu0 %v857_v22  ;;  %v899_v20 = vld [vmem:[#allocation2 + $0x1930] sm:$0xff]  ;;  %v798_v22 = vld [vmem:[#allocation2 + $0x1608] sm:$0xff] }
 0x251   :  { %3842 = vmatpush1.msra.mxu1 %v953_v24  ;;  %3804 = vmatprep.subr.mxu0 %v852_v30  ;;  %v894_v24 = vld [vmem:[#allocation2 + $0x1908] sm:$0xff]  ;;  %v797_v30 = vld [vmem:[#allocation2 + $0x1600] sm:$0xff] }
 0x252   :  { %3843 = vmatprep.subr.mxu1 %v948_v31  ;;  %3805 = vmatpush2.msra.mxu0 %v851_v33  ;;  %v893_v31 = vld [vmem:[#allocation2 + $0x1900] sm:$0xff]  ;;  %v792_v33 = vld [vmem:[#allocation2 + $0x15d8] sm:$0xff] }
 0x253   :  { %3844 = vmatpush1.msra.mxu1 %v947_v34  ;;  %3806 = vmatprep.subr.mxu0 %v846_v37  ;;  %v888_v34 = vld [vmem:[#allocation2 + $0x18d8] sm:$0xff]  ;;  %v791_v37 = vld [vmem:[#allocation2 + $0x15d0] sm:$0xff] }
 0x254   :  { %3845 = vmatprep.subr.mxu1 %v942_v38  ;;  %3807 = vmatpush2.msra.mxu0 %v845_v39  ;;  %v887_v38 = vld [vmem:[#allocation2 + $0x18d0] sm:$0xff]  ;;  %v786_v39 = vld [vmem:[#allocation2 + $0x15a8] sm:$0xff] }
 0x255   :  { %3846 = vmatpush1.msra.mxu1 %v941_v40  ;;  %3808 = vmatprep.subr.mxu0 %v840_v41  ;;  %v882_v40 = vld [vmem:[#allocation2 + $0x18a8] sm:$0xff]  ;;  %v785_v41 = vld [vmem:[#allocation2 + $0x15a0] sm:$0xff] }
 0x256   :  { %3847 = vmatprep.subr.mxu1 %v936_v44  ;;  %3809 = vmatpush2.msra.mxu0 %v839_v45  ;;  %v881_v44 = vld [vmem:[#allocation2 + $0x18a0] sm:$0xff]  ;;  %v780_v45 = vld [vmem:[#allocation2 + $0x1578] sm:$0xff] }
 0x257   :  { %3848 = vmatpush1.msra.mxu1 %v935_v46  ;;  %3810 = vmatprep.subr.mxu0 %v834_v47  ;;  %v876_v46 = vld [vmem:[#allocation2 + $0x1878] sm:$0xff]  ;;  %v779_v47 = vld [vmem:[#allocation2 + $0x1570] sm:$0xff] }
 0x258   :  { %3849 = vmatprep.subr.mxu1 %v930_v49  ;;  %3811 = vmatpush2.msra.mxu0 %v833_v50  ;;  %v875_v49 = vld [vmem:[#allocation2 + $0x1870] sm:$0xff]  ;;  %v774_v50 = vld [vmem:[#allocation2 + $0x1548] sm:$0xff] }
 0x259   :  { %3850 = vmatpush1.msra.mxu1 %v929_v51  ;;  %3812 = vmatprep.subr.mxu0 %v828_v53  ;;  %v870_v51 = vld [vmem:[#allocation2 + $0x1848] sm:$0xff]  ;;  %v773_v53 = vld [vmem:[#allocation2 + $0x1540] sm:$0xff] }
 0x25a   :  { %3851 = vmatprep.subr.mxu1 %v924_v55  ;;  %3813 = vmatpush2.msra.mxu0 %v827_v56  ;;  %v869_v55 = vld [vmem:[#allocation2 + $0x1840] sm:$0xff]  ;;  %v768_v56 = vld [vmem:[#allocation2 + $0x1518] sm:$0xff] }
 0x25b   :  { %3852 = vmatpush1.msra.mxu1 %v923_v58  ;;  %3814 = vmatprep.subr.mxu0 %v822_v59  ;;  %v864_v58 = vld [vmem:[#allocation2 + $0x1818] sm:$0xff]  ;;  %v767_v59 = vld [vmem:[#allocation2 + $0x1510] sm:$0xff] }
 0x25c   :  { %3853 = vmatprep.subr.mxu1 %v918_v60  ;;  %3815 = vmatpush2.msra.mxu0 %v821_v61  ;;  %v863_v60 = vld [vmem:[#allocation2 + $0x1810] sm:$0xff]  ;;  %v1050_v61 = vld [vmem:[#allocation2 + $0x1de8] sm:$0xff] }
 0x25d   :  { %3854 = vmatpush1.msra.mxu1 %v917_v63  ;;  %3816 = vmatprep.subr.mxu0 %v816_v0  ;;  %v1146_v63 = vld [vmem:[#allocation2 + $0x20e8] sm:$0xff]  ;;  %v1049_v0 = vld [vmem:[#allocation2 + $0x1de0] sm:$0xff] }
 0x25e   :  { %3855 = vmatprep.subr.mxu1 %v912_v2  ;;  %3817 = vmatpush2.msra.mxu0 %v815_v3  ;;  %v1145_v2 = vld [vmem:[#allocation2 + $0x20e0] sm:$0xff]  ;;  %v1044_v3 = vld [vmem:[#allocation2 + $0x1db8] sm:$0xff] }
 0x25f   :  { %3856 = vmatpush1.msra.mxu1 %v911_v4  ;;  %3818 = vmatprep.subr.mxu0 %v810_v5  ;;  %v1140_v4 = vld [vmem:[#allocation2 + $0x20b8] sm:$0xff]  ;;  %v1043_v5 = vld [vmem:[#allocation2 + $0x1db0] sm:$0xff] }
 0x260   :  { %3857 = vmatprep.subr.mxu1 %v906_v6  ;;  %3819 = vmatpush2.msra.mxu0 %v809_v7  ;;  %v1139_v6 = vld [vmem:[#allocation2 + $0x20b0] sm:$0xff]  ;;  %v1038_v7 = vld [vmem:[#allocation2 + $0x1d88] sm:$0xff] }
 0x261   :  { %3858 = vmatpush1.msra.mxu1 %v905_v11  ;;  %3820 = vmatprep.subr.mxu0 %v804_v12  ;;  %v1134_v11 = vld [vmem:[#allocation2 + $0x2088] sm:$0xff]  ;;  %v1037_v12 = vld [vmem:[#allocation2 + $0x1d80] sm:$0xff] }
 0x262   :  { %3859 = vmatprep.subr.mxu1 %v900_v13  ;;  %3821 = vmatpush2.msra.mxu0 %v803_v18  ;;  %v1133_v13 = vld [vmem:[#allocation2 + $0x2080] sm:$0xff]  ;;  %v1032_v18 = vld [vmem:[#allocation2 + $0x1d58] sm:$0xff] }
 0x263   :  { %3860 = vmatpush1.msra.mxu1 %v899_v20  ;;  %3822 = vmatprep.subr.mxu0 %v798_v22  ;;  %v1128_v20 = vld [vmem:[#allocation2 + $0x2058] sm:$0xff]  ;;  %v1031_v22 = vld [vmem:[#allocation2 + $0x1d50] sm:$0xff] }
 0x264   :  { %3861 = vmatprep.subr.mxu1 %v894_v24  ;;  %3823 = vmatpush2.msra.mxu0 %v797_v30  ;;  %v1127_v24 = vld [vmem:[#allocation2 + $0x2050] sm:$0xff]  ;;  %v1026_v30 = vld [vmem:[#allocation2 + $0x1d28] sm:$0xff] }
 0x265   :  { %3862 = vmatpush1.msra.mxu1 %v893_v31  ;;  %3824 = vmatprep.subr.mxu0 %v792_v33  ;;  %v1122_v31 = vld [vmem:[#allocation2 + $0x2028] sm:$0xff]  ;;  %v1025_v33 = vld [vmem:[#allocation2 + $0x1d20] sm:$0xff] }
 0x266   :  { %3863 = vmatprep.subr.mxu1 %v888_v34  ;;  %3825 = vmatpush2.msra.mxu0 %v791_v37  ;;  %v1121_v34 = vld [vmem:[#allocation2 + $0x2020] sm:$0xff]  ;;  %v1020_v37 = vld [vmem:[#allocation2 + $0x1cf8] sm:$0xff] }
 0x267   :  { %3864 = vmatpush1.msra.mxu1 %v887_v38  ;;  %3826 = vmatprep.subr.mxu0 %v786_v39  ;;  %v1116_v38 = vld [vmem:[#allocation2 + $0x1ff8] sm:$0xff]  ;;  %v1019_v39 = vld [vmem:[#allocation2 + $0x1cf0] sm:$0xff] }
 0x268   :  { %3865 = vmatprep.subr.mxu1 %v882_v40  ;;  %3827 = vmatpush2.msra.mxu0 %v785_v41  ;;  %v1115_v40 = vld [vmem:[#allocation2 + $0x1ff0] sm:$0xff]  ;;  %v1014_v41 = vld [vmem:[#allocation2 + $0x1cc8] sm:$0xff] }
 0x269   :  { %3866 = vmatpush1.msra.mxu1 %v881_v44  ;;  %3828 = vmatprep.subr.mxu0 %v780_v45  ;;  %v1110_v44 = vld [vmem:[#allocation2 + $0x1fc8] sm:$0xff]  ;;  %v1013_v45 = vld [vmem:[#allocation2 + $0x1cc0] sm:$0xff] }
 0x26a   :  { %3867 = vmatprep.subr.mxu1 %v876_v46  ;;  %3829 = vmatpush2.msra.mxu0 %v779_v47  ;;  %v1109_v46 = vld [vmem:[#allocation2 + $0x1fc0] sm:$0xff]  ;;  %v1008_v47 = vld [vmem:[#allocation2 + $0x1c98] sm:$0xff] }
 0x26b   :  { %3868 = vmatpush1.msra.mxu1 %v875_v49  ;;  %3830 = vmatprep.subr.mxu0 %v774_v50  ;;  %v1104_v49 = vld [vmem:[#allocation2 + $0x1f98] sm:$0xff]  ;;  %v1007_v50 = vld [vmem:[#allocation2 + $0x1c90] sm:$0xff] }
 0x26c   :  { %3869 = vmatprep.subr.mxu1 %v870_v51  ;;  %3831 = vmatpush2.msra.mxu0 %v773_v53  ;;  %v1103_v51 = vld [vmem:[#allocation2 + $0x1f90] sm:$0xff]  ;;  %v1002_v53 = vld [vmem:[#allocation2 + $0x1c68] sm:$0xff] }
 0x26d   :  { %3870 = vmatpush1.msra.mxu1 %v869_v55  ;;  %3832 = vmatprep.subr.mxu0 %v768_v56  ;;  %v1098_v55 = vld [vmem:[#allocation2 + $0x1f68] sm:$0xff]  ;;  %v1001_v56 = vld [vmem:[#allocation2 + $0x1c60] sm:$0xff] }
 0x26e   :  { %3871 = vmatprep.subr.mxu1 %v864_v58  ;;  %3833 = vmatpush2.msra.mxu0 %v767_v59  ;;  %v1097_v58 = vld [vmem:[#allocation2 + $0x1f60] sm:$0xff]  ;;  %v996_v59 = vld [vmem:[#allocation2 + $0x1c38] sm:$0xff] }
 0x26f   :  { %3834 = vmatprep.mubr.f32.mxu0 %v6174_v29  ;;  %3872 = vmatpush1.msra.mxu1 %v863_v60  ;;  %v1092_v60 = vld [vmem:[#allocation2 + $0x1f38] sm:$0xff] }
 0x270   :  { %3835 = vmatmul.mubr.f32.vlgmr.msra.gmra.mxu0 %v6166_v21  ;;  %3873 = vmatprep.subr.mxu1 %v1050_v61  ;;  %v995_v61 = vld [vmem:[#allocation2 + $0x1c30] sm:$0xff] }
 0x271   :  { %3912 = vmatprep.subr.mxu0 %v1146_v63  ;;  %3874 = vmatpush2.msra.mxu1 %v1049_v0  ;;  %v1091_v63 = vld [vmem:[#allocation2 + $0x1f30] sm:$0xff]  ;;  %v990_v0 = vld [vmem:[#allocation2 + $0x1c08] sm:$0xff] }
 0x272   :  { %3913 = vmatpush1.msra.mxu0 %v1145_v2  ;;  %3875 = vmatprep.subr.mxu1 %v1044_v3  ;;  %v1086_v2 = vld [vmem:[#allocation2 + $0x1f08] sm:$0xff]  ;;  %v989_v3 = vld [vmem:[#allocation2 + $0x1c00] sm:$0xff] }
 0x273   :  { %3914 = vmatprep.subr.mxu0 %v1140_v4  ;;  %3876 = vmatpush2.msra.mxu1 %v1043_v5  ;;  %v1085_v4 = vld [vmem:[#allocation2 + $0x1f00] sm:$0xff]  ;;  %v984_v5 = vld [vmem:[#allocation2 + $0x1bd8] sm:$0xff] }
 0x274   :  { %3915 = vmatpush1.msra.mxu0 %v1139_v6  ;;  %3877 = vmatprep.subr.mxu1 %v1038_v7  ;;  %v1080_v6 = vld [vmem:[#allocation2 + $0x1ed8] sm:$0xff]  ;;  %v983_v7 = vld [vmem:[#allocation2 + $0x1bd0] sm:$0xff] }
 0x275   :  { %3916 = vmatprep.subr.mxu0 %v1134_v11  ;;  %3878 = vmatpush2.msra.mxu1 %v1037_v12  ;;  %v1079_v11 = vld [vmem:[#allocation2 + $0x1ed0] sm:$0xff]  ;;  %v978_v12 = vld [vmem:[#allocation2 + $0x1ba8] sm:$0xff] }
 0x276   :  { %3917 = vmatpush1.msra.mxu0 %v1133_v13  ;;  %3879 = vmatprep.subr.mxu1 %v1032_v18  ;;  %v1074_v13 = vld [vmem:[#allocation2 + $0x1ea8] sm:$0xff]  ;;  %v977_v18 = vld [vmem:[#allocation2 + $0x1ba0] sm:$0xff] }
 0x277   :  { %3918 = vmatprep.subr.mxu0 %v1128_v20  ;;  %3880 = vmatpush2.msra.mxu1 %v1031_v22  ;;  %v1073_v20 = vld [vmem:[#allocation2 + $0x1ea0] sm:$0xff]  ;;  %v972_v22 = vld [vmem:[#allocation2 + $0x1b78] sm:$0xff] }
 0x278   :  { %3919 = vmatpush1.msra.mxu0 %v1127_v24  ;;  %3881 = vmatprep.subr.mxu1 %v1026_v30  ;;  %v1068_v24 = vld [vmem:[#allocation2 + $0x1e78] sm:$0xff]  ;;  %v971_v30 = vld [vmem:[#allocation2 + $0x1b70] sm:$0xff] }
 0x279   :  { %3920 = vmatprep.subr.mxu0 %v1122_v31  ;;  %3882 = vmatpush2.msra.mxu1 %v1025_v33  ;;  %v1067_v31 = vld [vmem:[#allocation2 + $0x1e70] sm:$0xff]  ;;  %v966_v33 = vld [vmem:[#allocation2 + $0x1b48] sm:$0xff] }
 0x27a   :  { %3921 = vmatpush1.msra.mxu0 %v1121_v34  ;;  %3883 = vmatprep.subr.mxu1 %v1020_v37  ;;  %v1062_v34 = vld [vmem:[#allocation2 + $0x1e48] sm:$0xff]  ;;  %v965_v37 = vld [vmem:[#allocation2 + $0x1b40] sm:$0xff] }
 0x27b   :  { %3922 = vmatprep.subr.mxu0 %v1116_v38  ;;  %3884 = vmatpush2.msra.mxu1 %v1019_v39  ;;  %v1061_v38 = vld [vmem:[#allocation2 + $0x1e40] sm:$0xff]  ;;  %v960_v39 = vld [vmem:[#allocation2 + $0x1b18] sm:$0xff] }
 0x27c   :  { %3923 = vmatpush1.msra.mxu0 %v1115_v40  ;;  %3885 = vmatprep.subr.mxu1 %v1014_v41  ;;  %v1056_v40 = vld [vmem:[#allocation2 + $0x1e18] sm:$0xff]  ;;  %v959_v41 = vld [vmem:[#allocation2 + $0x1b10] sm:$0xff] }
 0x27d   :  { %3924 = vmatprep.subr.mxu0 %v1110_v44  ;;  %3886 = vmatpush2.msra.mxu1 %v1013_v45  ;;  %v1055_v44 = vld [vmem:[#allocation2 + $0x1e10] sm:$0xff]  ;;  %v1242_v45 = vld [vmem:[#allocation2 + $0x23e8] sm:$0xff] }
 0x27e   :  { %3925 = vmatpush1.msra.mxu0 %v1109_v46  ;;  %3887 = vmatprep.subr.mxu1 %v1008_v47  ;;  %v1338_v46 = vld [vmem:[#allocation2 + $0x26e8] sm:$0xff]  ;;  %v1241_v47 = vld [vmem:[#allocation2 + $0x23e0] sm:$0xff] }
 0x27f   :  { %3926 = vmatprep.subr.mxu0 %v1104_v49  ;;  %3888 = vmatpush2.msra.mxu1 %v1007_v50  ;;  %v1337_v49 = vld [vmem:[#allocation2 + $0x26e0] sm:$0xff]  ;;  %v1236_v50 = vld [vmem:[#allocation2 + $0x23b8] sm:$0xff] }
 0x280   :  { %3927 = vmatpush1.msra.mxu0 %v1103_v51  ;;  %3889 = vmatprep.subr.mxu1 %v1002_v53  ;;  %v1332_v51 = vld [vmem:[#allocation2 + $0x26b8] sm:$0xff]  ;;  %v1235_v53 = vld [vmem:[#allocation2 + $0x23b0] sm:$0xff] }
 0x281   :  { %3928 = vmatprep.subr.mxu0 %v1098_v55  ;;  %3890 = vmatpush2.msra.mxu1 %v1001_v56  ;;  %v1331_v55 = vld [vmem:[#allocation2 + $0x26b0] sm:$0xff]  ;;  %v1230_v56 = vld [vmem:[#allocation2 + $0x2388] sm:$0xff] }
 0x282   :  { %3929 = vmatpush1.msra.mxu0 %v1097_v58  ;;  %3891 = vmatprep.subr.mxu1 %v996_v59  ;;  %v1326_v58 = vld [vmem:[#allocation2 + $0x2688] sm:$0xff]  ;;  %v1229_v59 = vld [vmem:[#allocation2 + $0x2380] sm:$0xff] }
 0x283   :  { %3930 = vmatprep.subr.mxu0 %v1092_v60  ;;  %3892 = vmatpush2.msra.mxu1 %v995_v61  ;;  %v1325_v60 = vld [vmem:[#allocation2 + $0x2680] sm:$0xff]  ;;  %v1224_v61 = vld [vmem:[#allocation2 + $0x2358] sm:$0xff] }
 0x284   :  { %3931 = vmatpush1.msra.mxu0 %v1091_v63  ;;  %3893 = vmatprep.subr.mxu1 %v990_v0  ;;  %v1320_v63 = vld [vmem:[#allocation2 + $0x2658] sm:$0xff]  ;;  %v1223_v0 = vld [vmem:[#allocation2 + $0x2350] sm:$0xff] }
 0x285   :  { %3932 = vmatprep.subr.mxu0 %v1086_v2  ;;  %3894 = vmatpush2.msra.mxu1 %v989_v3  ;;  %v1319_v2 = vld [vmem:[#allocation2 + $0x2650] sm:$0xff]  ;;  %v1218_v3 = vld [vmem:[#allocation2 + $0x2328] sm:$0xff] }
 0x286   :  { %3933 = vmatpush1.msra.mxu0 %v1085_v4  ;;  %3895 = vmatprep.subr.mxu1 %v984_v5  ;;  %v1314_v4 = vld [vmem:[#allocation2 + $0x2628] sm:$0xff]  ;;  %v1217_v5 = vld [vmem:[#allocation2 + $0x2320] sm:$0xff] }
 0x287   :  { %3934 = vmatprep.subr.mxu0 %v1080_v6  ;;  %3896 = vmatpush2.msra.mxu1 %v983_v7  ;;  %v1313_v6 = vld [vmem:[#allocation2 + $0x2620] sm:$0xff]  ;;  %v1212_v7 = vld [vmem:[#allocation2 + $0x22f8] sm:$0xff] }
 0x288   :  { %3935 = vmatpush1.msra.mxu0 %v1079_v11  ;;  %3897 = vmatprep.subr.mxu1 %v978_v12  ;;  %v1308_v11 = vld [vmem:[#allocation2 + $0x25f8] sm:$0xff]  ;;  %v1211_v12 = vld [vmem:[#allocation2 + $0x22f0] sm:$0xff] }
 0x289   :  { %3936 = vmatprep.subr.mxu0 %v1074_v13  ;;  %3898 = vmatpush2.msra.mxu1 %v977_v18  ;;  %v1307_v13 = vld [vmem:[#allocation2 + $0x25f0] sm:$0xff]  ;;  %v1206_v18 = vld [vmem:[#allocation2 + $0x22c8] sm:$0xff] }
 0x28a   :  { %3937 = vmatpush1.msra.mxu0 %v1073_v20  ;;  %3899 = vmatprep.subr.mxu1 %v972_v22  ;;  %v1302_v20 = vld [vmem:[#allocation2 + $0x25c8] sm:$0xff]  ;;  %v1205_v22 = vld [vmem:[#allocation2 + $0x22c0] sm:$0xff] }
 0x28b   :  { %3938 = vmatprep.subr.mxu0 %v1068_v24  ;;  %3900 = vmatpush2.msra.mxu1 %v971_v30  ;;  %v1301_v24 = vld [vmem:[#allocation2 + $0x25c0] sm:$0xff]  ;;  %v1200_v30 = vld [vmem:[#allocation2 + $0x2298] sm:$0xff] }
 0x28c   :  { %3939 = vmatpush1.msra.mxu0 %v1067_v31  ;;  %3901 = vmatprep.subr.mxu1 %v966_v33  ;;  %v1296_v31 = vld [vmem:[#allocation2 + $0x2598] sm:$0xff]  ;;  %v1199_v33 = vld [vmem:[#allocation2 + $0x2290] sm:$0xff] }
 0x28d   :  { %3940 = vmatprep.subr.mxu0 %v1062_v34  ;;  %3902 = vmatpush2.msra.mxu1 %v965_v37  ;;  %v1295_v34 = vld [vmem:[#allocation2 + $0x2590] sm:$0xff]  ;;  %v1194_v37 = vld [vmem:[#allocation2 + $0x2268] sm:$0xff] }
 0x28e   :  { %3941 = vmatpush1.msra.mxu0 %v1061_v38  ;;  %3903 = vmatprep.subr.mxu1 %v960_v39  ;;  %v1290_v38 = vld [vmem:[#allocation2 + $0x2568] sm:$0xff]  ;;  %v1193_v39 = vld [vmem:[#allocation2 + $0x2260] sm:$0xff] }
 0x28f   :  { %3942 = vmatprep.subr.mxu0 %v1056_v40  ;;  %3904 = vmatpush2.msra.mxu1 %v959_v41  ;;  %v1289_v40 = vld [vmem:[#allocation2 + $0x2560] sm:$0xff]  ;;  %v1188_v41 = vld [vmem:[#allocation2 + $0x2238] sm:$0xff] }
 0x290   :  { %3905 = vmatprep.mubr.f32.mxu1 %v6191_v54  ;;  %3943 = vmatpush1.msra.mxu0 %v1055_v44  ;;  %v1284_v44 = vld [vmem:[#allocation2 + $0x2538] sm:$0xff] }
 0x291   :  { %3906 = vmatmul.mubr.f32.vlgmr.msra.gmra.mxu1 %v6184_v43  ;;  %3944 = vmatprep.subr.mxu0 %v1242_v45  ;;  %v1187_v45 = vld [vmem:[#allocation2 + $0x2230] sm:$0xff] }
 0x292   :  { %3983 = vmatprep.subr.mxu1 %v1338_v46  ;;  %3945 = vmatpush2.msra.mxu0 %v1241_v47  ;;  %v1283_v46 = vld [vmem:[#allocation2 + $0x2530] sm:$0xff]  ;;  %v1182_v47 = vld [vmem:[#allocation2 + $0x2208] sm:$0xff] }
 0x293   :  { %3984 = vmatpush1.msra.mxu1 %v1337_v49  ;;  %3946 = vmatprep.subr.mxu0 %v1236_v50  ;;  %v1278_v49 = vld [vmem:[#allocation2 + $0x2508] sm:$0xff]  ;;  %v1181_v50 = vld [vmem:[#allocation2 + $0x2200] sm:$0xff] }
 0x294   :  { %3985 = vmatprep.subr.mxu1 %v1332_v51  ;;  %3947 = vmatpush2.msra.mxu0 %v1235_v53  ;;  %v1277_v51 = vld [vmem:[#allocation2 + $0x2500] sm:$0xff]  ;;  %v1176_v53 = vld [vmem:[#allocation2 + $0x21d8] sm:$0xff] }
 0x295   :  { %3986 = vmatpush1.msra.mxu1 %v1331_v55  ;;  %3948 = vmatprep.subr.mxu0 %v1230_v56  ;;  %v1272_v55 = vld [vmem:[#allocation2 + $0x24d8] sm:$0xff]  ;;  %v1175_v56 = vld [vmem:[#allocation2 + $0x21d0] sm:$0xff] }
 0x296   :  { %3987 = vmatprep.subr.mxu1 %v1326_v58  ;;  %3949 = vmatpush2.msra.mxu0 %v1229_v59  ;;  %v1271_v58 = vld [vmem:[#allocation2 + $0x24d0] sm:$0xff]  ;;  %v1170_v59 = vld [vmem:[#allocation2 + $0x21a8] sm:$0xff] }
 0x297   :  { %3988 = vmatpush1.msra.mxu1 %v1325_v60  ;;  %3950 = vmatprep.subr.mxu0 %v1224_v61  ;;  %v1266_v60 = vld [vmem:[#allocation2 + $0x24a8] sm:$0xff]  ;;  %v1169_v61 = vld [vmem:[#allocation2 + $0x21a0] sm:$0xff] }
 0x298   :  { %3989 = vmatprep.subr.mxu1 %v1320_v63  ;;  %3951 = vmatpush2.msra.mxu0 %v1223_v0  ;;  %v1265_v63 = vld [vmem:[#allocation2 + $0x24a0] sm:$0xff]  ;;  %v1164_v0 = vld [vmem:[#allocation2 + $0x2178] sm:$0xff] }
 0x299   :  { %3990 = vmatpush1.msra.mxu1 %v1319_v2  ;;  %3952 = vmatprep.subr.mxu0 %v1218_v3  ;;  %v1260_v2 = vld [vmem:[#allocation2 + $0x2478] sm:$0xff]  ;;  %v1163_v3 = vld [vmem:[#allocation2 + $0x2170] sm:$0xff] }
 0x29a   :  { %3991 = vmatprep.subr.mxu1 %v1314_v4  ;;  %3953 = vmatpush2.msra.mxu0 %v1217_v5  ;;  %v1259_v4 = vld [vmem:[#allocation2 + $0x2470] sm:$0xff]  ;;  %v1158_v5 = vld [vmem:[#allocation2 + $0x2148] sm:$0xff] }
 0x29b   :  { %3992 = vmatpush1.msra.mxu1 %v1313_v6  ;;  %3954 = vmatprep.subr.mxu0 %v1212_v7  ;;  %v1254_v6 = vld [vmem:[#allocation2 + $0x2448] sm:$0xff]  ;;  %v1157_v7 = vld [vmem:[#allocation2 + $0x2140] sm:$0xff] }
 0x29c   :  { %3993 = vmatprep.subr.mxu1 %v1308_v11  ;;  %3955 = vmatpush2.msra.mxu0 %v1211_v12  ;;  %v1253_v11 = vld [vmem:[#allocation2 + $0x2440] sm:$0xff]  ;;  %v1152_v12 = vld [vmem:[#allocation2 + $0x2118] sm:$0xff] }
 0x29d   :  { %3994 = vmatpush1.msra.mxu1 %v1307_v13  ;;  %3956 = vmatprep.subr.mxu0 %v1206_v18  ;;  %v1248_v13 = vld [vmem:[#allocation2 + $0x2418] sm:$0xff]  ;;  %v1151_v18 = vld [vmem:[#allocation2 + $0x2110] sm:$0xff] }
 0x29e   :  { %3995 = vmatprep.subr.mxu1 %v1302_v20  ;;  %3957 = vmatpush2.msra.mxu0 %v1205_v22  ;;  %v1247_v20 = vld [vmem:[#allocation2 + $0x2410] sm:$0xff]  ;;  %v1434_v22 = vld [vmem:[#allocation2 + $0x29e8] sm:$0xff] }
 0x29f   :  { %3996 = vmatpush1.msra.mxu1 %v1301_v24  ;;  %3958 = vmatprep.subr.mxu0 %v1200_v30  ;;  %v1530_v24 = vld [vmem:[#allocation2 + $0x2ce8] sm:$0xff]  ;;  %v1433_v30 = vld [vmem:[#allocation2 + $0x29e0] sm:$0xff] }
 0x2a0   :  { %3997 = vmatprep.subr.mxu1 %v1296_v31  ;;  %3959 = vmatpush2.msra.mxu0 %v1199_v33  ;;  %v1529_v31 = vld [vmem:[#allocation2 + $0x2ce0] sm:$0xff]  ;;  %v1428_v33 = vld [vmem:[#allocation2 + $0x29b8] sm:$0xff] }
 0x2a1   :  { %3998 = vmatpush1.msra.mxu1 %v1295_v34  ;;  %3960 = vmatprep.subr.mxu0 %v1194_v37  ;;  %v1524_v34 = vld [vmem:[#allocation2 + $0x2cb8] sm:$0xff]  ;;  %v1427_v37 = vld [vmem:[#allocation2 + $0x29b0] sm:$0xff] }
 0x2a2   :  { %3999 = vmatprep.subr.mxu1 %v1290_v38  ;;  %3961 = vmatpush2.msra.mxu0 %v1193_v39  ;;  %v1523_v38 = vld [vmem:[#allocation2 + $0x2cb0] sm:$0xff]  ;;  %v1422_v39 = vld [vmem:[#allocation2 + $0x2988] sm:$0xff] }
 0x2a3   :  { %4000 = vmatpush1.msra.mxu1 %v1289_v40  ;;  %3962 = vmatprep.subr.mxu0 %v1188_v41  ;;  %v1518_v40 = vld [vmem:[#allocation2 + $0x2c88] sm:$0xff]  ;;  %v1421_v41 = vld [vmem:[#allocation2 + $0x2980] sm:$0xff] }
 0x2a4   :  { %4001 = vmatprep.subr.mxu1 %v1284_v44  ;;  %3963 = vmatpush2.msra.mxu0 %v1187_v45  ;;  %v1517_v44 = vld [vmem:[#allocation2 + $0x2c80] sm:$0xff]  ;;  %v1416_v45 = vld [vmem:[#allocation2 + $0x2958] sm:$0xff] }
 0x2a5   :  { %4002 = vmatpush1.msra.mxu1 %v1283_v46  ;;  %3964 = vmatprep.subr.mxu0 %v1182_v47  ;;  %v1512_v46 = vld [vmem:[#allocation2 + $0x2c58] sm:$0xff]  ;;  %v1415_v47 = vld [vmem:[#allocation2 + $0x2950] sm:$0xff] }
 0x2a6   :  { %4003 = vmatprep.subr.mxu1 %v1278_v49  ;;  %3965 = vmatpush2.msra.mxu0 %v1181_v50  ;;  %v1511_v49 = vld [vmem:[#allocation2 + $0x2c50] sm:$0xff]  ;;  %v1410_v50 = vld [vmem:[#allocation2 + $0x2928] sm:$0xff] }
 0x2a7   :  { %4004 = vmatpush1.msra.mxu1 %v1277_v51  ;;  %3966 = vmatprep.subr.mxu0 %v1176_v53  ;;  %v1506_v51 = vld [vmem:[#allocation2 + $0x2c28] sm:$0xff]  ;;  %v1409_v53 = vld [vmem:[#allocation2 + $0x2920] sm:$0xff] }
 0x2a8   :  { %4005 = vmatprep.subr.mxu1 %v1272_v55  ;;  %3967 = vmatpush2.msra.mxu0 %v1175_v56  ;;  %v1505_v55 = vld [vmem:[#allocation2 + $0x2c20] sm:$0xff]  ;;  %v1404_v56 = vld [vmem:[#allocation2 + $0x28f8] sm:$0xff] }
 0x2a9   :  { %4006 = vmatpush1.msra.mxu1 %v1271_v58  ;;  %3968 = vmatprep.subr.mxu0 %v1170_v59  ;;  %v1500_v58 = vld [vmem:[#allocation2 + $0x2bf8] sm:$0xff]  ;;  %v1403_v59 = vld [vmem:[#allocation2 + $0x28f0] sm:$0xff] }
 0x2aa   :  { %4007 = vmatprep.subr.mxu1 %v1266_v60  ;;  %3969 = vmatpush2.msra.mxu0 %v1169_v61  ;;  %v1499_v60 = vld [vmem:[#allocation2 + $0x2bf0] sm:$0xff]  ;;  %v1398_v61 = vld [vmem:[#allocation2 + $0x28c8] sm:$0xff] }
 0x2ab   :  { %4008 = vmatpush1.msra.mxu1 %v1265_v63  ;;  %3970 = vmatprep.subr.mxu0 %v1164_v0  ;;  %v1494_v63 = vld [vmem:[#allocation2 + $0x2bc8] sm:$0xff]  ;;  %v1397_v0 = vld [vmem:[#allocation2 + $0x28c0] sm:$0xff] }
 0x2ac   :  { %4009 = vmatprep.subr.mxu1 %v1260_v2  ;;  %3971 = vmatpush2.msra.mxu0 %v1163_v3  ;;  %v1493_v2 = vld [vmem:[#allocation2 + $0x2bc0] sm:$0xff]  ;;  %v1392_v3 = vld [vmem:[#allocation2 + $0x2898] sm:$0xff] }
 0x2ad   :  { %4010 = vmatpush1.msra.mxu1 %v1259_v4  ;;  %3972 = vmatprep.subr.mxu0 %v1158_v5  ;;  %v1488_v4 = vld [vmem:[#allocation2 + $0x2b98] sm:$0xff]  ;;  %v1391_v5 = vld [vmem:[#allocation2 + $0x2890] sm:$0xff] }
 0x2ae   :  { %4011 = vmatprep.subr.mxu1 %v1254_v6  ;;  %3973 = vmatpush2.msra.mxu0 %v1157_v7  ;;  %v1487_v6 = vld [vmem:[#allocation2 + $0x2b90] sm:$0xff]  ;;  %v1386_v7 = vld [vmem:[#allocation2 + $0x2868] sm:$0xff] }
 0x2af   :  { %4012 = vmatpush1.msra.mxu1 %v1253_v11  ;;  %3974 = vmatprep.subr.mxu0 %v1152_v12  ;;  %v1482_v11 = vld [vmem:[#allocation2 + $0x2b68] sm:$0xff]  ;;  %v1385_v12 = vld [vmem:[#allocation2 + $0x2860] sm:$0xff] }
 0x2b0   :  { %4013 = vmatprep.subr.mxu1 %v1248_v13  ;;  %3975 = vmatpush2.msra.mxu0 %v1151_v18  ;;  %v1481_v13 = vld [vmem:[#allocation2 + $0x2b60] sm:$0xff]  ;;  %v1380_v18 = vld [vmem:[#allocation2 + $0x2838] sm:$0xff] }
 0x2b1   :  { %3976 = vmatprep.mubr.f32.mxu0 %v6195_v57  ;;  %4014 = vmatpush1.msra.mxu1 %v1247_v20  ;;  %v1476_v20 = vld [vmem:[#allocation2 + $0x2b38] sm:$0xff] }
 0x2b2   :  { %3977 = vmatmul.mubr.f32.vlgmr.msra.gmra.mxu0 %v6187_v48  ;;  %4015 = vmatprep.subr.mxu1 %v1434_v22  ;;  %v1379_v22 = vld [vmem:[#allocation2 + $0x2830] sm:$0xff] }
 0x2b3   :  { %4054 = vmatprep.subr.mxu0 %v1530_v24  ;;  %4016 = vmatpush2.msra.mxu1 %v1433_v30  ;;  %v1475_v24 = vld [vmem:[#allocation2 + $0x2b30] sm:$0xff]  ;;  %v1374_v30 = vld [vmem:[#allocation2 + $0x2808] sm:$0xff] }
 0x2b4   :  { %4055 = vmatpush1.msra.mxu0 %v1529_v31  ;;  %4017 = vmatprep.subr.mxu1 %v1428_v33  ;;  %v1470_v31 = vld [vmem:[#allocation2 + $0x2b08] sm:$0xff]  ;;  %v1373_v33 = vld [vmem:[#allocation2 + $0x2800] sm:$0xff] }
 0x2b5   :  { %4056 = vmatprep.subr.mxu0 %v1524_v34  ;;  %4018 = vmatpush2.msra.mxu1 %v1427_v37  ;;  %v1469_v34 = vld [vmem:[#allocation2 + $0x2b00] sm:$0xff]  ;;  %v1368_v37 = vld [vmem:[#allocation2 + $0x27d8] sm:$0xff] }
 0x2b6   :  { %4057 = vmatpush1.msra.mxu0 %v1523_v38  ;;  %4019 = vmatprep.subr.mxu1 %v1422_v39  ;;  %v1464_v38 = vld [vmem:[#allocation2 + $0x2ad8] sm:$0xff]  ;;  %v1367_v39 = vld [vmem:[#allocation2 + $0x27d0] sm:$0xff] }
 0x2b7   :  { %4058 = vmatprep.subr.mxu0 %v1518_v40  ;;  %4020 = vmatpush2.msra.mxu1 %v1421_v41  ;;  %v1463_v40 = vld [vmem:[#allocation2 + $0x2ad0] sm:$0xff]  ;;  %v1362_v41 = vld [vmem:[#allocation2 + $0x27a8] sm:$0xff] }
 0x2b8   :  { %4059 = vmatpush1.msra.mxu0 %v1517_v44  ;;  %4021 = vmatprep.subr.mxu1 %v1416_v45  ;;  %v1458_v44 = vld [vmem:[#allocation2 + $0x2aa8] sm:$0xff]  ;;  %v1361_v45 = vld [vmem:[#allocation2 + $0x27a0] sm:$0xff] }
 0x2b9   :  { %4060 = vmatprep.subr.mxu0 %v1512_v46  ;;  %4022 = vmatpush2.msra.mxu1 %v1415_v47  ;;  %v1457_v46 = vld [vmem:[#allocation2 + $0x2aa0] sm:$0xff]  ;;  %v1356_v47 = vld [vmem:[#allocation2 + $0x2778] sm:$0xff] }
 0x2ba   :  { %4061 = vmatpush1.msra.mxu0 %v1511_v49  ;;  %4023 = vmatprep.subr.mxu1 %v1410_v50  ;;  %v1452_v49 = vld [vmem:[#allocation2 + $0x2a78] sm:$0xff]  ;;  %v1355_v50 = vld [vmem:[#allocation2 + $0x2770] sm:$0xff] }
 0x2bb   :  { %4062 = vmatprep.subr.mxu0 %v1506_v51  ;;  %4024 = vmatpush2.msra.mxu1 %v1409_v53  ;;  %v1451_v51 = vld [vmem:[#allocation2 + $0x2a70] sm:$0xff]  ;;  %v1350_v53 = vld [vmem:[#allocation2 + $0x2748] sm:$0xff] }
 0x2bc   :  { %4063 = vmatpush1.msra.mxu0 %v1505_v55  ;;  %4025 = vmatprep.subr.mxu1 %v1404_v56  ;;  %v1446_v55 = vld [vmem:[#allocation2 + $0x2a48] sm:$0xff]  ;;  %v1349_v56 = vld [vmem:[#allocation2 + $0x2740] sm:$0xff] }
 0x2bd   :  { %4064 = vmatprep.subr.mxu0 %v1500_v58  ;;  %4026 = vmatpush2.msra.mxu1 %v1403_v59  ;;  %v1445_v58 = vld [vmem:[#allocation2 + $0x2a40] sm:$0xff]  ;;  %v1344_v59 = vld [vmem:[#allocation2 + $0x2718] sm:$0xff] }
 0x2be   :  { %4065 = vmatpush1.msra.mxu0 %v1499_v60  ;;  %4027 = vmatprep.subr.mxu1 %v1398_v61  ;;  %v1440_v60 = vld [vmem:[#allocation2 + $0x2a18] sm:$0xff]  ;;  %v1343_v61 = vld [vmem:[#allocation2 + $0x2710] sm:$0xff] }
 0x2bf   :  { %4066 = vmatprep.subr.mxu0 %v1494_v63  ;;  %4028 = vmatpush2.msra.mxu1 %v1397_v0  ;;  %v1439_v63 = vld [vmem:[#allocation2 + $0x2a10] sm:$0xff]  ;;  %v1626_v0 = vld [vmem:[#allocation2 + $0x2fe8] sm:$0xff] }
 0x2c0   :  { %4067 = vmatpush1.msra.mxu0 %v1493_v2  ;;  %4029 = vmatprep.subr.mxu1 %v1392_v3  ;;  %v1722_v2 = vld [vmem:[#allocation2 + $0x32e8] sm:$0xff]  ;;  %v1625_v3 = vld [vmem:[#allocation2 + $0x2fe0] sm:$0xff] }
 0x2c1   :  { %4068 = vmatprep.subr.mxu0 %v1488_v4  ;;  %4030 = vmatpush2.msra.mxu1 %v1391_v5  ;;  %v1721_v4 = vld [vmem:[#allocation2 + $0x32e0] sm:$0xff]  ;;  %v1620_v5 = vld [vmem:[#allocation2 + $0x2fb8] sm:$0xff] }
 0x2c2   :  { %4069 = vmatpush1.msra.mxu0 %v1487_v6  ;;  %4031 = vmatprep.subr.mxu1 %v1386_v7  ;;  %v1716_v6 = vld [vmem:[#allocation2 + $0x32b8] sm:$0xff]  ;;  %v1619_v7 = vld [vmem:[#allocation2 + $0x2fb0] sm:$0xff] }
 0x2c3   :  { %4070 = vmatprep.subr.mxu0 %v1482_v11  ;;  %4032 = vmatpush2.msra.mxu1 %v1385_v12  ;;  %v1715_v11 = vld [vmem:[#allocation2 + $0x32b0] sm:$0xff]  ;;  %v1614_v12 = vld [vmem:[#allocation2 + $0x2f88] sm:$0xff] }
 0x2c4   :  { %4071 = vmatpush1.msra.mxu0 %v1481_v13  ;;  %4033 = vmatprep.subr.mxu1 %v1380_v18  ;;  %v1710_v13 = vld [vmem:[#allocation2 + $0x3288] sm:$0xff]  ;;  %v1613_v18 = vld [vmem:[#allocation2 + $0x2f80] sm:$0xff] }
 0x2c5   :  { %4072 = vmatprep.subr.mxu0 %v1476_v20  ;;  %4034 = vmatpush2.msra.mxu1 %v1379_v22  ;;  %v1709_v20 = vld [vmem:[#allocation2 + $0x3280] sm:$0xff]  ;;  %v1608_v22 = vld [vmem:[#allocation2 + $0x2f58] sm:$0xff] }
 0x2c6   :  { %4073 = vmatpush1.msra.mxu0 %v1475_v24  ;;  %4035 = vmatprep.subr.mxu1 %v1374_v30  ;;  %v1704_v24 = vld [vmem:[#allocation2 + $0x3258] sm:$0xff]  ;;  %v1607_v30 = vld [vmem:[#allocation2 + $0x2f50] sm:$0xff] }
 0x2c7   :  { %4074 = vmatprep.subr.mxu0 %v1470_v31  ;;  %4036 = vmatpush2.msra.mxu1 %v1373_v33  ;;  %v1703_v31 = vld [vmem:[#allocation2 + $0x3250] sm:$0xff]  ;;  %v1602_v33 = vld [vmem:[#allocation2 + $0x2f28] sm:$0xff] }
 0x2c8   :  { %4075 = vmatpush1.msra.mxu0 %v1469_v34  ;;  %4037 = vmatprep.subr.mxu1 %v1368_v37  ;;  %v1698_v34 = vld [vmem:[#allocation2 + $0x3228] sm:$0xff]  ;;  %v1601_v37 = vld [vmem:[#allocation2 + $0x2f20] sm:$0xff] }
 0x2c9   :  { %4076 = vmatprep.subr.mxu0 %v1464_v38  ;;  %4038 = vmatpush2.msra.mxu1 %v1367_v39  ;;  %v1697_v38 = vld [vmem:[#allocation2 + $0x3220] sm:$0xff]  ;;  %v1596_v39 = vld [vmem:[#allocation2 + $0x2ef8] sm:$0xff] }
 0x2ca   :  { %4077 = vmatpush1.msra.mxu0 %v1463_v40  ;;  %4039 = vmatprep.subr.mxu1 %v1362_v41  ;;  %v1692_v40 = vld [vmem:[#allocation2 + $0x31f8] sm:$0xff]  ;;  %v1595_v41 = vld [vmem:[#allocation2 + $0x2ef0] sm:$0xff] }
 0x2cb   :  { %4078 = vmatprep.subr.mxu0 %v1458_v44  ;;  %4040 = vmatpush2.msra.mxu1 %v1361_v45  ;;  %v1691_v44 = vld [vmem:[#allocation2 + $0x31f0] sm:$0xff]  ;;  %v1590_v45 = vld [vmem:[#allocation2 + $0x2ec8] sm:$0xff] }
 0x2cc   :  { %4079 = vmatpush1.msra.mxu0 %v1457_v46  ;;  %4041 = vmatprep.subr.mxu1 %v1356_v47  ;;  %v1686_v46 = vld [vmem:[#allocation2 + $0x31c8] sm:$0xff]  ;;  %v1589_v47 = vld [vmem:[#allocation2 + $0x2ec0] sm:$0xff] }
 0x2cd   :  { %4080 = vmatprep.subr.mxu0 %v1452_v49  ;;  %4042 = vmatpush2.msra.mxu1 %v1355_v50  ;;  %v1685_v49 = vld [vmem:[#allocation2 + $0x31c0] sm:$0xff]  ;;  %v1584_v50 = vld [vmem:[#allocation2 + $0x2e98] sm:$0xff] }
 0x2ce   :  { %4081 = vmatpush1.msra.mxu0 %v1451_v51  ;;  %4043 = vmatprep.subr.mxu1 %v1350_v53  ;;  %v1680_v51 = vld [vmem:[#allocation2 + $0x3198] sm:$0xff]  ;;  %v1583_v53 = vld [vmem:[#allocation2 + $0x2e90] sm:$0xff] }
 0x2cf   :  { %4082 = vmatprep.subr.mxu0 %v1446_v55  ;;  %4044 = vmatpush2.msra.mxu1 %v1349_v56  ;;  %v1679_v55 = vld [vmem:[#allocation2 + $0x3190] sm:$0xff]  ;;  %v1578_v56 = vld [vmem:[#allocation2 + $0x2e68] sm:$0xff] }
 0x2d0   :  { %4083 = vmatpush1.msra.mxu0 %v1445_v58  ;;  %4045 = vmatprep.subr.mxu1 %v1344_v59  ;;  %v1674_v58 = vld [vmem:[#allocation2 + $0x3168] sm:$0xff]  ;;  %v1577_v59 = vld [vmem:[#allocation2 + $0x2e60] sm:$0xff] }
 0x2d1   :  { %4084 = vmatprep.subr.mxu0 %v1440_v60  ;;  %4046 = vmatpush2.msra.mxu1 %v1343_v61  ;;  %v1673_v60 = vld [vmem:[#allocation2 + $0x3160] sm:$0xff]  ;;  %v1572_v61 = vld [vmem:[#allocation2 + $0x2e38] sm:$0xff] }
 0x2d2   :  { %4047 = vmatprep.mubr.f32.mxu1 %v6212_v32  ;;  %4085 = vmatpush1.msra.mxu0 %v1439_v63  ;;  %v1668_v63 = vld [vmem:[#allocation2 + $0x3138] sm:$0xff] }
 0x2d3   :  { %4048 = vmatmul.mubr.f32.vlgmr.msra.gmra.mxu1 %v6205_v19  ;;  %4086 = vmatprep.subr.mxu0 %v1626_v0  ;;  %v1571_v0 = vld [vmem:[#allocation2 + $0x2e30] sm:$0xff] }
 0x2d4   :  { %4125 = vmatprep.subr.mxu1 %v1722_v2  ;;  %4087 = vmatpush2.msra.mxu0 %v1625_v3  ;;  %v1667_v2 = vld [vmem:[#allocation2 + $0x3130] sm:$0xff]  ;;  %v1566_v3 = vld [vmem:[#allocation2 + $0x2e08] sm:$0xff] }
 0x2d5   :  { %4126 = vmatpush1.msra.mxu1 %v1721_v4  ;;  %4088 = vmatprep.subr.mxu0 %v1620_v5  ;;  %v1662_v4 = vld [vmem:[#allocation2 + $0x3108] sm:$0xff]  ;;  %v1565_v5 = vld [vmem:[#allocation2 + $0x2e00] sm:$0xff] }
 0x2d6   :  { %4127 = vmatprep.subr.mxu1 %v1716_v6  ;;  %4089 = vmatpush2.msra.mxu0 %v1619_v7  ;;  %v1661_v6 = vld [vmem:[#allocation2 + $0x3100] sm:$0xff]  ;;  %v1560_v7 = vld [vmem:[#allocation2 + $0x2dd8] sm:$0xff] }
 0x2d7   :  { %4128 = vmatpush1.msra.mxu1 %v1715_v11  ;;  %4090 = vmatprep.subr.mxu0 %v1614_v12  ;;  %v1656_v11 = vld [vmem:[#allocation2 + $0x30d8] sm:$0xff]  ;;  %v1559_v12 = vld [vmem:[#allocation2 + $0x2dd0] sm:$0xff] }
 0x2d8   :  { %4129 = vmatprep.subr.mxu1 %v1710_v13  ;;  %4091 = vmatpush2.msra.mxu0 %v1613_v18  ;;  %v1655_v13 = vld [vmem:[#allocation2 + $0x30d0] sm:$0xff]  ;;  %v1554_v18 = vld [vmem:[#allocation2 + $0x2da8] sm:$0xff] }
 0x2d9   :  { %4130 = vmatpush1.msra.mxu1 %v1709_v20  ;;  %4092 = vmatprep.subr.mxu0 %v1608_v22  ;;  %v1650_v20 = vld [vmem:[#allocation2 + $0x30a8] sm:$0xff]  ;;  %v1553_v22 = vld [vmem:[#allocation2 + $0x2da0] sm:$0xff] }
 0x2da   :  { %4131 = vmatprep.subr.mxu1 %v1704_v24  ;;  %4093 = vmatpush2.msra.mxu0 %v1607_v30  ;;  %v1649_v24 = vld [vmem:[#allocation2 + $0x30a0] sm:$0xff]  ;;  %v1548_v30 = vld [vmem:[#allocation2 + $0x2d78] sm:$0xff] }
 0x2db   :  { %4132 = vmatpush1.msra.mxu1 %v1703_v31  ;;  %4094 = vmatprep.subr.mxu0 %v1602_v33  ;;  %v1644_v31 = vld [vmem:[#allocation2 + $0x3078] sm:$0xff]  ;;  %v1547_v33 = vld [vmem:[#allocation2 + $0x2d70] sm:$0xff] }
 0x2dc   :  { %4133 = vmatprep.subr.mxu1 %v1698_v34  ;;  %4095 = vmatpush2.msra.mxu0 %v1601_v37  ;;  %v1643_v34 = vld [vmem:[#allocation2 + $0x3070] sm:$0xff]  ;;  %v1542_v37 = vld [vmem:[#allocation2 + $0x2d48] sm:$0xff] }
 0x2dd   :  { %4134 = vmatpush1.msra.mxu1 %v1697_v38  ;;  %4096 = vmatprep.subr.mxu0 %v1596_v39  ;;  %v1638_v38 = vld [vmem:[#allocation2 + $0x3048] sm:$0xff]  ;;  %v1541_v39 = vld [vmem:[#allocation2 + $0x2d40] sm:$0xff] }
 0x2de   :  { %4135 = vmatprep.subr.mxu1 %v1692_v40  ;;  %4097 = vmatpush2.msra.mxu0 %v1595_v41  ;;  %v1637_v40 = vld [vmem:[#allocation2 + $0x3040] sm:$0xff]  ;;  %v1536_v41 = vld [vmem:[#allocation2 + $0x2d18] sm:$0xff] }
 0x2df   :  { %4136 = vmatpush1.msra.mxu1 %v1691_v44  ;;  %4098 = vmatprep.subr.mxu0 %v1590_v45  ;;  %v1632_v44 = vld [vmem:[#allocation2 + $0x3018] sm:$0xff]  ;;  %v1535_v45 = vld [vmem:[#allocation2 + $0x2d10] sm:$0xff] }
 0x2e0   :  { %4137 = vmatprep.subr.mxu1 %v1686_v46  ;;  %4099 = vmatpush2.msra.mxu0 %v1589_v47  ;;  %v1631_v46 = vld [vmem:[#allocation2 + $0x3010] sm:$0xff]  ;;  %v1818_v47 = vld [vmem:[#allocation2 + $0x35e8] sm:$0xff] }
 0x2e1   :  { %4138 = vmatpush1.msra.mxu1 %v1685_v49  ;;  %4100 = vmatprep.subr.mxu0 %v1584_v50  ;;  %v1914_v49 = vld [vmem:[#allocation2 + $0x38e8] sm:$0xff]  ;;  %v1817_v50 = vld [vmem:[#allocation2 + $0x35e0] sm:$0xff] }
 0x2e2   :  { %4139 = vmatprep.subr.mxu1 %v1680_v51  ;;  %4101 = vmatpush2.msra.mxu0 %v1583_v53  ;;  %v1913_v51 = vld [vmem:[#allocation2 + $0x38e0] sm:$0xff]  ;;  %v1812_v53 = vld [vmem:[#allocation2 + $0x35b8] sm:$0xff] }
 0x2e3   :  { %4140 = vmatpush1.msra.mxu1 %v1679_v55  ;;  %4102 = vmatprep.subr.mxu0 %v1578_v56  ;;  %v1908_v55 = vld [vmem:[#allocation2 + $0x38b8] sm:$0xff]  ;;  %v1811_v56 = vld [vmem:[#allocation2 + $0x35b0] sm:$0xff] }
 0x2e4   :  { %4141 = vmatprep.subr.mxu1 %v1674_v58  ;;  %4103 = vmatpush2.msra.mxu0 %v1577_v59  ;;  %v1907_v58 = vld [vmem:[#allocation2 + $0x38b0] sm:$0xff]  ;;  %v1806_v59 = vld [vmem:[#allocation2 + $0x3588] sm:$0xff] }
 0x2e5   :  { %4142 = vmatpush1.msra.mxu1 %v1673_v60  ;;  %4104 = vmatprep.subr.mxu0 %v1572_v61  ;;  %v1902_v60 = vld [vmem:[#allocation2 + $0x3888] sm:$0xff]  ;;  %v1805_v61 = vld [vmem:[#allocation2 + $0x3580] sm:$0xff] }
 0x2e6   :  { %4143 = vmatprep.subr.mxu1 %v1668_v63  ;;  %4105 = vmatpush2.msra.mxu0 %v1571_v0  ;;  %v1901_v63 = vld [vmem:[#allocation2 + $0x3880] sm:$0xff]  ;;  %v1800_v0 = vld [vmem:[#allocation2 + $0x3558] sm:$0xff] }
 0x2e7   :  { %4144 = vmatpush1.msra.mxu1 %v1667_v2  ;;  %4106 = vmatprep.subr.mxu0 %v1566_v3  ;;  %v1896_v2 = vld [vmem:[#allocation2 + $0x3858] sm:$0xff]  ;;  %v1799_v3 = vld [vmem:[#allocation2 + $0x3550] sm:$0xff] }
 0x2e8   :  { %4145 = vmatprep.subr.mxu1 %v1662_v4  ;;  %4107 = vmatpush2.msra.mxu0 %v1565_v5  ;;  %v1895_v4 = vld [vmem:[#allocation2 + $0x3850] sm:$0xff]  ;;  %v1794_v5 = vld [vmem:[#allocation2 + $0x3528] sm:$0xff] }
 0x2e9   :  { %4146 = vmatpush1.msra.mxu1 %v1661_v6  ;;  %4108 = vmatprep.subr.mxu0 %v1560_v7  ;;  %v1890_v6 = vld [vmem:[#allocation2 + $0x3828] sm:$0xff]  ;;  %v1793_v7 = vld [vmem:[#allocation2 + $0x3520] sm:$0xff] }
 0x2ea   :  { %4147 = vmatprep.subr.mxu1 %v1656_v11  ;;  %4109 = vmatpush2.msra.mxu0 %v1559_v12  ;;  %v1889_v11 = vld [vmem:[#allocation2 + $0x3820] sm:$0xff]  ;;  %v1788_v12 = vld [vmem:[#allocation2 + $0x34f8] sm:$0xff] }
 0x2eb   :  { %4148 = vmatpush1.msra.mxu1 %v1655_v13  ;;  %4110 = vmatprep.subr.mxu0 %v1554_v18  ;;  %v1884_v13 = vld [vmem:[#allocation2 + $0x37f8] sm:$0xff]  ;;  %v1787_v18 = vld [vmem:[#allocation2 + $0x34f0] sm:$0xff] }
 0x2ec   :  { %4149 = vmatprep.subr.mxu1 %v1650_v20  ;;  %4111 = vmatpush2.msra.mxu0 %v1553_v22  ;;  %v1883_v20 = vld [vmem:[#allocation2 + $0x37f0] sm:$0xff]  ;;  %v1782_v22 = vld [vmem:[#allocation2 + $0x34c8] sm:$0xff] }
 0x2ed   :  { %4150 = vmatpush1.msra.mxu1 %v1649_v24  ;;  %4112 = vmatprep.subr.mxu0 %v1548_v30  ;;  %v1878_v24 = vld [vmem:[#allocation2 + $0x37c8] sm:$0xff]  ;;  %v1781_v30 = vld [vmem:[#allocation2 + $0x34c0] sm:$0xff] }
 0x2ee   :  { %4151 = vmatprep.subr.mxu1 %v1644_v31  ;;  %4113 = vmatpush2.msra.mxu0 %v1547_v33  ;;  %v1877_v31 = vld [vmem:[#allocation2 + $0x37c0] sm:$0xff]  ;;  %v1776_v33 = vld [vmem:[#allocation2 + $0x3498] sm:$0xff] }
 0x2ef   :  { %4152 = vmatpush1.msra.mxu1 %v1643_v34  ;;  %4114 = vmatprep.subr.mxu0 %v1542_v37  ;;  %v1872_v34 = vld [vmem:[#allocation2 + $0x3798] sm:$0xff]  ;;  %v1775_v37 = vld [vmem:[#allocation2 + $0x3490] sm:$0xff] }
 0x2f0   :  { %4153 = vmatprep.subr.mxu1 %v1638_v38  ;;  %4115 = vmatpush2.msra.mxu0 %v1541_v39  ;;  %v1871_v38 = vld [vmem:[#allocation2 + $0x3790] sm:$0xff]  ;;  %v1770_v39 = vld [vmem:[#allocation2 + $0x3468] sm:$0xff] }
 0x2f1   :  { %4154 = vmatpush1.msra.mxu1 %v1637_v40  ;;  %4116 = vmatprep.subr.mxu0 %v1536_v41  ;;  %v1866_v40 = vld [vmem:[#allocation2 + $0x3768] sm:$0xff]  ;;  %v1769_v41 = vld [vmem:[#allocation2 + $0x3460] sm:$0xff] }
 0x2f2   :  { %4155 = vmatprep.subr.mxu1 %v1632_v44  ;;  %4117 = vmatpush2.msra.mxu0 %v1535_v45  ;;  %v1865_v44 = vld [vmem:[#allocation2 + $0x3760] sm:$0xff]  ;;  %v1764_v45 = vld [vmem:[#allocation2 + $0x3438] sm:$0xff] }
 0x2f3   :  { %4118 = vmatprep.mubr.f32.mxu0 %v6216_v35  ;;  %4156 = vmatpush1.msra.mxu1 %v1631_v46  ;;  %v1860_v46 = vld [vmem:[#allocation2 + $0x3738] sm:$0xff] }
 0x2f4   :  { %4119 = vmatmul.mubr.f32.vlgmr.msra.gmra.mxu0 %v6208_v25  ;;  %4157 = vmatprep.subr.mxu1 %v1818_v47  ;;  %v1763_v47 = vld [vmem:[#allocation2 + $0x3430] sm:$0xff] }
 0x2f5   :  { %4196 = vmatprep.subr.mxu0 %v1914_v49  ;;  %4158 = vmatpush2.msra.mxu1 %v1817_v50  ;;  %v1859_v49 = vld [vmem:[#allocation2 + $0x3730] sm:$0xff]  ;;  %v1758_v50 = vld [vmem:[#allocation2 + $0x3408] sm:$0xff] }
 0x2f6   :  { %4197 = vmatpush1.msra.mxu0 %v1913_v51  ;;  %4159 = vmatprep.subr.mxu1 %v1812_v53  ;;  %v1854_v51 = vld [vmem:[#allocation2 + $0x3708] sm:$0xff]  ;;  %v1757_v53 = vld [vmem:[#allocation2 + $0x3400] sm:$0xff] }
 0x2f7   :  { %4198 = vmatprep.subr.mxu0 %v1908_v55  ;;  %4160 = vmatpush2.msra.mxu1 %v1811_v56  ;;  %v1853_v55 = vld [vmem:[#allocation2 + $0x3700] sm:$0xff]  ;;  %v1752_v56 = vld [vmem:[#allocation2 + $0x33d8] sm:$0xff] }
 0x2f8   :  { %4199 = vmatpush1.msra.mxu0 %v1907_v58  ;;  %4161 = vmatprep.subr.mxu1 %v1806_v59  ;;  %v1848_v58 = vld [vmem:[#allocation2 + $0x36d8] sm:$0xff]  ;;  %v1751_v59 = vld [vmem:[#allocation2 + $0x33d0] sm:$0xff] }
 0x2f9   :  { %4200 = vmatprep.subr.mxu0 %v1902_v60  ;;  %4162 = vmatpush2.msra.mxu1 %v1805_v61  ;;  %v1847_v60 = vld [vmem:[#allocation2 + $0x36d0] sm:$0xff]  ;;  %v1746_v61 = vld [vmem:[#allocation2 + $0x33a8] sm:$0xff] }
 0x2fa   :  { %4201 = vmatpush1.msra.mxu0 %v1901_v63  ;;  %4163 = vmatprep.subr.mxu1 %v1800_v0  ;;  %v1842_v63 = vld [vmem:[#allocation2 + $0x36a8] sm:$0xff]  ;;  %v1745_v0 = vld [vmem:[#allocation2 + $0x33a0] sm:$0xff] }
 0x2fb   :  { %4202 = vmatprep.subr.mxu0 %v1896_v2  ;;  %4164 = vmatpush2.msra.mxu1 %v1799_v3  ;;  %v1841_v2 = vld [vmem:[#allocation2 + $0x36a0] sm:$0xff]  ;;  %v1740_v3 = vld [vmem:[#allocation2 + $0x3378] sm:$0xff] }
 0x2fc   :  { %4203 = vmatpush1.msra.mxu0 %v1895_v4  ;;  %4165 = vmatprep.subr.mxu1 %v1794_v5  ;;  %v1836_v4 = vld [vmem:[#allocation2 + $0x3678] sm:$0xff]  ;;  %v1739_v5 = vld [vmem:[#allocation2 + $0x3370] sm:$0xff] }
 0x2fd   :  { %4204 = vmatprep.subr.mxu0 %v1890_v6  ;;  %4166 = vmatpush2.msra.mxu1 %v1793_v7  ;;  %v1835_v6 = vld [vmem:[#allocation2 + $0x3670] sm:$0xff]  ;;  %v1734_v7 = vld [vmem:[#allocation2 + $0x3348] sm:$0xff] }
 0x2fe   :  { %4205 = vmatpush1.msra.mxu0 %v1889_v11  ;;  %4167 = vmatprep.subr.mxu1 %v1788_v12  ;;  %v1830_v11 = vld [vmem:[#allocation2 + $0x3648] sm:$0xff]  ;;  %v1733_v12 = vld [vmem:[#allocation2 + $0x3340] sm:$0xff] }
 0x2ff   :  { %4206 = vmatprep.subr.mxu0 %v1884_v13  ;;  %4168 = vmatpush2.msra.mxu1 %v1787_v18  ;;  %v1829_v13 = vld [vmem:[#allocation2 + $0x3640] sm:$0xff]  ;;  %v1728_v18 = vld [vmem:[#allocation2 + $0x3318] sm:$0xff] }
 0x300   :  { %4207 = vmatpush1.msra.mxu0 %v1883_v20  ;;  %4169 = vmatprep.subr.mxu1 %v1782_v22  ;;  %v1824_v20 = vld [vmem:[#allocation2 + $0x3618] sm:$0xff]  ;;  %v1727_v22 = vld [vmem:[#allocation2 + $0x3310] sm:$0xff] }
 0x301   :  { %4208 = vmatprep.subr.mxu0 %v1878_v24  ;;  %4170 = vmatpush2.msra.mxu1 %v1781_v30  ;;  %v1823_v24 = vld [vmem:[#allocation2 + $0x3610] sm:$0xff]  ;;  %v2010_v30 = vld [vmem:[#allocation2 + $0x3be8] sm:$0xff] }
 0x302   :  { %4209 = vmatpush1.msra.mxu0 %v1877_v31  ;;  %4171 = vmatprep.subr.mxu1 %v1776_v33  ;;  %v2106_v31 = vld [vmem:[#allocation2 + $0x3ee8] sm:$0xff]  ;;  %v2009_v33 = vld [vmem:[#allocation2 + $0x3be0] sm:$0xff] }
 0x303   :  { %4210 = vmatprep.subr.mxu0 %v1872_v34  ;;  %4172 = vmatpush2.msra.mxu1 %v1775_v37  ;;  %v2105_v34 = vld [vmem:[#allocation2 + $0x3ee0] sm:$0xff]  ;;  %v2004_v37 = vld [vmem:[#allocation2 + $0x3bb8] sm:$0xff] }
 0x304   :  { %4211 = vmatpush1.msra.mxu0 %v1871_v38  ;;  %4173 = vmatprep.subr.mxu1 %v1770_v39  ;;  %v2100_v38 = vld [vmem:[#allocation2 + $0x3eb8] sm:$0xff]  ;;  %v2003_v39 = vld [vmem:[#allocation2 + $0x3bb0] sm:$0xff] }
 0x305   :  { %4212 = vmatprep.subr.mxu0 %v1866_v40  ;;  %4174 = vmatpush2.msra.mxu1 %v1769_v41  ;;  %v2099_v40 = vld [vmem:[#allocation2 + $0x3eb0] sm:$0xff]  ;;  %v1998_v41 = vld [vmem:[#allocation2 + $0x3b88] sm:$0xff] }
 0x306   :  { %4213 = vmatpush1.msra.mxu0 %v1865_v44  ;;  %4175 = vmatprep.subr.mxu1 %v1764_v45  ;;  %v2094_v44 = vld [vmem:[#allocation2 + $0x3e88] sm:$0xff]  ;;  %v1997_v45 = vld [vmem:[#allocation2 + $0x3b80] sm:$0xff] }
 0x307   :  { %4214 = vmatprep.subr.mxu0 %v1860_v46  ;;  %4176 = vmatpush2.msra.mxu1 %v1763_v47  ;;  %v2093_v46 = vld [vmem:[#allocation2 + $0x3e80] sm:$0xff]  ;;  %v1992_v47 = vld [vmem:[#allocation2 + $0x3b58] sm:$0xff] }
 0x308   :  { %4215 = vmatpush1.msra.mxu0 %v1859_v49  ;;  %4177 = vmatprep.subr.mxu1 %v1758_v50  ;;  %v2088_v49 = vld [vmem:[#allocation2 + $0x3e58] sm:$0xff]  ;;  %v1991_v50 = vld [vmem:[#allocation2 + $0x3b50] sm:$0xff] }
 0x309   :  { %4216 = vmatprep.subr.mxu0 %v1854_v51  ;;  %4178 = vmatpush2.msra.mxu1 %v1757_v53  ;;  %v2087_v51 = vld [vmem:[#allocation2 + $0x3e50] sm:$0xff]  ;;  %v1986_v53 = vld [vmem:[#allocation2 + $0x3b28] sm:$0xff] }
 0x30a   :  { %4217 = vmatpush1.msra.mxu0 %v1853_v55  ;;  %4179 = vmatprep.subr.mxu1 %v1752_v56  ;;  %v2082_v55 = vld [vmem:[#allocation2 + $0x3e28] sm:$0xff]  ;;  %v1985_v56 = vld [vmem:[#allocation2 + $0x3b20] sm:$0xff] }
 0x30b   :  { %4218 = vmatprep.subr.mxu0 %v1848_v58  ;;  %4180 = vmatpush2.msra.mxu1 %v1751_v59  ;;  %v2081_v58 = vld [vmem:[#allocation2 + $0x3e20] sm:$0xff]  ;;  %v1980_v59 = vld [vmem:[#allocation2 + $0x3af8] sm:$0xff] }
 0x30c   :  { %4219 = vmatpush1.msra.mxu0 %v1847_v60  ;;  %4181 = vmatprep.subr.mxu1 %v1746_v61  ;;  %v2076_v60 = vld [vmem:[#allocation2 + $0x3df8] sm:$0xff]  ;;  %v1979_v61 = vld [vmem:[#allocation2 + $0x3af0] sm:$0xff] }
 0x30d   :  { %4220 = vmatprep.subr.mxu0 %v1842_v63  ;;  %4182 = vmatpush2.msra.mxu1 %v1745_v0  ;;  %v2075_v63 = vld [vmem:[#allocation2 + $0x3df0] sm:$0xff]  ;;  %v1974_v0 = vld [vmem:[#allocation2 + $0x3ac8] sm:$0xff] }
 0x30e   :  { %4221 = vmatpush1.msra.mxu0 %v1841_v2  ;;  %4183 = vmatprep.subr.mxu1 %v1740_v3  ;;  %v2070_v2 = vld [vmem:[#allocation2 + $0x3dc8] sm:$0xff]  ;;  %v1973_v3 = vld [vmem:[#allocation2 + $0x3ac0] sm:$0xff] }
 0x30f   :  { %4222 = vmatprep.subr.mxu0 %v1836_v4  ;;  %4184 = vmatpush2.msra.mxu1 %v1739_v5  ;;  %v2069_v4 = vld [vmem:[#allocation2 + $0x3dc0] sm:$0xff]  ;;  %v1968_v5 = vld [vmem:[#allocation2 + $0x3a98] sm:$0xff] }
 0x310   :  { %4223 = vmatpush1.msra.mxu0 %v1835_v6  ;;  %4185 = vmatprep.subr.mxu1 %v1734_v7  ;;  %v2064_v6 = vld [vmem:[#allocation2 + $0x3d98] sm:$0xff]  ;;  %v1967_v7 = vld [vmem:[#allocation2 + $0x3a90] sm:$0xff] }
 0x311   :  { %4224 = vmatprep.subr.mxu0 %v1830_v11  ;;  %4186 = vmatpush2.msra.mxu1 %v1733_v12  ;;  %v2063_v11 = vld [vmem:[#allocation2 + $0x3d90] sm:$0xff]  ;;  %v1962_v12 = vld [vmem:[#allocation2 + $0x3a68] sm:$0xff] }
 0x312   :  { %4225 = vmatpush1.msra.mxu0 %v1829_v13  ;;  %4187 = vmatprep.subr.mxu1 %v1728_v18  ;;  %v2058_v13 = vld [vmem:[#allocation2 + $0x3d68] sm:$0xff]  ;;  %v1961_v18 = vld [vmem:[#allocation2 + $0x3a60] sm:$0xff] }
 0x313   :  { %4226 = vmatprep.subr.mxu0 %v1824_v20  ;;  %4188 = vmatpush2.msra.mxu1 %v1727_v22  ;;  %v2057_v20 = vld [vmem:[#allocation2 + $0x3d60] sm:$0xff]  ;;  %v1956_v22 = vld [vmem:[#allocation2 + $0x3a38] sm:$0xff] }
 0x314   :  { %4189 = vmatprep.mubr.f32.mxu1 %v6233_v23  ;;  %4227 = vmatpush1.msra.mxu0 %v1823_v24  ;;  %v2052_v24 = vld [vmem:[#allocation2 + $0x3d38] sm:$0xff] }
 0x315   :  { %4190 = vmatmul.mubr.f32.vlgmr.msra.gmra.mxu1 %v6226_v9  ;;  %4228 = vmatprep.subr.mxu0 %v2010_v30  ;;  %v1955_v30 = vld [vmem:[#allocation2 + $0x3a30] sm:$0xff] }
 0x316   :  { %4267 = vmatprep.subr.mxu1 %v2106_v31  ;;  %4229 = vmatpush2.msra.mxu0 %v2009_v33  ;;  %v2051_v31 = vld [vmem:[#allocation2 + $0x3d30] sm:$0xff]  ;;  %v1950_v33 = vld [vmem:[#allocation2 + $0x3a08] sm:$0xff] }
 0x317   :  { %4268 = vmatpush1.msra.mxu1 %v2105_v34  ;;  %4230 = vmatprep.subr.mxu0 %v2004_v37  ;;  %v2046_v34 = vld [vmem:[#allocation2 + $0x3d08] sm:$0xff]  ;;  %v1949_v37 = vld [vmem:[#allocation2 + $0x3a00] sm:$0xff] }
 0x318   :  { %4269 = vmatprep.subr.mxu1 %v2100_v38  ;;  %4231 = vmatpush2.msra.mxu0 %v2003_v39  ;;  %v2045_v38 = vld [vmem:[#allocation2 + $0x3d00] sm:$0xff]  ;;  %v1944_v39 = vld [vmem:[#allocation2 + $0x39d8] sm:$0xff] }
 0x319   :  { %4270 = vmatpush1.msra.mxu1 %v2099_v40  ;;  %4232 = vmatprep.subr.mxu0 %v1998_v41  ;;  %v2040_v40 = vld [vmem:[#allocation2 + $0x3cd8] sm:$0xff]  ;;  %v1943_v41 = vld [vmem:[#allocation2 + $0x39d0] sm:$0xff] }
 0x31a   :  { %4271 = vmatprep.subr.mxu1 %v2094_v44  ;;  %4233 = vmatpush2.msra.mxu0 %v1997_v45  ;;  %v2039_v44 = vld [vmem:[#allocation2 + $0x3cd0] sm:$0xff]  ;;  %v1938_v45 = vld [vmem:[#allocation2 + $0x39a8] sm:$0xff] }
 0x31b   :  { %4272 = vmatpush1.msra.mxu1 %v2093_v46  ;;  %4234 = vmatprep.subr.mxu0 %v1992_v47  ;;  %v2034_v46 = vld [vmem:[#allocation2 + $0x3ca8] sm:$0xff]  ;;  %v1937_v47 = vld [vmem:[#allocation2 + $0x39a0] sm:$0xff] }
 0x31c   :  { %4273 = vmatprep.subr.mxu1 %v2088_v49  ;;  %4235 = vmatpush2.msra.mxu0 %v1991_v50  ;;  %v2033_v49 = vld [vmem:[#allocation2 + $0x3ca0] sm:$0xff]  ;;  %v1932_v50 = vld [vmem:[#allocation2 + $0x3978] sm:$0xff] }
 0x31d   :  { %4274 = vmatpush1.msra.mxu1 %v2087_v51  ;;  %4236 = vmatprep.subr.mxu0 %v1986_v53  ;;  %v2028_v51 = vld [vmem:[#allocation2 + $0x3c78] sm:$0xff]  ;;  %v1931_v53 = vld [vmem:[#allocation2 + $0x3970] sm:$0xff] }
 0x31e   :  { %4275 = vmatprep.subr.mxu1 %v2082_v55  ;;  %4237 = vmatpush2.msra.mxu0 %v1985_v56  ;;  %v2027_v55 = vld [vmem:[#allocation2 + $0x3c70] sm:$0xff]  ;;  %v1926_v56 = vld [vmem:[#allocation2 + $0x3948] sm:$0xff] }
 0x31f   :  { %4276 = vmatpush1.msra.mxu1 %v2081_v58  ;;  %4238 = vmatprep.subr.mxu0 %v1980_v59  ;;  %v2022_v58 = vld [vmem:[#allocation2 + $0x3c48] sm:$0xff]  ;;  %v1925_v59 = vld [vmem:[#allocation2 + $0x3940] sm:$0xff] }
 0x320   :  { %4277 = vmatprep.subr.mxu1 %v2076_v60  ;;  %4239 = vmatpush2.msra.mxu0 %v1979_v61  ;;  %v2021_v60 = vld [vmem:[#allocation2 + $0x3c40] sm:$0xff]  ;;  %v1920_v61 = vld [vmem:[#allocation2 + $0x3918] sm:$0xff] }
 0x321   :  { %4278 = vmatpush1.msra.mxu1 %v2075_v63  ;;  %4240 = vmatprep.subr.mxu0 %v1974_v0  ;;  %v2016_v63 = vld [vmem:[#allocation2 + $0x3c18] sm:$0xff]  ;;  %v1919_v0 = vld [vmem:[#allocation2 + $0x3910] sm:$0xff] }
 0x322   :  { %4279 = vmatprep.subr.mxu1 %v2070_v2  ;;  %4241 = vmatpush2.msra.mxu0 %v1973_v3  ;;  %v2015_v2 = vld [vmem:[#allocation2 + $0x3c10] sm:$0xff]  ;;  %v2202_v3 = vld [vmem:[#allocation2 + $0x41e8] sm:$0xff] }
 0x323   :  { %4280 = vmatpush1.msra.mxu1 %v2069_v4  ;;  %4242 = vmatprep.subr.mxu0 %v1968_v5  ;;  %v2298_v4 = vld [vmem:[#allocation2 + $0x44e8] sm:$0xff]  ;;  %v2201_v5 = vld [vmem:[#allocation2 + $0x41e0] sm:$0xff] }
 0x324   :  { %4281 = vmatprep.subr.mxu1 %v2064_v6  ;;  %4243 = vmatpush2.msra.mxu0 %v1967_v7  ;;  %v2297_v6 = vld [vmem:[#allocation2 + $0x44e0] sm:$0xff]  ;;  %v2196_v7 = vld [vmem:[#allocation2 + $0x41b8] sm:$0xff] }
 0x325   :  { %4282 = vmatpush1.msra.mxu1 %v2063_v11  ;;  %4244 = vmatprep.subr.mxu0 %v1962_v12  ;;  %v2292_v11 = vld [vmem:[#allocation2 + $0x44b8] sm:$0xff]  ;;  %v2195_v12 = vld [vmem:[#allocation2 + $0x41b0] sm:$0xff] }
 0x326   :  { %4283 = vmatprep.subr.mxu1 %v2058_v13  ;;  %4245 = vmatpush2.msra.mxu0 %v1961_v18  ;;  %v2291_v13 = vld [vmem:[#allocation2 + $0x44b0] sm:$0xff]  ;;  %v2190_v18 = vld [vmem:[#allocation2 + $0x4188] sm:$0xff] }
 0x327   :  { %4284 = vmatpush1.msra.mxu1 %v2057_v20  ;;  %4246 = vmatprep.subr.mxu0 %v1956_v22  ;;  %v2286_v20 = vld [vmem:[#allocation2 + $0x4488] sm:$0xff]  ;;  %v2189_v22 = vld [vmem:[#allocation2 + $0x4180] sm:$0xff] }
 0x328   :  { %4285 = vmatprep.subr.mxu1 %v2052_v24  ;;  %4247 = vmatpush2.msra.mxu0 %v1955_v30  ;;  %v2285_v24 = vld [vmem:[#allocation2 + $0x4480] sm:$0xff]  ;;  %v2184_v30 = vld [vmem:[#allocation2 + $0x4158] sm:$0xff] }
 0x329   :  { %4286 = vmatpush1.msra.mxu1 %v2051_v31  ;;  %4248 = vmatprep.subr.mxu0 %v1950_v33  ;;  %v2280_v31 = vld [vmem:[#allocation2 + $0x4458] sm:$0xff]  ;;  %v2183_v33 = vld [vmem:[#allocation2 + $0x4150] sm:$0xff] }
 0x32a   :  { %4287 = vmatprep.subr.mxu1 %v2046_v34  ;;  %4249 = vmatpush2.msra.mxu0 %v1949_v37  ;;  %v2279_v34 = vld [vmem:[#allocation2 + $0x4450] sm:$0xff]  ;;  %v2178_v37 = vld [vmem:[#allocation2 + $0x4128] sm:$0xff] }
 0x32b   :  { %4288 = vmatpush1.msra.mxu1 %v2045_v38  ;;  %4250 = vmatprep.subr.mxu0 %v1944_v39  ;;  %v2274_v38 = vld [vmem:[#allocation2 + $0x4428] sm:$0xff]  ;;  %v2177_v39 = vld [vmem:[#allocation2 + $0x4120] sm:$0xff] }
 0x32c   :  { %4289 = vmatprep.subr.mxu1 %v2040_v40  ;;  %4251 = vmatpush2.msra.mxu0 %v1943_v41  ;;  %v2273_v40 = vld [vmem:[#allocation2 + $0x4420] sm:$0xff]  ;;  %v2172_v41 = vld [vmem:[#allocation2 + $0x40f8] sm:$0xff] }
 0x32d   :  { %4290 = vmatpush1.msra.mxu1 %v2039_v44  ;;  %4252 = vmatprep.subr.mxu0 %v1938_v45  ;;  %v2268_v44 = vld [vmem:[#allocation2 + $0x43f8] sm:$0xff]  ;;  %v2171_v45 = vld [vmem:[#allocation2 + $0x40f0] sm:$0xff] }
 0x32e   :  { %4291 = vmatprep.subr.mxu1 %v2034_v46  ;;  %4253 = vmatpush2.msra.mxu0 %v1937_v47  ;;  %v2267_v46 = vld [vmem:[#allocation2 + $0x43f0] sm:$0xff]  ;;  %v2166_v47 = vld [vmem:[#allocation2 + $0x40c8] sm:$0xff] }
 0x32f   :  { %4292 = vmatpush1.msra.mxu1 %v2033_v49  ;;  %4254 = vmatprep.subr.mxu0 %v1932_v50  ;;  %v2262_v49 = vld [vmem:[#allocation2 + $0x43c8] sm:$0xff]  ;;  %v2165_v50 = vld [vmem:[#allocation2 + $0x40c0] sm:$0xff] }
 0x330   :  { %4293 = vmatprep.subr.mxu1 %v2028_v51  ;;  %4255 = vmatpush2.msra.mxu0 %v1931_v53  ;;  %v2261_v51 = vld [vmem:[#allocation2 + $0x43c0] sm:$0xff]  ;;  %v2160_v53 = vld [vmem:[#allocation2 + $0x4098] sm:$0xff] }
 0x331   :  { %4294 = vmatpush1.msra.mxu1 %v2027_v55  ;;  %4256 = vmatprep.subr.mxu0 %v1926_v56  ;;  %v2256_v55 = vld [vmem:[#allocation2 + $0x4398] sm:$0xff]  ;;  %v2159_v56 = vld [vmem:[#allocation2 + $0x4090] sm:$0xff] }
 0x332   :  { %4295 = vmatprep.subr.mxu1 %v2022_v58  ;;  %4257 = vmatpush2.msra.mxu0 %v1925_v59  ;;  %v2255_v58 = vld [vmem:[#allocation2 + $0x4390] sm:$0xff]  ;;  %v2154_v59 = vld [vmem:[#allocation2 + $0x4068] sm:$0xff] }
 0x333   :  { %4296 = vmatpush1.msra.mxu1 %v2021_v60  ;;  %4258 = vmatprep.subr.mxu0 %v1920_v61  ;;  %v2250_v60 = vld [vmem:[#allocation2 + $0x4368] sm:$0xff]  ;;  %v2153_v61 = vld [vmem:[#allocation2 + $0x4060] sm:$0xff] }
 0x334   :  { %4297 = vmatprep.subr.mxu1 %v2016_v63  ;;  %4259 = vmatpush2.msra.mxu0 %v1919_v0  ;;  %v2249_v63 = vld [vmem:[#allocation2 + $0x4360] sm:$0xff]  ;;  %v2148_v0 = vld [vmem:[#allocation2 + $0x4038] sm:$0xff] }
 0x335   :  { %4260 = vmatprep.mubr.f32.mxu0 %v6237_v28  ;;  %4298 = vmatpush1.msra.mxu1 %v2015_v2  ;;  %v2244_v2 = vld [vmem:[#allocation2 + $0x4338] sm:$0xff] }
 0x336   :  { %4261 = vmatmul.mubr.f32.vlgmr.msra.gmra.mxu0 %v6229_v15  ;;  %4299 = vmatprep.subr.mxu1 %v2202_v3  ;;  %v2147_v3 = vld [vmem:[#allocation2 + $0x4030] sm:$0xff] }
 0x337   :  { %4338 = vmatprep.subr.mxu0 %v2298_v4  ;;  %4300 = vmatpush2.msra.mxu1 %v2201_v5  ;;  %v2243_v4 = vld [vmem:[#allocation2 + $0x4330] sm:$0xff]  ;;  %v2142_v5 = vld [vmem:[#allocation2 + $0x4008] sm:$0xff] }
 0x338   :  { %4339 = vmatpush1.msra.mxu0 %v2297_v6  ;;  %4301 = vmatprep.subr.mxu1 %v2196_v7  ;;  %v2238_v6 = vld [vmem:[#allocation2 + $0x4308] sm:$0xff]  ;;  %v2141_v7 = vld [vmem:[#allocation2 + $0x4000] sm:$0xff] }
 0x339   :  { %4340 = vmatprep.subr.mxu0 %v2292_v11  ;;  %4302 = vmatpush2.msra.mxu1 %v2195_v12  ;;  %v2237_v11 = vld [vmem:[#allocation2 + $0x4300] sm:$0xff]  ;;  %v2136_v12 = vld [vmem:[#allocation2 + $0x3fd8] sm:$0xff] }
 0x33a   :  { %4341 = vmatpush1.msra.mxu0 %v2291_v13  ;;  %4303 = vmatprep.subr.mxu1 %v2190_v18  ;;  %v2232_v13 = vld [vmem:[#allocation2 + $0x42d8] sm:$0xff]  ;;  %v2135_v18 = vld [vmem:[#allocation2 + $0x3fd0] sm:$0xff] }
 0x33b   :  { %4342 = vmatprep.subr.mxu0 %v2286_v20  ;;  %4304 = vmatpush2.msra.mxu1 %v2189_v22  ;;  %v2231_v20 = vld [vmem:[#allocation2 + $0x42d0] sm:$0xff]  ;;  %v2130_v22 = vld [vmem:[#allocation2 + $0x3fa8] sm:$0xff] }
 0x33c   :  { %4343 = vmatpush1.msra.mxu0 %v2285_v24  ;;  %4305 = vmatprep.subr.mxu1 %v2184_v30  ;;  %v2226_v24 = vld [vmem:[#allocation2 + $0x42a8] sm:$0xff]  ;;  %v2129_v30 = vld [vmem:[#allocation2 + $0x3fa0] sm:$0xff] }
 0x33d   :  { %4344 = vmatprep.subr.mxu0 %v2280_v31  ;;  %4306 = vmatpush2.msra.mxu1 %v2183_v33  ;;  %v2225_v31 = vld [vmem:[#allocation2 + $0x42a0] sm:$0xff]  ;;  %v2124_v33 = vld [vmem:[#allocation2 + $0x3f78] sm:$0xff] }
 0x33e   :  { %4345 = vmatpush1.msra.mxu0 %v2279_v34  ;;  %4307 = vmatprep.subr.mxu1 %v2178_v37  ;;  %v2220_v34 = vld [vmem:[#allocation2 + $0x4278] sm:$0xff]  ;;  %v2123_v37 = vld [vmem:[#allocation2 + $0x3f70] sm:$0xff] }
 0x33f   :  { %4346 = vmatprep.subr.mxu0 %v2274_v38  ;;  %4308 = vmatpush2.msra.mxu1 %v2177_v39  ;;  %v2219_v38 = vld [vmem:[#allocation2 + $0x4270] sm:$0xff]  ;;  %v2118_v39 = vld [vmem:[#allocation2 + $0x3f48] sm:$0xff] }
 0x340   :  { %4347 = vmatpush1.msra.mxu0 %v2273_v40  ;;  %4309 = vmatprep.subr.mxu1 %v2172_v41  ;;  %v2214_v40 = vld [vmem:[#allocation2 + $0x4248] sm:$0xff]  ;;  %v2117_v41 = vld [vmem:[#allocation2 + $0x3f40] sm:$0xff] }
 0x341   :  { %4348 = vmatprep.subr.mxu0 %v2268_v44  ;;  %4310 = vmatpush2.msra.mxu1 %v2171_v45  ;;  %v2213_v44 = vld [vmem:[#allocation2 + $0x4240] sm:$0xff]  ;;  %v2112_v45 = vld [vmem:[#allocation2 + $0x3f18] sm:$0xff] }
 0x342   :  { %4349 = vmatpush1.msra.mxu0 %v2267_v46  ;;  %4311 = vmatprep.subr.mxu1 %v2166_v47  ;;  %v2208_v46 = vld [vmem:[#allocation2 + $0x4218] sm:$0xff]  ;;  %v2111_v47 = vld [vmem:[#allocation2 + $0x3f10] sm:$0xff] }
 0x343   :  { %4350 = vmatprep.subr.mxu0 %v2262_v49  ;;  %4312 = vmatpush2.msra.mxu1 %v2165_v50  ;;  %v2207_v49 = vld [vmem:[#allocation2 + $0x4210] sm:$0xff]  ;;  %v2394_v50 = vld [vmem:[#allocation2 + $0x47e8] sm:$0xff] }
 0x344   :  { %4351 = vmatpush1.msra.mxu0 %v2261_v51  ;;  %4313 = vmatprep.subr.mxu1 %v2160_v53  ;;  %v2490_v51 = vld [vmem:[#allocation2 + $0x4ae8] sm:$0xff]  ;;  %v2393_v53 = vld [vmem:[#allocation2 + $0x47e0] sm:$0xff] }
 0x345   :  { %4352 = vmatprep.subr.mxu0 %v2256_v55  ;;  %4314 = vmatpush2.msra.mxu1 %v2159_v56  ;;  %v2489_v55 = vld [vmem:[#allocation2 + $0x4ae0] sm:$0xff]  ;;  %v2388_v56 = vld [vmem:[#allocation2 + $0x47b8] sm:$0xff] }
 0x346   :  { %4353 = vmatpush1.msra.mxu0 %v2255_v58  ;;  %4315 = vmatprep.subr.mxu1 %v2154_v59  ;;  %v2484_v58 = vld [vmem:[#allocation2 + $0x4ab8] sm:$0xff]  ;;  %v2387_v59 = vld [vmem:[#allocation2 + $0x47b0] sm:$0xff] }
 0x347   :  { %4354 = vmatprep.subr.mxu0 %v2250_v60  ;;  %4316 = vmatpush2.msra.mxu1 %v2153_v61  ;;  %v2483_v60 = vld [vmem:[#allocation2 + $0x4ab0] sm:$0xff]  ;;  %v2382_v61 = vld [vmem:[#allocation2 + $0x4788] sm:$0xff] }
 0x348   :  { %4355 = vmatpush1.msra.mxu0 %v2249_v63  ;;  %4317 = vmatprep.subr.mxu1 %v2148_v0  ;;  %v2478_v63 = vld [vmem:[#allocation2 + $0x4a88] sm:$0xff]  ;;  %v2381_v0 = vld [vmem:[#allocation2 + $0x4780] sm:$0xff] }
 0x349   :  { %4356 = vmatprep.subr.mxu0 %v2244_v2  ;;  %4318 = vmatpush2.msra.mxu1 %v2147_v3  ;;  %v2477_v2 = vld [vmem:[#allocation2 + $0x4a80] sm:$0xff]  ;;  %v2376_v3 = vld [vmem:[#allocation2 + $0x4758] sm:$0xff] }
 0x34a   :  { %4357 = vmatpush1.msra.mxu0 %v2243_v4  ;;  %4319 = vmatprep.subr.mxu1 %v2142_v5  ;;  %v2472_v4 = vld [vmem:[#allocation2 + $0x4a58] sm:$0xff]  ;;  %v2375_v5 = vld [vmem:[#allocation2 + $0x4750] sm:$0xff] }
 0x34b   :  { %4358 = vmatprep.subr.mxu0 %v2238_v6  ;;  %4320 = vmatpush2.msra.mxu1 %v2141_v7  ;;  %v2471_v6 = vld [vmem:[#allocation2 + $0x4a50] sm:$0xff]  ;;  %v2370_v7 = vld [vmem:[#allocation2 + $0x4728] sm:$0xff] }
 0x34c   :  { %4359 = vmatpush1.msra.mxu0 %v2237_v11  ;;  %4321 = vmatprep.subr.mxu1 %v2136_v12  ;;  %v2466_v11 = vld [vmem:[#allocation2 + $0x4a28] sm:$0xff]  ;;  %v2369_v12 = vld [vmem:[#allocation2 + $0x4720] sm:$0xff] }
 0x34d   :  { %4360 = vmatprep.subr.mxu0 %v2232_v13  ;;  %4322 = vmatpush2.msra.mxu1 %v2135_v18  ;;  %v2465_v13 = vld [vmem:[#allocation2 + $0x4a20] sm:$0xff]  ;;  %v2364_v18 = vld [vmem:[#allocation2 + $0x46f8] sm:$0xff] }
 0x34e   :  { %4361 = vmatpush1.msra.mxu0 %v2231_v20  ;;  %4323 = vmatprep.subr.mxu1 %v2130_v22  ;;  %v2460_v20 = vld [vmem:[#allocation2 + $0x49f8] sm:$0xff]  ;;  %v2363_v22 = vld [vmem:[#allocation2 + $0x46f0] sm:$0xff] }
 0x34f   :  { %4362 = vmatprep.subr.mxu0 %v2226_v24  ;;  %4324 = vmatpush2.msra.mxu1 %v2129_v30  ;;  %v2459_v24 = vld [vmem:[#allocation2 + $0x49f0] sm:$0xff]  ;;  %v2358_v30 = vld [vmem:[#allocation2 + $0x46c8] sm:$0xff] }
 0x350   :  { %4363 = vmatpush1.msra.mxu0 %v2225_v31  ;;  %4325 = vmatprep.subr.mxu1 %v2124_v33  ;;  %v2454_v31 = vld [vmem:[#allocation2 + $0x49c8] sm:$0xff]  ;;  %v2357_v33 = vld [vmem:[#allocation2 + $0x46c0] sm:$0xff] }
 0x351   :  { %4364 = vmatprep.subr.mxu0 %v2220_v34  ;;  %4326 = vmatpush2.msra.mxu1 %v2123_v37  ;;  %v2453_v34 = vld [vmem:[#allocation2 + $0x49c0] sm:$0xff]  ;;  %v2352_v37 = vld [vmem:[#allocation2 + $0x4698] sm:$0xff] }
 0x352   :  { %4365 = vmatpush1.msra.mxu0 %v2219_v38  ;;  %4327 = vmatprep.subr.mxu1 %v2118_v39  ;;  %v2448_v38 = vld [vmem:[#allocation2 + $0x4998] sm:$0xff]  ;;  %v2351_v39 = vld [vmem:[#allocation2 + $0x4690] sm:$0xff] }
 0x353   :  { %4366 = vmatprep.subr.mxu0 %v2214_v40  ;;  %4328 = vmatpush2.msra.mxu1 %v2117_v41  ;;  %v2447_v40 = vld [vmem:[#allocation2 + $0x4990] sm:$0xff]  ;;  %v2346_v41 = vld [vmem:[#allocation2 + $0x4668] sm:$0xff] }
 0x354   :  { %4367 = vmatpush1.msra.mxu0 %v2213_v44  ;;  %4329 = vmatprep.subr.mxu1 %v2112_v45  ;;  %v2442_v44 = vld [vmem:[#allocation2 + $0x4968] sm:$0xff]  ;;  %v2345_v45 = vld [vmem:[#allocation2 + $0x4660] sm:$0xff] }
 0x355   :  { %4368 = vmatprep.subr.mxu0 %v2208_v46  ;;  %4330 = vmatpush2.msra.mxu1 %v2111_v47  ;;  %v2441_v46 = vld [vmem:[#allocation2 + $0x4960] sm:$0xff]  ;;  %v2340_v47 = vld [vmem:[#allocation2 + $0x4638] sm:$0xff] }
 0x356   :  { %4331 = vmatprep.mubr.f32.mxu1 %v6254_v36  ;;  %4369 = vmatpush1.msra.mxu0 %v2207_v49  ;;  %v2436_v49 = vld [vmem:[#allocation2 + $0x4938] sm:$0xff] }
 0x357   :  { %4332 = vmatmul.mubr.f32.vlgmr.msra.gmra.mxu1 %v6247_v17  ;;  %4370 = vmatprep.subr.mxu0 %v2394_v50  ;;  %v2339_v50 = vld [vmem:[#allocation2 + $0x4630] sm:$0xff] }
 0x358   :  { %4409 = vmatprep.subr.mxu1 %v2490_v51  ;;  %4371 = vmatpush2.msra.mxu0 %v2393_v53  ;;  %v2435_v51 = vld [vmem:[#allocation2 + $0x4930] sm:$0xff]  ;;  %v2334_v53 = vld [vmem:[#allocation2 + $0x4608] sm:$0xff] }
 0x359   :  { %4410 = vmatpush1.msra.mxu1 %v2489_v55  ;;  %4372 = vmatprep.subr.mxu0 %v2388_v56  ;;  %v2430_v55 = vld [vmem:[#allocation2 + $0x4908] sm:$0xff]  ;;  %v2333_v56 = vld [vmem:[#allocation2 + $0x4600] sm:$0xff] }
 0x35a   :  { %4411 = vmatprep.subr.mxu1 %v2484_v58  ;;  %4373 = vmatpush2.msra.mxu0 %v2387_v59  ;;  %v2429_v58 = vld [vmem:[#allocation2 + $0x4900] sm:$0xff]  ;;  %v2328_v59 = vld [vmem:[#allocation2 + $0x45d8] sm:$0xff] }
 0x35b   :  { %4412 = vmatpush1.msra.mxu1 %v2483_v60  ;;  %4374 = vmatprep.subr.mxu0 %v2382_v61  ;;  %v2424_v60 = vld [vmem:[#allocation2 + $0x48d8] sm:$0xff]  ;;  %v2327_v61 = vld [vmem:[#allocation2 + $0x45d0] sm:$0xff] }
 0x35c   :  { %4413 = vmatprep.subr.mxu1 %v2478_v63  ;;  %4375 = vmatpush2.msra.mxu0 %v2381_v0  ;;  %v2423_v63 = vld [vmem:[#allocation2 + $0x48d0] sm:$0xff]  ;;  %v2322_v0 = vld [vmem:[#allocation2 + $0x45a8] sm:$0xff] }
 0x35d   :  { %4414 = vmatpush1.msra.mxu1 %v2477_v2  ;;  %4376 = vmatprep.subr.mxu0 %v2376_v3  ;;  %v2418_v2 = vld [vmem:[#allocation2 + $0x48a8] sm:$0xff]  ;;  %v2321_v3 = vld [vmem:[#allocation2 + $0x45a0] sm:$0xff] }
 0x35e   :  { %4415 = vmatprep.subr.mxu1 %v2472_v4  ;;  %4377 = vmatpush2.msra.mxu0 %v2375_v5  ;;  %v2417_v4 = vld [vmem:[#allocation2 + $0x48a0] sm:$0xff]  ;;  %v2316_v5 = vld [vmem:[#allocation2 + $0x4578] sm:$0xff] }
 0x35f   :  { %4416 = vmatpush1.msra.mxu1 %v2471_v6  ;;  %4378 = vmatprep.subr.mxu0 %v2370_v7  ;;  %v2412_v6 = vld [vmem:[#allocation2 + $0x4878] sm:$0xff]  ;;  %v2315_v7 = vld [vmem:[#allocation2 + $0x4570] sm:$0xff] }
 0x360   :  { %4417 = vmatprep.subr.mxu1 %v2466_v11  ;;  %4379 = vmatpush2.msra.mxu0 %v2369_v12  ;;  %v2411_v11 = vld [vmem:[#allocation2 + $0x4870] sm:$0xff]  ;;  %v2310_v12 = vld [vmem:[#allocation2 + $0x4548] sm:$0xff] }
 0x361   :  { %4418 = vmatpush1.msra.mxu1 %v2465_v13  ;;  %4380 = vmatprep.subr.mxu0 %v2364_v18  ;;  %v2406_v13 = vld [vmem:[#allocation2 + $0x4848] sm:$0xff]  ;;  %v2309_v18 = vld [vmem:[#allocation2 + $0x4540] sm:$0xff] }
 0x362   :  { %4419 = vmatprep.subr.mxu1 %v2460_v20  ;;  %4381 = vmatpush2.msra.mxu0 %v2363_v22  ;;  %v2405_v20 = vld [vmem:[#allocation2 + $0x4840] sm:$0xff]  ;;  %v2304_v22 = vld [vmem:[#allocation2 + $0x4518] sm:$0xff] }
 0x363   :  { %4420 = vmatpush1.msra.mxu1 %v2459_v24  ;;  %4382 = vmatprep.subr.mxu0 %v2358_v30  ;;  %v2400_v24 = vld [vmem:[#allocation2 + $0x4818] sm:$0xff]  ;;  %v2303_v30 = vld [vmem:[#allocation2 + $0x4510] sm:$0xff] }
 0x364   :  { %4421 = vmatprep.subr.mxu1 %v2454_v31  ;;  %4383 = vmatpush2.msra.mxu0 %v2357_v33  ;;  %v2399_v31 = vld [vmem:[#allocation2 + $0x4810] sm:$0xff]  ;;  %v188_v33 = vld [vmem:[#allocation2 + $0x2f8] sm:$0xff] }
 0x365   :  { %4422 = vmatpush1.msra.mxu1 %v2453_v34  ;;  %4384 = vmatprep.subr.mxu0 %v2352_v37  ;;  %v380_v34 = vld [vmem:[#allocation2 + $0x8f8] sm:$0xff]  ;;  %v187_v37 = vld [vmem:[#allocation2 + $0x2f0] sm:$0xff] }
 0x366   :  { %4423 = vmatprep.subr.mxu1 %v2448_v38  ;;  %4385 = vmatpush2.msra.mxu0 %v2351_v39  ;;  %v379_v38 = vld [vmem:[#allocation2 + $0x8f0] sm:$0xff]  ;;  %v182_v39 = vld [vmem:[#allocation2 + $0x2c8] sm:$0xff] }
 0x367   :  { %4424 = vmatpush1.msra.mxu1 %v2447_v40  ;;  %4386 = vmatprep.subr.mxu0 %v2346_v41  ;;  %v374_v40 = vld [vmem:[#allocation2 + $0x8c8] sm:$0xff]  ;;  %v5941_v41 = vld.sshfl [vmem:[%s6436_s0 + $0x30] sm:$0x3 pattern:$0x76325410] }
 0x368   :  { %4425 = vmatprep.subr.mxu1 %v2442_v44  ;;  %4387 = vmatpush2.msra.mxu0 %v2345_v45  ;;  %v181_v44 = vld [vmem:[#allocation2 + $0x2c0] sm:$0xff] }
 0x369   :  { %4426 = vmatpush1.msra.mxu1 %v2441_v46  ;;  %4388 = vmatprep.subr.mxu0 %v2340_v47  ;;  %v373_v45 = vld [vmem:[#allocation2 + $0x8c0] sm:$0xff]  ;;  %v176_v46 = vld [vmem:[#allocation2 + $0x298] sm:$0xff] }
 0x36a   :  { %4427 = vmatprep.subr.mxu1 %v2436_v49  ;;  %4389 = vmatpush2.msra.mxu0 %v2339_v50  ;;  %v368_v47 = vld [vmem:[#allocation2 + $0x898] sm:$0xff]  ;;  %v175_v49 = vld [vmem:[#allocation2 + $0x290] sm:$0xff] }
 0x36b   :  { %4428 = vmatpush1.msra.mxu1 %v2435_v51  ;;  %4390 = vmatprep.subr.mxu0 %v2334_v53  ;;  %v367_v50 = vld [vmem:[#allocation2 + $0x890] sm:$0xff]  ;;  %v170_v51 = vld [vmem:[#allocation2 + $0x268] sm:$0xff] }
 0x36c   :  { %4429 = vmatprep.subr.mxu1 %v2430_v55  ;;  %4391 = vmatpush2.msra.mxu0 %v2333_v56  ;;  %v362_v53 = vld [vmem:[#allocation2 + $0x868] sm:$0xff]  ;;  %v169_v55 = vld [vmem:[#allocation2 + $0x260] sm:$0xff] }
 0x36d   :  { %4430 = vmatpush1.msra.mxu1 %v2429_v58  ;;  %4392 = vmatprep.subr.mxu0 %v2328_v59  ;;  %v361_v56 = vld [vmem:[#allocation2 + $0x860] sm:$0xff]  ;;  %v164_v58 = vld [vmem:[#allocation2 + $0x238] sm:$0xff] }
 0x36e   :  { %4431 = vmatprep.subr.mxu1 %v2424_v60  ;;  %4393 = vmatpush2.msra.mxu0 %v2327_v61  ;;  %v356_v59 = vld [vmem:[#allocation2 + $0x838] sm:$0xff]  ;;  %v163_v60 = vld [vmem:[#allocation2 + $0x230] sm:$0xff] }
 0x36f   :  { %4432 = vmatpush1.msra.mxu1 %v2423_v63  ;;  %4394 = vmatprep.subr.mxu0 %v2322_v0  ;;  %v355_v61 = vld [vmem:[#allocation2 + $0x830] sm:$0xff]  ;;  %v158_v63 = vld [vmem:[#allocation2 + $0x208] sm:$0xff] }
 0x370   :  { %4433 = vmatprep.subr.mxu1 %v2418_v2  ;;  %4395 = vmatpush2.msra.mxu0 %v2321_v3  ;;  %v350_v0 = vld [vmem:[#allocation2 + $0x808] sm:$0xff]  ;;  %v157_v2 = vld [vmem:[#allocation2 + $0x200] sm:$0xff] }
 0x371   :  { %4434 = vmatpush1.msra.mxu1 %v2417_v4  ;;  %4396 = vmatprep.subr.mxu0 %v2316_v5  ;;  %v349_v3 = vld [vmem:[#allocation2 + $0x800] sm:$0xff]  ;;  %v152_v4 = vld [vmem:[#allocation2 + $0x1d8] sm:$0xff] }
 0x372   :  { %4435 = vmatprep.subr.mxu1 %v2412_v6  ;;  %4397 = vmatpush2.msra.mxu0 %v2315_v7  ;;  %v344_v5 = vld [vmem:[#allocation2 + $0x7d8] sm:$0xff]  ;;  %v151_v6 = vld [vmem:[#allocation2 + $0x1d0] sm:$0xff] }
 0x373   :  { %4436 = vmatpush1.msra.mxu1 %v2411_v11  ;;  %4398 = vmatprep.subr.mxu0 %v2310_v12  ;;  %v343_v7 = vld [vmem:[#allocation2 + $0x7d0] sm:$0xff]  ;;  %v146_v11 = vld [vmem:[#allocation2 + $0x1a8] sm:$0xff] }
 0x374   :  { %4437 = vmatprep.subr.mxu1 %v2406_v13  ;;  %4399 = vmatpush2.msra.mxu0 %v2309_v18  ;;  %v338_v12 = vld [vmem:[#allocation2 + $0x7a8] sm:$0xff]  ;;  %v145_v13 = vld [vmem:[#allocation2 + $0x1a0] sm:$0xff] }
 0x375   :  { %4438 = vmatpush1.msra.mxu1 %v2405_v20  ;;  %4400 = vmatprep.subr.mxu0 %v2304_v22  ;;  %v337_v18 = vld [vmem:[#allocation2 + $0x7a0] sm:$0xff]  ;;  %v140_v20 = vld [vmem:[#allocation2 + $0x178] sm:$0xff] }
 0x376   :  { %4439 = vmatprep.subr.mxu1 %v2400_v24  ;;  %4401 = vmatpush2.msra.mxu0 %v2303_v30  ;;  %v332_v22 = vld [vmem:[#allocation2 + $0x778] sm:$0xff]  ;;  %v139_v24 = vld [vmem:[#allocation2 + $0x170] sm:$0xff] }
 0x377   :  { %4402 = vmatprep.mubr.f32.mxu0 %v6258_v52  ;;  %4440 = vmatpush1.msra.mxu1 %v2399_v31  ;;  %v331_v30 = vld [vmem:[#allocation2 + $0x770] sm:$0xff]  ;;  %v134_v31 = vld [vmem:[#allocation2 + $0x148] sm:$0xff] }
 0x378   :  { %4403 = vmatmul.mubr.f32.vlgmr.msra.gmra.mxu0 %v6250_v27  ;;  %4473 = vmatprep.mubr.f32.mxu1 %v6081_v14 }
 0x379   :  { %4480 = vmatprep.subr.mxu0 %v188_v33  ;;  %4551 = vmatprep.subr.mxu1 %v380_v34  ;;  %v326_v33 = vld [vmem:[#allocation2 + $0x748] sm:$0xff]  ;;  %v133_v34 = vld [vmem:[#allocation2 + $0x140] sm:$0xff] }
 0x37a   :  { %4474 = vmatmul.mubr.f32.vlgmr.msra.gmra.mxu1 %v5941_v41  ;;  %4481 = vmatpush1.msra.mxu0 %v187_v37  ;;  %v325_v37 = vld [vmem:[#allocation2 + $0x740] sm:$0xff]  ;;  %v319_v41 = vld [vmem:[#allocation2 + $0x710] sm:$0xff] }
 0x37b   :  { %4552 = vmatpush1.msra.mxu1 %v379_v38  ;;  %4482 = vmatprep.subr.mxu0 %v182_v39  ;;  %v128_v38 = vld [vmem:[#allocation2 + $0x118] sm:$0xff] }
 0x37c   :  { %4553 = vmatprep.subr.mxu1 %v374_v40  ;;  %4483 = vmatpush1.msra.mxu0 %v181_v44  ;;  %v320_v39 = vld [vmem:[#allocation2 + $0x718] sm:$0xff]  ;;  %v127_v40 = vld [vmem:[#allocation2 + $0x110] sm:$0xff]  ;;  %v122_v44 = vld [vmem:[#allocation2 + $0xe8] sm:$0xff] }
 0x37d   :  { %4554 = vmatpush1.msra.mxu1 %v373_v45  ;;  %4484 = vmatprep.subr.mxu0 %v176_v46  ;;  %v314_v45 = vld [vmem:[#allocation2 + $0x6e8] sm:$0xff]  ;;  %v121_v46 = vld [vmem:[#allocation2 + $0xe0] sm:$0xff] }
 0x37e   :  { %4555 = vmatprep.subr.mxu1 %v368_v47  ;;  %4485 = vmatpush1.msra.mxu0 %v175_v49  ;;  %v313_v47 = vld [vmem:[#allocation2 + $0x6e0] sm:$0xff]  ;;  %v116_v49 = vld [vmem:[#allocation2 + $0xb8] sm:$0xff] }
 0x37f   :  { %4556 = vmatpush1.msra.mxu1 %v367_v50  ;;  %4486 = vmatprep.subr.mxu0 %v170_v51  ;;  %v308_v50 = vld [vmem:[#allocation2 + $0x6b8] sm:$0xff]  ;;  %v115_v51 = vld [vmem:[#allocation2 + $0xb0] sm:$0xff] }
 0x380   :  { %4557 = vmatprep.subr.mxu1 %v362_v53  ;;  %4487 = vmatpush1.msra.mxu0 %v169_v55  ;;  %v307_v53 = vld [vmem:[#allocation2 + $0x6b0] sm:$0xff]  ;;  %v110_v55 = vld [vmem:[#allocation2 + $0x88] sm:$0xff] }
 0x381   :  { %4558 = vmatpush1.msra.mxu1 %v361_v56  ;;  %4488 = vmatprep.subr.mxu0 %v164_v58  ;;  %v302_v56 = vld [vmem:[#allocation2 + $0x688] sm:$0xff]  ;;  %v109_v58 = vld [vmem:[#allocation2 + $0x80] sm:$0xff] }
 0x382   :  { %4559 = vmatprep.subr.mxu1 %v356_v59  ;;  %4489 = vmatpush1.msra.mxu0 %v163_v60  ;;  %v301_v59 = vld [vmem:[#allocation2 + $0x680] sm:$0xff]  ;;  %v104_v60 = vld [vmem:[#allocation2 + $0x58] sm:$0xff] }
 0x383   :  { %4560 = vmatpush1.msra.mxu1 %v355_v61  ;;  %4490 = vmatprep.subr.mxu0 %v158_v63  ;;  %v296_v61 = vld [vmem:[#allocation2 + $0x658] sm:$0xff]  ;;  %v103_v63 = vld [vmem:[#allocation2 + $0x50] sm:$0xff] }
 0x384   :  { %4561 = vmatprep.subr.mxu1 %v350_v0  ;;  %4491 = vmatpush1.msra.mxu0 %v157_v2  ;;  %v295_v0 = vld [vmem:[#allocation2 + $0x650] sm:$0xff]  ;;  %v98_v2 = vld [vmem:[#allocation2 + $0x28] sm:$0xff] }
 0x385   :  { %4562 = vmatpush1.msra.mxu1 %v349_v3  ;;  %4492 = vmatprep.subr.mxu0 %v152_v4  ;;  %v290_v3 = vld [vmem:[#allocation2 + $0x628] sm:$0xff]  ;;  %v97_v4 = vld [vmem:[#allocation2 + $0x20] sm:$0xff] }
 0x386   :  { %4563 = vmatprep.subr.mxu1 %v344_v5  ;;  %4493 = vmatpush1.msra.mxu0 %v151_v6  ;;  %v289_v5 = vld [vmem:[#allocation2 + $0x620] sm:$0xff]  ;;  %v284_v6 = vld [vmem:[#allocation2 + $0x5f8] sm:$0xff] }
 0x387   :  { %4564 = vmatpush1.msra.mxu1 %v343_v7  ;;  %4494 = vmatprep.subr.mxu0 %v146_v11  ;;  %v476_v7 = vld [vmem:[#allocation2 + $0xbf8] sm:$0xff]  ;;  %v283_v11 = vld [vmem:[#allocation2 + $0x5f0] sm:$0xff] }
 0x388   :  { %4565 = vmatprep.subr.mxu1 %v338_v12  ;;  %4495 = vmatpush1.msra.mxu0 %v145_v13  ;;  %v475_v12 = vld [vmem:[#allocation2 + $0xbf0] sm:$0xff]  ;;  %v278_v13 = vld [vmem:[#allocation2 + $0x5c8] sm:$0xff] }
 0x389   :  { %4566 = vmatpush1.msra.mxu1 %v337_v18  ;;  %4496 = vmatprep.subr.mxu0 %v140_v20  ;;  %v470_v18 = vld [vmem:[#allocation2 + $0xbc8] sm:$0xff]  ;;  %v277_v20 = vld [vmem:[#allocation2 + $0x5c0] sm:$0xff] }
 0x38a   :  { %4567 = vmatprep.subr.mxu1 %v332_v22  ;;  %4497 = vmatpush1.msra.mxu0 %v139_v24  ;;  %v469_v22 = vld [vmem:[#allocation2 + $0xbc0] sm:$0xff]  ;;  %v272_v24 = vld [vmem:[#allocation2 + $0x598] sm:$0xff] }
 0x38b   :  { %4568 = vmatpush1.msra.mxu1 %v331_v30  ;;  %4498 = vmatprep.subr.mxu0 %v134_v31  ;;  %v464_v30 = vld [vmem:[#allocation2 + $0xb98] sm:$0xff]  ;;  %v271_v31 = vld [vmem:[#allocation2 + $0x590] sm:$0xff] }
 0x38c   :  { %4569 = vmatprep.subr.mxu1 %v326_v33  ;;  %4499 = vmatpush1.msra.mxu0 %v133_v34  ;;  %v463_v33 = vld [vmem:[#allocation2 + $0xb90] sm:$0xff]  ;;  %v266_v34 = vld [vmem:[#allocation2 + $0x568] sm:$0xff] }
 0x38d   :  { %4570 = vmatpush1.msra.mxu1 %v325_v37  ;;  %4500 = vmatprep.subr.mxu0 %v128_v38  ;;  %v458_v37 = vld [vmem:[#allocation2 + $0xb68] sm:$0xff]  ;;  %v265_v38 = vld [vmem:[#allocation2 + $0x560] sm:$0xff] }
 0x38e   :  { %4571 = vmatprep.subr.mxu1 %v320_v39  ;;  %4501 = vmatpush1.msra.mxu0 %v127_v40  ;;  %v457_v39 = vld [vmem:[#allocation2 + $0xb60] sm:$0xff]  ;;  %v260_v40 = vld [vmem:[#allocation2 + $0x538] sm:$0xff] }
 0x38f   :  { %4572 = vmatpush1.msra.mxu1 %v319_v41  ;;  %4502 = vmatprep.subr.mxu0 %v122_v44  ;;  %v452_v41 = vld [vmem:[#allocation2 + $0xb38] sm:$0xff]  ;;  %v259_v44 = vld [vmem:[#allocation2 + $0x530] sm:$0xff] }
 0x390   :  { %4573 = vmatprep.subr.mxu1 %v314_v45  ;;  %4503 = vmatpush1.msra.mxu0 %v121_v46  ;;  %v451_v45 = vld [vmem:[#allocation2 + $0xb30] sm:$0xff]  ;;  %v254_v46 = vld [vmem:[#allocation2 + $0x508] sm:$0xff] }
 0x391   :  { %4574 = vmatpush1.msra.mxu1 %v313_v47  ;;  %4504 = vmatprep.subr.mxu0 %v116_v49  ;;  %v446_v47 = vld [vmem:[#allocation2 + $0xb08] sm:$0xff]  ;;  %v253_v49 = vld [vmem:[#allocation2 + $0x500] sm:$0xff] }
 0x392   :  { %4575 = vmatprep.subr.mxu1 %v308_v50  ;;  %4505 = vmatpush1.msra.mxu0 %v115_v51  ;;  %v445_v50 = vld [vmem:[#allocation2 + $0xb00] sm:$0xff]  ;;  %v248_v51 = vld [vmem:[#allocation2 + $0x4d8] sm:$0xff] }
 0x393   :  { %4576 = vmatpush1.msra.mxu1 %v307_v53  ;;  %4506 = vmatprep.subr.mxu0 %v110_v55  ;;  %v440_v53 = vld [vmem:[#allocation2 + $0xad8] sm:$0xff]  ;;  %v247_v55 = vld [vmem:[#allocation2 + $0x4d0] sm:$0xff] }
 0x394   :  { %4577 = vmatprep.subr.mxu1 %v302_v56  ;;  %4507 = vmatpush1.msra.mxu0 %v109_v58  ;;  %v439_v56 = vld [vmem:[#allocation2 + $0xad0] sm:$0xff]  ;;  %v242_v58 = vld [vmem:[#allocation2 + $0x4a8] sm:$0xff] }
 0x395   :  { %4578 = vmatpush1.msra.mxu1 %v301_v59  ;;  %4508 = vmatprep.subr.mxu0 %v104_v60  ;;  %v434_v59 = vld [vmem:[#allocation2 + $0xaa8] sm:$0xff]  ;;  %v241_v60 = vld [vmem:[#allocation2 + $0x4a0] sm:$0xff] }
 0x396   :  { %4579 = vmatprep.subr.mxu1 %v296_v61  ;;  %4509 = vmatpush1.msra.mxu0 %v103_v63  ;;  %v433_v61 = vld [vmem:[#allocation2 + $0xaa0] sm:$0xff]  ;;  %v236_v63 = vld [vmem:[#allocation2 + $0x478] sm:$0xff] }
 0x397   :  { %4580 = vmatpush1.msra.mxu1 %v295_v0  ;;  %4510 = vmatprep.subr.mxu0 %v98_v2  ;;  %v428_v0 = vld [vmem:[#allocation2 + $0xa78] sm:$0xff]  ;;  %v235_v2 = vld [vmem:[#allocation2 + $0x470] sm:$0xff] }
 0x398   :  { %4581 = vmatprep.subr.mxu1 %v290_v3  ;;  %4511 = vmatpush1.msra.mxu0 %v97_v4  ;;  %v427_v3 = vld [vmem:[#allocation2 + $0xa70] sm:$0xff]  ;;  %v230_v4 = vld [vmem:[#allocation2 + $0x448] sm:$0xff] }
 0x399   :  { %4582 = vmatpush1.msra.mxu1 %v289_v5  ;;  %4512 = vmatprep.subr.mxu0 %v284_v6  ;;  %v422_v5 = vld [vmem:[#allocation2 + $0xa48] sm:$0xff]  ;;  %v229_v6 = vld [vmem:[#allocation2 + $0x440] sm:$0xff] }
 0x39a   :  { %4583 = vmatprep.subr.mxu1 %v476_v7  ;;  %4513 = vmatpush2.msra.mxu0 %v283_v11  ;;  %v421_v7 = vld [vmem:[#allocation2 + $0xa40] sm:$0xff]  ;;  %v224_v11 = vld [vmem:[#allocation2 + $0x418] sm:$0xff] }
 0x39b   :  { %4584 = vmatpush2.msra.mxu1 %v475_v12  ;;  %4514 = vmatprep.subr.mxu0 %v278_v13  ;;  %v416_v12 = vld [vmem:[#allocation2 + $0xa18] sm:$0xff]  ;;  %v223_v13 = vld [vmem:[#allocation2 + $0x410] sm:$0xff] }
 0x39c   :  { %4585 = vmatprep.subr.mxu1 %v470_v18  ;;  %4515 = vmatpush2.msra.mxu0 %v277_v20  ;;  %v415_v18 = vld [vmem:[#allocation2 + $0xa10] sm:$0xff]  ;;  %v218_v20 = vld [vmem:[#allocation2 + $0x3e8] sm:$0xff] }
 0x39d   :  { %4586 = vmatpush2.msra.mxu1 %v469_v22  ;;  %4516 = vmatprep.subr.mxu0 %v272_v24  ;;  %v410_v22 = vld [vmem:[#allocation2 + $0x9e8] sm:$0xff]  ;;  %v217_v24 = vld [vmem:[#allocation2 + $0x3e0] sm:$0xff] }
 0x39e   :  { %4587 = vmatprep.subr.mxu1 %v464_v30  ;;  %4517 = vmatpush2.msra.mxu0 %v271_v31  ;;  %v409_v30 = vld [vmem:[#allocation2 + $0x9e0] sm:$0xff]  ;;  %v212_v31 = vld [vmem:[#allocation2 + $0x3b8] sm:$0xff] }
 0x39f   :  { %4588 = vmatpush2.msra.mxu1 %v463_v33  ;;  %4518 = vmatprep.subr.mxu0 %v266_v34  ;;  %v404_v33 = vld [vmem:[#allocation2 + $0x9b8] sm:$0xff]  ;;  %v211_v34 = vld [vmem:[#allocation2 + $0x3b0] sm:$0xff] }
 0x3a0   :  { %4589 = vmatprep.subr.mxu1 %v458_v37  ;;  %4519 = vmatpush2.msra.mxu0 %v265_v38  ;;  %v403_v37 = vld [vmem:[#allocation2 + $0x9b0] sm:$0xff]  ;;  %v206_v38 = vld [vmem:[#allocation2 + $0x388] sm:$0xff] }
 0x3a1   :  { %4590 = vmatpush2.msra.mxu1 %v457_v39  ;;  %4520 = vmatprep.subr.mxu0 %v260_v40  ;;  %v398_v39 = vld [vmem:[#allocation2 + $0x988] sm:$0xff]  ;;  %v205_v40 = vld [vmem:[#allocation2 + $0x380] sm:$0xff] }
 0x3a2   :  { %4591 = vmatprep.subr.mxu1 %v452_v41  ;;  %4521 = vmatpush2.msra.mxu0 %v259_v44  ;;  %v397_v41 = vld [vmem:[#allocation2 + $0x980] sm:$0xff]  ;;  %v200_v44 = vld [vmem:[#allocation2 + $0x358] sm:$0xff] }
 0x3a3   :  { %4592 = vmatpush2.msra.mxu1 %v451_v45  ;;  %4522 = vmatprep.subr.mxu0 %v254_v46  ;;  %v392_v45 = vld [vmem:[#allocation2 + $0x958] sm:$0xff]  ;;  %v199_v46 = vld [vmem:[#allocation2 + $0x350] sm:$0xff] }
 0x3a4   :  { %4593 = vmatprep.subr.mxu1 %v446_v47  ;;  %4523 = vmatpush2.msra.mxu0 %v253_v49  ;;  %v391_v47 = vld [vmem:[#allocation2 + $0x950] sm:$0xff]  ;;  %v194_v49 = vld [vmem:[#allocation2 + $0x328] sm:$0xff] }
 0x3a5   :  { %4594 = vmatpush2.msra.mxu1 %v445_v50  ;;  %4524 = vmatprep.subr.mxu0 %v248_v51  ;;  %v386_v50 = vld [vmem:[#allocation2 + $0x928] sm:$0xff]  ;;  %v193_v51 = vld [vmem:[#allocation2 + $0x320] sm:$0xff] }
 0x3a6   :  { %4595 = vmatprep.subr.mxu1 %v440_v53  ;;  %4525 = vmatpush2.msra.mxu0 %v247_v55  ;;  %v385_v53 = vld [vmem:[#allocation2 + $0x920] sm:$0xff]  ;;  %v572_v55 = vld [vmem:[#allocation2 + $0xef8] sm:$0xff] }
 0x3a7   :  { %4596 = vmatpush2.msra.mxu1 %v439_v56  ;;  %4526 = vmatprep.subr.mxu0 %v242_v58  ;;  %v764_v56 = vld [vmem:[#allocation2 + $0x14f8] sm:$0xff]  ;;  %v571_v58 = vld [vmem:[#allocation2 + $0xef0] sm:$0xff] }
 0x3a8   :  { %4597 = vmatprep.subr.mxu1 %v434_v59  ;;  %4527 = vmatpush2.msra.mxu0 %v241_v60  ;;  %v763_v59 = vld [vmem:[#allocation2 + $0x14f0] sm:$0xff]  ;;  %v566_v60 = vld [vmem:[#allocation2 + $0xec8] sm:$0xff] }
 0x3a9   :  { %4598 = vmatpush2.msra.mxu1 %v433_v61  ;;  %4528 = vmatprep.subr.mxu0 %v236_v63  ;;  %v758_v61 = vld [vmem:[#allocation2 + $0x14c8] sm:$0xff]  ;;  %v565_v63 = vld [vmem:[#allocation2 + $0xec0] sm:$0xff] }
 0x3aa   :  { %4599 = vmatprep.subr.mxu1 %v428_v0  ;;  %4529 = vmatpush2.msra.mxu0 %v235_v2  ;;  %v757_v0 = vld [vmem:[#allocation2 + $0x14c0] sm:$0xff]  ;;  %v752_v2 = vld [vmem:[#allocation2 + $0x1498] sm:$0xff] }
 0x3ab   :  { %4600 = vmatpush2.msra.mxu1 %v427_v3  ;;  %4530 = vmatprep.subr.mxu0 %v230_v4  ;;  %v559_v3 = vld [vmem:[#allocation2 + $0xe90] sm:$0xff]  ;;  %v554_v4 = vld [vmem:[#allocation2 + $0xe68] sm:$0xff] }
 0x3ac   :  { %4601 = vmatprep.subr.mxu1 %v422_v5  ;;  %4531 = vmatpush2.msra.mxu0 %v229_v6  ;;  %v745_v5 = vld [vmem:[#allocation2 + $0x1460] sm:$0xff]  ;;  %v548_v6 = vld [vmem:[#allocation2 + $0xe38] sm:$0xff] }
 0x3ad   :  { %4602 = vmatpush2.msra.mxu1 %v421_v7  ;;  %4532 = vmatprep.subr.mxu0 %v224_v11  ;;  %v740_v7 = vld [vmem:[#allocation2 + $0x1438] sm:$0xff]  ;;  %v547_v11 = vld [vmem:[#allocation2 + $0xe30] sm:$0xff] }
 0x3ae   :  { %4603 = vmatprep.subr.mxu1 %v416_v12  ;;  %4533 = vmatpush2.msra.mxu0 %v223_v13  ;;  %v739_v12 = vld [vmem:[#allocation2 + $0x1430] sm:$0xff]  ;;  %v542_v13 = vld [vmem:[#allocation2 + $0xe08] sm:$0xff] }
 0x3af   :  { %4604 = vmatpush2.msra.mxu1 %v415_v18  ;;  %4534 = vmatprep.subr.mxu0 %v218_v20  ;;  %v734_v18 = vld [vmem:[#allocation2 + $0x1408] sm:$0xff]  ;;  %v541_v20 = vld [vmem:[#allocation2 + $0xe00] sm:$0xff] }
 0x3b0   :  { %4605 = vmatprep.subr.mxu1 %v410_v22  ;;  %4535 = vmatpush2.msra.mxu0 %v217_v24  ;;  %v733_v22 = vld [vmem:[#allocation2 + $0x1400] sm:$0xff]  ;;  %v536_v24 = vld [vmem:[#allocation2 + $0xdd8] sm:$0xff] }
 0x3b1   :  { %4606 = vmatpush2.msra.mxu1 %v409_v30  ;;  %4536 = vmatprep.subr.mxu0 %v212_v31  ;;  %v728_v30 = vld [vmem:[#allocation2 + $0x13d8] sm:$0xff]  ;;  %v535_v31 = vld [vmem:[#allocation2 + $0xdd0] sm:$0xff] }
 0x3b2   :  { %4607 = vmatprep.subr.mxu1 %v404_v33  ;;  %4537 = vmatpush2.msra.mxu0 %v211_v34  ;;  %v727_v33 = vld [vmem:[#allocation2 + $0x13d0] sm:$0xff]  ;;  %v530_v34 = vld [vmem:[#allocation2 + $0xda8] sm:$0xff] }
 0x3b3   :  { %4608 = vmatpush2.msra.mxu1 %v403_v37  ;;  %4538 = vmatprep.subr.mxu0 %v206_v38  ;;  %v722_v37 = vld [vmem:[#allocation2 + $0x13a8] sm:$0xff]  ;;  %v529_v38 = vld [vmem:[#allocation2 + $0xda0] sm:$0xff] }
 0x3b4   :  { %4609 = vmatprep.subr.mxu1 %v398_v39  ;;  %4539 = vmatpush2.msra.mxu0 %v205_v40  ;;  %v721_v39 = vld [vmem:[#allocation2 + $0x13a0] sm:$0xff]  ;;  %v524_v40 = vld [vmem:[#allocation2 + $0xd78] sm:$0xff] }
 0x3b5   :  { %4610 = vmatpush2.msra.mxu1 %v397_v41  ;;  %4540 = vmatprep.subr.mxu0 %v200_v44  ;;  %v716_v41 = vld [vmem:[#allocation2 + $0x1378] sm:$0xff]  ;;  %v523_v44 = vld [vmem:[#allocation2 + $0xd70] sm:$0xff] }
 0x3b6   :  { %4611 = vmatprep.subr.mxu1 %v392_v45  ;;  %4541 = vmatpush2.msra.mxu0 %v199_v46  ;;  %v715_v45 = vld [vmem:[#allocation2 + $0x1370] sm:$0xff]  ;;  %v518_v46 = vld [vmem:[#allocation2 + $0xd48] sm:$0xff] }
 0x3b7   :  { %4612 = vmatpush2.msra.mxu1 %v391_v47  ;;  %4542 = vmatprep.subr.mxu0 %v194_v49  ;;  %v710_v47 = vld [vmem:[#allocation2 + $0x1348] sm:$0xff]  ;;  %v517_v49 = vld [vmem:[#allocation2 + $0xd40] sm:$0xff] }
 0x3b8   :  { %4613 = vmatprep.subr.mxu1 %v386_v50  ;;  %4543 = vmatpush2.msra.mxu0 %v193_v51  ;;  %v709_v50 = vld [vmem:[#allocation2 + $0x1340] sm:$0xff]  ;;  %v512_v51 = vld [vmem:[#allocation2 + $0xd18] sm:$0xff] }
 0x3b9   :  { %4544 = vmatprep.mubr.f32.mxu0 %v6149_v8  ;;  %4614 = vmatpush2.msra.mxu1 %v385_v53  ;;  %v560_v8 = vld [vmem:[#allocation2 + $0xe98] sm:$0xff] }
 0x3ba   :  { %4615 = vmatprep.mubr.f32.mxu1 %v6153_v10  ;;  %4545 = vmatmul.mubr.f32.vlgmr.msra.gmra.mxu0 %v6142_v62  ;;  %v751_v10 = vld [vmem:[#allocation2 + $0x1490] sm:$0xff]  ;;  %v746_v62 = vld [vmem:[#allocation2 + $0x1468] sm:$0xff]  ;;  %v704_v53 = vld [vmem:[#allocation2 + $0x1318] sm:$0xff] }
 0x3bb   :  { %4616 = vmatmul.mubr.f32.vlgmr.msra.gmra.mxu1 %v6145_v1  ;;  %4622 = vmatprep.subr.mxu0 %v572_v55  ;;  %v553_v1 = vld [vmem:[#allocation2 + $0xe60] sm:$0xff]  ;;  %v511_v55 = vld [vmem:[#allocation2 + $0xd10] sm:$0xff] }
 0x3bc   :  { %4693 = vmatprep.subr.mxu1 %v764_v56  ;;  %4623 = vmatpush1.msra.mxu0 %v571_v58  ;;  %v703_v56 = vld [vmem:[#allocation2 + $0x1310] sm:$0xff]  ;;  %v506_v58 = vld [vmem:[#allocation2 + $0xce8] sm:$0xff] }
 0x3bd   :  { %4694 = vmatpush1.msra.mxu1 %v763_v59  ;;  %4624 = vmatprep.subr.mxu0 %v566_v60  ;;  %v698_v59 = vld [vmem:[#allocation2 + $0x12e8] sm:$0xff]  ;;  %v505_v60 = vld [vmem:[#allocation2 + $0xce0] sm:$0xff] }
 0x3be   :  { %4695 = vmatprep.subr.mxu1 %v758_v61  ;;  %4625 = vmatpush1.msra.mxu0 %v565_v63  ;;  %v697_v61 = vld [vmem:[#allocation2 + $0x12e0] sm:$0xff]  ;;  %v500_v63 = vld [vmem:[#allocation2 + $0xcb8] sm:$0xff] }
 0x3bf   :  { %4696 = vmatpush1.msra.mxu1 %v757_v0  ;;  %4626 = vmatprep.subr.mxu0 %v560_v8  ;;  %v692_v0 = vld [vmem:[#allocation2 + $0x12b8] sm:$0xff]  ;;  %v499_v8 = vld [vmem:[#allocation2 + $0xcb0] sm:$0xff] }
 0x3c0   :  { %4697 = vmatprep.subr.mxu1 %v752_v2  ;;  %4627 = vmatpush1.msra.mxu0 %v559_v3  ;;  %v691_v2 = vld [vmem:[#allocation2 + $0x12b0] sm:$0xff]  ;;  %v494_v3 = vld [vmem:[#allocation2 + $0xc88] sm:$0xff] }
 0x3c1   :  { %4698 = vmatpush1.msra.mxu1 %v751_v10  ;;  %4628 = vmatprep.subr.mxu0 %v554_v4  ;;  %v686_v10 = vld [vmem:[#allocation2 + $0x1288] sm:$0xff]  ;;  %v493_v4 = vld [vmem:[#allocation2 + $0xc80] sm:$0xff] }
 0x3c2   :  { %4699 = vmatprep.subr.mxu1 %v746_v62  ;;  %4629 = vmatpush1.msra.mxu0 %v553_v1  ;;  %v685_v62 = vld [vmem:[#allocation2 + $0x1280] sm:$0xff]  ;;  %v488_v1 = vld [vmem:[#allocation2 + $0xc58] sm:$0xff] }
 0x3c3   :  { %4700 = vmatpush1.msra.mxu1 %v745_v5  ;;  %4630 = vmatprep.subr.mxu0 %v548_v6  ;;  %v680_v5 = vld [vmem:[#allocation2 + $0x1258] sm:$0xff]  ;;  %v487_v6 = vld [vmem:[#allocation2 + $0xc50] sm:$0xff] }
 0x3c4   :  { %4701 = vmatprep.subr.mxu1 %v740_v7  ;;  %4631 = vmatpush1.msra.mxu0 %v547_v11  ;;  %v679_v7 = vld [vmem:[#allocation2 + $0x1250] sm:$0xff]  ;;  %v482_v11 = vld [vmem:[#allocation2 + $0xc28] sm:$0xff] }
 0x3c5   :  { %4702 = vmatpush1.msra.mxu1 %v739_v12  ;;  %4632 = vmatprep.subr.mxu0 %v542_v13  ;;  %v674_v12 = vld [vmem:[#allocation2 + $0x1228] sm:$0xff]  ;;  %v481_v13 = vld [vmem:[#allocation2 + $0xc20] sm:$0xff] }
 0x3c6   :  { %4703 = vmatprep.subr.mxu1 %v734_v18  ;;  %4633 = vmatpush1.msra.mxu0 %v541_v20  ;;  %v673_v18 = vld [vmem:[#allocation2 + $0x1220] sm:$0xff]  ;;  %v668_v20 = vld [vmem:[#allocation2 + $0x11f8] sm:$0xff] }
 0x3c7   :  { %4704 = vmatpush1.msra.mxu1 %v733_v22  ;;  %4634 = vmatprep.subr.mxu0 %v536_v24  ;;  %v860_v22 = vld [vmem:[#allocation2 + $0x17f8] sm:$0xff]  ;;  %v667_v24 = vld [vmem:[#allocation2 + $0x11f0] sm:$0xff] }
 0x3c8   :  { %4705 = vmatprep.subr.mxu1 %v728_v30  ;;  %4635 = vmatpush1.msra.mxu0 %v535_v31  ;;  %v859_v30 = vld [vmem:[#allocation2 + $0x17f0] sm:$0xff]  ;;  %v662_v31 = vld [vmem:[#allocation2 + $0x11c8] sm:$0xff] }
 0x3c9   :  { %4706 = vmatpush1.msra.mxu1 %v727_v33  ;;  %4636 = vmatprep.subr.mxu0 %v530_v34  ;;  %v854_v33 = vld [vmem:[#allocation2 + $0x17c8] sm:$0xff]  ;;  %v661_v34 = vld [vmem:[#allocation2 + $0x11c0] sm:$0xff] }
 0x3ca   :  { %4707 = vmatprep.subr.mxu1 %v722_v37  ;;  %4637 = vmatpush1.msra.mxu0 %v529_v38  ;;  %v853_v37 = vld [vmem:[#allocation2 + $0x17c0] sm:$0xff]  ;;  %v656_v38 = vld [vmem:[#allocation2 + $0x1198] sm:$0xff] }
 0x3cb   :  { %4708 = vmatpush1.msra.mxu1 %v721_v39  ;;  %4638 = vmatprep.subr.mxu0 %v524_v40  ;;  %v848_v39 = vld [vmem:[#allocation2 + $0x1798] sm:$0xff]  ;;  %v655_v40 = vld [vmem:[#allocation2 + $0x1190] sm:$0xff] }
 0x3cc   :  { %4709 = vmatprep.subr.mxu1 %v716_v41  ;;  %4639 = vmatpush1.msra.mxu0 %v523_v44  ;;  %v847_v41 = vld [vmem:[#allocation2 + $0x1790] sm:$0xff]  ;;  %v650_v44 = vld [vmem:[#allocation2 + $0x1168] sm:$0xff] }
 0x3cd   :  { %4710 = vmatpush1.msra.mxu1 %v715_v45  ;;  %4640 = vmatprep.subr.mxu0 %v518_v46  ;;  %v842_v45 = vld [vmem:[#allocation2 + $0x1768] sm:$0xff]  ;;  %v649_v46 = vld [vmem:[#allocation2 + $0x1160] sm:$0xff] }
 0x3ce   :  { %4711 = vmatprep.subr.mxu1 %v710_v47  ;;  %4641 = vmatpush1.msra.mxu0 %v517_v49  ;;  %v841_v47 = vld [vmem:[#allocation2 + $0x1760] sm:$0xff]  ;;  %v644_v49 = vld [vmem:[#allocation2 + $0x1138] sm:$0xff] }
 0x3cf   :  { %4712 = vmatpush1.msra.mxu1 %v709_v50  ;;  %4642 = vmatprep.subr.mxu0 %v512_v51  ;;  %v836_v50 = vld [vmem:[#allocation2 + $0x1738] sm:$0xff]  ;;  %v643_v51 = vld [vmem:[#allocation2 + $0x1130] sm:$0xff] }
 0x3d0   :  { %4713 = vmatprep.subr.mxu1 %v704_v53  ;;  %4643 = vmatpush1.msra.mxu0 %v511_v55  ;;  %v835_v53 = vld [vmem:[#allocation2 + $0x1730] sm:$0xff]  ;;  %v638_v55 = vld [vmem:[#allocation2 + $0x1108] sm:$0xff] }
 0x3d1   :  { %4714 = vmatpush1.msra.mxu1 %v703_v56  ;;  %4644 = vmatprep.subr.mxu0 %v506_v58  ;;  %v830_v56 = vld [vmem:[#allocation2 + $0x1708] sm:$0xff]  ;;  %v637_v58 = vld [vmem:[#allocation2 + $0x1100] sm:$0xff] }
 0x3d2   :  { %4715 = vmatprep.subr.mxu1 %v698_v59  ;;  %4645 = vmatpush1.msra.mxu0 %v505_v60  ;;  %v829_v59 = vld [vmem:[#allocation2 + $0x1700] sm:$0xff]  ;;  %v632_v60 = vld [vmem:[#allocation2 + $0x10d8] sm:$0xff] }
 0x3d3   :  { %4716 = vmatpush1.msra.mxu1 %v697_v61  ;;  %4646 = vmatprep.subr.mxu0 %v500_v63  ;;  %v824_v61 = vld [vmem:[#allocation2 + $0x16d8] sm:$0xff]  ;;  %v631_v63 = vld [vmem:[#allocation2 + $0x10d0] sm:$0xff] }
 0x3d4   :  { %4717 = vmatprep.subr.mxu1 %v692_v0  ;;  %4647 = vmatpush1.msra.mxu0 %v499_v8  ;;  %v823_v0 = vld [vmem:[#allocation2 + $0x16d0] sm:$0xff]  ;;  %v626_v8 = vld [vmem:[#allocation2 + $0x10a8] sm:$0xff] }
 0x3d5   :  { %4718 = vmatpush1.msra.mxu1 %v691_v2  ;;  %4648 = vmatprep.subr.mxu0 %v494_v3  ;;  %v818_v2 = vld [vmem:[#allocation2 + $0x16a8] sm:$0xff]  ;;  %v625_v3 = vld [vmem:[#allocation2 + $0x10a0] sm:$0xff] }
 0x3d6   :  { %4719 = vmatprep.subr.mxu1 %v686_v10  ;;  %4649 = vmatpush1.msra.mxu0 %v493_v4  ;;  %v817_v10 = vld [vmem:[#allocation2 + $0x16a0] sm:$0xff]  ;;  %v620_v4 = vld [vmem:[#allocation2 + $0x1078] sm:$0xff] }
 0x3d7   :  { %4720 = vmatpush1.msra.mxu1 %v685_v62  ;;  %4650 = vmatprep.subr.mxu0 %v488_v1  ;;  %v812_v62 = vld [vmem:[#allocation2 + $0x1678] sm:$0xff]  ;;  %v619_v1 = vld [vmem:[#allocation2 + $0x1070] sm:$0xff] }
 0x3d8   :  { %4721 = vmatprep.subr.mxu1 %v680_v5  ;;  %4651 = vmatpush1.msra.mxu0 %v487_v6  ;;  %v811_v5 = vld [vmem:[#allocation2 + $0x1670] sm:$0xff]  ;;  %v614_v6 = vld [vmem:[#allocation2 + $0x1048] sm:$0xff] }
 0x3d9   :  { %4722 = vmatpush1.msra.mxu1 %v679_v7  ;;  %4652 = vmatprep.subr.mxu0 %v482_v11  ;;  %v806_v7 = vld [vmem:[#allocation2 + $0x1648] sm:$0xff]  ;;  %v613_v11 = vld [vmem:[#allocation2 + $0x1040] sm:$0xff] }
 0x3da   :  { %4723 = vmatprep.subr.mxu1 %v674_v12  ;;  %4653 = vmatpush1.msra.mxu0 %v481_v13  ;;  %v805_v12 = vld [vmem:[#allocation2 + $0x1640] sm:$0xff]  ;;  %v608_v13 = vld [vmem:[#allocation2 + $0x1018] sm:$0xff] }
 0x3db   :  { %4724 = vmatpush1.msra.mxu1 %v673_v18  ;;  %4654 = vmatprep.subr.mxu0 %v668_v20  ;;  %v800_v18 = vld [vmem:[#allocation2 + $0x1618] sm:$0xff]  ;;  %v607_v20 = vld [vmem:[#allocation2 + $0x1010] sm:$0xff] }
 0x3dc   :  { %4725 = vmatprep.subr.mxu1 %v860_v22  ;;  %4655 = vmatpush2.msra.mxu0 %v667_v24  ;;  %v799_v22 = vld [vmem:[#allocation2 + $0x1610] sm:$0xff]  ;;  %v602_v24 = vld [vmem:[#allocation2 + $0xfe8] sm:$0xff] }
 0x3dd   :  { %4726 = vmatpush2.msra.mxu1 %v859_v30  ;;  %4656 = vmatprep.subr.mxu0 %v662_v31  ;;  %v794_v30 = vld [vmem:[#allocation2 + $0x15e8] sm:$0xff]  ;;  %v601_v31 = vld [vmem:[#allocation2 + $0xfe0] sm:$0xff] }
 0x3de   :  { %4727 = vmatprep.subr.mxu1 %v854_v33  ;;  %4657 = vmatpush2.msra.mxu0 %v661_v34  ;;  %v793_v33 = vld [vmem:[#allocation2 + $0x15e0] sm:$0xff]  ;;  %v596_v34 = vld [vmem:[#allocation2 + $0xfb8] sm:$0xff] }
 0x3df   :  { %4728 = vmatpush2.msra.mxu1 %v853_v37  ;;  %4658 = vmatprep.subr.mxu0 %v656_v38  ;;  %v788_v37 = vld [vmem:[#allocation2 + $0x15b8] sm:$0xff]  ;;  %v595_v38 = vld [vmem:[#allocation2 + $0xfb0] sm:$0xff] }
 0x3e0   :  { %4729 = vmatprep.subr.mxu1 %v848_v39  ;;  %4659 = vmatpush2.msra.mxu0 %v655_v40  ;;  %v787_v39 = vld [vmem:[#allocation2 + $0x15b0] sm:$0xff]  ;;  %v590_v40 = vld [vmem:[#allocation2 + $0xf88] sm:$0xff] }
 0x3e1   :  { %4730 = vmatpush2.msra.mxu1 %v847_v41  ;;  %4660 = vmatprep.subr.mxu0 %v650_v44  ;;  %v782_v41 = vld [vmem:[#allocation2 + $0x1588] sm:$0xff]  ;;  %v589_v44 = vld [vmem:[#allocation2 + $0xf80] sm:$0xff] }
 0x3e2   :  { %4731 = vmatprep.subr.mxu1 %v842_v45  ;;  %4661 = vmatpush2.msra.mxu0 %v649_v46  ;;  %v781_v45 = vld [vmem:[#allocation2 + $0x1580] sm:$0xff]  ;;  %v584_v46 = vld [vmem:[#allocation2 + $0xf58] sm:$0xff] }
 0x3e3   :  { %4732 = vmatpush2.msra.mxu1 %v841_v47  ;;  %4662 = vmatprep.subr.mxu0 %v644_v49  ;;  %v776_v47 = vld [vmem:[#allocation2 + $0x1558] sm:$0xff]  ;;  %v583_v49 = vld [vmem:[#allocation2 + $0xf50] sm:$0xff] }
 0x3e4   :  { %4733 = vmatprep.subr.mxu1 %v836_v50  ;;  %4663 = vmatpush2.msra.mxu0 %v643_v51  ;;  %v775_v50 = vld [vmem:[#allocation2 + $0x1550] sm:$0xff]  ;;  %v578_v51 = vld [vmem:[#allocation2 + $0xf28] sm:$0xff] }
 0x3e5   :  { %4734 = vmatpush2.msra.mxu1 %v835_v53  ;;  %4664 = vmatprep.subr.mxu0 %v638_v55  ;;  %v770_v53 = vld [vmem:[#allocation2 + $0x1528] sm:$0xff]  ;;  %v577_v55 = vld [vmem:[#allocation2 + $0xf20] sm:$0xff] }
 0x3e6   :  { %4735 = vmatprep.subr.mxu1 %v830_v56  ;;  %4665 = vmatpush2.msra.mxu0 %v637_v58  ;;  %v769_v56 = vld [vmem:[#allocation2 + $0x1520] sm:$0xff]  ;;  %v956_v58 = vld [vmem:[#allocation2 + $0x1af8] sm:$0xff] }
 0x3e7   :  { %4736 = vmatpush2.msra.mxu1 %v829_v59  ;;  %4666 = vmatprep.subr.mxu0 %v632_v60  ;;  %v1148_v59 = vld [vmem:[#allocation2 + $0x20f8] sm:$0xff]  ;;  %v955_v60 = vld [vmem:[#allocation2 + $0x1af0] sm:$0xff] }
 0x3e8   :  { %4737 = vmatprep.subr.mxu1 %v824_v61  ;;  %4667 = vmatpush2.msra.mxu0 %v631_v63  ;;  %v1147_v61 = vld [vmem:[#allocation2 + $0x20f0] sm:$0xff]  ;;  %v950_v63 = vld [vmem:[#allocation2 + $0x1ac8] sm:$0xff] }
 0x3e9   :  { %4738 = vmatpush2.msra.mxu1 %v823_v0  ;;  %4668 = vmatprep.subr.mxu0 %v626_v8  ;;  %v1142_v0 = vld [vmem:[#allocation2 + $0x20c8] sm:$0xff]  ;;  %v949_v8 = vld [vmem:[#allocation2 + $0x1ac0] sm:$0xff] }
 0x3ea   :  { %4739 = vmatprep.subr.mxu1 %v818_v2  ;;  %4669 = vmatpush2.msra.mxu0 %v625_v3  ;;  %v1141_v2 = vld [vmem:[#allocation2 + $0x20c0] sm:$0xff]  ;;  %v944_v3 = vld [vmem:[#allocation2 + $0x1a98] sm:$0xff] }
 0x3eb   :  { %4740 = vmatpush2.msra.mxu1 %v817_v10  ;;  %4670 = vmatprep.subr.mxu0 %v620_v4  ;;  %v943_v10 = vld [vmem:[#allocation2 + $0x1a90] sm:$0xff]  ;;  %v938_v4 = vld [vmem:[#allocation2 + $0x1a68] sm:$0xff] }
 0x3ec   :  { %4741 = vmatprep.subr.mxu1 %v812_v62  ;;  %4671 = vmatpush2.msra.mxu0 %v619_v1  ;;  %v937_v62 = vld [vmem:[#allocation2 + $0x1a60] sm:$0xff] }
 0x3ed   :  { %4742 = vmatpush2.msra.mxu1 %v811_v5  ;;  %4672 = vmatprep.subr.mxu0 %v614_v6  ;;  %v1129_v1 = vld [vmem:[#allocation2 + $0x2060] sm:$0xff]  ;;  %v1124_v5 = vld [vmem:[#allocation2 + $0x2038] sm:$0xff]  ;;  %v931_v6 = vld [vmem:[#allocation2 + $0x1a30] sm:$0xff] }
 0x3ee   :  { %4743 = vmatprep.subr.mxu1 %v806_v7  ;;  %4673 = vmatpush2.msra.mxu0 %v613_v11  ;;  %v1123_v7 = vld [vmem:[#allocation2 + $0x2030] sm:$0xff]  ;;  %v926_v11 = vld [vmem:[#allocation2 + $0x1a08] sm:$0xff] }
 0x3ef   :  { %4744 = vmatpush2.msra.mxu1 %v805_v12  ;;  %4674 = vmatprep.subr.mxu0 %v608_v13  ;;  %v1118_v12 = vld [vmem:[#allocation2 + $0x2008] sm:$0xff]  ;;  %v925_v13 = vld [vmem:[#allocation2 + $0x1a00] sm:$0xff] }
 0x3f0   :  { %4745 = vmatprep.subr.mxu1 %v800_v18  ;;  %4675 = vmatpush2.msra.mxu0 %v607_v20  ;;  %v1117_v18 = vld [vmem:[#allocation2 + $0x2000] sm:$0xff]  ;;  %v920_v20 = vld [vmem:[#allocation2 + $0x19d8] sm:$0xff] }
 0x3f1   :  { %4746 = vmatpush2.msra.mxu1 %v799_v22  ;;  %4676 = vmatprep.subr.mxu0 %v602_v24  ;;  %v1112_v22 = vld [vmem:[#allocation2 + $0x1fd8] sm:$0xff]  ;;  %v919_v24 = vld [vmem:[#allocation2 + $0x19d0] sm:$0xff] }
 0x3f2   :  { %4747 = vmatprep.subr.mxu1 %v794_v30  ;;  %4677 = vmatpush2.msra.mxu0 %v601_v31  ;;  %v1111_v30 = vld [vmem:[#allocation2 + $0x1fd0] sm:$0xff]  ;;  %v914_v31 = vld [vmem:[#allocation2 + $0x19a8] sm:$0xff] }
 0x3f3   :  { %4748 = vmatpush2.msra.mxu1 %v793_v33  ;;  %4678 = vmatprep.subr.mxu0 %v596_v34  ;;  %v1106_v33 = vld [vmem:[#allocation2 + $0x1fa8] sm:$0xff]  ;;  %v913_v34 = vld [vmem:[#allocation2 + $0x19a0] sm:$0xff] }
 0x3f4   :  { %4749 = vmatprep.subr.mxu1 %v788_v37  ;;  %4679 = vmatpush2.msra.mxu0 %v595_v38  ;;  %v1105_v37 = vld [vmem:[#allocation2 + $0x1fa0] sm:$0xff]  ;;  %v908_v38 = vld [vmem:[#allocation2 + $0x1978] sm:$0xff] }
 0x3f5   :  { %4750 = vmatpush2.msra.mxu1 %v787_v39  ;;  %4680 = vmatprep.subr.mxu0 %v590_v40  ;;  %v1100_v39 = vld [vmem:[#allocation2 + $0x1f78] sm:$0xff]  ;;  %v907_v40 = vld [vmem:[#allocation2 + $0x1970] sm:$0xff] }
 0x3f6   :  { %4751 = vmatprep.subr.mxu1 %v782_v41  ;;  %4681 = vmatpush2.msra.mxu0 %v589_v44  ;;  %v1099_v41 = vld [vmem:[#allocation2 + $0x1f70] sm:$0xff]  ;;  %v902_v44 = vld [vmem:[#allocation2 + $0x1948] sm:$0xff] }
 0x3f7   :  { %4752 = vmatpush2.msra.mxu1 %v781_v45  ;;  %4682 = vmatprep.subr.mxu0 %v584_v46  ;;  %v1094_v45 = vld [vmem:[#allocation2 + $0x1f48] sm:$0xff]  ;;  %v901_v46 = vld [vmem:[#allocation2 + $0x1940] sm:$0xff] }
 0x3f8   :  { %4753 = vmatprep.subr.mxu1 %v776_v47  ;;  %4683 = vmatpush2.msra.mxu0 %v583_v49  ;;  %v1093_v47 = vld [vmem:[#allocation2 + $0x1f40] sm:$0xff]  ;;  %v896_v49 = vld [vmem:[#allocation2 + $0x1918] sm:$0xff] }
 0x3f9   :  { %4754 = vmatpush2.msra.mxu1 %v775_v50  ;;  %4684 = vmatprep.subr.mxu0 %v578_v51  ;;  %v1088_v50 = vld [vmem:[#allocation2 + $0x1f18] sm:$0xff]  ;;  %v895_v51 = vld [vmem:[#allocation2 + $0x1910] sm:$0xff] }
 0x3fa   :  { %4755 = vmatprep.subr.mxu1 %v770_v53  ;;  %4685 = vmatpush2.msra.mxu0 %v577_v55  ;;  %v1087_v53 = vld [vmem:[#allocation2 + $0x1f10] sm:$0xff]  ;;  %v890_v55 = vld [vmem:[#allocation2 + $0x18e8] sm:$0xff] }
 0x3fb   :  { %4686 = vmatprep.mubr.f32.mxu0 %v6170_v26  ;;  %4756 = vmatpush2.msra.mxu1 %v769_v56  ;;  %v1136_v26 = vld [vmem:[#allocation2 + $0x2098] sm:$0xff]  ;;  %v1082_v56 = vld [vmem:[#allocation2 + $0x1ee8] sm:$0xff] }
 0x3fc   :  { %4687 = vmatmul.mubr.f32.vlgmr.msra.gmra.mxu0 %v6163_v16  ;;  %4757 = vmatprep.mubr.f32.mxu1 %v6174_v29  ;;  %v1135_v16 = vld [vmem:[#allocation2 + $0x2090] sm:$0xff]  ;;  %v1130_v29 = vld [vmem:[#allocation2 + $0x2068] sm:$0xff] }
 0x3fd   :  { %4764 = vmatprep.subr.mxu0 %v956_v58  ;;  %4835 = vmatprep.subr.mxu1 %v1148_v59  ;;  %v889_v58 = vld [vmem:[#allocation2 + $0x18e0] sm:$0xff] }
 0x3fe   :  { %4758 = vmatmul.mubr.f32.vlgmr.msra.gmra.mxu1 %v6166_v21  ;;  %4765 = vmatpush1.msra.mxu0 %v955_v60  ;;  %v932_v21 = vld [vmem:[#allocation2 + $0x1a38] sm:$0xff]  ;;  %v1081_v59 = vld [vmem:[#allocation2 + $0x1ee0] sm:$0xff] }
 0x3ff   :  { %4836 = vmatpush1.msra.mxu1 %v1147_v61  ;;  %4766 = vmatprep.subr.mxu0 %v950_v63  ;;  %v884_v60 = vld [vmem:[#allocation2 + $0x18b8] sm:$0xff]  ;;  %v883_v63 = vld [vmem:[#allocation2 + $0x18b0] sm:$0xff] }
 0x400   :  { %4837 = vmatprep.subr.mxu1 %v1142_v0  ;;  %4767 = vmatpush1.msra.mxu0 %v949_v8  ;;  %v1076_v61 = vld [vmem:[#allocation2 + $0x1eb8] sm:$0xff]  ;;  %v1075_v0 = vld [vmem:[#allocation2 + $0x1eb0] sm:$0xff]  ;;  %v878_v8 = vld [vmem:[#allocation2 + $0x1888] sm:$0xff] }
 0x401   :  { %4838 = vmatpush1.msra.mxu1 %v1141_v2  ;;  %4768 = vmatprep.subr.mxu0 %v944_v3  ;;  %v1070_v2 = vld [vmem:[#allocation2 + $0x1e88] sm:$0xff]  ;;  %v877_v3 = vld [vmem:[#allocation2 + $0x1880] sm:$0xff] }
 0x402   :  { %4839 = vmatprep.subr.mxu1 %v1136_v26  ;;  %4769 = vmatpush1.msra.mxu0 %v943_v10  ;;  %v1069_v26 = vld [vmem:[#allocation2 + $0x1e80] sm:$0xff]  ;;  %v872_v10 = vld [vmem:[#allocation2 + $0x1858] sm:$0xff] }
 0x403   :  { %4840 = vmatpush1.msra.mxu1 %v1135_v16  ;;  %4770 = vmatprep.subr.mxu0 %v938_v4  ;;  %v1064_v16 = vld [vmem:[#allocation2 + $0x1e58] sm:$0xff]  ;;  %v871_v4 = vld [vmem:[#allocation2 + $0x1850] sm:$0xff] }
 0x404   :  { %4841 = vmatprep.subr.mxu1 %v1130_v29  ;;  %4771 = vmatpush1.msra.mxu0 %v937_v62  ;;  %v1063_v29 = vld [vmem:[#allocation2 + $0x1e50] sm:$0xff]  ;;  %v866_v62 = vld [vmem:[#allocation2 + $0x1828] sm:$0xff] }
 0x405   :  { %4842 = vmatpush1.msra.mxu1 %v1129_v1  ;;  %4772 = vmatprep.subr.mxu0 %v932_v21  ;;  %v1058_v1 = vld [vmem:[#allocation2 + $0x1e28] sm:$0xff]  ;;  %v865_v21 = vld [vmem:[#allocation2 + $0x1820] sm:$0xff] }
 0x406   :  { %4843 = vmatprep.subr.mxu1 %v1124_v5  ;;  %4773 = vmatpush1.msra.mxu0 %v931_v6  ;;  %v1057_v5 = vld [vmem:[#allocation2 + $0x1e20] sm:$0xff]  ;;  %v1052_v6 = vld [vmem:[#allocation2 + $0x1df8] sm:$0xff] }
 0x407   :  { %4844 = vmatpush1.msra.mxu1 %v1123_v7  ;;  %4774 = vmatprep.subr.mxu0 %v926_v11  ;;  %v1244_v7 = vld [vmem:[#allocation2 + $0x23f8] sm:$0xff]  ;;  %v1051_v11 = vld [vmem:[#allocation2 + $0x1df0] sm:$0xff] }
 0x408   :  { %4845 = vmatprep.subr.mxu1 %v1118_v12  ;;  %4775 = vmatpush1.msra.mxu0 %v925_v13  ;;  %v1243_v12 = vld [vmem:[#allocation2 + $0x23f0] sm:$0xff]  ;;  %v1046_v13 = vld [vmem:[#allocation2 + $0x1dc8] sm:$0xff] }
 0x409   :  { %4846 = vmatpush1.msra.mxu1 %v1117_v18  ;;  %4776 = vmatprep.subr.mxu0 %v920_v20  ;;  %v1238_v18 = vld [vmem:[#allocation2 + $0x23c8] sm:$0xff]  ;;  %v1045_v20 = vld [vmem:[#allocation2 + $0x1dc0] sm:$0xff] }
 0x40a   :  { %4847 = vmatprep.subr.mxu1 %v1112_v22  ;;  %4777 = vmatpush1.msra.mxu0 %v919_v24  ;;  %v1237_v22 = vld [vmem:[#allocation2 + $0x23c0] sm:$0xff]  ;;  %v1040_v24 = vld [vmem:[#allocation2 + $0x1d98] sm:$0xff] }
 0x40b   :  { %4848 = vmatpush1.msra.mxu1 %v1111_v30  ;;  %4778 = vmatprep.subr.mxu0 %v914_v31  ;;  %v1232_v30 = vld [vmem:[#allocation2 + $0x2398] sm:$0xff]  ;;  %v1039_v31 = vld [vmem:[#allocation2 + $0x1d90] sm:$0xff] }
 0x40c   :  { %4849 = vmatprep.subr.mxu1 %v1106_v33  ;;  %4779 = vmatpush1.msra.mxu0 %v913_v34  ;;  %v1231_v33 = vld [vmem:[#allocation2 + $0x2390] sm:$0xff]  ;;  %v1034_v34 = vld [vmem:[#allocation2 + $0x1d68] sm:$0xff] }
 0x40d   :  { %4850 = vmatpush1.msra.mxu1 %v1105_v37  ;;  %4780 = vmatprep.subr.mxu0 %v908_v38  ;;  %v1226_v37 = vld [vmem:[#allocation2 + $0x2368] sm:$0xff]  ;;  %v1033_v38 = vld [vmem:[#allocation2 + $0x1d60] sm:$0xff] }
 0x40e   :  { %4851 = vmatprep.subr.mxu1 %v1100_v39  ;;  %4781 = vmatpush1.msra.mxu0 %v907_v40  ;;  %v1225_v39 = vld [vmem:[#allocation2 + $0x2360] sm:$0xff]  ;;  %v1028_v40 = vld [vmem:[#allocation2 + $0x1d38] sm:$0xff] }
 0x40f   :  { %4852 = vmatpush1.msra.mxu1 %v1099_v41  ;;  %4782 = vmatprep.subr.mxu0 %v902_v44  ;;  %v1220_v41 = vld [vmem:[#allocation2 + $0x2338] sm:$0xff]  ;;  %v1027_v44 = vld [vmem:[#allocation2 + $0x1d30] sm:$0xff] }
 0x410   :  { %4853 = vmatprep.subr.mxu1 %v1094_v45  ;;  %4783 = vmatpush1.msra.mxu0 %v901_v46  ;;  %v1219_v45 = vld [vmem:[#allocation2 + $0x2330] sm:$0xff]  ;;  %v1022_v46 = vld [vmem:[#allocation2 + $0x1d08] sm:$0xff] }
 0x411   :  { %4854 = vmatpush1.msra.mxu1 %v1093_v47  ;;  %4784 = vmatprep.subr.mxu0 %v896_v49  ;;  %v1214_v47 = vld [vmem:[#allocation2 + $0x2308] sm:$0xff]  ;;  %v1021_v49 = vld [vmem:[#allocation2 + $0x1d00] sm:$0xff] }
 0x412   :  { %4855 = vmatprep.subr.mxu1 %v1088_v50  ;;  %4785 = vmatpush1.msra.mxu0 %v895_v51  ;;  %v1213_v50 = vld [vmem:[#allocation2 + $0x2300] sm:$0xff]  ;;  %v1016_v51 = vld [vmem:[#allocation2 + $0x1cd8] sm:$0xff] }
 0x413   :  { %4856 = vmatpush1.msra.mxu1 %v1087_v53  ;;  %4786 = vmatprep.subr.mxu0 %v890_v55  ;;  %v1208_v53 = vld [vmem:[#allocation2 + $0x22d8] sm:$0xff]  ;;  %v1015_v55 = vld [vmem:[#allocation2 + $0x1cd0] sm:$0xff] }
 0x414   :  { %4857 = vmatprep.subr.mxu1 %v1082_v56  ;;  %4787 = vmatpush1.msra.mxu0 %v889_v58  ;;  %v1207_v56 = vld [vmem:[#allocation2 + $0x22d0] sm:$0xff]  ;;  %v1010_v58 = vld [vmem:[#allocation2 + $0x1ca8] sm:$0xff] }
 0x415   :  { %4858 = vmatpush1.msra.mxu1 %v1081_v59  ;;  %4788 = vmatprep.subr.mxu0 %v884_v60  ;;  %v1202_v59 = vld [vmem:[#allocation2 + $0x22a8] sm:$0xff]  ;;  %v1009_v60 = vld [vmem:[#allocation2 + $0x1ca0] sm:$0xff] }
 0x416   :  { %4859 = vmatprep.subr.mxu1 %v1076_v61  ;;  %4789 = vmatpush1.msra.mxu0 %v883_v63  ;;  %v1201_v61 = vld [vmem:[#allocation2 + $0x22a0] sm:$0xff]  ;;  %v1004_v63 = vld [vmem:[#allocation2 + $0x1c78] sm:$0xff] }
 0x417   :  { %4860 = vmatpush1.msra.mxu1 %v1075_v0  ;;  %4790 = vmatprep.subr.mxu0 %v878_v8  ;;  %v1196_v0 = vld [vmem:[#allocation2 + $0x2278] sm:$0xff]  ;;  %v1003_v8 = vld [vmem:[#allocation2 + $0x1c70] sm:$0xff] }
 0x418   :  { %4861 = vmatprep.subr.mxu1 %v1070_v2  ;;  %4791 = vmatpush1.msra.mxu0 %v877_v3  ;;  %v1195_v2 = vld [vmem:[#allocation2 + $0x2270] sm:$0xff]  ;;  %v998_v3 = vld [vmem:[#allocation2 + $0x1c48] sm:$0xff] }
 0x419   :  { %4862 = vmatpush1.msra.mxu1 %v1069_v26  ;;  %4792 = vmatprep.subr.mxu0 %v872_v10  ;;  %v1190_v26 = vld [vmem:[#allocation2 + $0x2248] sm:$0xff]  ;;  %v997_v10 = vld [vmem:[#allocation2 + $0x1c40] sm:$0xff] }
 0x41a   :  { %4863 = vmatprep.subr.mxu1 %v1064_v16  ;;  %4793 = vmatpush1.msra.mxu0 %v871_v4  ;;  %v1189_v16 = vld [vmem:[#allocation2 + $0x2240] sm:$0xff]  ;;  %v992_v4 = vld [vmem:[#allocation2 + $0x1c18] sm:$0xff] }
 0x41b   :  { %4864 = vmatpush1.msra.mxu1 %v1063_v29  ;;  %4794 = vmatprep.subr.mxu0 %v866_v62  ;;  %v1184_v29 = vld [vmem:[#allocation2 + $0x2218] sm:$0xff]  ;;  %v991_v62 = vld [vmem:[#allocation2 + $0x1c10] sm:$0xff] }
 0x41c   :  { %4865 = vmatprep.subr.mxu1 %v1058_v1  ;;  %4795 = vmatpush1.msra.mxu0 %v865_v21  ;;  %v1183_v1 = vld [vmem:[#allocation2 + $0x2210] sm:$0xff]  ;;  %v986_v21 = vld [vmem:[#allocation2 + $0x1be8] sm:$0xff] }
 0x41d   :  { %4866 = vmatpush1.msra.mxu1 %v1057_v5  ;;  %4796 = vmatprep.subr.mxu0 %v1052_v6  ;;  %v1178_v5 = vld [vmem:[#allocation2 + $0x21e8] sm:$0xff]  ;;  %v985_v6 = vld [vmem:[#allocation2 + $0x1be0] sm:$0xff] }
 0x41e   :  { %4867 = vmatprep.subr.mxu1 %v1244_v7  ;;  %4797 = vmatpush2.msra.mxu0 %v1051_v11  ;;  %v1177_v7 = vld [vmem:[#allocation2 + $0x21e0] sm:$0xff]  ;;  %v980_v11 = vld [vmem:[#allocation2 + $0x1bb8] sm:$0xff] }
 0x41f   :  { %4868 = vmatpush2.msra.mxu1 %v1243_v12  ;;  %4798 = vmatprep.subr.mxu0 %v1046_v13  ;;  %v1172_v12 = vld [vmem:[#allocation2 + $0x21b8] sm:$0xff]  ;;  %v979_v13 = vld [vmem:[#allocation2 + $0x1bb0] sm:$0xff] }
 0x420   :  { %4869 = vmatprep.subr.mxu1 %v1238_v18  ;;  %4799 = vmatpush2.msra.mxu0 %v1045_v20  ;;  %v1171_v18 = vld [vmem:[#allocation2 + $0x21b0] sm:$0xff]  ;;  %v974_v20 = vld [vmem:[#allocation2 + $0x1b88] sm:$0xff] }
 0x421   :  { %4870 = vmatpush2.msra.mxu1 %v1237_v22  ;;  %4800 = vmatprep.subr.mxu0 %v1040_v24  ;;  %v1166_v22 = vld [vmem:[#allocation2 + $0x2188] sm:$0xff]  ;;  %v973_v24 = vld [vmem:[#allocation2 + $0x1b80] sm:$0xff] }
 0x422   :  { %4871 = vmatprep.subr.mxu1 %v1232_v30  ;;  %4801 = vmatpush2.msra.mxu0 %v1039_v31  ;;  %v1165_v30 = vld [vmem:[#allocation2 + $0x2180] sm:$0xff]  ;;  %v968_v31 = vld [vmem:[#allocation2 + $0x1b58] sm:$0xff] }
 0x423   :  { %4872 = vmatpush2.msra.mxu1 %v1231_v33  ;;  %4802 = vmatprep.subr.mxu0 %v1034_v34  ;;  %v1160_v33 = vld [vmem:[#allocation2 + $0x2158] sm:$0xff]  ;;  %v967_v34 = vld [vmem:[#allocation2 + $0x1b50] sm:$0xff] }
 0x424   :  { %4873 = vmatprep.subr.mxu1 %v1226_v37  ;;  %4803 = vmatpush2.msra.mxu0 %v1033_v38  ;;  %v1159_v37 = vld [vmem:[#allocation2 + $0x2150] sm:$0xff]  ;;  %v962_v38 = vld [vmem:[#allocation2 + $0x1b28] sm:$0xff] }
 0x425   :  { %4874 = vmatpush2.msra.mxu1 %v1225_v39  ;;  %4804 = vmatprep.subr.mxu0 %v1028_v40  ;;  %v1154_v39 = vld [vmem:[#allocation2 + $0x2128] sm:$0xff]  ;;  %v961_v40 = vld [vmem:[#allocation2 + $0x1b20] sm:$0xff] }
 0x426   :  { %4875 = vmatprep.subr.mxu1 %v1220_v41  ;;  %4805 = vmatpush2.msra.mxu0 %v1027_v44  ;;  %v1153_v41 = vld [vmem:[#allocation2 + $0x2120] sm:$0xff]  ;;  %v1340_v44 = vld [vmem:[#allocation2 + $0x26f8] sm:$0xff] }
 0x427   :  { %4876 = vmatpush2.msra.mxu1 %v1219_v45  ;;  %4806 = vmatprep.subr.mxu0 %v1022_v46  ;;  %v1532_v45 = vld [vmem:[#allocation2 + $0x2cf8] sm:$0xff]  ;;  %v1339_v46 = vld [vmem:[#allocation2 + $0x26f0] sm:$0xff] }
 0x428   :  { %4877 = vmatprep.subr.mxu1 %v1214_v47  ;;  %4807 = vmatpush2.msra.mxu0 %v1021_v49  ;;  %v1531_v47 = vld [vmem:[#allocation2 + $0x2cf0] sm:$0xff]  ;;  %v1334_v49 = vld [vmem:[#allocation2 + $0x26c8] sm:$0xff] }
 0x429   :  { %4878 = vmatpush2.msra.mxu1 %v1213_v50  ;;  %4808 = vmatprep.subr.mxu0 %v1016_v51  ;;  %v1526_v50 = vld [vmem:[#allocation2 + $0x2cc8] sm:$0xff]  ;;  %v1333_v51 = vld [vmem:[#allocation2 + $0x26c0] sm:$0xff] }
 0x42a   :  { %4879 = vmatprep.subr.mxu1 %v1208_v53  ;;  %4809 = vmatpush2.msra.mxu0 %v1015_v55  ;;  %v1525_v53 = vld [vmem:[#allocation2 + $0x2cc0] sm:$0xff]  ;;  %v1328_v55 = vld [vmem:[#allocation2 + $0x2698] sm:$0xff] }
 0x42b   :  { %4880 = vmatpush2.msra.mxu1 %v1207_v56  ;;  %4810 = vmatprep.subr.mxu0 %v1010_v58  ;;  %v1327_v56 = vld [vmem:[#allocation2 + $0x2690] sm:$0xff]  ;;  %v1322_v58 = vld [vmem:[#allocation2 + $0x2668] sm:$0xff] }
 0x42c   :  { %4881 = vmatprep.subr.mxu1 %v1202_v59  ;;  %4811 = vmatpush2.msra.mxu0 %v1009_v60  ;;  %v1321_v59 = vld [vmem:[#allocation2 + $0x2660] sm:$0xff] }
 0x42d   :  { %4882 = vmatpush2.msra.mxu1 %v1201_v61  ;;  %4812 = vmatprep.subr.mxu0 %v1004_v63  ;;  %v1513_v60 = vld [vmem:[#allocation2 + $0x2c60] sm:$0xff]  ;;  %v1508_v61 = vld [vmem:[#allocation2 + $0x2c38] sm:$0xff]  ;;  %v1315_v63 = vld [vmem:[#allocation2 + $0x2630] sm:$0xff] }
 0x42e   :  { %4883 = vmatprep.subr.mxu1 %v1196_v0  ;;  %4813 = vmatpush2.msra.mxu0 %v1003_v8  ;;  %v1507_v0 = vld [vmem:[#allocation2 + $0x2c30] sm:$0xff]  ;;  %v1310_v8 = vld [vmem:[#allocation2 + $0x2608] sm:$0xff] }
 0x42f   :  { %4884 = vmatpush2.msra.mxu1 %v1195_v2  ;;  %4814 = vmatprep.subr.mxu0 %v998_v3  ;;  %v1502_v2 = vld [vmem:[#allocation2 + $0x2c08] sm:$0xff]  ;;  %v1309_v3 = vld [vmem:[#allocation2 + $0x2600] sm:$0xff] }
 0x430   :  { %4885 = vmatprep.subr.mxu1 %v1190_v26  ;;  %4815 = vmatpush2.msra.mxu0 %v997_v10  ;;  %v1501_v26 = vld [vmem:[#allocation2 + $0x2c00] sm:$0xff]  ;;  %v1304_v10 = vld [vmem:[#allocation2 + $0x25d8] sm:$0xff] }
 0x431   :  { %4886 = vmatpush2.msra.mxu1 %v1189_v16  ;;  %4816 = vmatprep.subr.mxu0 %v992_v4  ;;  %v1496_v16 = vld [vmem:[#allocation2 + $0x2bd8] sm:$0xff]  ;;  %v1303_v4 = vld [vmem:[#allocation2 + $0x25d0] sm:$0xff] }
 0x432   :  { %4887 = vmatprep.subr.mxu1 %v1184_v29  ;;  %4817 = vmatpush2.msra.mxu0 %v991_v62  ;;  %v1495_v29 = vld [vmem:[#allocation2 + $0x2bd0] sm:$0xff]  ;;  %v1298_v62 = vld [vmem:[#allocation2 + $0x25a8] sm:$0xff] }
 0x433   :  { %4888 = vmatpush2.msra.mxu1 %v1183_v1  ;;  %4818 = vmatprep.subr.mxu0 %v986_v21  ;;  %v1490_v1 = vld [vmem:[#allocation2 + $0x2ba8] sm:$0xff]  ;;  %v1297_v21 = vld [vmem:[#allocation2 + $0x25a0] sm:$0xff] }
 0x434   :  { %4889 = vmatprep.subr.mxu1 %v1178_v5  ;;  %4819 = vmatpush2.msra.mxu0 %v985_v6  ;;  %v1489_v5 = vld [vmem:[#allocation2 + $0x2ba0] sm:$0xff]  ;;  %v1292_v6 = vld [vmem:[#allocation2 + $0x2578] sm:$0xff] }
 0x435   :  { %4890 = vmatpush2.msra.mxu1 %v1177_v7  ;;  %4820 = vmatprep.subr.mxu0 %v980_v11  ;;  %v1484_v7 = vld [vmem:[#allocation2 + $0x2b78] sm:$0xff]  ;;  %v1291_v11 = vld [vmem:[#allocation2 + $0x2570] sm:$0xff] }
 0x436   :  { %4891 = vmatprep.subr.mxu1 %v1172_v12  ;;  %4821 = vmatpush2.msra.mxu0 %v979_v13  ;;  %v1483_v12 = vld [vmem:[#allocation2 + $0x2b70] sm:$0xff]  ;;  %v1286_v13 = vld [vmem:[#allocation2 + $0x2548] sm:$0xff] }
 0x437   :  { %4892 = vmatpush2.msra.mxu1 %v1171_v18  ;;  %4822 = vmatprep.subr.mxu0 %v974_v20  ;;  %v1478_v18 = vld [vmem:[#allocation2 + $0x2b48] sm:$0xff]  ;;  %v1285_v20 = vld [vmem:[#allocation2 + $0x2540] sm:$0xff] }
 0x438   :  { %4893 = vmatprep.subr.mxu1 %v1166_v22  ;;  %4823 = vmatpush2.msra.mxu0 %v973_v24  ;;  %v1477_v22 = vld [vmem:[#allocation2 + $0x2b40] sm:$0xff]  ;;  %v1280_v24 = vld [vmem:[#allocation2 + $0x2518] sm:$0xff] }
 0x439   :  { %4894 = vmatpush2.msra.mxu1 %v1165_v30  ;;  %4824 = vmatprep.subr.mxu0 %v968_v31  ;;  %v1472_v30 = vld [vmem:[#allocation2 + $0x2b18] sm:$0xff]  ;;  %v1279_v31 = vld [vmem:[#allocation2 + $0x2510] sm:$0xff] }
 0x43a   :  { %4895 = vmatprep.subr.mxu1 %v1160_v33  ;;  %4825 = vmatpush2.msra.mxu0 %v967_v34  ;;  %v1471_v33 = vld [vmem:[#allocation2 + $0x2b10] sm:$0xff]  ;;  %v1274_v34 = vld [vmem:[#allocation2 + $0x24e8] sm:$0xff] }
 0x43b   :  { %4896 = vmatpush2.msra.mxu1 %v1159_v37  ;;  %4826 = vmatprep.subr.mxu0 %v962_v38  ;;  %v1466_v37 = vld [vmem:[#allocation2 + $0x2ae8] sm:$0xff]  ;;  %v1273_v38 = vld [vmem:[#allocation2 + $0x24e0] sm:$0xff] }
 0x43c   :  { %4897 = vmatprep.subr.mxu1 %v1154_v39  ;;  %4827 = vmatpush2.msra.mxu0 %v961_v40  ;;  %v1465_v39 = vld [vmem:[#allocation2 + $0x2ae0] sm:$0xff]  ;;  %v1268_v40 = vld [vmem:[#allocation2 + $0x24b8] sm:$0xff] }
 0x43d   :  { %4828 = vmatprep.mubr.f32.mxu0 %v6191_v54  ;;  %4898 = vmatpush2.msra.mxu1 %v1153_v41  ;;  %v1520_v54 = vld [vmem:[#allocation2 + $0x2c98] sm:$0xff] }
 0x43e   :  { %4829 = vmatmul.mubr.f32.vlgmr.msra.gmra.mxu0 %v6184_v43  ;;  %4899 = vmatprep.mubr.f32.mxu1 %v6195_v57  ;;  %v1519_v43 = vld [vmem:[#allocation2 + $0x2c90] sm:$0xff]  ;;  %v1514_v57 = vld [vmem:[#allocation2 + $0x2c68] sm:$0xff]  ;;  %v1460_v41 = vld [vmem:[#allocation2 + $0x2ab8] sm:$0xff] }
 0x43f   :  { %4906 = vmatprep.subr.mxu0 %v1340_v44  ;;  %4977 = vmatprep.subr.mxu1 %v1532_v45  ;;  %v1267_v44 = vld [vmem:[#allocation2 + $0x24b0] sm:$0xff] }
 0x440   :  { %4900 = vmatmul.mubr.f32.vlgmr.msra.gmra.mxu1 %v6187_v48  ;;  %4907 = vmatpush1.msra.mxu0 %v1339_v46  ;;  %v1316_v48 = vld [vmem:[#allocation2 + $0x2638] sm:$0xff]  ;;  %v1459_v45 = vld [vmem:[#allocation2 + $0x2ab0] sm:$0xff]  ;;  %v1262_v46 = vld [vmem:[#allocation2 + $0x2488] sm:$0xff] }
 0x441   :  { %4978 = vmatpush1.msra.mxu1 %v1531_v47  ;;  %4908 = vmatprep.subr.mxu0 %v1334_v49  ;;  %v1454_v47 = vld [vmem:[#allocation2 + $0x2a88] sm:$0xff]  ;;  %v1261_v49 = vld [vmem:[#allocation2 + $0x2480] sm:$0xff] }
 0x442   :  { %4979 = vmatprep.subr.mxu1 %v1526_v50  ;;  %4909 = vmatpush1.msra.mxu0 %v1333_v51  ;;  %v1453_v50 = vld [vmem:[#allocation2 + $0x2a80] sm:$0xff]  ;;  %v1256_v51 = vld [vmem:[#allocation2 + $0x2458] sm:$0xff] }
 0x443   :  { %4980 = vmatpush1.msra.mxu1 %v1525_v53  ;;  %4910 = vmatprep.subr.mxu0 %v1328_v55  ;;  %v1448_v53 = vld [vmem:[#allocation2 + $0x2a58] sm:$0xff]  ;;  %v1255_v55 = vld [vmem:[#allocation2 + $0x2450] sm:$0xff] }
 0x444   :  { %4981 = vmatprep.subr.mxu1 %v1520_v54  ;;  %4911 = vmatpush1.msra.mxu0 %v1327_v56  ;;  %v1447_v54 = vld [vmem:[#allocation2 + $0x2a50] sm:$0xff]  ;;  %v1250_v56 = vld [vmem:[#allocation2 + $0x2428] sm:$0xff] }
 0x445   :  { %4982 = vmatpush1.msra.mxu1 %v1519_v43  ;;  %4912 = vmatprep.subr.mxu0 %v1322_v58  ;;  %v1442_v43 = vld [vmem:[#allocation2 + $0x2a28] sm:$0xff]  ;;  %v1249_v58 = vld [vmem:[#allocation2 + $0x2420] sm:$0xff] }
 0x446   :  { %4983 = vmatprep.subr.mxu1 %v1514_v57  ;;  %4913 = vmatpush1.msra.mxu0 %v1321_v59  ;;  %v1441_v57 = vld [vmem:[#allocation2 + $0x2a20] sm:$0xff]  ;;  %v1436_v59 = vld [vmem:[#allocation2 + $0x29f8] sm:$0xff] }
 0x447   :  { %4984 = vmatpush1.msra.mxu1 %v1513_v60  ;;  %4914 = vmatprep.subr.mxu0 %v1316_v48  ;;  %v1628_v60 = vld [vmem:[#allocation2 + $0x2ff8] sm:$0xff]  ;;  %v1435_v48 = vld [vmem:[#allocation2 + $0x29f0] sm:$0xff] }
 0x448   :  { %4985 = vmatprep.subr.mxu1 %v1508_v61  ;;  %4915 = vmatpush1.msra.mxu0 %v1315_v63  ;;  %v1627_v61 = vld [vmem:[#allocation2 + $0x2ff0] sm:$0xff]  ;;  %v1430_v63 = vld [vmem:[#allocation2 + $0x29c8] sm:$0xff] }
 0x449   :  { %4986 = vmatpush1.msra.mxu1 %v1507_v0  ;;  %4916 = vmatprep.subr.mxu0 %v1310_v8  ;;  %v1622_v0 = vld [vmem:[#allocation2 + $0x2fc8] sm:$0xff]  ;;  %v1429_v8 = vld [vmem:[#allocation2 + $0x29c0] sm:$0xff] }
 0x44a   :  { %4987 = vmatprep.subr.mxu1 %v1502_v2  ;;  %4917 = vmatpush1.msra.mxu0 %v1309_v3  ;;  %v1621_v2 = vld [vmem:[#allocation2 + $0x2fc0] sm:$0xff]  ;;  %v1424_v3 = vld [vmem:[#allocation2 + $0x2998] sm:$0xff] }
 0x44b   :  { %4988 = vmatpush1.msra.mxu1 %v1501_v26  ;;  %4918 = vmatprep.subr.mxu0 %v1304_v10  ;;  %v1616_v26 = vld [vmem:[#allocation2 + $0x2f98] sm:$0xff]  ;;  %v1423_v10 = vld [vmem:[#allocation2 + $0x2990] sm:$0xff] }
 0x44c   :  { %4989 = vmatprep.subr.mxu1 %v1496_v16  ;;  %4919 = vmatpush1.msra.mxu0 %v1303_v4  ;;  %v1615_v16 = vld [vmem:[#allocation2 + $0x2f90] sm:$0xff]  ;;  %v1418_v4 = vld [vmem:[#allocation2 + $0x2968] sm:$0xff] }
 0x44d   :  { %4990 = vmatpush1.msra.mxu1 %v1495_v29  ;;  %4920 = vmatprep.subr.mxu0 %v1298_v62  ;;  %v1610_v29 = vld [vmem:[#allocation2 + $0x2f68] sm:$0xff]  ;;  %v1417_v62 = vld [vmem:[#allocation2 + $0x2960] sm:$0xff] }
 0x44e   :  { %4991 = vmatprep.subr.mxu1 %v1490_v1  ;;  %4921 = vmatpush1.msra.mxu0 %v1297_v21  ;;  %v1609_v1 = vld [vmem:[#allocation2 + $0x2f60] sm:$0xff]  ;;  %v1412_v21 = vld [vmem:[#allocation2 + $0x2938] sm:$0xff] }
 0x44f   :  { %4992 = vmatpush1.msra.mxu1 %v1489_v5  ;;  %4922 = vmatprep.subr.mxu0 %v1292_v6  ;;  %v1604_v5 = vld [vmem:[#allocation2 + $0x2f38] sm:$0xff]  ;;  %v1411_v6 = vld [vmem:[#allocation2 + $0x2930] sm:$0xff] }
 0x450   :  { %4993 = vmatprep.subr.mxu1 %v1484_v7  ;;  %4923 = vmatpush1.msra.mxu0 %v1291_v11  ;;  %v1603_v7 = vld [vmem:[#allocation2 + $0x2f30] sm:$0xff]  ;;  %v1406_v11 = vld [vmem:[#allocation2 + $0x2908] sm:$0xff] }
 0x451   :  { %4994 = vmatpush1.msra.mxu1 %v1483_v12  ;;  %4924 = vmatprep.subr.mxu0 %v1286_v13  ;;  %v1598_v12 = vld [vmem:[#allocation2 + $0x2f08] sm:$0xff]  ;;  %v1405_v13 = vld [vmem:[#allocation2 + $0x2900] sm:$0xff] }
 0x452   :  { %4995 = vmatprep.subr.mxu1 %v1478_v18  ;;  %4925 = vmatpush1.msra.mxu0 %v1285_v20  ;;  %v1597_v18 = vld [vmem:[#allocation2 + $0x2f00] sm:$0xff]  ;;  %v1400_v20 = vld [vmem:[#allocation2 + $0x28d8] sm:$0xff] }
 0x453   :  { %4996 = vmatpush1.msra.mxu1 %v1477_v22  ;;  %4926 = vmatprep.subr.mxu0 %v1280_v24  ;;  %v1592_v22 = vld [vmem:[#allocation2 + $0x2ed8] sm:$0xff]  ;;  %v1399_v24 = vld [vmem:[#allocation2 + $0x28d0] sm:$0xff] }
 0x454   :  { %4997 = vmatprep.subr.mxu1 %v1472_v30  ;;  %4927 = vmatpush1.msra.mxu0 %v1279_v31  ;;  %v1591_v30 = vld [vmem:[#allocation2 + $0x2ed0] sm:$0xff]  ;;  %v1394_v31 = vld [vmem:[#allocation2 + $0x28a8] sm:$0xff] }
 0x455   :  { %4998 = vmatpush1.msra.mxu1 %v1471_v33  ;;  %4928 = vmatprep.subr.mxu0 %v1274_v34  ;;  %v1586_v33 = vld [vmem:[#allocation2 + $0x2ea8] sm:$0xff]  ;;  %v1393_v34 = vld [vmem:[#allocation2 + $0x28a0] sm:$0xff] }
 0x456   :  { %4999 = vmatprep.subr.mxu1 %v1466_v37  ;;  %4929 = vmatpush1.msra.mxu0 %v1273_v38  ;;  %v1585_v37 = vld [vmem:[#allocation2 + $0x2ea0] sm:$0xff]  ;;  %v1388_v38 = vld [vmem:[#allocation2 + $0x2878] sm:$0xff] }
 0x457   :  { %5000 = vmatpush1.msra.mxu1 %v1465_v39  ;;  %4930 = vmatprep.subr.mxu0 %v1268_v40  ;;  %v1580_v39 = vld [vmem:[#allocation2 + $0x2e78] sm:$0xff]  ;;  %v1387_v40 = vld [vmem:[#allocation2 + $0x2870] sm:$0xff] }
 0x458   :  { %5001 = vmatprep.subr.mxu1 %v1460_v41  ;;  %4931 = vmatpush1.msra.mxu0 %v1267_v44  ;;  %v1579_v41 = vld [vmem:[#allocation2 + $0x2e70] sm:$0xff]  ;;  %v1382_v44 = vld [vmem:[#allocation2 + $0x2848] sm:$0xff] }
 0x459   :  { %5002 = vmatpush1.msra.mxu1 %v1459_v45  ;;  %4932 = vmatprep.subr.mxu0 %v1262_v46  ;;  %v1574_v45 = vld [vmem:[#allocation2 + $0x2e48] sm:$0xff]  ;;  %v1381_v46 = vld [vmem:[#allocation2 + $0x2840] sm:$0xff] }
 0x45a   :  { %5003 = vmatprep.subr.mxu1 %v1454_v47  ;;  %4933 = vmatpush1.msra.mxu0 %v1261_v49  ;;  %v1573_v47 = vld [vmem:[#allocation2 + $0x2e40] sm:$0xff]  ;;  %v1376_v49 = vld [vmem:[#allocation2 + $0x2818] sm:$0xff] }
 0x45b   :  { %5004 = vmatpush1.msra.mxu1 %v1453_v50  ;;  %4934 = vmatprep.subr.mxu0 %v1256_v51  ;;  %v1568_v50 = vld [vmem:[#allocation2 + $0x2e18] sm:$0xff]  ;;  %v1375_v51 = vld [vmem:[#allocation2 + $0x2810] sm:$0xff] }
 0x45c   :  { %5005 = vmatprep.subr.mxu1 %v1448_v53  ;;  %4935 = vmatpush1.msra.mxu0 %v1255_v55  ;;  %v1567_v53 = vld [vmem:[#allocation2 + $0x2e10] sm:$0xff]  ;;  %v1370_v55 = vld [vmem:[#allocation2 + $0x27e8] sm:$0xff] }
 0x45d   :  { %5006 = vmatpush1.msra.mxu1 %v1447_v54  ;;  %4936 = vmatprep.subr.mxu0 %v1250_v56  ;;  %v1562_v54 = vld [vmem:[#allocation2 + $0x2de8] sm:$0xff]  ;;  %v1369_v56 = vld [vmem:[#allocation2 + $0x27e0] sm:$0xff] }
 0x45e   :  { %5007 = vmatprep.subr.mxu1 %v1442_v43  ;;  %4937 = vmatpush1.msra.mxu0 %v1249_v58  ;;  %v1561_v43 = vld [vmem:[#allocation2 + $0x2de0] sm:$0xff]  ;;  %v1364_v58 = vld [vmem:[#allocation2 + $0x27b8] sm:$0xff] }
 0x45f   :  { %5008 = vmatpush1.msra.mxu1 %v1441_v57  ;;  %4938 = vmatprep.subr.mxu0 %v1436_v59  ;;  %v1556_v57 = vld [vmem:[#allocation2 + $0x2db8] sm:$0xff]  ;;  %v1363_v59 = vld [vmem:[#allocation2 + $0x27b0] sm:$0xff] }
 0x460   :  { %5009 = vmatprep.subr.mxu1 %v1628_v60  ;;  %4939 = vmatpush2.msra.mxu0 %v1435_v48  ;;  %v1555_v60 = vld [vmem:[#allocation2 + $0x2db0] sm:$0xff]  ;;  %v1358_v48 = vld [vmem:[#allocation2 + $0x2788] sm:$0xff] }
 0x461   :  { %5010 = vmatpush2.msra.mxu1 %v1627_v61  ;;  %4940 = vmatprep.subr.mxu0 %v1430_v63  ;;  %v1550_v61 = vld [vmem:[#allocation2 + $0x2d88] sm:$0xff]  ;;  %v1357_v63 = vld [vmem:[#allocation2 + $0x2780] sm:$0xff] }
 0x462   :  { %5011 = vmatprep.subr.mxu1 %v1622_v0  ;;  %4941 = vmatpush2.msra.mxu0 %v1429_v8  ;;  %v1549_v0 = vld [vmem:[#allocation2 + $0x2d80] sm:$0xff]  ;;  %v1352_v8 = vld [vmem:[#allocation2 + $0x2758] sm:$0xff] }
 0x463   :  { %5012 = vmatpush2.msra.mxu1 %v1621_v2  ;;  %4942 = vmatprep.subr.mxu0 %v1424_v3  ;;  %v1544_v2 = vld [vmem:[#allocation2 + $0x2d58] sm:$0xff]  ;;  %v1351_v3 = vld [vmem:[#allocation2 + $0x2750] sm:$0xff] }
 0x464   :  { %5013 = vmatprep.subr.mxu1 %v1616_v26  ;;  %4943 = vmatpush2.msra.mxu0 %v1423_v10  ;;  %v1543_v26 = vld [vmem:[#allocation2 + $0x2d50] sm:$0xff]  ;;  %v1346_v10 = vld [vmem:[#allocation2 + $0x2728] sm:$0xff] }
 0x465   :  { %5014 = vmatpush2.msra.mxu1 %v1615_v16  ;;  %4944 = vmatprep.subr.mxu0 %v1418_v4  ;;  %v1538_v16 = vld [vmem:[#allocation2 + $0x2d28] sm:$0xff]  ;;  %v1345_v4 = vld [vmem:[#allocation2 + $0x2720] sm:$0xff] }
 0x466   :  { %5015 = vmatprep.subr.mxu1 %v1610_v29  ;;  %4945 = vmatpush2.msra.mxu0 %v1417_v62  ;;  %v1537_v29 = vld [vmem:[#allocation2 + $0x2d20] sm:$0xff]  ;;  %v1724_v62 = vld [vmem:[#allocation2 + $0x32f8] sm:$0xff] }
 0x467   :  { %5016 = vmatpush2.msra.mxu1 %v1609_v1  ;;  %4946 = vmatprep.subr.mxu0 %v1412_v21  ;;  %v1916_v1 = vld [vmem:[#allocation2 + $0x38f8] sm:$0xff]  ;;  %v1723_v21 = vld [vmem:[#allocation2 + $0x32f0] sm:$0xff] }
 0x468   :  { %5017 = vmatprep.subr.mxu1 %v1604_v5  ;;  %4947 = vmatpush2.msra.mxu0 %v1411_v6  ;;  %v1915_v5 = vld [vmem:[#allocation2 + $0x38f0] sm:$0xff]  ;;  %v1718_v6 = vld [vmem:[#allocation2 + $0x32c8] sm:$0xff] }
 0x469   :  { %5018 = vmatpush2.msra.mxu1 %v1603_v7  ;;  %4948 = vmatprep.subr.mxu0 %v1406_v11  ;;  %v1910_v7 = vld [vmem:[#allocation2 + $0x38c8] sm:$0xff]  ;;  %v1717_v11 = vld [vmem:[#allocation2 + $0x32c0] sm:$0xff] }
 0x46a   :  { %5019 = vmatprep.subr.mxu1 %v1598_v12  ;;  %4949 = vmatpush2.msra.mxu0 %v1405_v13  ;;  %v1909_v12 = vld [vmem:[#allocation2 + $0x38c0] sm:$0xff]  ;;  %v1712_v13 = vld [vmem:[#allocation2 + $0x3298] sm:$0xff] }
 0x46b   :  { %5020 = vmatpush2.msra.mxu1 %v1597_v18  ;;  %4950 = vmatprep.subr.mxu0 %v1400_v20  ;;  %v1711_v18 = vld [vmem:[#allocation2 + $0x3290] sm:$0xff]  ;;  %v1706_v20 = vld [vmem:[#allocation2 + $0x3268] sm:$0xff] }
 0x46c   :  { %5021 = vmatprep.subr.mxu1 %v1592_v22  ;;  %4951 = vmatpush2.msra.mxu0 %v1399_v24  ;;  %v1705_v22 = vld [vmem:[#allocation2 + $0x3260] sm:$0xff] }
 0x46d   :  { %5022 = vmatpush2.msra.mxu1 %v1591_v30  ;;  %4952 = vmatprep.subr.mxu0 %v1394_v31  ;;  %v1897_v24 = vld [vmem:[#allocation2 + $0x3860] sm:$0xff]  ;;  %v1892_v30 = vld [vmem:[#allocation2 + $0x3838] sm:$0xff]  ;;  %v1699_v31 = vld [vmem:[#allocation2 + $0x3230] sm:$0xff] }
 0x46e   :  { %5023 = vmatprep.subr.mxu1 %v1586_v33  ;;  %4953 = vmatpush2.msra.mxu0 %v1393_v34  ;;  %v1891_v33 = vld [vmem:[#allocation2 + $0x3830] sm:$0xff]  ;;  %v1694_v34 = vld [vmem:[#allocation2 + $0x3208] sm:$0xff] }
 0x46f   :  { %5024 = vmatpush2.msra.mxu1 %v1585_v37  ;;  %4954 = vmatprep.subr.mxu0 %v1388_v38  ;;  %v1886_v37 = vld [vmem:[#allocation2 + $0x3808] sm:$0xff]  ;;  %v1693_v38 = vld [vmem:[#allocation2 + $0x3200] sm:$0xff] }
 0x470   :  { %5025 = vmatprep.subr.mxu1 %v1580_v39  ;;  %4955 = vmatpush2.msra.mxu0 %v1387_v40  ;;  %v1885_v39 = vld [vmem:[#allocation2 + $0x3800] sm:$0xff]  ;;  %v1688_v40 = vld [vmem:[#allocation2 + $0x31d8] sm:$0xff] }
 0x471   :  { %5026 = vmatpush2.msra.mxu1 %v1579_v41  ;;  %4956 = vmatprep.subr.mxu0 %v1382_v44  ;;  %v1880_v41 = vld [vmem:[#allocation2 + $0x37d8] sm:$0xff]  ;;  %v1687_v44 = vld [vmem:[#allocation2 + $0x31d0] sm:$0xff] }
 0x472   :  { %5027 = vmatprep.subr.mxu1 %v1574_v45  ;;  %4957 = vmatpush2.msra.mxu0 %v1381_v46  ;;  %v1879_v45 = vld [vmem:[#allocation2 + $0x37d0] sm:$0xff]  ;;  %v1682_v46 = vld [vmem:[#allocation2 + $0x31a8] sm:$0xff] }
 0x473   :  { %5028 = vmatpush2.msra.mxu1 %v1573_v47  ;;  %4958 = vmatprep.subr.mxu0 %v1376_v49  ;;  %v1874_v47 = vld [vmem:[#allocation2 + $0x37a8] sm:$0xff]  ;;  %v1681_v49 = vld [vmem:[#allocation2 + $0x31a0] sm:$0xff] }
 0x474   :  { %5029 = vmatprep.subr.mxu1 %v1568_v50  ;;  %4959 = vmatpush2.msra.mxu0 %v1375_v51  ;;  %v1873_v50 = vld [vmem:[#allocation2 + $0x37a0] sm:$0xff]  ;;  %v1676_v51 = vld [vmem:[#allocation2 + $0x3178] sm:$0xff] }
 0x475   :  { %5030 = vmatpush2.msra.mxu1 %v1567_v53  ;;  %4960 = vmatprep.subr.mxu0 %v1370_v55  ;;  %v1868_v53 = vld [vmem:[#allocation2 + $0x3778] sm:$0xff]  ;;  %v1675_v55 = vld [vmem:[#allocation2 + $0x3170] sm:$0xff] }
 0x476   :  { %5031 = vmatprep.subr.mxu1 %v1562_v54  ;;  %4961 = vmatpush2.msra.mxu0 %v1369_v56  ;;  %v1867_v54 = vld [vmem:[#allocation2 + $0x3770] sm:$0xff]  ;;  %v1670_v56 = vld [vmem:[#allocation2 + $0x3148] sm:$0xff] }
 0x477   :  { %5032 = vmatpush2.msra.mxu1 %v1561_v43  ;;  %4962 = vmatprep.subr.mxu0 %v1364_v58  ;;  %v1862_v43 = vld [vmem:[#allocation2 + $0x3748] sm:$0xff]  ;;  %v1669_v58 = vld [vmem:[#allocation2 + $0x3140] sm:$0xff] }
 0x478   :  { %5033 = vmatprep.subr.mxu1 %v1556_v57  ;;  %4963 = vmatpush2.msra.mxu0 %v1363_v59  ;;  %v1861_v57 = vld [vmem:[#allocation2 + $0x3740] sm:$0xff]  ;;  %v1664_v59 = vld [vmem:[#allocation2 + $0x3118] sm:$0xff] }
 0x479   :  { %5034 = vmatpush2.msra.mxu1 %v1555_v60  ;;  %4964 = vmatprep.subr.mxu0 %v1358_v48  ;;  %v1856_v60 = vld [vmem:[#allocation2 + $0x3718] sm:$0xff]  ;;  %v1663_v48 = vld [vmem:[#allocation2 + $0x3110] sm:$0xff] }
 0x47a   :  { %5035 = vmatprep.subr.mxu1 %v1550_v61  ;;  %4965 = vmatpush2.msra.mxu0 %v1357_v63  ;;  %v1855_v61 = vld [vmem:[#allocation2 + $0x3710] sm:$0xff]  ;;  %v1658_v63 = vld [vmem:[#allocation2 + $0x30e8] sm:$0xff] }
 0x47b   :  { %5036 = vmatpush2.msra.mxu1 %v1549_v0  ;;  %4966 = vmatprep.subr.mxu0 %v1352_v8  ;;  %v1850_v0 = vld [vmem:[#allocation2 + $0x36e8] sm:$0xff]  ;;  %v1657_v8 = vld [vmem:[#allocation2 + $0x30e0] sm:$0xff] }
 0x47c   :  { %5037 = vmatprep.subr.mxu1 %v1544_v2  ;;  %4967 = vmatpush2.msra.mxu0 %v1351_v3  ;;  %v1849_v2 = vld [vmem:[#allocation2 + $0x36e0] sm:$0xff]  ;;  %v1652_v3 = vld [vmem:[#allocation2 + $0x30b8] sm:$0xff] }
 0x47d   :  { %5038 = vmatpush2.msra.mxu1 %v1543_v26  ;;  %4968 = vmatprep.subr.mxu0 %v1346_v10  ;;  %v1844_v26 = vld [vmem:[#allocation2 + $0x36b8] sm:$0xff]  ;;  %v1651_v10 = vld [vmem:[#allocation2 + $0x30b0] sm:$0xff] }
 0x47e   :  { %5039 = vmatprep.subr.mxu1 %v1538_v16  ;;  %4969 = vmatpush2.msra.mxu0 %v1345_v4  ;;  %v1843_v16 = vld [vmem:[#allocation2 + $0x36b0] sm:$0xff]  ;;  %v1646_v4 = vld [vmem:[#allocation2 + $0x3088] sm:$0xff] }
 0x47f   :  { %4970 = vmatprep.mubr.f32.mxu0 %v6212_v32  ;;  %5040 = vmatpush2.msra.mxu1 %v1537_v29  ;;  %v1904_v32 = vld [vmem:[#allocation2 + $0x3898] sm:$0xff]  ;;  %v1838_v29 = vld [vmem:[#allocation2 + $0x3688] sm:$0xff] }
 0x480   :  { %4971 = vmatmul.mubr.f32.vlgmr.msra.gmra.mxu0 %v6205_v19  ;;  %5041 = vmatprep.mubr.f32.mxu1 %v6216_v35  ;;  %v1903_v19 = vld [vmem:[#allocation2 + $0x3890] sm:$0xff]  ;;  %v1898_v35 = vld [vmem:[#allocation2 + $0x3868] sm:$0xff] }
 0x481   :  { %5048 = vmatprep.subr.mxu0 %v1724_v62  ;;  %5119 = vmatprep.subr.mxu1 %v1916_v1  ;;  %v1645_v62 = vld [vmem:[#allocation2 + $0x3080] sm:$0xff] }
 0x482   :  { %5042 = vmatmul.mubr.f32.vlgmr.msra.gmra.mxu1 %v6208_v25  ;;  %5049 = vmatpush1.msra.mxu0 %v1723_v21  ;;  %v1700_v25 = vld [vmem:[#allocation2 + $0x3238] sm:$0xff]  ;;  %v1837_v1 = vld [vmem:[#allocation2 + $0x3680] sm:$0xff] }
 0x483   :  { %5120 = vmatpush1.msra.mxu1 %v1915_v5  ;;  %5050 = vmatprep.subr.mxu0 %v1718_v6  ;;  %v1640_v21 = vld [vmem:[#allocation2 + $0x3058] sm:$0xff]  ;;  %v1639_v6 = vld [vmem:[#allocation2 + $0x3050] sm:$0xff] }
 0x484   :  { %5121 = vmatprep.subr.mxu1 %v1910_v7  ;;  %5051 = vmatpush1.msra.mxu0 %v1717_v11  ;;  %v1832_v5 = vld [vmem:[#allocation2 + $0x3658] sm:$0xff]  ;;  %v1831_v7 = vld [vmem:[#allocation2 + $0x3650] sm:$0xff]  ;;  %v1634_v11 = vld [vmem:[#allocation2 + $0x3028] sm:$0xff] }
 0x485   :  { %5122 = vmatpush1.msra.mxu1 %v1909_v12  ;;  %5052 = vmatprep.subr.mxu0 %v1712_v13  ;;  %v1826_v12 = vld [vmem:[#allocation2 + $0x3628] sm:$0xff]  ;;  %v1633_v13 = vld [vmem:[#allocation2 + $0x3020] sm:$0xff] }
 0x486   :  { %5123 = vmatprep.subr.mxu1 %v1904_v32  ;;  %5053 = vmatpush1.msra.mxu0 %v1711_v18  ;;  %v1825_v32 = vld [vmem:[#allocation2 + $0x3620] sm:$0xff]  ;;  %v1820_v18 = vld [vmem:[#allocation2 + $0x35f8] sm:$0xff] }
 0x487   :  { %5124 = vmatpush1.msra.mxu1 %v1903_v19  ;;  %5054 = vmatprep.subr.mxu0 %v1706_v20  ;;  %v2012_v19 = vld [vmem:[#allocation2 + $0x3bf8] sm:$0xff]  ;;  %v1819_v20 = vld [vmem:[#allocation2 + $0x35f0] sm:$0xff] }
 0x488   :  { %5125 = vmatprep.subr.mxu1 %v1898_v35  ;;  %5055 = vmatpush1.msra.mxu0 %v1705_v22  ;;  %v2011_v35 = vld [vmem:[#allocation2 + $0x3bf0] sm:$0xff]  ;;  %v1814_v22 = vld [vmem:[#allocation2 + $0x35c8] sm:$0xff] }
 0x489   :  { %5126 = vmatpush1.msra.mxu1 %v1897_v24  ;;  %5056 = vmatprep.subr.mxu0 %v1700_v25  ;;  %v2006_v24 = vld [vmem:[#allocation2 + $0x3bc8] sm:$0xff]  ;;  %v1813_v25 = vld [vmem:[#allocation2 + $0x35c0] sm:$0xff] }
 0x48a   :  { %5127 = vmatprep.subr.mxu1 %v1892_v30  ;;  %5057 = vmatpush1.msra.mxu0 %v1699_v31  ;;  %v2005_v30 = vld [vmem:[#allocation2 + $0x3bc0] sm:$0xff]  ;;  %v1808_v31 = vld [vmem:[#allocation2 + $0x3598] sm:$0xff] }
 0x48b   :  { %5128 = vmatpush1.msra.mxu1 %v1891_v33  ;;  %5058 = vmatprep.subr.mxu0 %v1694_v34  ;;  %v2000_v33 = vld [vmem:[#allocation2 + $0x3b98] sm:$0xff]  ;;  %v1807_v34 = vld [vmem:[#allocation2 + $0x3590] sm:$0xff] }
 0x48c   :  { %5129 = vmatprep.subr.mxu1 %v1886_v37  ;;  %5059 = vmatpush1.msra.mxu0 %v1693_v38  ;;  %v1999_v37 = vld [vmem:[#allocation2 + $0x3b90] sm:$0xff]  ;;  %v1802_v38 = vld [vmem:[#allocation2 + $0x3568] sm:$0xff] }
 0x48d   :  { %5130 = vmatpush1.msra.mxu1 %v1885_v39  ;;  %5060 = vmatprep.subr.mxu0 %v1688_v40  ;;  %v1994_v39 = vld [vmem:[#allocation2 + $0x3b68] sm:$0xff]  ;;  %v1801_v40 = vld [vmem:[#allocation2 + $0x3560] sm:$0xff] }
 0x48e   :  { %5131 = vmatprep.subr.mxu1 %v1880_v41  ;;  %5061 = vmatpush1.msra.mxu0 %v1687_v44  ;;  %v1993_v41 = vld [vmem:[#allocation2 + $0x3b60] sm:$0xff]  ;;  %v1796_v44 = vld [vmem:[#allocation2 + $0x3538] sm:$0xff] }
 0x48f   :  { %5132 = vmatpush1.msra.mxu1 %v1879_v45  ;;  %5062 = vmatprep.subr.mxu0 %v1682_v46  ;;  %v1988_v45 = vld [vmem:[#allocation2 + $0x3b38] sm:$0xff]  ;;  %v1795_v46 = vld [vmem:[#allocation2 + $0x3530] sm:$0xff] }
 0x490   :  { %5133 = vmatprep.subr.mxu1 %v1874_v47  ;;  %5063 = vmatpush1.msra.mxu0 %v1681_v49  ;;  %v1987_v47 = vld [vmem:[#allocation2 + $0x3b30] sm:$0xff]  ;;  %v1790_v49 = vld [vmem:[#allocation2 + $0x3508] sm:$0xff] }
 0x491   :  { %5134 = vmatpush1.msra.mxu1 %v1873_v50  ;;  %5064 = vmatprep.subr.mxu0 %v1676_v51  ;;  %v1982_v50 = vld [vmem:[#allocation2 + $0x3b08] sm:$0xff]  ;;  %v1789_v51 = vld [vmem:[#allocation2 + $0x3500] sm:$0xff] }
 0x492   :  { %5135 = vmatprep.subr.mxu1 %v1868_v53  ;;  %5065 = vmatpush1.msra.mxu0 %v1675_v55  ;;  %v1981_v53 = vld [vmem:[#allocation2 + $0x3b00] sm:$0xff]  ;;  %v1784_v55 = vld [vmem:[#allocation2 + $0x34d8] sm:$0xff] }
 0x493   :  { %5136 = vmatpush1.msra.mxu1 %v1867_v54  ;;  %5066 = vmatprep.subr.mxu0 %v1670_v56  ;;  %v1976_v54 = vld [vmem:[#allocation2 + $0x3ad8] sm:$0xff]  ;;  %v1783_v56 = vld [vmem:[#allocation2 + $0x34d0] sm:$0xff] }
 0x494   :  { %5137 = vmatprep.subr.mxu1 %v1862_v43  ;;  %5067 = vmatpush1.msra.mxu0 %v1669_v58  ;;  %v1975_v43 = vld [vmem:[#allocation2 + $0x3ad0] sm:$0xff]  ;;  %v1778_v58 = vld [vmem:[#allocation2 + $0x34a8] sm:$0xff] }
 0x495   :  { %5138 = vmatpush1.msra.mxu1 %v1861_v57  ;;  %5068 = vmatprep.subr.mxu0 %v1664_v59  ;;  %v1970_v57 = vld [vmem:[#allocation2 + $0x3aa8] sm:$0xff]  ;;  %v1777_v59 = vld [vmem:[#allocation2 + $0x34a0] sm:$0xff] }
 0x496   :  { %5139 = vmatprep.subr.mxu1 %v1856_v60  ;;  %5069 = vmatpush1.msra.mxu0 %v1663_v48  ;;  %v1969_v60 = vld [vmem:[#allocation2 + $0x3aa0] sm:$0xff]  ;;  %v1772_v48 = vld [vmem:[#allocation2 + $0x3478] sm:$0xff] }
 0x497   :  { %5140 = vmatpush1.msra.mxu1 %v1855_v61  ;;  %5070 = vmatprep.subr.mxu0 %v1658_v63  ;;  %v1964_v61 = vld [vmem:[#allocation2 + $0x3a78] sm:$0xff]  ;;  %v1771_v63 = vld [vmem:[#allocation2 + $0x3470] sm:$0xff] }
 0x498   :  { %5141 = vmatprep.subr.mxu1 %v1850_v0  ;;  %5071 = vmatpush1.msra.mxu0 %v1657_v8  ;;  %v1963_v0 = vld [vmem:[#allocation2 + $0x3a70] sm:$0xff]  ;;  %v1766_v8 = vld [vmem:[#allocation2 + $0x3448] sm:$0xff] }
 0x499   :  { %5142 = vmatpush1.msra.mxu1 %v1849_v2  ;;  %5072 = vmatprep.subr.mxu0 %v1652_v3  ;;  %v1958_v2 = vld [vmem:[#allocation2 + $0x3a48] sm:$0xff]  ;;  %v1765_v3 = vld [vmem:[#allocation2 + $0x3440] sm:$0xff] }
 0x49a   :  { %5143 = vmatprep.subr.mxu1 %v1844_v26  ;;  %5073 = vmatpush1.msra.mxu0 %v1651_v10  ;;  %v1957_v26 = vld [vmem:[#allocation2 + $0x3a40] sm:$0xff]  ;;  %v1760_v10 = vld [vmem:[#allocation2 + $0x3418] sm:$0xff] }
 0x49b   :  { %5144 = vmatpush1.msra.mxu1 %v1843_v16  ;;  %5074 = vmatprep.subr.mxu0 %v1646_v4  ;;  %v1952_v16 = vld [vmem:[#allocation2 + $0x3a18] sm:$0xff]  ;;  %v1759_v4 = vld [vmem:[#allocation2 + $0x3410] sm:$0xff] }
 0x49c   :  { %5145 = vmatprep.subr.mxu1 %v1838_v29  ;;  %5075 = vmatpush1.msra.mxu0 %v1645_v62  ;;  %v1951_v29 = vld [vmem:[#allocation2 + $0x3a10] sm:$0xff]  ;;  %v1754_v62 = vld [vmem:[#allocation2 + $0x33e8] sm:$0xff] }
 0x49d   :  { %5146 = vmatpush1.msra.mxu1 %v1837_v1  ;;  %5076 = vmatprep.subr.mxu0 %v1640_v21  ;;  %v1946_v1 = vld [vmem:[#allocation2 + $0x39e8] sm:$0xff]  ;;  %v1753_v21 = vld [vmem:[#allocation2 + $0x33e0] sm:$0xff] }
 0x49e   :  { %5147 = vmatprep.subr.mxu1 %v1832_v5  ;;  %5077 = vmatpush1.msra.mxu0 %v1639_v6  ;;  %v1945_v5 = vld [vmem:[#allocation2 + $0x39e0] sm:$0xff]  ;;  %v1748_v6 = vld [vmem:[#allocation2 + $0x33b8] sm:$0xff] }
 0x49f   :  { %5148 = vmatpush1.msra.mxu1 %v1831_v7  ;;  %5078 = vmatprep.subr.mxu0 %v1634_v11  ;;  %v1940_v7 = vld [vmem:[#allocation2 + $0x39b8] sm:$0xff]  ;;  %v1747_v11 = vld [vmem:[#allocation2 + $0x33b0] sm:$0xff] }
 0x4a0   :  { %5149 = vmatprep.subr.mxu1 %v1826_v12  ;;  %5079 = vmatpush1.msra.mxu0 %v1633_v13  ;;  %v1939_v12 = vld [vmem:[#allocation2 + $0x39b0] sm:$0xff]  ;;  %v1742_v13 = vld [vmem:[#allocation2 + $0x3388] sm:$0xff] }
 0x4a1   :  { %5150 = vmatpush1.msra.mxu1 %v1825_v32  ;;  %5080 = vmatprep.subr.mxu0 %v1820_v18  ;;  %v1934_v32 = vld [vmem:[#allocation2 + $0x3988] sm:$0xff]  ;;  %v1741_v18 = vld [vmem:[#allocation2 + $0x3380] sm:$0xff] }
 0x4a2   :  { %5151 = vmatprep.subr.mxu1 %v2012_v19  ;;  %5081 = vmatpush2.msra.mxu0 %v1819_v20  ;;  %v1933_v19 = vld [vmem:[#allocation2 + $0x3980] sm:$0xff]  ;;  %v1736_v20 = vld [vmem:[#allocation2 + $0x3358] sm:$0xff] }
 0x4a3   :  { %5152 = vmatpush2.msra.mxu1 %v2011_v35  ;;  %5082 = vmatprep.subr.mxu0 %v1814_v22  ;;  %v1928_v35 = vld [vmem:[#allocation2 + $0x3958] sm:$0xff]  ;;  %v1735_v22 = vld [vmem:[#allocation2 + $0x3350] sm:$0xff] }
 0x4a4   :  { %5153 = vmatprep.subr.mxu1 %v2006_v24  ;;  %5083 = vmatpush2.msra.mxu0 %v1813_v25  ;;  %v1927_v24 = vld [vmem:[#allocation2 + $0x3950] sm:$0xff]  ;;  %v1730_v25 = vld [vmem:[#allocation2 + $0x3328] sm:$0xff] }
 0x4a5   :  { %5154 = vmatpush2.msra.mxu1 %v2005_v30  ;;  %5084 = vmatprep.subr.mxu0 %v1808_v31  ;;  %v1922_v30 = vld [vmem:[#allocation2 + $0x3928] sm:$0xff]  ;;  %v1729_v31 = vld [vmem:[#allocation2 + $0x3320] sm:$0xff] }
 0x4a6   :  { %5155 = vmatprep.subr.mxu1 %v2000_v33  ;;  %5085 = vmatpush2.msra.mxu0 %v1807_v34  ;;  %v1921_v33 = vld [vmem:[#allocation2 + $0x3920] sm:$0xff]  ;;  %v2108_v34 = vld [vmem:[#allocation2 + $0x3ef8] sm:$0xff] }
 0x4a7   :  { %5156 = vmatpush2.msra.mxu1 %v1999_v37  ;;  %5086 = vmatprep.subr.mxu0 %v1802_v38  ;;  %v2300_v37 = vld [vmem:[#allocation2 + $0x44f8] sm:$0xff]  ;;  %v2107_v38 = vld [vmem:[#allocation2 + $0x3ef0] sm:$0xff] }
 0x4a8   :  { %5157 = vmatprep.subr.mxu1 %v1994_v39  ;;  %5087 = vmatpush2.msra.mxu0 %v1801_v40  ;;  %v2299_v39 = vld [vmem:[#allocation2 + $0x44f0] sm:$0xff]  ;;  %v2102_v40 = vld [vmem:[#allocation2 + $0x3ec8] sm:$0xff] }
 0x4a9   :  { %5158 = vmatpush2.msra.mxu1 %v1993_v41  ;;  %5088 = vmatprep.subr.mxu0 %v1796_v44  ;;  %v2294_v41 = vld [vmem:[#allocation2 + $0x44c8] sm:$0xff]  ;;  %v2101_v44 = vld [vmem:[#allocation2 + $0x3ec0] sm:$0xff] }
 0x4aa   :  { %5159 = vmatprep.subr.mxu1 %v1988_v45  ;;  %5089 = vmatpush2.msra.mxu0 %v1795_v46  ;;  %v2293_v45 = vld [vmem:[#allocation2 + $0x44c0] sm:$0xff]  ;;  %v2096_v46 = vld [vmem:[#allocation2 + $0x3e98] sm:$0xff] }
 0x4ab   :  { %5160 = vmatpush2.msra.mxu1 %v1987_v47  ;;  %5090 = vmatprep.subr.mxu0 %v1790_v49  ;;  %v2095_v47 = vld [vmem:[#allocation2 + $0x3e90] sm:$0xff]  ;;  %v6316_v49 = vpop.f32.mrf.mxu0 }
 0x4ac   :  { %5161 = vmatprep.subr.mxu1 %v1982_v50  ;;  %5091 = vmatpush2.msra.mxu0 %v1789_v51  ;;  %v2282_v50 = vld [vmem:[#allocation2 + $0x4468] sm:$0xff]  ;;  %v2089_v51 = vld [vmem:[#allocation2 + $0x3e60] sm:$0xff] }
 0x4ad   :  { %5162 = vmatpush2.msra.mxu1 %v1981_v53  ;;  %5092 = vmatprep.subr.mxu0 %v1784_v55  ;;  %v2084_v53 = vld [vmem:[#allocation2 + $0x3e38] sm:$0xff] }
 0x4ae   :  { %5163 = vmatprep.subr.mxu1 %v1976_v54  ;;  %5093 = vmatpush2.msra.mxu0 %v1783_v56  ;;  %v2276_v55 = vld [vmem:[#allocation2 + $0x4438] sm:$0xff]  ;;  %v2083_v54 = vld [vmem:[#allocation2 + $0x3e30] sm:$0xff] }
 0x4af   :  { %5164 = vmatpush2.msra.mxu1 %v1975_v43  ;;  %5094 = vmatprep.subr.mxu0 %v1778_v58  ;;  %v2275_v56 = vld [vmem:[#allocation2 + $0x4430] sm:$0xff]  ;;  %v6318_v43 = vpop.f32.mrf.mxu1  ;;  %v6320_v58 = vpop.f32.mrf.mxu0 }
 0x4b0   :  { %5165 = vmatprep.subr.mxu1 %v1970_v57  ;;  %5095 = vmatpush2.msra.mxu0 %v1777_v59  ;;  %v2078_v57 = vld [vmem:[#allocation2 + $0x3e08] sm:$0xff] }
 0x4b1   :  { %5166 = vmatpush2.msra.mxu1 %v1969_v60  ;;  %5096 = vmatprep.subr.mxu0 %v1772_v48  ;;  %v2270_v59 = vld [vmem:[#allocation2 + $0x4408] sm:$0xff]  ;;  %v2077_v60 = vld [vmem:[#allocation2 + $0x3e00] sm:$0xff] }
 0x4b2   :  { %5167 = vmatprep.subr.mxu1 %v1964_v61  ;;  %5097 = vmatpush2.msra.mxu0 %v1771_v63  ;;  %v2269_v48 = vld [vmem:[#allocation2 + $0x4400] sm:$0xff]  ;;  %v6322_v61 = vpop.f32.mrf.mxu0  ;;  %v2072_v63 = vld [vmem:[#allocation2 + $0x3dd8] sm:$0xff] }
 0x4b3   :  { %5168 = vmatpush2.msra.mxu1 %v1963_v0  ;;  %5098 = vmatprep.subr.mxu0 %v1766_v8  ;;  %v2264_v0 = vld [vmem:[#allocation2 + $0x43d8] sm:$0xff]  ;;  %v2071_v8 = vld [vmem:[#allocation2 + $0x3dd0] sm:$0xff] }
 0x4b4   :  { %5169 = vmatprep.subr.mxu1 %v1958_v2  ;;  %5099 = vmatpush2.msra.mxu0 %v1765_v3  ;;  %v2263_v2 = vld [vmem:[#allocation2 + $0x43d0] sm:$0xff]  ;;  %v2773_v3 = vpop.f32.mrf.mxu1 }
 0x4b5   :  { %5170 = vmatpush2.msra.mxu1 %v1957_v26  ;;  %5100 = vmatprep.subr.mxu0 %v1760_v10  ;;  %v2066_v26 = vld [vmem:[#allocation2 + $0x3da8] sm:$0xff] }
 0x4b6   :  { %5171 = vmatprep.subr.mxu1 %v1952_v16  ;;  %5101 = vmatpush2.msra.mxu0 %v1759_v4  ;;  %v2258_v10 = vld [vmem:[#allocation2 + $0x43a8] sm:$0xff]  ;;  %v2065_v16 = vld [vmem:[#allocation2 + $0x3da0] sm:$0xff] }
 0x4b7   :  { %5172 = vmatpush2.msra.mxu1 %v1951_v29  ;;  %5102 = vmatprep.subr.mxu0 %v1754_v62  ;;  %v2257_v4 = vld [vmem:[#allocation2 + $0x43a0] sm:$0xff]  ;;  %v2844_v29 = vpop.f32.mrf.mxu0  ;;  %v6324_v62 = vpop.f32.mrf.mxu1 }
 0x4b8   :  { %5173 = vmatprep.subr.mxu1 %v1946_v1  ;;  %5103 = vmatpush2.msra.mxu0 %v1753_v21  ;;  %v2060_v1 = vld [vmem:[#allocation2 + $0x3d78] sm:$0xff] }
 0x4b9   :  { %5174 = vmatpush2.msra.mxu1 %v1945_v5  ;;  %5104 = vmatprep.subr.mxu0 %v1748_v6  ;;  %v2252_v21 = vld [vmem:[#allocation2 + $0x4378] sm:$0xff]  ;;  %v2059_v5 = vld [vmem:[#allocation2 + $0x3d70] sm:$0xff] }
 0x4ba   :  { %5175 = vmatprep.subr.mxu1 %v1940_v7  ;;  %5105 = vmatpush2.msra.mxu0 %v1747_v11  ;;  %v2251_v6 = vld [vmem:[#allocation2 + $0x4370] sm:$0xff]  ;;  %v6326_v7 = vpop.f32.mrf.mxu0  ;;  %v2054_v11 = vld [vmem:[#allocation2 + $0x3d48] sm:$0xff] }
 0x4bb   :  { %5176 = vmatpush2.msra.mxu1 %v1939_v12  ;;  %5106 = vmatprep.subr.mxu0 %v1742_v13  ;;  %v2246_v12 = vld [vmem:[#allocation2 + $0x4348] sm:$0xff]  ;;  %v2053_v13 = vld [vmem:[#allocation2 + $0x3d40] sm:$0xff] }
 0x4bc   :  { %5177 = vmatprep.subr.mxu1 %v1934_v32  ;;  %5107 = vmatpush2.msra.mxu0 %v1741_v18  ;;  %v2245_v32 = vld [vmem:[#allocation2 + $0x4340] sm:$0xff]  ;;  %v2915_v18 = vpop.f32.mrf.mxu1 }
 0x4bd   :  { %5178 = vmatpush2.msra.mxu1 %v1933_v19  ;;  %5108 = vmatprep.subr.mxu0 %v1736_v20  ;;  %v2048_v19 = vld [vmem:[#allocation2 + $0x3d18] sm:$0xff] }
 0x4be   :  { %5179 = vmatprep.subr.mxu1 %v1928_v35  ;;  %5109 = vmatpush2.msra.mxu0 %v1735_v22  ;;  %v2240_v20 = vld [vmem:[#allocation2 + $0x4318] sm:$0xff]  ;;  %v2047_v35 = vld [vmem:[#allocation2 + $0x3d10] sm:$0xff] }
 0x4bf   :  { %5180 = vmatpush2.msra.mxu1 %v1927_v24  ;;  %5110 = vmatprep.subr.mxu0 %v1730_v25  ;;  %v2239_v22 = vld [vmem:[#allocation2 + $0x4310] sm:$0xff]  ;;  %v2986_v24 = vpop.f32.mrf.mxu0  ;;  %v6328_v25 = vpop.f32.mrf.mxu1 }
 0x4c0   :  { %5181 = vmatprep.subr.mxu1 %v1922_v30  ;;  %5111 = vmatpush2.msra.mxu0 %v1729_v31  ;;  %v2042_v30 = vld [vmem:[#allocation2 + $0x3ce8] sm:$0xff] }
 0x4c1   :  { %5112 = vmatprep.mubr.f32.mxu0 %v6233_v23  ;;  %5182 = vmatpush2.msra.mxu1 %v1921_v33  ;;  %v2288_v23 = vld [vmem:[#allocation2 + $0x4498] sm:$0xff]  ;;  %v2234_v31 = vld [vmem:[#allocation2 + $0x42e8] sm:$0xff]  ;;  %v2041_v33 = vld [vmem:[#allocation2 + $0x3ce0] sm:$0xff] }
 0x4c2   :  { %5113 = vmatmul.mubr.f32.vlgmr.msra.gmra.mxu0 %v6226_v9  ;;  %5183 = vmatprep.mubr.f32.mxu1 %v6237_v28  ;;  %v2287_v9 = vld [vmem:[#allocation2 + $0x4490] sm:$0xff]  ;;  %v2090_v28 = vld [vmem:[#allocation2 + $0x3e68] sm:$0xff] }
 0x4c3   :  { %5190 = vmatprep.subr.mxu0 %v2108_v34  ;;  %5261 = vmatprep.subr.mxu1 %v2300_v37  ;;  %v2233_v34 = vld [vmem:[#allocation2 + $0x42e0] sm:$0xff]  ;;  %v6330_v37 = vpop.f32.mrf.mxu0 }
 0x4c4   :  { %5184 = vmatmul.mubr.f32.vlgmr.msra.gmra.mxu1 %v6229_v15  ;;  %5191 = vmatpush1.msra.mxu0 %v2107_v38  ;;  %v2281_v15 = vld [vmem:[#allocation2 + $0x4460] sm:$0xff]  ;;  %v2036_v38 = vld [vmem:[#allocation2 + $0x3cb8] sm:$0xff] }
 0x4c5   :  { %5262 = vmatpush1.msra.mxu1 %v2299_v39  ;;  %5192 = vmatprep.subr.mxu0 %v2102_v40  ;;  %v2228_v39 = vld [vmem:[#allocation2 + $0x42b8] sm:$0xff]  ;;  %v2774_v40 = vadd.f32 %v2773_v3, %v6320_v58  ;;  %v2018_v58 = vld [vmem:[#allocation2 + $0x3c28] sm:$0xff]  ;;  %v2203_v3 = vld [vmem:[#allocation2 + $0x41f0] sm:$0xff] }
 0x4c6   :  { %5263 = vmatprep.subr.mxu1 %v2294_v41  ;;  %5193 = vmatpush1.msra.mxu0 %v2101_v44  ;;  %v2035_v41 = vld [vmem:[#allocation2 + $0x3cb0] sm:$0xff] }
 0x4c7   :  { %5264 = vmatpush1.msra.mxu1 %v2293_v45  ;;  %5194 = vmatprep.subr.mxu0 %v2096_v46  ;;  %v2227_v44 = vld [vmem:[#allocation2 + $0x42b0] sm:$0xff]  ;;  %v3057_v45 = vpop.f32.mrf.mxu1  ;;  %v2030_v46 = vld [vmem:[#allocation2 + $0x3c88] sm:$0xff] }
 0x4c8   :  { %5265 = vmatprep.subr.mxu1 %v2288_v23  ;;  %5195 = vmatpush1.msra.mxu0 %v2095_v47  ;;  %v2222_v23 = vld [vmem:[#allocation2 + $0x4288] sm:$0xff]  ;;  %v2845_v47 = vadd.f32 %v2844_v29, %v2774_v40 }
 0x4c9   :  { %5266 = vmatpush1.msra.mxu1 %v2287_v9  ;;  %5196 = vmatprep.subr.mxu0 %v2090_v28  ;;  %v2029_v9 = vld [vmem:[#allocation2 + $0x3c80] sm:$0xff]  ;;  %v2390_v29 = vld [vmem:[#allocation2 + $0x47c8] sm:$0xff] }
 0x4ca   :  { %5267 = vmatprep.subr.mxu1 %v2282_v50  ;;  %5197 = vmatpush1.msra.mxu0 %v2089_v51  ;;  %v2221_v28 = vld [vmem:[#allocation2 + $0x4280] sm:$0xff]  ;;  %v3128_v50 = vpop.f32.mrf.mxu0  ;;  %v6333_v51 = vpop.f32.mrf.mxu1 }
 0x4cb   :  { %5268 = vmatpush1.msra.mxu1 %v2281_v15  ;;  %5198 = vmatprep.subr.mxu0 %v2084_v53  ;;  %v2024_v15 = vld [vmem:[#allocation2 + $0x3c58] sm:$0xff] }
 0x4cc   :  { %5269 = vmatprep.subr.mxu1 %v2276_v55  ;;  %5199 = vmatpush1.msra.mxu0 %v2083_v54  ;;  %v2216_v53 = vld [vmem:[#allocation2 + $0x4258] sm:$0xff]  ;;  %v2023_v55 = vld [vmem:[#allocation2 + $0x3c50] sm:$0xff] }
 0x4cd   :  { %5270 = vmatpush1.msra.mxu1 %v2275_v56  ;;  %5200 = vmatprep.subr.mxu0 %v2078_v57  ;;  %v2215_v54 = vld [vmem:[#allocation2 + $0x4250] sm:$0xff]  ;;  %v6335_v56 = vpop.f32.mrf.mxu0  ;;  %v2210_v57 = vld [vmem:[#allocation2 + $0x4228] sm:$0xff] }
 0x4ce   :  { %5271 = vmatprep.subr.mxu1 %v2270_v59  ;;  %5201 = vmatpush1.msra.mxu0 %v2077_v60  ;;  %v2916_v59 = vadd.f32 %v2915_v18, %v2845_v47  ;;  %v2017_v60 = vld [vmem:[#allocation2 + $0x3c20] sm:$0xff] }
 0x4cf   :  { %5272 = vmatpush1.msra.mxu1 %v2269_v48  ;;  %5202 = vmatprep.subr.mxu0 %v2072_v63  ;;  %v2209_v48 = vld [vmem:[#allocation2 + $0x4220] sm:$0xff]  ;;  %v3199_v63 = vpop.f32.mrf.mxu1 }
 0x4d0   :  { %5273 = vmatprep.subr.mxu1 %v2264_v0  ;;  %5203 = vmatpush1.msra.mxu0 %v2071_v8  ;;  %v2204_v0 = vld [vmem:[#allocation2 + $0x41f8] sm:$0xff] }
 0x4d1   :  { %5274 = vmatpush1.msra.mxu1 %v2263_v2  ;;  %5204 = vmatprep.subr.mxu0 %v2066_v26  ;;  %v2396_v8 = vld [vmem:[#allocation2 + $0x47f8] sm:$0xff]  ;;  %v2987_v2 = vadd.f32 %v2986_v24, %v2916_v59  ;;  %v2395_v26 = vld [vmem:[#allocation2 + $0x47f0] sm:$0xff]  ;;  %v2377_v24 = vld [vmem:[#allocation2 + $0x4760] sm:$0xff] }
 0x4d2   :  { %5275 = vmatprep.subr.mxu1 %v2258_v10  ;;  %5205 = vmatpush1.msra.mxu0 %v2065_v16  ;;  %v3270_v10 = vpop.f32.mrf.mxu0  ;;  %v6337_v16 = vpop.f32.mrf.mxu1  ;;  %v2161_v59 = vld [vmem:[#allocation2 + $0x40a0] sm:$0xff] }
 0x4d3   :  { %5276 = vmatpush1.msra.mxu1 %v2257_v4  ;;  %5206 = vmatprep.subr.mxu0 %v2060_v1  ;;  %v2198_v4 = vld [vmem:[#allocation2 + $0x41c8] sm:$0xff]  ;;  %v2197_v1 = vld [vmem:[#allocation2 + $0x41c0] sm:$0xff] }
 0x4d4   :  { %5277 = vmatprep.subr.mxu1 %v2252_v21  ;;  %5207 = vmatpush1.msra.mxu0 %v2059_v5  ;;  %v2389_v21 = vld [vmem:[#allocation2 + $0x47c0] sm:$0xff]  ;;  %v6339_v5 = vpop.f32.mrf.mxu0  ;;  %v3341_v18 = vpop.f32.mrf.mxu1 }
 0x4d5   :  { %5278 = vmatpush1.msra.mxu1 %v2251_v6  ;;  %5208 = vmatprep.subr.mxu0 %v2054_v11  ;;  %v2192_v6 = vld [vmem:[#allocation2 + $0x4198] sm:$0xff] }
 0x4d6   :  { %5279 = vmatprep.subr.mxu1 %v2246_v12  ;;  %5209 = vmatpush1.msra.mxu0 %v2053_v13  ;;  %v2384_v11 = vld [vmem:[#allocation2 + $0x4798] sm:$0xff]  ;;  %v3058_v12 = vadd.f32 %v3057_v45, %v2987_v2  ;;  %v2191_v13 = vld [vmem:[#allocation2 + $0x4190] sm:$0xff] }
 0x4d7   :  { %5280 = vmatpush1.msra.mxu1 %v2245_v32  ;;  %5210 = vmatprep.subr.mxu0 %v2048_v19  ;;  %v2383_v32 = vld [vmem:[#allocation2 + $0x4790] sm:$0xff]  ;;  %v2186_v19 = vld [vmem:[#allocation2 + $0x4168] sm:$0xff] }
 0x4d8   :  { %5281 = vmatprep.subr.mxu1 %v2240_v20  ;;  %5211 = vmatpush1.msra.mxu0 %v2047_v35  ;;  %v2378_v20 = vld [vmem:[#allocation2 + $0x4768] sm:$0xff]  ;;  %v3129_v35 = vadd.f32 %v3128_v50, %v3058_v12  ;;  %v2155_v2 = vld [vmem:[#allocation2 + $0x4070] sm:$0xff]  ;;  %v2144_v12 = vld [vmem:[#allocation2 + $0x4018] sm:$0xff] }
 0x4d9   :  { %5282 = vmatpush1.msra.mxu1 %v2239_v22  ;;  %5212 = vmatprep.subr.mxu0 %v2042_v30  ;;  %v2185_v22 = vld [vmem:[#allocation2 + $0x4160] sm:$0xff]  ;;  %v3412_v30 = vpop.f32.mrf.mxu0 }
 0x4da   :  { %5283 = vmatprep.subr.mxu1 %v2234_v31  ;;  %5213 = vmatpush1.msra.mxu0 %v2041_v33  ;;  %v6341_v31 = vpop.f32.mrf.mxu1  ;;  %v2180_v33 = vld [vmem:[#allocation2 + $0x4138] sm:$0xff]  ;;  %v3200_v45 = vadd.f32 %v3199_v63, %v3129_v35  ;;  %v2138_v35 = vld [vmem:[#allocation2 + $0x3fe8] sm:$0xff] }
 0x4db   :  { %5284 = vmatpush1.msra.mxu1 %v2233_v34  ;;  %5214 = vmatprep.subr.mxu0 %v2036_v38  ;;  %v2372_v34 = vld [vmem:[#allocation2 + $0x4738] sm:$0xff]  ;;  %v2179_v38 = vld [vmem:[#allocation2 + $0x4130] sm:$0xff]  ;;  %v6343_v40 = vpop.f32.mrf.mxu0 }
 0x4dc   :  { %5285 = vmatprep.subr.mxu1 %v2228_v39  ;;  %5215 = vmatpush1.msra.mxu0 %v2035_v41  ;;  %v2371_v39 = vld [vmem:[#allocation2 + $0x4730] sm:$0xff]  ;;  %v2174_v41 = vld [vmem:[#allocation2 + $0x4108] sm:$0xff]  ;;  %v3483_v47 = vpop.f32.mrf.mxu1  ;;  %v3271_v50 = vadd.f32 %v3270_v10, %v3200_v45  ;;  %v2156_v63 = vld [vmem:[#allocation2 + $0x4078] sm:$0xff] }
 0x4dd   :  { %5286 = vmatpush1.msra.mxu1 %v2227_v44  ;;  %5216 = vmatprep.subr.mxu0 %v2030_v46  ;;  %v2366_v44 = vld [vmem:[#allocation2 + $0x4708] sm:$0xff]  ;;  %v2173_v46 = vld [vmem:[#allocation2 + $0x4100] sm:$0xff] }
 0x4de   :  { %5287 = vmatprep.subr.mxu1 %v2222_v23  ;;  %5217 = vmatpush1.msra.mxu0 %v2029_v9  ;;  %v2365_v23 = vld [vmem:[#allocation2 + $0x4700] sm:$0xff]  ;;  %v2168_v9 = vld [vmem:[#allocation2 + $0x40d8] sm:$0xff]  ;;  %v2150_v10 = vld [vmem:[#allocation2 + $0x4048] sm:$0xff] }
 0x4df   :  { %5288 = vmatpush1.msra.mxu1 %v2221_v28  ;;  %5218 = vmatprep.subr.mxu0 %v2024_v15  ;;  %v2360_v28 = vld [vmem:[#allocation2 + $0x46d8] sm:$0xff]  ;;  %v2167_v15 = vld [vmem:[#allocation2 + $0x40d0] sm:$0xff] }
 0x4e0   :  { %5289 = vmatprep.subr.mxu1 %v2216_v53  ;;  %5219 = vmatpush1.msra.mxu0 %v2023_v55  ;;  %v2359_v53 = vld [vmem:[#allocation2 + $0x46d0] sm:$0xff]  ;;  %v3554_v55 = vpop.f32.mrf.mxu0 }
 0x4e1   :  { %5290 = vmatpush1.msra.mxu1 %v2215_v54  ;;  %5220 = vmatprep.subr.mxu0 %v2018_v58  ;;  %v6345_v54 = vpop.f32.mrf.mxu1  ;;  %v2162_v58 = vld [vmem:[#allocation2 + $0x40a8] sm:$0xff] }
 0x4e2   :  { %5291 = vmatprep.subr.mxu1 %v2210_v57  ;;  %5221 = vmatpush1.msra.mxu0 %v2017_v60  ;;  %v2354_v57 = vld [vmem:[#allocation2 + $0x46a8] sm:$0xff]  ;;  %v2353_v60 = vld [vmem:[#allocation2 + $0x46a0] sm:$0xff] }
 0x4e3   :  { %5292 = vmatpush1.msra.mxu1 %v2209_v48  ;;  %5222 = vmatprep.subr.mxu0 %v2204_v0  ;;  %v6347_v48 = vpop.f32.mrf.mxu0  ;;  %v2348_v0 = vld [vmem:[#allocation2 + $0x4678] sm:$0xff] }
 0x4e4   :  { %5293 = vmatprep.subr.mxu1 %v2396_v8  ;;  %5223 = vmatpush2.msra.mxu0 %v2203_v3  ;;  %v3342_v8 = vadd.f32 %v3341_v18, %v3271_v50  ;;  %v2347_v3 = vld [vmem:[#allocation2 + $0x4670] sm:$0xff] }
 0x4e5   :  { %5294 = vmatpush2.msra.mxu1 %v2395_v26  ;;  %5224 = vmatprep.subr.mxu0 %v2198_v4  ;;  %v6349_v26 = vpop.f32.mrf.mxu1  ;;  %v2342_v4 = vld [vmem:[#allocation2 + $0x4648] sm:$0xff]  ;;  %v2143_v18 = vld [vmem:[#allocation2 + $0x4010] sm:$0xff] }
 0x4e6   :  { %5295 = vmatprep.subr.mxu1 %v2390_v29  ;;  %5225 = vmatpush2.msra.mxu0 %v2197_v1  ;;  %v3413_v29 = vadd.f32 %v3412_v30, %v3342_v8  ;;  %v2149_v1 = vld [vmem:[#allocation2 + $0x4040] sm:$0xff] }
 0x4e7   :  { %5296 = vmatpush2.msra.mxu1 %v2389_v21  ;;  %5226 = vmatprep.subr.mxu0 %v2192_v6  ;;  %v2341_v21 = vld [vmem:[#allocation2 + $0x4640] sm:$0xff]  ;;  %v6351_v6 = vpop.f32.mrf.mxu0 }
 0x4e8   :  { %5297 = vmatprep.subr.mxu1 %v2384_v11  ;;  %5227 = vmatpush2.msra.mxu0 %v2191_v13  ;;  %v6353_v11 = vpop.f32.mrf.mxu1  ;;  %v2336_v13 = vld [vmem:[#allocation2 + $0x4618] sm:$0xff]  ;;  %v2137_v30 = vld [vmem:[#allocation2 + $0x3fe0] sm:$0xff] }
 0x4e9   :  { %5298 = vmatpush2.msra.mxu1 %v2383_v32  ;;  %5228 = vmatprep.subr.mxu0 %v2186_v19  ;;  %v5411_v32 = vsub.s32 1, %v6133_v42  ;;  %v2335_v19 = vld [vmem:[#allocation2 + $0x4610] sm:$0xff] }
 0x4ea   :  { %5299 = vmatprep.subr.mxu1 %v2378_v20  ;;  %5229 = vmatpush2.msra.mxu0 %v2185_v22  ;;  %v6356_v20 = vpop.f32.mrf.mxu0  ;;  %v2330_v22 = vld [vmem:[#allocation2 + $0x45e8] sm:$0xff] }
 0x4eb   :  { %5300 = vmatpush2.msra.mxu1 %v2377_v24  ;;  %5230 = vmatprep.subr.mxu0 %v2180_v33  ;;  %v3484_v24 = vadd.f32 %v3483_v47, %v3413_v29  ;;  %v2329_v33 = vld [vmem:[#allocation2 + $0x45e0] sm:$0xff]  ;;  %v2323_v47 = vld [vmem:[#allocation2 + $0x45b0] sm:$0xff] }
 0x4ec   :  { %5301 = vmatprep.subr.mxu1 %v2372_v34  ;;  %5231 = vmatpush2.msra.mxu0 %v2179_v38  ;;  %v2772_v34 = vadd.f32 %v6318_v43, %v6316_v49  ;;  %v6360_v38 = vld [vmem:[#allocation5] sm:$0x3f]  ;;  %v2126_v49 = vld [vmem:[#allocation2 + $0x3f88] sm:$0xff] }
 0x4ed   :  { %5302 = vmatpush2.msra.mxu1 %v2371_v39  ;;  %5232 = vmatprep.subr.mxu0 %v2174_v41  ;;  %v3767_v39 = vpop.f32.mrf.mxu1  ;;  %v2132_v41 = vld [vmem:[#allocation2 + $0x3fb8] sm:$0xff]  ;;  %v3555_v45 = vadd.f32 %v3554_v55, %v3484_v24  ;;  %v2318_v43 = vld [vmem:[#allocation2 + $0x4588] sm:$0xff] }
 0x4ee   :  { %5303 = vmatprep.subr.mxu1 %v2366_v44  ;;  %5233 = vmatpush2.msra.mxu0 %v2173_v46  ;;  %v2324_v44 = vld [vmem:[#allocation2 + $0x45b8] sm:$0xff]  ;;  %v5412_v46 = vrot.slane %v6360_v38, %v5411_v32  ;;  %v6366_v55 = vld [vmem:[#allocation7] sm:$0x3f] }
 0x4ef   :  { %5304 = vmatpush2.msra.mxu1 %v2365_v23  ;;  %5234 = vmatprep.subr.mxu0 %v2168_v9  ;;  %v2131_v23 = vld [vmem:[#allocation2 + $0x3fb0] sm:$0xff]  ;;  %v2843_v9 = vadd.f32 %v6322_v61, %v2772_v34  ;;  %v6364_v50 = vpop.f32.mrf.mxu1  ;;  %v2485_v34 = vld [vmem:[#allocation2 + $0x4ac0] sm:$0xff] }
 0x4f0   :  { %5305 = vmatprep.subr.mxu1 %v2360_v28  ;;  %5235 = vmatpush2.msra.mxu0 %v2167_v15  ;;  %v3838_v28 = vpop.f32.mrf.mxu0  ;;  %v2125_v15 = vld [vmem:[#allocation2 + $0x3f80] sm:$0xff]  ;;  %v5436_v61 = vmul.f32 %v5412_v46, %v3555_v45 }
 0x4f1   :  { %5306 = vmatpush2.msra.mxu1 %v2359_v53  ;;  %5236 = vmatprep.subr.mxu0 %v2162_v58  ;;  %v2317_v53 = vld [vmem:[#allocation2 + $0x4580] sm:$0xff]  ;;  %v2914_v8 = vadd.f32 %v6324_v62, %v2843_v9 }
 0x4f2   :  { %5307 = vmatprep.subr.mxu1 %v2354_v57  ;;  %5237 = vmatpush2.msra.mxu0 %v2161_v59  ;;  %v6368_v58 = vpop.f32.mrf.mxu0  ;;  %v2120_v57 = vld [vmem:[#allocation2 + $0x3f58] sm:$0xff] }
 0x4f3   :  { %5308 = vmatpush2.msra.mxu1 %v2353_v60  ;;  %5238 = vmatprep.subr.mxu0 %v2156_v63  ;;  %v2312_v59 = vld [vmem:[#allocation2 + $0x4558] sm:$0xff]  ;;  %v2119_v60 = vld [vmem:[#allocation2 + $0x3f50] sm:$0xff]  ;;  %v2985_v29 = vadd.f32 %v6326_v7, %v2914_v8  ;;  %v5496_v8 = vld [vmem:[#allocation8 + $0x58] sm:$0xff] }
 0x4f4   :  { %5309 = vmatprep.subr.mxu1 %v2348_v0  ;;  %5239 = vmatpush2.msra.mxu0 %v2155_v2  ;;  %v2311_v63 = vld [vmem:[#allocation2 + $0x4550] sm:$0xff]  ;;  %v5450_v0 = vrot.slane %v6366_v55, %v5411_v32  ;;  %v3909_v2 = vpop.f32.mrf.mxu1 }
 0x4f5   :  { %5310 = vmatpush2.msra.mxu1 %v2347_v3  ;;  %5240 = vmatprep.subr.mxu0 %v2150_v10  ;;  %v2114_v3 = vld [vmem:[#allocation2 + $0x3f28] sm:$0xff]  ;;  %v3056_v24 = vadd.f32 %v6328_v25, %v2985_v29  ;;  %v5499_v25 = vld [vmem:[#allocation8 + $0x70] sm:$0xff] }
 0x4f6   :  { %5311 = vmatprep.subr.mxu1 %v2342_v4  ;;  %5241 = vmatpush2.msra.mxu0 %v2149_v1  ;;  %v2306_v10 = vld [vmem:[#allocation2 + $0x4528] sm:$0xff]  ;;  %v2113_v4 = vld [vmem:[#allocation2 + $0x3f20] sm:$0xff]  ;;  %v3980_v1 = vpop.f32.mrf.mxu0  ;;  %v5474_v62 = vadd.f32 %v5450_v0, %v5436_v61  ;;  %v2467_v61 = vld [vmem:[#allocation2 + $0x4a30] sm:$0xff] }
 0x4f7   :  { %5312 = vmatpush2.msra.mxu1 %v2341_v21  ;;  %5242 = vmatprep.subr.mxu0 %v2144_v12  ;;  %v6373_v21 = vpop.f32.mrf.mxu1  ;;  %v2305_v12 = vld [vmem:[#allocation2 + $0x4520] sm:$0xff] }
 0x4f8   :  { %5313 = vmatprep.subr.mxu1 %v2336_v13  ;;  %5243 = vmatpush2.msra.mxu0 %v2143_v18  ;;  %v3697_v13 = vadd.f32 %v6351_v6, %v6349_v26  ;;  %v6377_v32 = vpop.f32.mrf.mxu0  ;;  %v2492_v18 = vld [vmem:[#allocation2 + $0x4af8] sm:$0xff]  ;;  %v2486_v26 = vld [vmem:[#allocation2 + $0x4ac8] sm:$0xff] }
 0x4f9   :  { %5314 = vmatpush2.msra.mxu1 %v2335_v19  ;;  %5244 = vmatprep.subr.mxu0 %v2138_v35  ;;  %v5516_v19 = vld [vmem:[#allocation8 + $0xf8] sm:$0xff]  ;;  %v2491_v35 = vld [vmem:[#allocation2 + $0x4af0] sm:$0xff]  ;;  %v5495_v29 = vld [vmem:[#allocation8 + $0x50] sm:$0xff] }
 0x4fa   :  { %5315 = vmatprep.subr.mxu1 %v2330_v22  ;;  %5245 = vmatpush2.msra.mxu0 %v2137_v30  ;;  %v3768_v7 = vadd.f32 %v3767_v39, %v3697_v13  ;;  %v5500_v22 = vld [vmem:[#allocation8 + $0x78] sm:$0xff]  ;;  %v4051_v30 = vpop.f32.mrf.mxu1  ;;  %v3127_v39 = vadd.f32 %v6330_v37, %v3056_v24  ;;  %v5513_v37 = vld [vmem:[#allocation8 + $0xe0] sm:$0xff] }
 0x4fb   :  { %5316 = vmatpush2.msra.mxu1 %v2329_v33  ;;  %5246 = vmatprep.subr.mxu0 %v2132_v41  ;;  %v5515_v33 = vld [vmem:[#allocation8 + $0xf0] sm:$0xff]  ;;  %v4122_v41 = vpop.f32.mrf.mxu0  ;;  %v2455_v13 = vld [vmem:[#allocation2 + $0x49d0] sm:$0xff] }
 0x4fc   :  { %5317 = vmatprep.subr.mxu1 %v2324_v44  ;;  %5247 = vmatpush2.msra.mxu0 %v2131_v23  ;;  %v3839_v6 = vadd.f32 %v3838_v28, %v3768_v7  ;;  %v2480_v44 = vld [vmem:[#allocation2 + $0x4a98] sm:$0xff]  ;;  %v2473_v28 = vld [vmem:[#allocation2 + $0x4a60] sm:$0xff]  ;;  %v2450_v7 = vld [vmem:[#allocation2 + $0x49a8] sm:$0xff] }
 0x4fd   :  { %5318 = vmatpush2.msra.mxu1 %v2323_v47  ;;  %5248 = vmatprep.subr.mxu0 %v2126_v49  ;;  %v6387_v46 = vpop.f32.mrf.mxu0  ;;  %v5498_v23 = vld [vmem:[#allocation8 + $0x68] sm:$0xff]  ;;  %v2474_v47 = vld [vmem:[#allocation2 + $0x4a68] sm:$0xff]  ;;  %v3198_v49 = vadd.f32 %v6333_v51, %v3127_v39  ;;  %v2449_v24 = vld [vmem:[#allocation2 + $0x49a0] sm:$0xff] }
 0x4fe   :  { %5319 = vmatprep.subr.mxu1 %v2318_v43  ;;  %5249 = vmatpush2.msra.mxu0 %v2125_v15  ;;  %v3910_v45 = vadd.f32 %v3909_v2, %v3839_v6  ;;  %v5497_v15 = vld [vmem:[#allocation8 + $0x60] sm:$0xff] }
 0x4ff   :  { %5320 = vmatpush2.msra.mxu1 %v2317_v53  ;;  %5250 = vmatprep.subr.mxu0 %v2120_v57  ;;  %v2468_v53 = vld [vmem:[#allocation2 + $0x4a38] sm:$0xff]  ;;  %v2462_v2 = vld [vmem:[#allocation2 + $0x4a08] sm:$0xff]  ;;  %v2443_v39 = vld [vmem:[#allocation2 + $0x4970] sm:$0xff] }
 0x500   :  { %5321 = vmatprep.subr.mxu1 %v2312_v59  ;;  %5251 = vmatpush2.msra.mxu0 %v2119_v60  ;;  %v3981_v9 = vadd.f32 %v3980_v1, %v3910_v45  ;;  %v5512_v59 = vld [vmem:[#allocation8 + $0xd8] sm:$0xff]  ;;  %v3269_v60 = vadd.f32 %v6335_v56, %v3198_v49  ;;  %v2456_v1 = vld [vmem:[#allocation2 + $0x49d8] sm:$0xff]  ;;  %v2431_v49 = vld [vmem:[#allocation2 + $0x4910] sm:$0xff] }
 0x501   :  { %5322 = vmatpush2.msra.mxu1 %v2311_v63  ;;  %5252 = vmatprep.subr.mxu0 %v2114_v3  ;;  %v4264_v63 = vpop.f32.mrf.mxu0  ;;  %v5511_v3 = vld [vmem:[#allocation8 + $0xd0] sm:$0xff]  ;;  %v5510_v56 = vld [vmem:[#allocation8 + $0xc8] sm:$0xff] }
 0x502   :  { %5323 = vmatprep.subr.mxu1 %v2306_v10  ;;  %5253 = vmatpush2.msra.mxu0 %v2113_v4  ;;  %v4052_v57 = vadd.f32 %v4051_v30, %v3981_v9  ;;  %v2461_v10 = vld [vmem:[#allocation2 + $0x4a00] sm:$0xff] }
 0x503   :  { %5254 = vmatprep.mubr.f32.mxu0 %v6254_v36  ;;  %5324 = vmatpush2.msra.mxu1 %v2305_v12  ;;  %v5480_v36 = vmax.f32 %v5474_v62, 0.0  ;;  %v6393_v4 = vpop.f32.mrf.mxu0  ;;  %v3340_v62 = vadd.f32 %v6337_v16, %v3269_v60  ;;  %v5491_v9 = vld [vmem:[#allocation8 + $0x30] sm:$0xff] }
 0x504   :  { %5325 = vmatprep.mubr.f32.mxu1 %v6258_v52  ;;  %5255 = vmatmul.mubr.f32.vlgmr.msra.gmra.mxu0 %v6247_v17  ;;  %v6385_v52 = vpop.f32.mrf.mxu1  ;;  %v5514_v17 = vld [vmem:[#allocation8 + $0xe8] sm:$0xff]  ;;  %v4123_v51 = vadd.f32 %v4122_v41, %v4052_v57  ;;  %v5407_v41 = vsub.s32 0, %v6133_v42  ;;  %v2426_v57 = vld [vmem:[#allocation2 + $0x48e8] sm:$0xff]  ;;  %v2425_v60 = vld [vmem:[#allocation2 + $0x48e0] sm:$0xff] }
 0x505   :  { %5326 = vmatmul.mubr.f32.vlgmr.msra.gmra.mxu1 %v6250_v27  ;;  %5332 = vmatprep.subr.mxu0 %v2492_v18  ;;  %v2479_v27 = vld [vmem:[#allocation2 + $0x4a90] sm:$0xff]  ;;  %v3411_v30 = vadd.f32 %v6339_v5, %v3340_v62  ;;  %v5419_v5 = vsub.s32 3, %v6133_v42  ;;  %v5487_v62 = vld [vmem:[#allocation8 + $0x10] sm:$0xff] }
 0x506   :  { %5818 = vmatprep.subr.mxu1 %v5516_v19  ;;  %5333 = vmatpush1.msra.mxu0 %v2491_v35  ;;  %v4193_v43 = vpop.f32.mrf.mxu1  ;;  %v5494_v19 = vld [vmem:[#allocation8 + $0x48] sm:$0xff] }
 0x507   :  { %5819 = vmatpush3.msra.mxu1 %v5500_v22  ;;  %5652 = vmatprep.mubr.f32.mxu1 %v5480_v36  ;;  %v4194_v12 = vadd.f32 %v4193_v43, %v4123_v51  ;;  %v5509_v22 = vld [vmem:[#allocation8 + $0xc0] sm:$0xff] }
 0x508   :  { %5334 = vmatprep.subr.mxu0 %v2486_v26  ;;  %5820 = vmatprep.subr.mxu1 %v5515_v33  ;;  %v6391_v0 = vpop.f32.mrf.mxu1  ;;  %v4406_v26 = vpop.f32.mrf.mxu0  ;;  %v5493_v36 = vld [vmem:[#allocation8 + $0x40] sm:$0xff]  ;;  %v2444_v33 = vld [vmem:[#allocation2 + $0x4978] sm:$0xff] }
 0x509   :  { %5335 = vmatpush1.msra.mxu0 %v2485_v34  ;;  %5821 = vmatpush3.msra.mxu1 %v5499_v25  ;;  %v4265_v35 = vadd.f32 %v4264_v63, %v4194_v12  ;;  %v5508_v34 = vld [vmem:[#allocation8 + $0xb8] sm:$0xff]  ;;  %v5489_v63 = vld [vmem:[#allocation8 + $0x20] sm:$0xff]  ;;  %v5503_v12 = vld [vmem:[#allocation8 + $0x90] sm:$0xff] }
 0x50a   :  { %5336 = vmatprep.subr.mxu0 %v2480_v44  ;;  %5822 = vmatprep.subr.mxu1 %v5514_v17  ;;  %v4335_v18 = vpop.f32.mrf.mxu1  ;;  %v5492_v25 = vld [vmem:[#allocation8 + $0x38] sm:$0xff]  ;;  %v5507_v17 = vld [vmem:[#allocation8 + $0xb0] sm:$0xff] }
 0x50b   :  { %5337 = vmatpush1.msra.mxu0 %v2479_v27  ;;  %5823 = vmatpush3.msra.mxu1 %v5498_v23  ;;  %v4336_v16 = vadd.f32 %v4335_v18, %v4265_v35  ;;  %v2438_v44 = vld [vmem:[#allocation2 + $0x4948] sm:$0xff]  ;;  %v2437_v27 = vld [vmem:[#allocation2 + $0x4940] sm:$0xff]  ;;  %v3482_v23 = vadd.f32 %v6341_v31, %v3411_v30  ;;  %v5420_v31 = vrot.slane %v6360_v38, %v5419_v5  ;;  %v2408_v18 = vld [vmem:[#allocation2 + $0x4858] sm:$0xff] }
 0x50c   :  { %5338 = vmatprep.subr.mxu0 %v2474_v47  ;;  %5824 = vmatprep.subr.mxu1 %v5513_v37  ;;  %v6397_v6 = vpop.f32.mrf.mxu1  ;;  %v2432_v37 = vld [vmem:[#allocation2 + $0x4918] sm:$0xff]  ;;  %v3695_v30 = vadd.f32 %v6347_v48, %v6345_v54  ;;  %v5532_v54 = vld [vmem:[#allocation8 + $0x178] sm:$0xff] }
 0x50d   :  { %5339 = vmatpush1.msra.mxu0 %v2473_v28  ;;  %5825 = vmatpush3.msra.mxu1 %v5497_v15  ;;  %v4407_v45 = vadd.f32 %v4406_v26, %v4336_v16  ;;  %v5506_v28 = vld [vmem:[#allocation8 + $0xa8] sm:$0xff]  ;;  %v3553_v43 = vadd.f32 %v6343_v40, %v3482_v23  ;;  %v5408_v15 = vrot.slane %v6360_v38, %v5407_v41  ;;  %v5504_v40 = vld [vmem:[#allocation8 + $0x98] sm:$0xff]  ;;  %v5501_v26 = vld [vmem:[#allocation8 + $0x80] sm:$0xff] }
 0x50e   :  { %5340 = vmatprep.subr.mxu0 %v2468_v53  ;;  %5826 = vmatprep.subr.mxu1 %v5512_v59  ;;  %v4477_v47 = vpop.f32.mrf.mxu1  ;;  %v5490_v53 = vld [vmem:[#allocation8 + $0x28] sm:$0xff]  ;;  %v5485_v16 = vld [vmem:[#allocation8] sm:$0xff] }
 0x50f   :  { %5341 = vmatpush1.msra.mxu0 %v2467_v61  ;;  %5827 = vmatpush3.msra.mxu1 %v5496_v8  ;;  %v4478_v59 = vadd.f32 %v4477_v47, %v4407_v45  ;;  %v5505_v61 = vld [vmem:[#allocation8 + $0xa0] sm:$0xff]  ;;  %v2420_v8 = vld [vmem:[#allocation2 + $0x48b8] sm:$0xff]  ;;  %v5435_v51 = vmul.f32 %v5408_v15, %v3553_v43 }
 0x510   :  { %5342 = vmatprep.subr.mxu0 %v2462_v2  ;;  %5828 = vmatprep.subr.mxu1 %v5511_v3  ;;  %v2419_v2 = vld [vmem:[#allocation2 + $0x48b0] sm:$0xff]  ;;  %v5446_v3 = vrot.slane %v6366_v55, %v5407_v41  ;;  %v5548_v41 = vld [vmem:[#allocation8 + $0x1f8] sm:$0xff] }
 0x511   :  { %5343 = vmatpush1.msra.mxu0 %v2461_v10  ;;  %5829 = vmatpush3.msra.mxu1 %v5495_v29  ;;  %v5488_v10 = vld [vmem:[#allocation8 + $0x18] sm:$0xff]  ;;  %v5529_v47 = vld [vmem:[#allocation8 + $0x160] sm:$0xff]  ;;  %v5542_v43 = vld [vmem:[#allocation8 + $0x1c8] sm:$0xff] }
 0x512   :  { %5344 = vmatprep.subr.mxu0 %v2456_v1  ;;  %5830 = vmatprep.subr.mxu1 %v5510_v56  ;;  %v2414_v29 = vld [vmem:[#allocation2 + $0x4888] sm:$0xff]  ;;  %v5438_v1 = vmul.f32 %v5420_v31, %v4478_v59  ;;  %v2413_v56 = vld [vmem:[#allocation2 + $0x4880] sm:$0xff]  ;;  %v5473_v35 = vadd.f32 %v5446_v3, %v5435_v51 }
 0x513   :  { %5345 = vmatpush1.msra.mxu0 %v2455_v13  ;;  %5831 = vmatpush3.msra.mxu1 %v5494_v19  ;;  %v5458_v13 = vrot.slane %v6366_v55, %v5419_v5  ;;  %v5502_v19 = vld [vmem:[#allocation8 + $0x88] sm:$0xff]  ;;  %v5531_v5 = vld [vmem:[#allocation8 + $0x170] sm:$0xff]  ;;  %v5540_v59 = vld [vmem:[#allocation8 + $0x1b8] sm:$0xff] }
 0x514   :  { %5346 = vmatprep.subr.mxu0 %v2450_v7  ;;  %5832 = vmatprep.subr.mxu1 %v5509_v22  ;;  %v2407_v7 = vld [vmem:[#allocation2 + $0x4850] sm:$0xff]  ;;  %v5536_v51 = vld [vmem:[#allocation8 + $0x198] sm:$0xff] }
 0x515   :  { %5347 = vmatpush1.msra.mxu0 %v2449_v24  ;;  %5833 = vmatpush3.msra.mxu1 %v5493_v36  ;;  %v5486_v22 = vld [vmem:[#allocation8 + $0x8] sm:$0xff]  ;;  %v2402_v24 = vld [vmem:[#allocation2 + $0x4828] sm:$0xff]  ;;  %v2401_v36 = vld [vmem:[#allocation2 + $0x4820] sm:$0xff] }
 0x516   :  { %5348 = vmatprep.subr.mxu0 %v2444_v33  ;;  %5834 = vmatprep.subr.mxu1 %v5508_v34  ;;  %v5476_v33 = vadd.f32 %v5458_v13, %v5438_v1  ;;  %v3766_v34 = vadd.f32 %v6353_v11, %v3695_v30  ;;  %v5547_v11 = vld [vmem:[#allocation8 + $0x1f0] sm:$0xff]  ;;  %v5518_v13 = vld [vmem:[#allocation8 + $0x108] sm:$0xff] }
 0x517   :  { %5349 = vmatpush1.msra.mxu0 %v2443_v39  ;;  %5835 = vmatpush3.msra.mxu1 %v5492_v25  ;;  %v5479_v39 = vmax.f32 %v5473_v35, 0.0  ;;  %v5535_v1 = vld [vmem:[#allocation8 + $0x190] sm:$0xff]  ;;  %v5564_v35 = vld [vmem:[#allocation8 + $0x278] sm:$0xff]  ;;  %v5578_v30 = vld [vmem:[#allocation8 + $0x2e8] sm:$0xff] }
 0x518   :  { %5350 = vmatprep.subr.mxu0 %v2438_v44  ;;  %5836 = vmatprep.subr.mxu1 %v5507_v17  ;;  %v3837_v25 = vadd.f32 %v6356_v20, %v3766_v34  ;;  %v5482_v48 = vmax.f32 %v5476_v33, 0.0  ;;  %v5942_v44 = vld.sshfl [vmem:[%s6436_s0 + $0x30] sm:$0x3 pattern:$0x76325410]  ;;  %v5546_v17 = vld [vmem:[#allocation8 + $0x1e8] sm:$0xff] }
 0x519   :  { %5351 = vmatpush1.msra.mxu0 %v2437_v27  ;;  %5837 = vmatpush3.msra.mxu1 %v5491_v9  ;;  %v5545_v27 = vld [vmem:[#allocation8 + $0x1e0] sm:$0xff]  ;;  %v5544_v9 = vld [vmem:[#allocation8 + $0x1d8] sm:$0xff]  ;;  %s6082_s0 = smov [#allocation11]  }
 0x51a   :  { %5352 = vmatprep.subr.mxu0 %v2432_v37  ;;  %5838 = vmatprep.subr.mxu1 %v5506_v28  ;;  %v3908_v45 = vadd.f32 %v6364_v50, %v3837_v25  ;;  %v5528_v50 = vld [vmem:[#allocation8 + $0x158] sm:$0xff]  ;;  %v5543_v28 = vld [vmem:[#allocation8 + $0x1d0] sm:$0xff]  ;;  %v5561_v33 = vld [vmem:[#allocation8 + $0x260] sm:$0xff]  ;;  %s5805_s15 = sshll.u32 %s6082_s0, 4  ;;  %s5806_s15 = int_to_ptr.vmem [resolvable:$true] %s5805_s15 }
 0x51b   :  { %5353 = vmatpush1.msra.mxu0 %v2431_v49  ;;  %5839 = vmatpush3.msra.mxu1 %v5490_v53  ;;  %v5541_v53 = vld [vmem:[#allocation8 + $0x1c0] sm:$0xff]  ;;  %v5560_v34 = vld [vmem:[#allocation8 + $0x258] sm:$0xff]  ;;  %v5574_v25 = vld [vmem:[#allocation8 + $0x2c8] sm:$0xff]  ;;  %s6043_s16 = scalar_lea.vmem %s5806_s15, 32  ;;  %p6048_p12 = scmp.lt.s32.totalorder %s5806_s15, %s5806_s15 }
 0x51c   :  { %5354 = vmatprep.subr.mxu0 %v2426_v57  ;;  %5840 = vmatprep.subr.mxu1 %v5505_v61  ;;  %v3979_v20 = vadd.f32 %v6368_v58, %v3908_v45  ;;  %v5527_v58 = vld [vmem:[#allocation8 + $0x150] sm:$0xff]  ;;  %v5524_v61 = vld [vmem:[#allocation8 + $0x138] sm:$0xff]  ;;  %p6044_p11 = scmp.ne.s32.totalorder %s5806_s15, %s6043_s16  ;;  %p6049_p13 = scmp.lt.s32.totalorder %s6043_s16, %s6043_s16 }
 0x51d   :  { %5355 = vmatpush1.msra.mxu0 %v2425_v60  ;;  %5841 = vmatpush3.msra.mxu1 %v5489_v63  ;;  %v5539_v60 = vld [vmem:[#allocation8 + $0x1b0] sm:$0xff]  ;;  %v5538_v63 = vld [vmem:[#allocation8 + $0x1a8] sm:$0xff]  ;;  %v5556_v45 = vld [vmem:[#allocation8 + $0x238] sm:$0xff] }
 0x51e   :  { %5356 = vmatprep.subr.mxu0 %v2420_v8  ;;  %5842 = vmatprep.subr.mxu1 %v5504_v40  ;;  %v4050_v23 = vadd.f32 %v6373_v21, %v3979_v20  ;;  %v5526_v21 = vld [vmem:[#allocation8 + $0x148] sm:$0xff]  ;;  %p6050_p0 = por %p6049_p13, %p6048_p12 }
 0x51f   :  { %5357 = vmatpush1.msra.mxu0 %v2419_v2  ;;  %5843 = vmatpush3.msra.mxu1 %v5488_v10  ;;  %v5522_v40 = vld [vmem:[#allocation8 + $0x128] sm:$0xff]  ;;  %v5537_v2 = vld [vmem:[#allocation8 + $0x1a0] sm:$0xff] }
 0x520   :  { %5358 = vmatprep.subr.mxu0 %v2414_v29  ;;  %5844 = vmatprep.subr.mxu1 %v5503_v12  ;;  %v4121_v37 = vadd.f32 %v6377_v32, %v4050_v23  ;;  %v5525_v32 = vld [vmem:[#allocation8 + $0x140] sm:$0xff]  ;;  %v5520_v29 = vld [vmem:[#allocation8 + $0x118] sm:$0xff]  ;;  %v5519_v12 = vld [vmem:[#allocation8 + $0x110] sm:$0xff]  ;;  %p6051_p1 = pnand %p6050_p0, %p6044_p11 }
 0x521   :  { %5359 = vmatpush1.msra.mxu0 %v2413_v56  ;;  %5845 = vmatpush3.msra.mxu1 %v5487_v62  ;;  %v5533_v62 = vld [vmem:[#allocation8 + $0x180] sm:$0xff]  ;;  %v5570_v20 = vld [vmem:[#allocation8 + $0x2a8] sm:$0xff] }
 0x522   :  { %5360 = vmatprep.subr.mxu0 %v2408_v18  ;;  %5846 = vmatprep.subr.mxu1 %v5502_v19  ;;  %v4192_v49 = vadd.f32 %v6385_v52, %v4121_v37  ;;  %v5415_v52 = vsub.s32 2, %v6133_v42  ;;  %v5517_v18 = vld [vmem:[#allocation8 + $0x100] sm:$0xff]  ;;  %v5567_v37 = vld [vmem:[#allocation8 + $0x290] sm:$0xff] }
 0x523   :  { %5361 = vmatpush1.msra.mxu0 %v2407_v7  ;;  %5847 = vmatpush3.msra.mxu1 %v5486_v22  ;;  %v5580_v7 = vld [vmem:[#allocation8 + $0x2f8] sm:$0xff]  ;;  %v5579_v22 = vld [vmem:[#allocation8 + $0x2f0] sm:$0xff]  ;;  %v5553_v23 = vld [vmem:[#allocation8 + $0x220] sm:$0xff] }
 0x524   :  { %5362 = vmatprep.subr.mxu0 %v2402_v24  ;;  %5848 = vmatprep.subr.mxu1 %v5501_v26  ;;  %v4263_v15 = vadd.f32 %v6387_v46, %v4192_v49  ;;  %v5523_v46 = vld [vmem:[#allocation8 + $0x130] sm:$0xff]  ;;  %v5454_v10 = vrot.slane %v6366_v55, %v5415_v52  ;;  %v5562_v26 = vld [vmem:[#allocation8 + $0x268] sm:$0xff] }
 0x525   :  { %5363 = vmatpush1.msra.mxu0 %v2401_v36  ;;  %5396 = vmatprep.mubr.f32.mxu0 %v6081_v14  ;;  %v5530_v14 = vld [vmem:[#allocation8 + $0x168] sm:$0xff]  ;;  %v5563_v24 = vld [vmem:[#allocation8 + $0x270] sm:$0xff]  ;;  %v5577_v36 = vld [vmem:[#allocation8 + $0x2e0] sm:$0xff] }
 0x526   :  { %5849 = vmatpush3.msra.mxu1 %v5485_v16  ;;  %5397 = vmatmul.mubr.f32.vlgmr.msra.gmra.mxu0 %v5942_v44  ;;  %v4334_v57 = vadd.f32 %v6391_v0, %v4263_v15  ;;  %v5416_v0 = vrot.slane %v6360_v38, %v5415_v52  ;;  %v5576_v16 = vld [vmem:[#allocation8 + $0x2d8] sm:$0xff]  ;;  %v5557_v44 = vld [vmem:[#allocation8 + $0x240] sm:$0xff]  ;;  %v5550_v49 = vld [vmem:[#allocation8 + $0x208] sm:$0xff]  ;;  %v4546_v15 = vpop.f32.mrf.mxu0 }
 0x527   :  { %5653 = vmatmul.mubr.f32.vlgmr.msra.gmra.mxu1 %v5479_v39  ;;  %5853 = vmatprep.subr.mxu0 %v5548_v41  ;;  %v5575_v39 = vld [vmem:[#allocation8 + $0x2d0] sm:$0xff] }
 0x528   :  { %5722 = vmatprep.mubr.f32.mxu0 %v5482_v48  ;;  %5854 = vmatpush3.msra.mxu0 %v5532_v54  ;;  %v4405_v31 = vadd.f32 %v6393_v4, %v4334_v57  ;;  %v5521_v4 = vld [vmem:[#allocation8 + $0x120] sm:$0xff]  ;;  %v5559_v41 = vld [vmem:[#allocation8 + $0x250] sm:$0xff]  ;;  %v5558_v54 = vld [vmem:[#allocation8 + $0x248] sm:$0xff] }
 0x529   :  { %5855 = vmatprep.subr.mxu0 %v5547_v11  ;;  %5888 = vmatprep.subr.mxu1 %v5580_v7  ;;  %v5573_v48 = vld [vmem:[#allocation8 + $0x2c0] sm:$0xff]  ;;  %v5572_v11 = vld [vmem:[#allocation8 + $0x2b8] sm:$0xff] }
 0x52a   :  { %5856 = vmatpush3.msra.mxu0 %v5531_v5  ;;  %v4476_v8 = vadd.f32 %v6397_v6, %v4405_v31  ;;  %v5534_v6 = vld [vmem:[#allocation8 + $0x188] sm:$0xff]  ;;  %5889 = vmatpush3.msra.mxu1 %v5564_v35  ;;  %v5571_v5 = vld [vmem:[#allocation8 + $0x2b0] sm:$0xff] }
 0x52b   :  { %5857 = vmatprep.subr.mxu0 %v5546_v17  ;;  %5890 = vmatprep.subr.mxu1 %v5579_v22  ;;  %v5555_v17 = vld [vmem:[#allocation8 + $0x230] sm:$0xff] }
 0x52c   :  { %5858 = vmatpush3.msra.mxu0 %v5530_v14  ;;  %v5437_v3 = vmul.f32 %v5416_v0, %v4476_v8  ;;  %5891 = vmatpush3.msra.mxu1 %v5563_v24  ;;  %v5554_v14 = vld [vmem:[#allocation8 + $0x228] sm:$0xff] }
 0x52d   :  { %5859 = vmatprep.subr.mxu0 %v5545_v27  ;;  %5892 = vmatprep.subr.mxu1 %v5578_v30  ;;  %v5569_v27 = vld [vmem:[#allocation8 + $0x2a0] sm:$0xff] }
 0x52e   :  { %5860 = vmatpush3.msra.mxu0 %v5529_v47  ;;  %v5475_v56 = vadd.f32 %v5454_v10, %v5437_v3  ;;  %5893 = vmatpush3.msra.mxu1 %v5562_v26  ;;  %v5568_v47 = vld [vmem:[#allocation8 + $0x298] sm:$0xff] }
 0x52f   :  { %5861 = vmatprep.subr.mxu0 %v5544_v9  ;;  %5894 = vmatprep.subr.mxu1 %v5577_v36  ;;  %v5552_v9 = vld [vmem:[#allocation8 + $0x218] sm:$0xff] }
 0x530   :  { %5862 = vmatpush3.msra.mxu0 %v5528_v50  ;;  %v5481_v19 = vmax.f32 %v5475_v56, 0.0  ;;  %5895 = vmatpush3.msra.mxu1 %v5561_v33  ;;  %v5551_v50 = vld [vmem:[#allocation8 + $0x210] sm:$0xff] }
 0x531   :  { %5863 = vmatprep.subr.mxu0 %v5543_v28  ;;  %5896 = vmatprep.subr.mxu1 %v5576_v16  ;;  %v5566_v28 = vld [vmem:[#allocation8 + $0x288] sm:$0xff] }
 0x532   :  { %5864 = vmatpush3.msra.mxu0 %v5527_v58  ;;  %5897 = vmatpush3.msra.mxu1 %v5560_v34  ;;  %v5565_v58 = vld [vmem:[#allocation8 + $0x280] sm:$0xff] }
 0x533   :  { %5865 = vmatprep.subr.mxu0 %v5542_v43  ;;  %5898 = vmatprep.subr.mxu1 %v5575_v39  ;;  %v5549_v43 = vld [vmem:[#allocation8 + $0x200] sm:$0xff] }
 0x534   :  { %5866 = vmatpush3.msra.mxu0 %v5526_v21  ;;  %5899 = vmatpush3.msra.mxu1 %v5559_v41  ;;  %v4617_v21 = vpop.f32.mrf.mxu1 }
 0x535   :  { %5867 = vmatprep.subr.mxu0 %v5541_v53  ;;  %5900 = vmatprep.subr.mxu1 %v5574_v25  ;;  %v4548_v53 = vpop.f32.mrf.mxu0 }
 0x536   :  { %5868 = vmatpush3.msra.mxu0 %v5525_v32  ;;  %5901 = vmatpush3.msra.mxu1 %v5558_v54  ;;  %v4619_v32 = vpop.f32.mrf.mxu1  ;;  %v5423_v54 = vsub.s32 4, %v6133_v42 }
 0x537   :  { %5869 = vmatprep.subr.mxu0 %v5540_v59  ;;  %5902 = vmatprep.subr.mxu1 %v5573_v48  ;;  %v4688_v57 = vpop.f32.mrf.mxu0  ;;  %v4618_v59 = vadd.f32 %v4617_v21, %v4546_v15 }
 0x538   :  { %5870 = vmatpush3.msra.mxu0 %v5524_v61  ;;  %5903 = vmatpush3.msra.mxu1 %v5557_v44  ;;  %v4759_v52 = vpop.f32.mrf.mxu1  ;;  %v4620_v61 = vadd.f32 %v4619_v32, %v4548_v53  ;;  %v5427_v44 = vsub.s32 5, %v6133_v42 }
 0x539   :  { %5871 = vmatprep.subr.mxu0 %v5539_v60  ;;  %5904 = vmatprep.subr.mxu1 %v5572_v11  ;;  %v4690_v31 = vpop.f32.mrf.mxu0  ;;  %v4689_v60 = vadd.f32 %v4688_v57, %v4618_v59 }
 0x53a   :  { %5872 = vmatpush3.msra.mxu0 %v5523_v46  ;;  %5905 = vmatpush3.msra.mxu1 %v5556_v45  ;;  %v4761_v8 = vpop.f32.mrf.mxu1 }
 0x53b   :  { %5873 = vmatprep.subr.mxu0 %v5538_v63  ;;  %5906 = vmatprep.subr.mxu1 %v5571_v5  ;;  %v4830_v46 = vpop.f32.mrf.mxu0  ;;  %v4691_v63 = vadd.f32 %v4690_v31, %v4620_v61  ;;  %v4760_v0 = vadd.f32 %v4759_v52, %v4689_v60  ;;  %v5424_v5 = vrot.slane %v6360_v38, %v5423_v54 }
 0x53c   :  { %5874 = vmatpush3.msra.mxu0 %v5522_v40  ;;  %5907 = vmatpush3.msra.mxu1 %v5555_v17 }
 0x53d   :  { %5875 = vmatprep.subr.mxu0 %v5537_v2  ;;  %5908 = vmatprep.subr.mxu1 %v5570_v20  ;;  %v4832_v40 = vpop.f32.mrf.mxu0  ;;  %v4901_v2 = vpop.f32.mrf.mxu1 }
 0x53e   :  { %5876 = vmatpush3.msra.mxu0 %v5521_v4  ;;  %5909 = vmatpush3.msra.mxu1 %v5554_v14  ;;  %v4762_v4 = vadd.f32 %v4761_v8, %v4691_v63 }
 0x53f   :  { %5877 = vmatprep.subr.mxu0 %v5536_v51  ;;  %5910 = vmatprep.subr.mxu1 %v5569_v27  ;;  %v4831_v51 = vadd.f32 %v4830_v46, %v4760_v0  ;;  %v5428_v27 = vrot.slane %v6360_v38, %v5427_v44  ;;  %v5817_v38 = vld [vmem:[#allocation10] ss:$0 sm:$0xff] }
 0x540   :  { %5878 = vmatpush3.msra.mxu0 %v5520_v29  ;;  %5911 = vmatpush3.msra.mxu1 %v5553_v23  ;;  %v4972_v3 = vpop.f32.mrf.mxu0  ;;  %v4833_v10 = vadd.f32 %v4832_v40, %v4762_v4  ;;  %v4903_v29 = vpop.f32.mrf.mxu1  ;;  %v5462_v23 = vrot.slane %v6366_v55, %v5423_v54 }
 0x541   :  { %5879 = vmatprep.subr.mxu0 %v5535_v1  ;;  %5912 = vmatprep.subr.mxu1 %v5568_v47  ;;  %v4902_v1 = vadd.f32 %v4901_v2, %v4831_v51 }
 0x542   :  { %5880 = vmatpush3.msra.mxu0 %v5519_v12  ;;  %5913 = vmatpush3.msra.mxu1 %v5552_v9  ;;  %v4974_v12 = vpop.f32.mrf.mxu0  ;;  %v4904_v56 = vadd.f32 %v4903_v29, %v4833_v10 }
 0x543   :  { %5881 = vmatprep.subr.mxu0 %v5534_v6  ;;  %5914 = vmatprep.subr.mxu1 %v5567_v37  ;;  %v5043_v6 = vpop.f32.mrf.mxu1 }
 0x544   :  { %5882 = vmatpush3.msra.mxu0 %v5518_v13  ;;  %5915 = vmatpush3.msra.mxu1 %v5551_v50  ;;  %v4973_v13 = vadd.f32 %v4972_v3, %v4902_v1  ;;  %v5466_v50 = vrot.slane %v6366_v55, %v5427_v44 }
 0x545   :  { %5883 = vmatprep.subr.mxu0 %v5533_v62  ;;  %5916 = vmatprep.subr.mxu1 %v5566_v28 }
 0x546   :  { %5884 = vmatpush3.msra.mxu0 %v5517_v18  ;;  %5917 = vmatpush3.msra.mxu1 %v5550_v49  ;;  %v4975_v18 = vadd.f32 %v4974_v12, %v4904_v56  ;;  %v5044_v7 = vadd.f32 %v5043_v6, %v4973_v13 }
 0x547   :  { %5723 = vmatmul.mubr.f32.vlgmr.msra.gmra.mxu0 %v5481_v19  ;;  %5918 = vmatprep.subr.mxu1 %v5565_v58  ;;  %v5045_v19 = vpop.f32.mrf.mxu1 }
 0x548   :  { %5919 = vmatpush3.msra.mxu1 %v5549_v43  ;;  %v5046_v24 = vadd.f32 %v5045_v19, %v4975_v18 }
 0x582   :  { %v5114_v62 = vpop.f32.mrf.mxu0 }
 0x583   :  { %v5115_v30 = vadd.f32 %v5114_v62, %v5044_v7 }
 0x584   :  { %v5116_v35 = vpop.f32.mrf.mxu0  ;;  %v5185_v22 = vpop.f32.mrf.mxu1 }
 0x585   :  { %v5117_v36 = vadd.f32 %v5116_v35, %v5046_v24  ;;  %v5186_v16 = vadd.f32 %v5185_v22, %v5115_v30 }
 0x586   :  { %v5187_v33 = vpop.f32.mrf.mxu1 }
 0x587   :  { %v5188_v41 = vadd.f32 %v5187_v33, %v5117_v36 }
 0x5c4   :  { %v5256_v26 = vpop.f32.mrf.mxu0 }
 0x5c5   :  { %v5327_v39 = vpop.f32.mrf.mxu1  ;;  %v5257_v25 = vadd.f32 %v5256_v26, %v5186_v16 }
 0x5c6   :  { %v5258_v34 = vpop.f32.mrf.mxu0 }
 0x5c7   :  { %v5259_v48 = vadd.f32 %v5258_v34, %v5188_v41  ;;  %v5329_v11 = vpop.f32.mrf.mxu1  ;;  %v5328_v45 = vadd.f32 %v5327_v39, %v5257_v25 }
 0x5c9   :  { %v5330_v20 = vadd.f32 %v5329_v11, %v5259_v48 }
 0x5e6   :  { %v5398_v17 = vpop.f32.mrf.mxu0 }
 0x5e7   :  { %v5399_v14 = vadd.f32 %v5398_v17, %v5328_v45  ;;  %v5850_v15 = vpop.f32.mrf.mxu1 }
 0x5e8   :  { %v5400_v47 = vpop.f32.mrf.mxu0 }
 0x5e9   :  { %v5439_v9 = vmul.f32 %v5424_v5, %v5399_v14  ;;  %v5401_v37 = vadd.f32 %v5400_v47, %v5330_v20  ;;  %v5851_v53 = vpop.f32.mrf.mxu1 }
 0x5ea   :  { %v5852_v32 = vadd.f32 %v5851_v53, %v5850_v15 }
 0x5eb   :  { %v5440_v28 = vmul.f32 %v5428_v27, %v5401_v37  ;;  %v5477_v49 = vadd.f32 %v5462_v23, %v5439_v9 }
 0x5ec   :  { %v5655_v52 = vadd.f32 %v5852_v32, %v5817_v38 }
 0x5ed   :  { %v5478_v58 = vadd.f32 %v5466_v50, %v5440_v28  ;;  %v5483_v43 = vmax.f32 %v5477_v49, 0.0 }
 0x5ef   :  { %v5484_v42 = vmax.f32 %v5478_v58, 0.0 }
 0x5f1   :  { %5792 = vmatprep.mubr.f32.mxu1 %v5484_v42 }
 0x5f2   :  { %5793 = vmatmul.mubr.f32.vlgmr.msra.gmra.mxu1 %v5483_v43 }
 0x607   :  { %v5885_v21 = vpop.f32.mrf.mxu0 }
 0x609   :  { %v5886_v57 = vpop.f32.mrf.mxu0 }
 0x60a   :  { %v5887_v59 = vadd.f32 %v5886_v57, %v5885_v21 }
 0x60c   :  { %v5725_v55 = vadd.f32 %v5887_v59, %v5655_v52 }
 0x6b2   :  { %v5920_v31 = vpop.f32.mrf.mxu1 }
 0x6b4   :  { %v5921_v61 = vpop.f32.mrf.mxu1 }
 0x6b5   :  { %v5922_v60 = vadd.f32 %v5921_v61, %v5920_v31 }
 0x6b7   :  { %v5795_v46 = vadd.f32 %v5922_v60, %v5725_v55 }
 0x6b9   :  { %5798 = vst [vmem:[#allocation11] sm:$0x3] %v5795_v46 }
 0x6ba   :  { %6054 = shalt.err (!%p6051_p1)
}
 0x6bb   :  { %5808 = dma.vmem_to_hbm [thread:$0]  %s5806_s15, 32, %s6442_s6, [#allocation4]  }
 0x6bc   :  { %6069 = dma.done.wait [#allocation4], 32  }
 0x6bd   :  { %6070 = vsyncadd [#allocation4], 4294967264 }
 0x6be   :  { %5812 = vsyncpa [#allocation3], 1 }
 0x6bf   :  { %5813 = vsyncpa [#allocation6], 1 }
 0x6c0   :  { %5814 = vsyncpa [#allocation9], 1 }
 0x6c1   :  { %5815 = vsyncpa [#allocation4], 1 }

</bundles_post_ra>
